<compile_context>
chip_gen: v5e
topology: v5e:2x2
jax: 0.10.0
libtpu: 0.0.40
codegen_flags: <defaults>
</compile_context>

<pallas_src>
import jax
import jax.numpy as jnp
from jax.experimental import pallas as pl
from jax.experimental.pallas import tpu as pltpu

SLAB = 32            # per-block padded feature/hidden slab
NSLOT = 4            # fused slab order: lstm2 | lstm3 | lstm4 | lstm1
HID = SLAB * NSLOT   # 128-lane fused hidden
LANE = 128


def _vmem_spec():
    return pl.BlockSpec(memory_space=pltpu.MemorySpace.VMEM)


def _hbm_spec():
    return pl.BlockSpec(memory_space=pl.ANY)


def _sigmoid(z):
    # sigmoid(z) == 0.5 * tanh(0.5 * z) + 0.5  -> single EUP issue instead of exp + divide.
    return 0.5 * jnp.tanh(0.5 * z) + 0.5


# --------------------------------------------------------------------------------------
# Fused kernel: one block-diagonal 2-layer LSTM recurrence (T=12) + pooling + MLP.
# --------------------------------------------------------------------------------------
def _make_fused_kernel(N, S, T1, TB):
    B = N * S
    H = HID

    def gates(z, c):
        # PyTorch gate order i, f, g, o; each slice is a full aligned 128-lane group.
        i = _sigmoid(z[:, 0 * H:1 * H])
        f = _sigmoid(z[:, 1 * H:2 * H])
        g = jnp.tanh(z[:, 2 * H:3 * H])
        o = _sigmoid(z[:, 3 * H:4 * H])
        c_new = f * c + i * g
        return o * jnp.tanh(c_new), c_new

    def kernel(x_ref, wih0_ref, whh0_ref, b0_ref, wih1_ref, whh1_ref, b1_ref,
               pool_ref, nts_ref,
               w1_hbm, mb1_ref, w2_hbm, mb2_ref, w3_hbm, mb3_ref, w4_ref, mb4_ref,
               out_ref, w1_buf, w2_buf, w3_buf, dma_sem):
        # Kick off the MLP weight DMAs; they complete under the LSTM recurrence.
        cp_w1 = pltpu.make_async_copy(w1_hbm, w1_buf, dma_sem.at[0])
        cp_w2 = pltpu.make_async_copy(w2_hbm, w2_buf, dma_sem.at[1])
        cp_w3 = pltpu.make_async_copy(w3_hbm, w3_buf, dma_sem.at[2])
        cp_w1.start()
        cp_w2.start()
        cp_w3.start()

        # Layer-0 input projection hoisted out of the recurrence (one big bf16 matmul).
        z0_all = jnp.dot(x_ref[...], wih0_ref[...],
                         preferred_element_type=jnp.float32) + b0_ref[...]     # (T1*B, 4H) f32
        whh0 = whh0_ref[...]
        wih1 = wih1_ref[...]
        whh1 = whh1_ref[...]
        b1 = b1_ref[...]

        # Freeze mask: after step TB only the lstm1 slab (lanes >= 3*SLAB) keeps updating.
        lstm1_only = jax.lax.broadcasted_iota(jnp.int32, (1, H), 1) >= 3 * SLAB

        zero = jnp.zeros((B, H), jnp.float32)
        h0, c0 = zero, zero      # layer-0 state (f32)
        h1, c1 = zero, zero      # layer-1 state (f32)

        # Fused, layer-interleaved recurrence (static unroll).  Layer-1 step t only needs
        # h0 after step t, so its chain sits one step behind layer-0's: serial path ~T1+1
        # recurrence steps instead of 2*T1.
        for t in range(T1):
            z = z0_all[t * B:(t + 1) * B, :] + jnp.dot(
                h0.astype(jnp.bfloat16), whh0, preferred_element_type=jnp.float32)
            h0n, c0n = gates(z, c0)
            if t < TB:
                h0, c0 = h0n, c0n
            else:
                h0 = jnp.where(lstm1_only, h0n, h0)
                c0 = jnp.where(lstm1_only, c0n, c0)

            z = (jnp.dot(h0.astype(jnp.bfloat16), wih1,
                         preferred_element_type=jnp.float32) + b1
                 + jnp.dot(h1.astype(jnp.bfloat16), whh1,
                           preferred_element_type=jnp.float32))
            h1n, c1n = gates(z, c1)
            if t < TB:
                h1, c1 = h1n, c1n
            else:
                h1 = jnp.where(lstm1_only, h1n, h1)
                c1 = jnp.where(lstm1_only, c1n, c1)

        # AdaptiveAvgPool1d(1) over the series axis for all four blocks in one small matmul.
        pooled = jnp.dot(pool_ref[...], h1, preferred_element_type=jnp.float32)  # (N, H)

        # MLP weights must be resident now; waits sit right before first use.
        cp_w1.wait()
        cp_w2.wait()
        cp_w3.wait()

        # First MLP layer split (no in-kernel concatenate): nts @ w1p[:128] + pooled @ w1p[128:].
        h = (jnp.dot(nts_ref[...], w1_buf[0:LANE, :], preferred_element_type=jnp.float32)
             + jnp.dot(pooled.astype(jnp.bfloat16), w1_buf[LANE:, :],
                       preferred_element_type=jnp.float32)
             + mb1_ref[...])
        h = jnp.maximum(h, 0.0)
        h = jnp.maximum(jnp.dot(h.astype(jnp.bfloat16), w2_buf[...],
                                preferred_element_type=jnp.float32) + mb2_ref[...], 0.0)
        h = jnp.maximum(jnp.dot(h.astype(jnp.bfloat16), w3_buf[...],
                                preferred_element_type=jnp.float32) + mb3_ref[...], 0.0)
        # (N, 1) head kept in f32 (negligible; single masked store).
        out_ref[...] = _sigmoid(jnp.dot(h, w4_ref[...],
                                        preferred_element_type=jnp.float32) + mb4_ref[...])

    return kernel


# --------------------------------------------------------------------------------------
# Parameter packing: block-diagonalize the real (PyTorch-shaped) parameters into one
# 4-slab group and re-pack the first MLP weight to the padded in-kernel layout.
# --------------------------------------------------------------------------------------
def _pack_lstm_weight(ws, in_dims, hid_dims):
    """Block-diagonal, gate-major packed weight: (HID, 4*HID)."""
    out = jnp.zeros((HID, 4 * HID), jnp.float32)
    for k, (w, fi, hi) in enumerate(zip(ws, in_dims, hid_dims)):
        for g in range(4):
            out = out.at[SLAB * k:SLAB * k + fi,
                         HID * g + SLAB * k:HID * g + SLAB * k + hi].set(
                w[:, hi * g:hi * (g + 1)])
    return out


def _pack_lstm_bias(bs, hid_dims):
    out = jnp.zeros((1, 4 * HID), jnp.float32)
    for k, (b, hi) in enumerate(zip(bs, hid_dims)):
        for g in range(4):
            out = out.at[:, HID * g + SLAB * k:HID * g + SLAB * k + hi].set(
                b[:, hi * g:hi * (g + 1)])
    return out


def pack_params(params):
    p1, p2, p3, p4, pm = params
    plist = [p2, p3, p4, p1]                         # slab order: lstm2 | lstm3 | lstm4 | lstm1
    f_dims = [p[0].shape[0] for p in plist]
    h_dims = [p[1].shape[0] for p in plist]
    assert all(d <= SLAB for d in f_dims + h_dims)

    bf16 = jnp.bfloat16
    wih0 = _pack_lstm_weight([p[0] for p in plist], f_dims, h_dims).astype(bf16)
    whh0 = _pack_lstm_weight([p[1] for p in plist], h_dims, h_dims).astype(bf16)
    b0 = _pack_lstm_bias([p[2] for p in plist], h_dims)
    wih1 = _pack_lstm_weight([p[3] for p in plist], h_dims, h_dims).astype(bf16)
    whh1 = _pack_lstm_weight([p[4] for p in plist], h_dims, h_dims).astype(bf16)
    b1 = _pack_lstm_bias([p[5] for p in plist], h_dims)
    lstm = (wih0, whh0, b0, wih1, whh1, b1)

    h2, h3, h4, h1 = h_dims
    w1, mb1, w2, mb2, w3, mb3, w4, mb4 = pm
    nts_dim = w1.shape[0] - (h1 + h2 + h3 + h4)      # 100 for this model
    assert 0 < nts_dim <= LANE

    # Padded in-kernel MLP input layout: [nts 0:128 | pooled slabs 128:256].
    off = nts_dim
    w1p = jnp.zeros((LANE + HID, w1.shape[1]), jnp.float32)                     # (256, 256)
    w1p = w1p.at[0:nts_dim].set(w1[0:nts_dim])
    w1p = w1p.at[LANE + 0 * SLAB:LANE + 0 * SLAB + h2].set(w1[off + h1:off + h1 + h2])
    w1p = w1p.at[LANE + 1 * SLAB:LANE + 1 * SLAB + h3].set(
        w1[off + h1 + h2:off + h1 + h2 + h3])
    w1p = w1p.at[LANE + 2 * SLAB:LANE + 2 * SLAB + h4].set(
        w1[off + h1 + h2 + h3:off + h1 + h2 + h3 + h4])
    w1p = w1p.at[LANE + 3 * SLAB:LANE + 3 * SLAB + h1].set(w1[off:off + h1])

    mlp = (w1p.astype(bf16), mb1, w2.astype(bf16), mb2, w3.astype(bf16), mb3, w4, mb4)
    return {"lstm": lstm, "mlp": mlp}


# --------------------------------------------------------------------------------------
# Forward wrapper (input layout prep + single pallas_call).
# --------------------------------------------------------------------------------------
def _prep_x_fused(ts_list, t_total):
    """[(N,S,Tk,Fk)] -> time-major flat (t_total*N*S, HID) bf16, each block in its slab."""
    N, S = ts_list[0].shape[:2]
    B = N * S
    x = jnp.zeros((t_total, B, HID), jnp.float32)
    for k, ts in enumerate(ts_list):
        _, _, Tk, Fk = ts.shape
        xk = jnp.transpose(ts.reshape(B, Tk, Fk), (1, 0, 2))                    # (Tk, B, Fk)
        x = x.at[:Tk, :, SLAB * k:SLAB * k + Fk].set(xk)
    return x.reshape(t_total * B, HID).astype(jnp.bfloat16)


def lstm_model2_forward(nts, ts1, ts2, ts3, ts4, packed):
    N, S, T1, _ = ts1.shape
    TB = ts2.shape[2]

    x = _prep_x_fused([ts2, ts3, ts4, ts1], T1)                                 # (T1*B, 128)
    nts_pad = jnp.pad(nts, ((0, 0), (0, LANE - nts.shape[1]))).astype(jnp.bfloat16)
    # Precomputed series-mean pooling matrix: P[n, b] = 1/S iff b // S == n.
    pool = jnp.repeat(jnp.eye(N, dtype=jnp.float32), S, axis=1) / S             # (N, N*S)

    lstm = packed["lstm"]
    w1p, mb1, w2, mb2, w3, mb3, w4, mb4 = packed["mlp"]

    kernel = _make_fused_kernel(N, S, T1, TB)
    args = (x,) + lstm + (pool, nts_pad) + (w1p, mb1, w2, mb2, w3, mb3, w4, mb4)
    in_specs = ([_vmem_spec()] * 9
                + [_hbm_spec(), _vmem_spec(), _hbm_spec(), _vmem_spec(),
                   _hbm_spec(), _vmem_spec(), _vmem_spec(), _vmem_spec()])
    return pl.pallas_call(
        kernel,
        out_shape=jax.ShapeDtypeStruct((N, w4.shape[1]), jnp.float32),
        in_specs=in_specs,
        out_specs=_vmem_spec(),
        scratch_shapes=[
            pltpu.VMEM(w1p.shape, jnp.bfloat16),
            pltpu.VMEM(w2.shape, jnp.bfloat16),
            pltpu.VMEM(w3.shape, jnp.bfloat16),
            pltpu.SemaphoreType.DMA((3,)),
        ],
    )(*args)


# --------------------------------------------------------------------------------------
# Parameter init (deterministic, PyTorch-style uniform ranges, real/unpadded shapes).
# --------------------------------------------------------------------------------------
def init_hlstm_params(key, num_features, hidden_size):
    bound = 1.0 / (hidden_size ** 0.5)
    keys = jax.random.split(key, 8)

    def u(k_, shape):
        return jax.random.uniform(k_, shape, jnp.float32, -bound, bound)

    wih0 = u(keys[0], (num_features, 4 * hidden_size))                          # W_ih_l0^T
    whh0 = u(keys[1], (hidden_size, 4 * hidden_size))                           # W_hh_l0^T
    b0 = u(keys[2], (1, 4 * hidden_size)) + u(keys[3], (1, 4 * hidden_size))    # b_ih + b_hh
    wih1 = u(keys[4], (hidden_size, 4 * hidden_size))                           # W_ih_l1^T
    whh1 = u(keys[5], (hidden_size, 4 * hidden_size))                           # W_hh_l1^T
    b1 = u(keys[6], (1, 4 * hidden_size)) + u(keys[7], (1, 4 * hidden_size))
    return (wih0, whh0, b0, wih1, whh1, b1)


def init_mlp_params(key, in_dim, layer_size, out_dim):
    keys = jax.random.split(key, 4)

    def lin(k_, fan_in, fan_out):
        bound = 1.0 / (fan_in ** 0.5)
        k1, k2 = jax.random.split(k_)
        w = jax.random.uniform(k1, (fan_in, fan_out), jnp.float32, -bound, bound)
        b = jax.random.uniform(k2, (1, fan_out), jnp.float32, -bound, bound)
        return w, b

    w1, b1 = lin(keys[0], in_dim, layer_size)
    w2, b2 = lin(keys[1], layer_size, layer_size)
    w3, b3 = lin(keys[2], layer_size, layer_size)
    w4, b4 = lin(keys[3], layer_size, out_dim)
    return (w1, b1, w2, b2, w3, b3, w4, b4)


# --------------------------------------------------------------------------------------
# Pure-JAX reference (mirrors the PyTorch module) for in-script validation.
# --------------------------------------------------------------------------------------
def _ref_hlstm(x, params):
    wih0, whh0, b0, wih1, whh1, b1 = params
    N, S, T, F = x.shape
    H = whh0.shape[0]
    xb = x.reshape(N * S, T, F)

    def cell(xt, h, c, wih, whh, b):
        z = xt @ wih + h @ whh + b
        i = jax.nn.sigmoid(z[:, :H])
        f = jax.nn.sigmoid(z[:, H:2 * H])
        g = jnp.tanh(z[:, 2 * H:3 * H])
        o = jax.nn.sigmoid(z[:, 3 * H:])
        c = f * c + i * g
        return o * jnp.tanh(c), c

    z0 = jnp.zeros((N * S, H), jnp.float32)
    h0, c0, h1, c1 = z0, z0, z0, z0
    for t in range(T):
        h0, c0 = cell(xb[:, t], h0, c0, wih0, whh0, b0)
        h1, c1 = cell(h0, h1, c1, wih1, whh1, b1)
    return h1.reshape(N, S, H).mean(axis=1)


def reference_forward(nts, ts1, ts2, ts3, ts4, params):
    p1, p2, p3, p4, (w1, b1, w2, b2, w3, b3, w4, b4) = params
    o1 = _ref_hlstm(ts1, p1)
    o2 = _ref_hlstm(ts2, p2)
    o3 = _ref_hlstm(ts3, p3)
    o4 = _ref_hlstm(ts4, p4)
    x = jnp.concatenate([nts, o1, o2, o3, o4], axis=1)
    h = jax.nn.relu(x @ w1 + b1)
    h = jax.nn.relu(h @ w2 + b2)
    h = jax.nn.relu(h @ w3 + b3)
    return jax.nn.sigmoid(h @ w4 + b4)


# --------------------------------------------------------------------------------------
if __name__ == "__main__":
    key = jax.random.PRNGKey(0)
    k_in, k_p = jax.random.split(key)
    ki = jax.random.split(k_in, 5)

    N = 2
    # nts width = 184 - (4 + 16 + 32 + 32) = 100
    nts = jax.random.normal(ki[0], (N, 100), jnp.float32)
    ts1 = jax.random.normal(ki[1], (N, 4, 12, 1), jnp.float32)
    ts2 = jax.random.normal(ki[2], (N, 4, 4, 8), jnp.float32)
    ts3 = jax.random.normal(ki[3], (N, 4, 4, 16), jnp.float32)
    ts4 = jax.random.normal(ki[4], (N, 4, 4, 29), jnp.float32)

    kp = jax.random.split(k_p, 5)
    params = (
        init_hlstm_params(kp[0], 1, 4),       # lstm1: HierarchicalLSTM(4, 12, 1, 4)
        init_hlstm_params(kp[1], 8, 16),      # lstm2: HierarchicalLSTM(4, 4, 8, 16)
        init_hlstm_params(kp[2], 16, 32),     # lstm3: HierarchicalLSTM(4, 4, 16, 32)
        init_hlstm_params(kp[3], 29, 32),     # lstm4: HierarchicalLSTM(4, 4, 29, 32)
        init_mlp_params(kp[4], 184, 256, 1),  # MLP(184, 1, layer_size=256, num_of_layers=2)
    )
    packed = pack_params(params)

    out = jax.jit(lstm_model2_forward)(nts, ts1, ts2, ts3, ts4, packed)
    out = jax.block_until_ready(out)
    assert out.shape == (N, 1), out.shape
    assert bool(jnp.all(jnp.isfinite(out)))

    # Validate against the pure-JAX reference of the PyTorch module.  Tolerance absorbs
    # bf16 MXU operands compounding over the 12-step recurrence; packing/masking bugs
    # would be orders of magnitude larger.
    ref = jax.jit(reference_forward)(nts, ts1, ts2, ts3, ts4, params)
    max_err = float(jnp.max(jnp.abs(out - ref)))
    assert max_err < 3e-2, f"mismatch vs reference: {max_err}"

    print("KERNEL_OK")
</pallas_src>

<mosaic_0001>
module attributes {stable_mosaic.version = 11 : i64} {
  func.func @kernel(%arg0: memref<96x128xbf16, #tpu.memory_space<vmem>>, %arg1: memref<128x512xbf16, #tpu.memory_space<vmem>>, %arg2: memref<128x512xbf16, #tpu.memory_space<vmem>>, %arg3: memref<1x512xf32, #tpu.memory_space<vmem>>, %arg4: memref<128x512xbf16, #tpu.memory_space<vmem>>, %arg5: memref<128x512xbf16, #tpu.memory_space<vmem>>, %arg6: memref<1x512xf32, #tpu.memory_space<vmem>>, %arg7: memref<2x8xf32, #tpu.memory_space<vmem>>, %arg8: memref<2x128xbf16, #tpu.memory_space<vmem>>, %arg9: memref<256x256xbf16, #tpu.memory_space<any>>, %arg10: memref<1x256xf32, #tpu.memory_space<vmem>>, %arg11: memref<256x256xbf16, #tpu.memory_space<any>>, %arg12: memref<1x256xf32, #tpu.memory_space<vmem>>, %arg13: memref<256x256xbf16, #tpu.memory_space<any>>, %arg14: memref<1x256xf32, #tpu.memory_space<vmem>>, %arg15: memref<256x1xf32, #tpu.memory_space<vmem>>, %arg16: memref<1x1xf32, #tpu.memory_space<vmem>>, %arg17: memref<2x1xf32, #tpu.memory_space<vmem>>, %arg18: memref<256x256xbf16, #tpu.memory_space<vmem>>, %arg19: memref<256x256xbf16, #tpu.memory_space<vmem>>, %arg20: memref<256x256xbf16, #tpu.memory_space<vmem>>, %arg21: memref<3x!tpu.dma_semaphore, #tpu.memory_space<semaphore_mem>>) attributes {dimension_semantics = [], scalar_prefetch = 0 : i64, scratch_operands = 4 : i64, tpu.core_type = #tpu.core_type<tc>} {
    %c0_i32 = arith.constant 0 : i32
    %0 = tpu.memref_slice %arg21[%c0_i32] : memref<3x!tpu.dma_semaphore, #tpu.memory_space<semaphore_mem>> -> memref<1x!tpu.dma_semaphore, #tpu.memory_space<semaphore_mem>>
    %1 = tpu.memref_squeeze %0 : memref<1x!tpu.dma_semaphore, #tpu.memory_space<semaphore_mem>> -> memref<!tpu.dma_semaphore, #tpu.memory_space<semaphore_mem>>
    tpu.enqueue_dma source(%arg9 : memref<256x256xbf16, #tpu.memory_space<any>>) target(%arg18 : memref<256x256xbf16, #tpu.memory_space<vmem>>) target_semaphore(%1 : memref<!tpu.dma_semaphore, #tpu.memory_space<semaphore_mem>>)
    %c1_i32 = arith.constant 1 : i32
    %2 = tpu.memref_slice %arg21[%c1_i32] : memref<3x!tpu.dma_semaphore, #tpu.memory_space<semaphore_mem>> -> memref<1x!tpu.dma_semaphore, #tpu.memory_space<semaphore_mem>>
    %3 = tpu.memref_squeeze %2 : memref<1x!tpu.dma_semaphore, #tpu.memory_space<semaphore_mem>> -> memref<!tpu.dma_semaphore, #tpu.memory_space<semaphore_mem>>
    tpu.enqueue_dma source(%arg11 : memref<256x256xbf16, #tpu.memory_space<any>>) target(%arg19 : memref<256x256xbf16, #tpu.memory_space<vmem>>) target_semaphore(%3 : memref<!tpu.dma_semaphore, #tpu.memory_space<semaphore_mem>>)
    %c2_i32 = arith.constant 2 : i32
    %4 = tpu.memref_slice %arg21[%c2_i32] : memref<3x!tpu.dma_semaphore, #tpu.memory_space<semaphore_mem>> -> memref<1x!tpu.dma_semaphore, #tpu.memory_space<semaphore_mem>>
    %5 = tpu.memref_squeeze %4 : memref<1x!tpu.dma_semaphore, #tpu.memory_space<semaphore_mem>> -> memref<!tpu.dma_semaphore, #tpu.memory_space<semaphore_mem>>
    tpu.enqueue_dma source(%arg13 : memref<256x256xbf16, #tpu.memory_space<any>>) target(%arg20 : memref<256x256xbf16, #tpu.memory_space<vmem>>) target_semaphore(%5 : memref<!tpu.dma_semaphore, #tpu.memory_space<semaphore_mem>>)
    %c0 = arith.constant 0 : index
    %c0_0 = arith.constant 0 : index
    %6 = vector.load %arg0[%c0, %c0_0] : memref<96x128xbf16, #tpu.memory_space<vmem>>, vector<96x128xbf16>
    %c0_1 = arith.constant 0 : index
    %c0_2 = arith.constant 0 : index
    %7 = vector.load %arg1[%c0_1, %c0_2] : memref<128x512xbf16, #tpu.memory_space<vmem>>, vector<128x512xbf16>
    %cst = arith.constant dense<0.000000e+00> : vector<96x512xf32>
    %8 = tpu.matmul %6, %7, %cst {dimension_numbers = #tpu.dot_dimension_numbers<[1], [0], [0], [1], [0, 0, 1, 1], [], []>} : vector<96x128xbf16>, vector<128x512xbf16>, vector<96x512xf32> -> vector<96x512xf32>
    %c0_3 = arith.constant 0 : index
    %c0_4 = arith.constant 0 : index
    %9 = vector.load %arg3[%c0_3, %c0_4] : memref<1x512xf32, #tpu.memory_space<vmem>>, vector<1x512xf32>
    %10 = vector.broadcast %9 : vector<1x512xf32> to vector<96x512xf32>
    %11 = arith.addf %8, %10 : vector<96x512xf32>
    %c0_5 = arith.constant 0 : index
    %c0_6 = arith.constant 0 : index
    %12 = vector.load %arg2[%c0_5, %c0_6] : memref<128x512xbf16, #tpu.memory_space<vmem>>, vector<128x512xbf16>
    %c0_7 = arith.constant 0 : index
    %c0_8 = arith.constant 0 : index
    %13 = vector.load %arg4[%c0_7, %c0_8] : memref<128x512xbf16, #tpu.memory_space<vmem>>, vector<128x512xbf16>
    %c0_9 = arith.constant 0 : index
    %c0_10 = arith.constant 0 : index
    %14 = vector.load %arg5[%c0_9, %c0_10] : memref<128x512xbf16, #tpu.memory_space<vmem>>, vector<128x512xbf16>
    %c0_11 = arith.constant 0 : index
    %c0_12 = arith.constant 0 : index
    %15 = vector.load %arg6[%c0_11, %c0_12] : memref<1x512xf32, #tpu.memory_space<vmem>>, vector<1x512xf32>
    %16 = tpu.iota {dimensions = array<i32: 1>} : vector<1x128xi32>
    %c96_i32 = arith.constant 96 : i32
    %17 = vector.broadcast %c96_i32 : i32 to vector<1x128xi32>
    %18 = arith.cmpi sge, %16, %17 : vector<1x128xi32>
    %cst_13 = arith.constant 0.000000e+00 : f32
    %19 = vector.broadcast %cst_13 : f32 to vector<8x128xf32>
    %20 = vector.extract_strided_slice %11 {offsets = [0, 0], sizes = [8, 512], strides = [1, 1]} : vector<96x512xf32> to vector<8x512xf32>
    %21 = arith.truncf %19 : vector<8x128xf32> to vector<8x128xbf16>
    %cst_14 = arith.constant dense<0.000000e+00> : vector<8x512xf32>
    %22 = tpu.matmul %21, %12, %cst_14 {dimension_numbers = #tpu.dot_dimension_numbers<[1], [0], [0], [1], [0, 0, 1, 1], [], []>} : vector<8x128xbf16>, vector<128x512xbf16>, vector<8x512xf32> -> vector<8x512xf32>
    %23 = arith.addf %20, %22 : vector<8x512xf32>
    %24 = vector.extract_strided_slice %23 {offsets = [0, 0], sizes = [8, 128], strides = [1, 1]} : vector<8x512xf32> to vector<8x128xf32>
    %cst_15 = arith.constant 5.000000e-01 : f32
    %25 = vector.broadcast %cst_15 : f32 to vector<8x128xf32>
    %26 = arith.mulf %25, %24 : vector<8x128xf32>
    %27 = math.tanh %26 : vector<8x128xf32>
    %cst_16 = arith.constant 5.000000e-01 : f32
    %28 = vector.broadcast %cst_16 : f32 to vector<8x128xf32>
    %29 = arith.mulf %28, %27 : vector<8x128xf32>
    %cst_17 = arith.constant 5.000000e-01 : f32
    %30 = vector.broadcast %cst_17 : f32 to vector<8x128xf32>
    %31 = arith.addf %29, %30 : vector<8x128xf32>
    %32 = vector.extract_strided_slice %23 {offsets = [0, 128], sizes = [8, 128], strides = [1, 1]} : vector<8x512xf32> to vector<8x128xf32>
    %cst_18 = arith.constant 5.000000e-01 : f32
    %33 = vector.broadcast %cst_18 : f32 to vector<8x128xf32>
    %34 = arith.mulf %33, %32 : vector<8x128xf32>
    %35 = math.tanh %34 : vector<8x128xf32>
    %cst_19 = arith.constant 5.000000e-01 : f32
    %36 = vector.broadcast %cst_19 : f32 to vector<8x128xf32>
    %37 = arith.mulf %36, %35 : vector<8x128xf32>
    %cst_20 = arith.constant 5.000000e-01 : f32
    %38 = vector.broadcast %cst_20 : f32 to vector<8x128xf32>
    %39 = arith.addf %37, %38 : vector<8x128xf32>
    %40 = vector.extract_strided_slice %23 {offsets = [0, 256], sizes = [8, 128], strides = [1, 1]} : vector<8x512xf32> to vector<8x128xf32>
    %41 = math.tanh %40 : vector<8x128xf32>
    %42 = vector.extract_strided_slice %23 {offsets = [0, 384], sizes = [8, 128], strides = [1, 1]} : vector<8x512xf32> to vector<8x128xf32>
    %cst_21 = arith.constant 5.000000e-01 : f32
    %43 = vector.broadcast %cst_21 : f32 to vector<8x128xf32>
    %44 = arith.mulf %43, %42 : vector<8x128xf32>
    %45 = math.tanh %44 : vector<8x128xf32>
    %cst_22 = arith.constant 5.000000e-01 : f32
    %46 = vector.broadcast %cst_22 : f32 to vector<8x128xf32>
    %47 = arith.mulf %46, %45 : vector<8x128xf32>
    %cst_23 = arith.constant 5.000000e-01 : f32
    %48 = vector.broadcast %cst_23 : f32 to vector<8x128xf32>
    %49 = arith.addf %47, %48 : vector<8x128xf32>
    %50 = arith.mulf %39, %19 : vector<8x128xf32>
    %51 = arith.mulf %31, %41 : vector<8x128xf32>
    %52 = arith.addf %50, %51 : vector<8x128xf32>
    %53 = math.tanh %52 : vector<8x128xf32>
    %54 = arith.mulf %49, %53 : vector<8x128xf32>
    %55 = arith.truncf %54 : vector<8x128xf32> to vector<8x128xbf16>
    %cst_24 = arith.constant dense<0.000000e+00> : vector<8x512xf32>
    %56 = tpu.matmul %55, %13, %cst_24 {dimension_numbers = #tpu.dot_dimension_numbers<[1], [0], [0], [1], [0, 0, 1, 1], [], []>} : vector<8x128xbf16>, vector<128x512xbf16>, vector<8x512xf32> -> vector<8x512xf32>
    %57 = vector.broadcast %15 : vector<1x512xf32> to vector<8x512xf32>
    %58 = arith.addf %56, %57 : vector<8x512xf32>
    %59 = arith.truncf %19 : vector<8x128xf32> to vector<8x128xbf16>
    %cst_25 = arith.constant dense<0.000000e+00> : vector<8x512xf32>
    %60 = tpu.matmul %59, %14, %cst_25 {dimension_numbers = #tpu.dot_dimension_numbers<[1], [0], [0], [1], [0, 0, 1, 1], [], []>} : vector<8x128xbf16>, vector<128x512xbf16>, vector<8x512xf32> -> vector<8x512xf32>
    %61 = arith.addf %58, %60 : vector<8x512xf32>
    %62 = vector.extract_strided_slice %61 {offsets = [0, 0], sizes = [8, 128], strides = [1, 1]} : vector<8x512xf32> to vector<8x128xf32>
    %cst_26 = arith.constant 5.000000e-01 : f32
    %63 = vector.broadcast %cst_26 : f32 to vector<8x128xf32>
    %64 = arith.mulf %63, %62 : vector<8x128xf32>
    %65 = math.tanh %64 : vector<8x128xf32>
    %cst_27 = arith.constant 5.000000e-01 : f32
    %66 = vector.broadcast %cst_27 : f32 to vector<8x128xf32>
    %67 = arith.mulf %66, %65 : vector<8x128xf32>
    %cst_28 = arith.constant 5.000000e-01 : f32
    %68 = vector.broadcast %cst_28 : f32 to vector<8x128xf32>
    %69 = arith.addf %67, %68 : vector<8x128xf32>
    %70 = vector.extract_strided_slice %61 {offsets = [0, 128], sizes = [8, 128], strides = [1, 1]} : vector<8x512xf32> to vector<8x128xf32>
    %cst_29 = arith.constant 5.000000e-01 : f32
    %71 = vector.broadcast %cst_29 : f32 to vector<8x128xf32>
    %72 = arith.mulf %71, %70 : vector<8x128xf32>
    %73 = math.tanh %72 : vector<8x128xf32>
    %cst_30 = arith.constant 5.000000e-01 : f32
    %74 = vector.broadcast %cst_30 : f32 to vector<8x128xf32>
    %75 = arith.mulf %74, %73 : vector<8x128xf32>
    %cst_31 = arith.constant 5.000000e-01 : f32
    %76 = vector.broadcast %cst_31 : f32 to vector<8x128xf32>
    %77 = arith.addf %75, %76 : vector<8x128xf32>
    %78 = vector.extract_strided_slice %61 {offsets = [0, 256], sizes = [8, 128], strides = [1, 1]} : vector<8x512xf32> to vector<8x128xf32>
    %79 = math.tanh %78 : vector<8x128xf32>
    %80 = vector.extract_strided_slice %61 {offsets = [0, 384], sizes = [8, 128], strides = [1, 1]} : vector<8x512xf32> to vector<8x128xf32>
    %cst_32 = arith.constant 5.000000e-01 : f32
    %81 = vector.broadcast %cst_32 : f32 to vector<8x128xf32>
    %82 = arith.mulf %81, %80 : vector<8x128xf32>
    %83 = math.tanh %82 : vector<8x128xf32>
    %cst_33 = arith.constant 5.000000e-01 : f32
    %84 = vector.broadcast %cst_33 : f32 to vector<8x128xf32>
    %85 = arith.mulf %84, %83 : vector<8x128xf32>
    %cst_34 = arith.constant 5.000000e-01 : f32
    %86 = vector.broadcast %cst_34 : f32 to vector<8x128xf32>
    %87 = arith.addf %85, %86 : vector<8x128xf32>
    %88 = arith.mulf %77, %19 : vector<8x128xf32>
    %89 = arith.mulf %69, %79 : vector<8x128xf32>
    %90 = arith.addf %88, %89 : vector<8x128xf32>
    %91 = math.tanh %90 : vector<8x128xf32>
    %92 = arith.mulf %87, %91 : vector<8x128xf32>
    %93 = vector.extract_strided_slice %11 {offsets = [8, 0], sizes = [8, 512], strides = [1, 1]} : vector<96x512xf32> to vector<8x512xf32>
    %94 = arith.truncf %54 : vector<8x128xf32> to vector<8x128xbf16>
    %cst_35 = arith.constant dense<0.000000e+00> : vector<8x512xf32>
    %95 = tpu.matmul %94, %12, %cst_35 {dimension_numbers = #tpu.dot_dimension_numbers<[1], [0], [0], [1], [0, 0, 1, 1], [], []>} : vector<8x128xbf16>, vector<128x512xbf16>, vector<8x512xf32> -> vector<8x512xf32>
    %96 = arith.addf %93, %95 : vector<8x512xf32>
    %97 = vector.extract_strided_slice %96 {offsets = [0, 0], sizes = [8, 128], strides = [1, 1]} : vector<8x512xf32> to vector<8x128xf32>
    %cst_36 = arith.constant 5.000000e-01 : f32
    %98 = vector.broadcast %cst_36 : f32 to vector<8x128xf32>
    %99 = arith.mulf %98, %97 : vector<8x128xf32>
    %100 = math.tanh %99 : vector<8x128xf32>
    %cst_37 = arith.constant 5.000000e-01 : f32
    %101 = vector.broadcast %cst_37 : f32 to vector<8x128xf32>
    %102 = arith.mulf %101, %100 : vector<8x128xf32>
    %cst_38 = arith.constant 5.000000e-01 : f32
    %103 = vector.broadcast %cst_38 : f32 to vector<8x128xf32>
    %104 = arith.addf %102, %103 : vector<8x128xf32>
    %105 = vector.extract_strided_slice %96 {offsets = [0, 128], sizes = [8, 128], strides = [1, 1]} : vector<8x512xf32> to vector<8x128xf32>
    %cst_39 = arith.constant 5.000000e-01 : f32
    %106 = vector.broadcast %cst_39 : f32 to vector<8x128xf32>
    %107 = arith.mulf %106, %105 : vector<8x128xf32>
    %108 = math.tanh %107 : vector<8x128xf32>
    %cst_40 = arith.constant 5.000000e-01 : f32
    %109 = vector.broadcast %cst_40 : f32 to vector<8x128xf32>
    %110 = arith.mulf %109, %108 : vector<8x128xf32>
    %cst_41 = arith.constant 5.000000e-01 : f32
    %111 = vector.broadcast %cst_41 : f32 to vector<8x128xf32>
    %112 = arith.addf %110, %111 : vector<8x128xf32>
    %113 = vector.extract_strided_slice %96 {offsets = [0, 256], sizes = [8, 128], strides = [1, 1]} : vector<8x512xf32> to vector<8x128xf32>
    %114 = math.tanh %113 : vector<8x128xf32>
    %115 = vector.extract_strided_slice %96 {offsets = [0, 384], sizes = [8, 128], strides = [1, 1]} : vector<8x512xf32> to vector<8x128xf32>
    %cst_42 = arith.constant 5.000000e-01 : f32
    %116 = vector.broadcast %cst_42 : f32 to vector<8x128xf32>
    %117 = arith.mulf %116, %115 : vector<8x128xf32>
    %118 = math.tanh %117 : vector<8x128xf32>
    %cst_43 = arith.constant 5.000000e-01 : f32
    %119 = vector.broadcast %cst_43 : f32 to vector<8x128xf32>
    %120 = arith.mulf %119, %118 : vector<8x128xf32>
    %cst_44 = arith.constant 5.000000e-01 : f32
    %121 = vector.broadcast %cst_44 : f32 to vector<8x128xf32>
    %122 = arith.addf %120, %121 : vector<8x128xf32>
    %123 = arith.mulf %112, %52 : vector<8x128xf32>
    %124 = arith.mulf %104, %114 : vector<8x128xf32>
    %125 = arith.addf %123, %124 : vector<8x128xf32>
    %126 = math.tanh %125 : vector<8x128xf32>
    %127 = arith.mulf %122, %126 : vector<8x128xf32>
    %128 = arith.truncf %127 : vector<8x128xf32> to vector<8x128xbf16>
    %cst_45 = arith.constant dense<0.000000e+00> : vector<8x512xf32>
    %129 = tpu.matmul %128, %13, %cst_45 {dimension_numbers = #tpu.dot_dimension_numbers<[1], [0], [0], [1], [0, 0, 1, 1], [], []>} : vector<8x128xbf16>, vector<128x512xbf16>, vector<8x512xf32> -> vector<8x512xf32>
    %130 = vector.broadcast %15 : vector<1x512xf32> to vector<8x512xf32>
    %131 = arith.addf %129, %130 : vector<8x512xf32>
    %132 = arith.truncf %92 : vector<8x128xf32> to vector<8x128xbf16>
    %cst_46 = arith.constant dense<0.000000e+00> : vector<8x512xf32>
    %133 = tpu.matmul %132, %14, %cst_46 {dimension_numbers = #tpu.dot_dimension_numbers<[1], [0], [0], [1], [0, 0, 1, 1], [], []>} : vector<8x128xbf16>, vector<128x512xbf16>, vector<8x512xf32> -> vector<8x512xf32>
    %134 = arith.addf %131, %133 : vector<8x512xf32>
    %135 = vector.extract_strided_slice %134 {offsets = [0, 0], sizes = [8, 128], strides = [1, 1]} : vector<8x512xf32> to vector<8x128xf32>
    %cst_47 = arith.constant 5.000000e-01 : f32
    %136 = vector.broadcast %cst_47 : f32 to vector<8x128xf32>
    %137 = arith.mulf %136, %135 : vector<8x128xf32>
    %138 = math.tanh %137 : vector<8x128xf32>
    %cst_48 = arith.constant 5.000000e-01 : f32
    %139 = vector.broadcast %cst_48 : f32 to vector<8x128xf32>
    %140 = arith.mulf %139, %138 : vector<8x128xf32>
    %cst_49 = arith.constant 5.000000e-01 : f32
    %141 = vector.broadcast %cst_49 : f32 to vector<8x128xf32>
    %142 = arith.addf %140, %141 : vector<8x128xf32>
    %143 = vector.extract_strided_slice %134 {offsets = [0, 128], sizes = [8, 128], strides = [1, 1]} : vector<8x512xf32> to vector<8x128xf32>
    %cst_50 = arith.constant 5.000000e-01 : f32
    %144 = vector.broadcast %cst_50 : f32 to vector<8x128xf32>
    %145 = arith.mulf %144, %143 : vector<8x128xf32>
    %146 = math.tanh %145 : vector<8x128xf32>
    %cst_51 = arith.constant 5.000000e-01 : f32
    %147 = vector.broadcast %cst_51 : f32 to vector<8x128xf32>
    %148 = arith.mulf %147, %146 : vector<8x128xf32>
    %cst_52 = arith.constant 5.000000e-01 : f32
    %149 = vector.broadcast %cst_52 : f32 to vector<8x128xf32>
    %150 = arith.addf %148, %149 : vector<8x128xf32>
    %151 = vector.extract_strided_slice %134 {offsets = [0, 256], sizes = [8, 128], strides = [1, 1]} : vector<8x512xf32> to vector<8x128xf32>
    %152 = math.tanh %151 : vector<8x128xf32>
    %153 = vector.extract_strided_slice %134 {offsets = [0, 384], sizes = [8, 128], strides = [1, 1]} : vector<8x512xf32> to vector<8x128xf32>
    %cst_53 = arith.constant 5.000000e-01 : f32
    %154 = vector.broadcast %cst_53 : f32 to vector<8x128xf32>
    %155 = arith.mulf %154, %153 : vector<8x128xf32>
    %156 = math.tanh %155 : vector<8x128xf32>
    %cst_54 = arith.constant 5.000000e-01 : f32
    %157 = vector.broadcast %cst_54 : f32 to vector<8x128xf32>
    %158 = arith.mulf %157, %156 : vector<8x128xf32>
    %cst_55 = arith.constant 5.000000e-01 : f32
    %159 = vector.broadcast %cst_55 : f32 to vector<8x128xf32>
    %160 = arith.addf %158, %159 : vector<8x128xf32>
    %161 = arith.mulf %150, %90 : vector<8x128xf32>
    %162 = arith.mulf %142, %152 : vector<8x128xf32>
    %163 = arith.addf %161, %162 : vector<8x128xf32>
    %164 = math.tanh %163 : vector<8x128xf32>
    %165 = arith.mulf %160, %164 : vector<8x128xf32>
    %166 = vector.extract_strided_slice %11 {offsets = [16, 0], sizes = [8, 512], strides = [1, 1]} : vector<96x512xf32> to vector<8x512xf32>
    %167 = arith.truncf %127 : vector<8x128xf32> to vector<8x128xbf16>
    %cst_56 = arith.constant dense<0.000000e+00> : vector<8x512xf32>
    %168 = tpu.matmul %167, %12, %cst_56 {dimension_numbers = #tpu.dot_dimension_numbers<[1], [0], [0], [1], [0, 0, 1, 1], [], []>} : vector<8x128xbf16>, vector<128x512xbf16>, vector<8x512xf32> -> vector<8x512xf32>
    %169 = arith.addf %166, %168 : vector<8x512xf32>
    %170 = vector.extract_strided_slice %169 {offsets = [0, 0], sizes = [8, 128], strides = [1, 1]} : vector<8x512xf32> to vector<8x128xf32>
    %cst_57 = arith.constant 5.000000e-01 : f32
    %171 = vector.broadcast %cst_57 : f32 to vector<8x128xf32>
    %172 = arith.mulf %171, %170 : vector<8x128xf32>
    %173 = math.tanh %172 : vector<8x128xf32>
    %cst_58 = arith.constant 5.000000e-01 : f32
    %174 = vector.broadcast %cst_58 : f32 to vector<8x128xf32>
    %175 = arith.mulf %174, %173 : vector<8x128xf32>
    %cst_59 = arith.constant 5.000000e-01 : f32
    %176 = vector.broadcast %cst_59 : f32 to vector<8x128xf32>
    %177 = arith.addf %175, %176 : vector<8x128xf32>
    %178 = vector.extract_strided_slice %169 {offsets = [0, 128], sizes = [8, 128], strides = [1, 1]} : vector<8x512xf32> to vector<8x128xf32>
    %cst_60 = arith.constant 5.000000e-01 : f32
    %179 = vector.broadcast %cst_60 : f32 to vector<8x128xf32>
    %180 = arith.mulf %179, %178 : vector<8x128xf32>
    %181 = math.tanh %180 : vector<8x128xf32>
    %cst_61 = arith.constant 5.000000e-01 : f32
    %182 = vector.broadcast %cst_61 : f32 to vector<8x128xf32>
    %183 = arith.mulf %182, %181 : vector<8x128xf32>
    %cst_62 = arith.constant 5.000000e-01 : f32
    %184 = vector.broadcast %cst_62 : f32 to vector<8x128xf32>
    %185 = arith.addf %183, %184 : vector<8x128xf32>
    %186 = vector.extract_strided_slice %169 {offsets = [0, 256], sizes = [8, 128], strides = [1, 1]} : vector<8x512xf32> to vector<8x128xf32>
    %187 = math.tanh %186 : vector<8x128xf32>
    %188 = vector.extract_strided_slice %169 {offsets = [0, 384], sizes = [8, 128], strides = [1, 1]} : vector<8x512xf32> to vector<8x128xf32>
    %cst_63 = arith.constant 5.000000e-01 : f32
    %189 = vector.broadcast %cst_63 : f32 to vector<8x128xf32>
    %190 = arith.mulf %189, %188 : vector<8x128xf32>
    %191 = math.tanh %190 : vector<8x128xf32>
    %cst_64 = arith.constant 5.000000e-01 : f32
    %192 = vector.broadcast %cst_64 : f32 to vector<8x128xf32>
    %193 = arith.mulf %192, %191 : vector<8x128xf32>
    %cst_65 = arith.constant 5.000000e-01 : f32
    %194 = vector.broadcast %cst_65 : f32 to vector<8x128xf32>
    %195 = arith.addf %193, %194 : vector<8x128xf32>
    %196 = arith.mulf %185, %125 : vector<8x128xf32>
    %197 = arith.mulf %177, %187 : vector<8x128xf32>
    %198 = arith.addf %196, %197 : vector<8x128xf32>
    %199 = math.tanh %198 : vector<8x128xf32>
    %200 = arith.mulf %195, %199 : vector<8x128xf32>
    %201 = arith.truncf %200 : vector<8x128xf32> to vector<8x128xbf16>
    %cst_66 = arith.constant dense<0.000000e+00> : vector<8x512xf32>
    %202 = tpu.matmul %201, %13, %cst_66 {dimension_numbers = #tpu.dot_dimension_numbers<[1], [0], [0], [1], [0, 0, 1, 1], [], []>} : vector<8x128xbf16>, vector<128x512xbf16>, vector<8x512xf32> -> vector<8x512xf32>
    %203 = vector.broadcast %15 : vector<1x512xf32> to vector<8x512xf32>
    %204 = arith.addf %202, %203 : vector<8x512xf32>
    %205 = arith.truncf %165 : vector<8x128xf32> to vector<8x128xbf16>
    %cst_67 = arith.constant dense<0.000000e+00> : vector<8x512xf32>
    %206 = tpu.matmul %205, %14, %cst_67 {dimension_numbers = #tpu.dot_dimension_numbers<[1], [0], [0], [1], [0, 0, 1, 1], [], []>} : vector<8x128xbf16>, vector<128x512xbf16>, vector<8x512xf32> -> vector<8x512xf32>
    %207 = arith.addf %204, %206 : vector<8x512xf32>
    %208 = vector.extract_strided_slice %207 {offsets = [0, 0], sizes = [8, 128], strides = [1, 1]} : vector<8x512xf32> to vector<8x128xf32>
    %cst_68 = arith.constant 5.000000e-01 : f32
    %209 = vector.broadcast %cst_68 : f32 to vector<8x128xf32>
    %210 = arith.mulf %209, %208 : vector<8x128xf32>
    %211 = math.tanh %210 : vector<8x128xf32>
    %cst_69 = arith.constant 5.000000e-01 : f32
    %212 = vector.broadcast %cst_69 : f32 to vector<8x128xf32>
    %213 = arith.mulf %212, %211 : vector<8x128xf32>
    %cst_70 = arith.constant 5.000000e-01 : f32
    %214 = vector.broadcast %cst_70 : f32 to vector<8x128xf32>
    %215 = arith.addf %213, %214 : vector<8x128xf32>
    %216 = vector.extract_strided_slice %207 {offsets = [0, 128], sizes = [8, 128], strides = [1, 1]} : vector<8x512xf32> to vector<8x128xf32>
    %cst_71 = arith.constant 5.000000e-01 : f32
    %217 = vector.broadcast %cst_71 : f32 to vector<8x128xf32>
    %218 = arith.mulf %217, %216 : vector<8x128xf32>
    %219 = math.tanh %218 : vector<8x128xf32>
    %cst_72 = arith.constant 5.000000e-01 : f32
    %220 = vector.broadcast %cst_72 : f32 to vector<8x128xf32>
    %221 = arith.mulf %220, %219 : vector<8x128xf32>
    %cst_73 = arith.constant 5.000000e-01 : f32
    %222 = vector.broadcast %cst_73 : f32 to vector<8x128xf32>
    %223 = arith.addf %221, %222 : vector<8x128xf32>
    %224 = vector.extract_strided_slice %207 {offsets = [0, 256], sizes = [8, 128], strides = [1, 1]} : vector<8x512xf32> to vector<8x128xf32>
    %225 = math.tanh %224 : vector<8x128xf32>
    %226 = vector.extract_strided_slice %207 {offsets = [0, 384], sizes = [8, 128], strides = [1, 1]} : vector<8x512xf32> to vector<8x128xf32>
    %cst_74 = arith.constant 5.000000e-01 : f32
    %227 = vector.broadcast %cst_74 : f32 to vector<8x128xf32>
    %228 = arith.mulf %227, %226 : vector<8x128xf32>
    %229 = math.tanh %228 : vector<8x128xf32>
    %cst_75 = arith.constant 5.000000e-01 : f32
    %230 = vector.broadcast %cst_75 : f32 to vector<8x128xf32>
    %231 = arith.mulf %230, %229 : vector<8x128xf32>
    %cst_76 = arith.constant 5.000000e-01 : f32
    %232 = vector.broadcast %cst_76 : f32 to vector<8x128xf32>
    %233 = arith.addf %231, %232 : vector<8x128xf32>
    %234 = arith.mulf %223, %163 : vector<8x128xf32>
    %235 = arith.mulf %215, %225 : vector<8x128xf32>
    %236 = arith.addf %234, %235 : vector<8x128xf32>
    %237 = math.tanh %236 : vector<8x128xf32>
    %238 = arith.mulf %233, %237 : vector<8x128xf32>
    %239 = vector.extract_strided_slice %11 {offsets = [24, 0], sizes = [8, 512], strides = [1, 1]} : vector<96x512xf32> to vector<8x512xf32>
    %240 = arith.truncf %200 : vector<8x128xf32> to vector<8x128xbf16>
    %cst_77 = arith.constant dense<0.000000e+00> : vector<8x512xf32>
    %241 = tpu.matmul %240, %12, %cst_77 {dimension_numbers = #tpu.dot_dimension_numbers<[1], [0], [0], [1], [0, 0, 1, 1], [], []>} : vector<8x128xbf16>, vector<128x512xbf16>, vector<8x512xf32> -> vector<8x512xf32>
    %242 = arith.addf %239, %241 : vector<8x512xf32>
    %243 = vector.extract_strided_slice %242 {offsets = [0, 0], sizes = [8, 128], strides = [1, 1]} : vector<8x512xf32> to vector<8x128xf32>
    %cst_78 = arith.constant 5.000000e-01 : f32
    %244 = vector.broadcast %cst_78 : f32 to vector<8x128xf32>
    %245 = arith.mulf %244, %243 : vector<8x128xf32>
    %246 = math.tanh %245 : vector<8x128xf32>
    %cst_79 = arith.constant 5.000000e-01 : f32
    %247 = vector.broadcast %cst_79 : f32 to vector<8x128xf32>
    %248 = arith.mulf %247, %246 : vector<8x128xf32>
    %cst_80 = arith.constant 5.000000e-01 : f32
    %249 = vector.broadcast %cst_80 : f32 to vector<8x128xf32>
    %250 = arith.addf %248, %249 : vector<8x128xf32>
    %251 = vector.extract_strided_slice %242 {offsets = [0, 128], sizes = [8, 128], strides = [1, 1]} : vector<8x512xf32> to vector<8x128xf32>
    %cst_81 = arith.constant 5.000000e-01 : f32
    %252 = vector.broadcast %cst_81 : f32 to vector<8x128xf32>
    %253 = arith.mulf %252, %251 : vector<8x128xf32>
    %254 = math.tanh %253 : vector<8x128xf32>
    %cst_82 = arith.constant 5.000000e-01 : f32
    %255 = vector.broadcast %cst_82 : f32 to vector<8x128xf32>
    %256 = arith.mulf %255, %254 : vector<8x128xf32>
    %cst_83 = arith.constant 5.000000e-01 : f32
    %257 = vector.broadcast %cst_83 : f32 to vector<8x128xf32>
    %258 = arith.addf %256, %257 : vector<8x128xf32>
    %259 = vector.extract_strided_slice %242 {offsets = [0, 256], sizes = [8, 128], strides = [1, 1]} : vector<8x512xf32> to vector<8x128xf32>
    %260 = math.tanh %259 : vector<8x128xf32>
    %261 = vector.extract_strided_slice %242 {offsets = [0, 384], sizes = [8, 128], strides = [1, 1]} : vector<8x512xf32> to vector<8x128xf32>
    %cst_84 = arith.constant 5.000000e-01 : f32
    %262 = vector.broadcast %cst_84 : f32 to vector<8x128xf32>
    %263 = arith.mulf %262, %261 : vector<8x128xf32>
    %264 = math.tanh %263 : vector<8x128xf32>
    %cst_85 = arith.constant 5.000000e-01 : f32
    %265 = vector.broadcast %cst_85 : f32 to vector<8x128xf32>
    %266 = arith.mulf %265, %264 : vector<8x128xf32>
    %cst_86 = arith.constant 5.000000e-01 : f32
    %267 = vector.broadcast %cst_86 : f32 to vector<8x128xf32>
    %268 = arith.addf %266, %267 : vector<8x128xf32>
    %269 = arith.mulf %258, %198 : vector<8x128xf32>
    %270 = arith.mulf %250, %260 : vector<8x128xf32>
    %271 = arith.addf %269, %270 : vector<8x128xf32>
    %272 = math.tanh %271 : vector<8x128xf32>
    %273 = arith.mulf %268, %272 : vector<8x128xf32>
    %274 = arith.truncf %273 : vector<8x128xf32> to vector<8x128xbf16>
    %cst_87 = arith.constant dense<0.000000e+00> : vector<8x512xf32>
    %275 = tpu.matmul %274, %13, %cst_87 {dimension_numbers = #tpu.dot_dimension_numbers<[1], [0], [0], [1], [0, 0, 1, 1], [], []>} : vector<8x128xbf16>, vector<128x512xbf16>, vector<8x512xf32> -> vector<8x512xf32>
    %276 = vector.broadcast %15 : vector<1x512xf32> to vector<8x512xf32>
    %277 = arith.addf %275, %276 : vector<8x512xf32>
    %278 = arith.truncf %238 : vector<8x128xf32> to vector<8x128xbf16>
    %cst_88 = arith.constant dense<0.000000e+00> : vector<8x512xf32>
    %279 = tpu.matmul %278, %14, %cst_88 {dimension_numbers = #tpu.dot_dimension_numbers<[1], [0], [0], [1], [0, 0, 1, 1], [], []>} : vector<8x128xbf16>, vector<128x512xbf16>, vector<8x512xf32> -> vector<8x512xf32>
    %280 = arith.addf %277, %279 : vector<8x512xf32>
    %281 = vector.extract_strided_slice %280 {offsets = [0, 0], sizes = [8, 128], strides = [1, 1]} : vector<8x512xf32> to vector<8x128xf32>
    %cst_89 = arith.constant 5.000000e-01 : f32
    %282 = vector.broadcast %cst_89 : f32 to vector<8x128xf32>
    %283 = arith.mulf %282, %281 : vector<8x128xf32>
    %284 = math.tanh %283 : vector<8x128xf32>
    %cst_90 = arith.constant 5.000000e-01 : f32
    %285 = vector.broadcast %cst_90 : f32 to vector<8x128xf32>
    %286 = arith.mulf %285, %284 : vector<8x128xf32>
    %cst_91 = arith.constant 5.000000e-01 : f32
    %287 = vector.broadcast %cst_91 : f32 to vector<8x128xf32>
    %288 = arith.addf %286, %287 : vector<8x128xf32>
    %289 = vector.extract_strided_slice %280 {offsets = [0, 128], sizes = [8, 128], strides = [1, 1]} : vector<8x512xf32> to vector<8x128xf32>
    %cst_92 = arith.constant 5.000000e-01 : f32
    %290 = vector.broadcast %cst_92 : f32 to vector<8x128xf32>
    %291 = arith.mulf %290, %289 : vector<8x128xf32>
    %292 = math.tanh %291 : vector<8x128xf32>
    %cst_93 = arith.constant 5.000000e-01 : f32
    %293 = vector.broadcast %cst_93 : f32 to vector<8x128xf32>
    %294 = arith.mulf %293, %292 : vector<8x128xf32>
    %cst_94 = arith.constant 5.000000e-01 : f32
    %295 = vector.broadcast %cst_94 : f32 to vector<8x128xf32>
    %296 = arith.addf %294, %295 : vector<8x128xf32>
    %297 = vector.extract_strided_slice %280 {offsets = [0, 256], sizes = [8, 128], strides = [1, 1]} : vector<8x512xf32> to vector<8x128xf32>
    %298 = math.tanh %297 : vector<8x128xf32>
    %299 = vector.extract_strided_slice %280 {offsets = [0, 384], sizes = [8, 128], strides = [1, 1]} : vector<8x512xf32> to vector<8x128xf32>
    %cst_95 = arith.constant 5.000000e-01 : f32
    %300 = vector.broadcast %cst_95 : f32 to vector<8x128xf32>
    %301 = arith.mulf %300, %299 : vector<8x128xf32>
    %302 = math.tanh %301 : vector<8x128xf32>
    %cst_96 = arith.constant 5.000000e-01 : f32
    %303 = vector.broadcast %cst_96 : f32 to vector<8x128xf32>
    %304 = arith.mulf %303, %302 : vector<8x128xf32>
    %cst_97 = arith.constant 5.000000e-01 : f32
    %305 = vector.broadcast %cst_97 : f32 to vector<8x128xf32>
    %306 = arith.addf %304, %305 : vector<8x128xf32>
    %307 = arith.mulf %296, %236 : vector<8x128xf32>
    %308 = arith.mulf %288, %298 : vector<8x128xf32>
    %309 = arith.addf %307, %308 : vector<8x128xf32>
    %310 = math.tanh %309 : vector<8x128xf32>
    %311 = arith.mulf %306, %310 : vector<8x128xf32>
    %312 = vector.extract_strided_slice %11 {offsets = [32, 0], sizes = [8, 512], strides = [1, 1]} : vector<96x512xf32> to vector<8x512xf32>
    %313 = arith.truncf %273 : vector<8x128xf32> to vector<8x128xbf16>
    %cst_98 = arith.constant dense<0.000000e+00> : vector<8x512xf32>
    %314 = tpu.matmul %313, %12, %cst_98 {dimension_numbers = #tpu.dot_dimension_numbers<[1], [0], [0], [1], [0, 0, 1, 1], [], []>} : vector<8x128xbf16>, vector<128x512xbf16>, vector<8x512xf32> -> vector<8x512xf32>
    %315 = arith.addf %312, %314 : vector<8x512xf32>
    %316 = vector.extract_strided_slice %315 {offsets = [0, 0], sizes = [8, 128], strides = [1, 1]} : vector<8x512xf32> to vector<8x128xf32>
    %cst_99 = arith.constant 5.000000e-01 : f32
    %317 = vector.broadcast %cst_99 : f32 to vector<8x128xf32>
    %318 = arith.mulf %317, %316 : vector<8x128xf32>
    %319 = math.tanh %318 : vector<8x128xf32>
    %cst_100 = arith.constant 5.000000e-01 : f32
    %320 = vector.broadcast %cst_100 : f32 to vector<8x128xf32>
    %321 = arith.mulf %320, %319 : vector<8x128xf32>
    %cst_101 = arith.constant 5.000000e-01 : f32
    %322 = vector.broadcast %cst_101 : f32 to vector<8x128xf32>
    %323 = arith.addf %321, %322 : vector<8x128xf32>
    %324 = vector.extract_strided_slice %315 {offsets = [0, 128], sizes = [8, 128], strides = [1, 1]} : vector<8x512xf32> to vector<8x128xf32>
    %cst_102 = arith.constant 5.000000e-01 : f32
    %325 = vector.broadcast %cst_102 : f32 to vector<8x128xf32>
    %326 = arith.mulf %325, %324 : vector<8x128xf32>
    %327 = math.tanh %326 : vector<8x128xf32>
    %cst_103 = arith.constant 5.000000e-01 : f32
    %328 = vector.broadcast %cst_103 : f32 to vector<8x128xf32>
    %329 = arith.mulf %328, %327 : vector<8x128xf32>
    %cst_104 = arith.constant 5.000000e-01 : f32
    %330 = vector.broadcast %cst_104 : f32 to vector<8x128xf32>
    %331 = arith.addf %329, %330 : vector<8x128xf32>
    %332 = vector.extract_strided_slice %315 {offsets = [0, 256], sizes = [8, 128], strides = [1, 1]} : vector<8x512xf32> to vector<8x128xf32>
    %333 = math.tanh %332 : vector<8x128xf32>
    %334 = vector.extract_strided_slice %315 {offsets = [0, 384], sizes = [8, 128], strides = [1, 1]} : vector<8x512xf32> to vector<8x128xf32>
    %cst_105 = arith.constant 5.000000e-01 : f32
    %335 = vector.broadcast %cst_105 : f32 to vector<8x128xf32>
    %336 = arith.mulf %335, %334 : vector<8x128xf32>
    %337 = math.tanh %336 : vector<8x128xf32>
    %cst_106 = arith.constant 5.000000e-01 : f32
    %338 = vector.broadcast %cst_106 : f32 to vector<8x128xf32>
    %339 = arith.mulf %338, %337 : vector<8x128xf32>
    %cst_107 = arith.constant 5.000000e-01 : f32
    %340 = vector.broadcast %cst_107 : f32 to vector<8x128xf32>
    %341 = arith.addf %339, %340 : vector<8x128xf32>
    %342 = arith.mulf %331, %271 : vector<8x128xf32>
    %343 = arith.mulf %323, %333 : vector<8x128xf32>
    %344 = arith.addf %342, %343 : vector<8x128xf32>
    %345 = math.tanh %344 : vector<8x128xf32>
    %346 = arith.mulf %341, %345 : vector<8x128xf32>
    %347 = vector.shape_cast %18 : vector<1x128xi1> to vector<1x128xi1>
    %348 = vector.broadcast %347 : vector<1x128xi1> to vector<8x128xi1>
    %349 = arith.select %348, %346, %273 : vector<8x128xi1>, vector<8x128xf32>
    %350 = vector.shape_cast %18 : vector<1x128xi1> to vector<1x128xi1>
    %351 = vector.broadcast %350 : vector<1x128xi1> to vector<8x128xi1>
    %352 = arith.select %351, %344, %271 : vector<8x128xi1>, vector<8x128xf32>
    %353 = arith.truncf %349 : vector<8x128xf32> to vector<8x128xbf16>
    %cst_108 = arith.constant dense<0.000000e+00> : vector<8x512xf32>
    %354 = tpu.matmul %353, %13, %cst_108 {dimension_numbers = #tpu.dot_dimension_numbers<[1], [0], [0], [1], [0, 0, 1, 1], [], []>} : vector<8x128xbf16>, vector<128x512xbf16>, vector<8x512xf32> -> vector<8x512xf32>
    %355 = vector.broadcast %15 : vector<1x512xf32> to vector<8x512xf32>
    %356 = arith.addf %354, %355 : vector<8x512xf32>
    %357 = arith.truncf %311 : vector<8x128xf32> to vector<8x128xbf16>
    %cst_109 = arith.constant dense<0.000000e+00> : vector<8x512xf32>
    %358 = tpu.matmul %357, %14, %cst_109 {dimension_numbers = #tpu.dot_dimension_numbers<[1], [0], [0], [1], [0, 0, 1, 1], [], []>} : vector<8x128xbf16>, vector<128x512xbf16>, vector<8x512xf32> -> vector<8x512xf32>
    %359 = arith.addf %356, %358 : vector<8x512xf32>
    %360 = vector.extract_strided_slice %359 {offsets = [0, 0], sizes = [8, 128], strides = [1, 1]} : vector<8x512xf32> to vector<8x128xf32>
    %cst_110 = arith.constant 5.000000e-01 : f32
    %361 = vector.broadcast %cst_110 : f32 to vector<8x128xf32>
    %362 = arith.mulf %361, %360 : vector<8x128xf32>
    %363 = math.tanh %362 : vector<8x128xf32>
    %cst_111 = arith.constant 5.000000e-01 : f32
    %364 = vector.broadcast %cst_111 : f32 to vector<8x128xf32>
    %365 = arith.mulf %364, %363 : vector<8x128xf32>
    %cst_112 = arith.constant 5.000000e-01 : f32
    %366 = vector.broadcast %cst_112 : f32 to vector<8x128xf32>
    %367 = arith.addf %365, %366 : vector<8x128xf32>
    %368 = vector.extract_strided_slice %359 {offsets = [0, 128], sizes = [8, 128], strides = [1, 1]} : vector<8x512xf32> to vector<8x128xf32>
    %cst_113 = arith.constant 5.000000e-01 : f32
    %369 = vector.broadcast %cst_113 : f32 to vector<8x128xf32>
    %370 = arith.mulf %369, %368 : vector<8x128xf32>
    %371 = math.tanh %370 : vector<8x128xf32>
    %cst_114 = arith.constant 5.000000e-01 : f32
    %372 = vector.broadcast %cst_114 : f32 to vector<8x128xf32>
    %373 = arith.mulf %372, %371 : vector<8x128xf32>
    %cst_115 = arith.constant 5.000000e-01 : f32
    %374 = vector.broadcast %cst_115 : f32 to vector<8x128xf32>
    %375 = arith.addf %373, %374 : vector<8x128xf32>
    %376 = vector.extract_strided_slice %359 {offsets = [0, 256], sizes = [8, 128], strides = [1, 1]} : vector<8x512xf32> to vector<8x128xf32>
    %377 = math.tanh %376 : vector<8x128xf32>
    %378 = vector.extract_strided_slice %359 {offsets = [0, 384], sizes = [8, 128], strides = [1, 1]} : vector<8x512xf32> to vector<8x128xf32>
    %cst_116 = arith.constant 5.000000e-01 : f32
    %379 = vector.broadcast %cst_116 : f32 to vector<8x128xf32>
    %380 = arith.mulf %379, %378 : vector<8x128xf32>
    %381 = math.tanh %380 : vector<8x128xf32>
    %cst_117 = arith.constant 5.000000e-01 : f32
    %382 = vector.broadcast %cst_117 : f32 to vector<8x128xf32>
    %383 = arith.mulf %382, %381 : vector<8x128xf32>
    %cst_118 = arith.constant 5.000000e-01 : f32
    %384 = vector.broadcast %cst_118 : f32 to vector<8x128xf32>
    %385 = arith.addf %383, %384 : vector<8x128xf32>
    %386 = arith.mulf %375, %309 : vector<8x128xf32>
    %387 = arith.mulf %367, %377 : vector<8x128xf32>
    %388 = arith.addf %386, %387 : vector<8x128xf32>
    %389 = math.tanh %388 : vector<8x128xf32>
    %390 = arith.mulf %385, %389 : vector<8x128xf32>
    %391 = vector.shape_cast %18 : vector<1x128xi1> to vector<1x128xi1>
    %392 = vector.broadcast %391 : vector<1x128xi1> to vector<8x128xi1>
    %393 = arith.select %392, %390, %311 : vector<8x128xi1>, vector<8x128xf32>
    %394 = vector.shape_cast %18 : vector<1x128xi1> to vector<1x128xi1>
    %395 = vector.broadcast %394 : vector<1x128xi1> to vector<8x128xi1>
    %396 = arith.select %395, %388, %309 : vector<8x128xi1>, vector<8x128xf32>
    %397 = vector.extract_strided_slice %11 {offsets = [40, 0], sizes = [8, 512], strides = [1, 1]} : vector<96x512xf32> to vector<8x512xf32>
    %398 = arith.truncf %349 : vector<8x128xf32> to vector<8x128xbf16>
    %cst_119 = arith.constant dense<0.000000e+00> : vector<8x512xf32>
    %399 = tpu.matmul %398, %12, %cst_119 {dimension_numbers = #tpu.dot_dimension_numbers<[1], [0], [0], [1], [0, 0, 1, 1], [], []>} : vector<8x128xbf16>, vector<128x512xbf16>, vector<8x512xf32> -> vector<8x512xf32>
    %400 = arith.addf %397, %399 : vector<8x512xf32>
    %401 = vector.extract_strided_slice %400 {offsets = [0, 0], sizes = [8, 128], strides = [1, 1]} : vector<8x512xf32> to vector<8x128xf32>
    %cst_120 = arith.constant 5.000000e-01 : f32
    %402 = vector.broadcast %cst_120 : f32 to vector<8x128xf32>
    %403 = arith.mulf %402, %401 : vector<8x128xf32>
    %404 = math.tanh %403 : vector<8x128xf32>
    %cst_121 = arith.constant 5.000000e-01 : f32
    %405 = vector.broadcast %cst_121 : f32 to vector<8x128xf32>
    %406 = arith.mulf %405, %404 : vector<8x128xf32>
    %cst_122 = arith.constant 5.000000e-01 : f32
    %407 = vector.broadcast %cst_122 : f32 to vector<8x128xf32>
    %408 = arith.addf %406, %407 : vector<8x128xf32>
    %409 = vector.extract_strided_slice %400 {offsets = [0, 128], sizes = [8, 128], strides = [1, 1]} : vector<8x512xf32> to vector<8x128xf32>
    %cst_123 = arith.constant 5.000000e-01 : f32
    %410 = vector.broadcast %cst_123 : f32 to vector<8x128xf32>
    %411 = arith.mulf %410, %409 : vector<8x128xf32>
    %412 = math.tanh %411 : vector<8x128xf32>
    %cst_124 = arith.constant 5.000000e-01 : f32
    %413 = vector.broadcast %cst_124 : f32 to vector<8x128xf32>
    %414 = arith.mulf %413, %412 : vector<8x128xf32>
    %cst_125 = arith.constant 5.000000e-01 : f32
    %415 = vector.broadcast %cst_125 : f32 to vector<8x128xf32>
    %416 = arith.addf %414, %415 : vector<8x128xf32>
    %417 = vector.extract_strided_slice %400 {offsets = [0, 256], sizes = [8, 128], strides = [1, 1]} : vector<8x512xf32> to vector<8x128xf32>
    %418 = math.tanh %417 : vector<8x128xf32>
    %419 = vector.extract_strided_slice %400 {offsets = [0, 384], sizes = [8, 128], strides = [1, 1]} : vector<8x512xf32> to vector<8x128xf32>
    %cst_126 = arith.constant 5.000000e-01 : f32
    %420 = vector.broadcast %cst_126 : f32 to vector<8x128xf32>
    %421 = arith.mulf %420, %419 : vector<8x128xf32>
    %422 = math.tanh %421 : vector<8x128xf32>
    %cst_127 = arith.constant 5.000000e-01 : f32
    %423 = vector.broadcast %cst_127 : f32 to vector<8x128xf32>
    %424 = arith.mulf %423, %422 : vector<8x128xf32>
    %cst_128 = arith.constant 5.000000e-01 : f32
    %425 = vector.broadcast %cst_128 : f32 to vector<8x128xf32>
    %426 = arith.addf %424, %425 : vector<8x128xf32>
    %427 = arith.mulf %416, %352 : vector<8x128xf32>
    %428 = arith.mulf %408, %418 : vector<8x128xf32>
    %429 = arith.addf %427, %428 : vector<8x128xf32>
    %430 = math.tanh %429 : vector<8x128xf32>
    %431 = arith.mulf %426, %430 : vector<8x128xf32>
    %432 = vector.shape_cast %18 : vector<1x128xi1> to vector<1x128xi1>
    %433 = vector.broadcast %432 : vector<1x128xi1> to vector<8x128xi1>
    %434 = arith.select %433, %431, %349 : vector<8x128xi1>, vector<8x128xf32>
    %435 = vector.shape_cast %18 : vector<1x128xi1> to vector<1x128xi1>
    %436 = vector.broadcast %435 : vector<1x128xi1> to vector<8x128xi1>
    %437 = arith.select %436, %429, %352 : vector<8x128xi1>, vector<8x128xf32>
    %438 = arith.truncf %434 : vector<8x128xf32> to vector<8x128xbf16>
    %cst_129 = arith.constant dense<0.000000e+00> : vector<8x512xf32>
    %439 = tpu.matmul %438, %13, %cst_129 {dimension_numbers = #tpu.dot_dimension_numbers<[1], [0], [0], [1], [0, 0, 1, 1], [], []>} : vector<8x128xbf16>, vector<128x512xbf16>, vector<8x512xf32> -> vector<8x512xf32>
    %440 = vector.broadcast %15 : vector<1x512xf32> to vector<8x512xf32>
    %441 = arith.addf %439, %440 : vector<8x512xf32>
    %442 = arith.truncf %393 : vector<8x128xf32> to vector<8x128xbf16>
    %cst_130 = arith.constant dense<0.000000e+00> : vector<8x512xf32>
    %443 = tpu.matmul %442, %14, %cst_130 {dimension_numbers = #tpu.dot_dimension_numbers<[1], [0], [0], [1], [0, 0, 1, 1], [], []>} : vector<8x128xbf16>, vector<128x512xbf16>, vector<8x512xf32> -> vector<8x512xf32>
    %444 = arith.addf %441, %443 : vector<8x512xf32>
    %445 = vector.extract_strided_slice %444 {offsets = [0, 0], sizes = [8, 128], strides = [1, 1]} : vector<8x512xf32> to vector<8x128xf32>
    %cst_131 = arith.constant 5.000000e-01 : f32
    %446 = vector.broadcast %cst_131 : f32 to vector<8x128xf32>
    %447 = arith.mulf %446, %445 : vector<8x128xf32>
    %448 = math.tanh %447 : vector<8x128xf32>
    %cst_132 = arith.constant 5.000000e-01 : f32
    %449 = vector.broadcast %cst_132 : f32 to vector<8x128xf32>
    %450 = arith.mulf %449, %448 : vector<8x128xf32>
    %cst_133 = arith.constant 5.000000e-01 : f32
    %451 = vector.broadcast %cst_133 : f32 to vector<8x128xf32>
    %452 = arith.addf %450, %451 : vector<8x128xf32>
    %453 = vector.extract_strided_slice %444 {offsets = [0, 128], sizes = [8, 128], strides = [1, 1]} : vector<8x512xf32> to vector<8x128xf32>
    %cst_134 = arith.constant 5.000000e-01 : f32
    %454 = vector.broadcast %cst_134 : f32 to vector<8x128xf32>
    %455 = arith.mulf %454, %453 : vector<8x128xf32>
    %456 = math.tanh %455 : vector<8x128xf32>
    %cst_135 = arith.constant 5.000000e-01 : f32
    %457 = vector.broadcast %cst_135 : f32 to vector<8x128xf32>
    %458 = arith.mulf %457, %456 : vector<8x128xf32>
    %cst_136 = arith.constant 5.000000e-01 : f32
    %459 = vector.broadcast %cst_136 : f32 to vector<8x128xf32>
    %460 = arith.addf %458, %459 : vector<8x128xf32>
    %461 = vector.extract_strided_slice %444 {offsets = [0, 256], sizes = [8, 128], strides = [1, 1]} : vector<8x512xf32> to vector<8x128xf32>
    %462 = math.tanh %461 : vector<8x128xf32>
    %463 = vector.extract_strided_slice %444 {offsets = [0, 384], sizes = [8, 128], strides = [1, 1]} : vector<8x512xf32> to vector<8x128xf32>
    %cst_137 = arith.constant 5.000000e-01 : f32
    %464 = vector.broadcast %cst_137 : f32 to vector<8x128xf32>
    %465 = arith.mulf %464, %463 : vector<8x128xf32>
    %466 = math.tanh %465 : vector<8x128xf32>
    %cst_138 = arith.constant 5.000000e-01 : f32
    %467 = vector.broadcast %cst_138 : f32 to vector<8x128xf32>
    %468 = arith.mulf %467, %466 : vector<8x128xf32>
    %cst_139 = arith.constant 5.000000e-01 : f32
    %469 = vector.broadcast %cst_139 : f32 to vector<8x128xf32>
    %470 = arith.addf %468, %469 : vector<8x128xf32>
    %471 = arith.mulf %460, %396 : vector<8x128xf32>
    %472 = arith.mulf %452, %462 : vector<8x128xf32>
    %473 = arith.addf %471, %472 : vector<8x128xf32>
    %474 = math.tanh %473 : vector<8x128xf32>
    %475 = arith.mulf %470, %474 : vector<8x128xf32>
    %476 = vector.shape_cast %18 : vector<1x128xi1> to vector<1x128xi1>
    %477 = vector.broadcast %476 : vector<1x128xi1> to vector<8x128xi1>
    %478 = arith.select %477, %475, %393 : vector<8x128xi1>, vector<8x128xf32>
    %479 = vector.shape_cast %18 : vector<1x128xi1> to vector<1x128xi1>
    %480 = vector.broadcast %479 : vector<1x128xi1> to vector<8x128xi1>
    %481 = arith.select %480, %473, %396 : vector<8x128xi1>, vector<8x128xf32>
    %482 = vector.extract_strided_slice %11 {offsets = [48, 0], sizes = [8, 512], strides = [1, 1]} : vector<96x512xf32> to vector<8x512xf32>
    %483 = arith.truncf %434 : vector<8x128xf32> to vector<8x128xbf16>
    %cst_140 = arith.constant dense<0.000000e+00> : vector<8x512xf32>
    %484 = tpu.matmul %483, %12, %cst_140 {dimension_numbers = #tpu.dot_dimension_numbers<[1], [0], [0], [1], [0, 0, 1, 1], [], []>} : vector<8x128xbf16>, vector<128x512xbf16>, vector<8x512xf32> -> vector<8x512xf32>
    %485 = arith.addf %482, %484 : vector<8x512xf32>
    %486 = vector.extract_strided_slice %485 {offsets = [0, 0], sizes = [8, 128], strides = [1, 1]} : vector<8x512xf32> to vector<8x128xf32>
    %cst_141 = arith.constant 5.000000e-01 : f32
    %487 = vector.broadcast %cst_141 : f32 to vector<8x128xf32>
    %488 = arith.mulf %487, %486 : vector<8x128xf32>
    %489 = math.tanh %488 : vector<8x128xf32>
    %cst_142 = arith.constant 5.000000e-01 : f32
    %490 = vector.broadcast %cst_142 : f32 to vector<8x128xf32>
    %491 = arith.mulf %490, %489 : vector<8x128xf32>
    %cst_143 = arith.constant 5.000000e-01 : f32
    %492 = vector.broadcast %cst_143 : f32 to vector<8x128xf32>
    %493 = arith.addf %491, %492 : vector<8x128xf32>
    %494 = vector.extract_strided_slice %485 {offsets = [0, 128], sizes = [8, 128], strides = [1, 1]} : vector<8x512xf32> to vector<8x128xf32>
    %cst_144 = arith.constant 5.000000e-01 : f32
    %495 = vector.broadcast %cst_144 : f32 to vector<8x128xf32>
    %496 = arith.mulf %495, %494 : vector<8x128xf32>
    %497 = math.tanh %496 : vector<8x128xf32>
    %cst_145 = arith.constant 5.000000e-01 : f32
    %498 = vector.broadcast %cst_145 : f32 to vector<8x128xf32>
    %499 = arith.mulf %498, %497 : vector<8x128xf32>
    %cst_146 = arith.constant 5.000000e-01 : f32
    %500 = vector.broadcast %cst_146 : f32 to vector<8x128xf32>
    %501 = arith.addf %499, %500 : vector<8x128xf32>
    %502 = vector.extract_strided_slice %485 {offsets = [0, 256], sizes = [8, 128], strides = [1, 1]} : vector<8x512xf32> to vector<8x128xf32>
    %503 = math.tanh %502 : vector<8x128xf32>
    %504 = vector.extract_strided_slice %485 {offsets = [0, 384], sizes = [8, 128], strides = [1, 1]} : vector<8x512xf32> to vector<8x128xf32>
    %cst_147 = arith.constant 5.000000e-01 : f32
    %505 = vector.broadcast %cst_147 : f32 to vector<8x128xf32>
    %506 = arith.mulf %505, %504 : vector<8x128xf32>
    %507 = math.tanh %506 : vector<8x128xf32>
    %cst_148 = arith.constant 5.000000e-01 : f32
    %508 = vector.broadcast %cst_148 : f32 to vector<8x128xf32>
    %509 = arith.mulf %508, %507 : vector<8x128xf32>
    %cst_149 = arith.constant 5.000000e-01 : f32
    %510 = vector.broadcast %cst_149 : f32 to vector<8x128xf32>
    %511 = arith.addf %509, %510 : vector<8x128xf32>
    %512 = arith.mulf %501, %437 : vector<8x128xf32>
    %513 = arith.mulf %493, %503 : vector<8x128xf32>
    %514 = arith.addf %512, %513 : vector<8x128xf32>
    %515 = math.tanh %514 : vector<8x128xf32>
    %516 = arith.mulf %511, %515 : vector<8x128xf32>
    %517 = vector.shape_cast %18 : vector<1x128xi1> to vector<1x128xi1>
    %518 = vector.broadcast %517 : vector<1x128xi1> to vector<8x128xi1>
    %519 = arith.select %518, %516, %434 : vector<8x128xi1>, vector<8x128xf32>
    %520 = vector.shape_cast %18 : vector<1x128xi1> to vector<1x128xi1>
    %521 = vector.broadcast %520 : vector<1x128xi1> to vector<8x128xi1>
    %522 = arith.select %521, %514, %437 : vector<8x128xi1>, vector<8x128xf32>
    %523 = arith.truncf %519 : vector<8x128xf32> to vector<8x128xbf16>
    %cst_150 = arith.constant dense<0.000000e+00> : vector<8x512xf32>
    %524 = tpu.matmul %523, %13, %cst_150 {dimension_numbers = #tpu.dot_dimension_numbers<[1], [0], [0], [1], [0, 0, 1, 1], [], []>} : vector<8x128xbf16>, vector<128x512xbf16>, vector<8x512xf32> -> vector<8x512xf32>
    %525 = vector.broadcast %15 : vector<1x512xf32> to vector<8x512xf32>
    %526 = arith.addf %524, %525 : vector<8x512xf32>
    %527 = arith.truncf %478 : vector<8x128xf32> to vector<8x128xbf16>
    %cst_151 = arith.constant dense<0.000000e+00> : vector<8x512xf32>
    %528 = tpu.matmul %527, %14, %cst_151 {dimension_numbers = #tpu.dot_dimension_numbers<[1], [0], [0], [1], [0, 0, 1, 1], [], []>} : vector<8x128xbf16>, vector<128x512xbf16>, vector<8x512xf32> -> vector<8x512xf32>
    %529 = arith.addf %526, %528 : vector<8x512xf32>
    %530 = vector.extract_strided_slice %529 {offsets = [0, 0], sizes = [8, 128], strides = [1, 1]} : vector<8x512xf32> to vector<8x128xf32>
    %cst_152 = arith.constant 5.000000e-01 : f32
    %531 = vector.broadcast %cst_152 : f32 to vector<8x128xf32>
    %532 = arith.mulf %531, %530 : vector<8x128xf32>
    %533 = math.tanh %532 : vector<8x128xf32>
    %cst_153 = arith.constant 5.000000e-01 : f32
    %534 = vector.broadcast %cst_153 : f32 to vector<8x128xf32>
    %535 = arith.mulf %534, %533 : vector<8x128xf32>
    %cst_154 = arith.constant 5.000000e-01 : f32
    %536 = vector.broadcast %cst_154 : f32 to vector<8x128xf32>
    %537 = arith.addf %535, %536 : vector<8x128xf32>
    %538 = vector.extract_strided_slice %529 {offsets = [0, 128], sizes = [8, 128], strides = [1, 1]} : vector<8x512xf32> to vector<8x128xf32>
    %cst_155 = arith.constant 5.000000e-01 : f32
    %539 = vector.broadcast %cst_155 : f32 to vector<8x128xf32>
    %540 = arith.mulf %539, %538 : vector<8x128xf32>
    %541 = math.tanh %540 : vector<8x128xf32>
    %cst_156 = arith.constant 5.000000e-01 : f32
    %542 = vector.broadcast %cst_156 : f32 to vector<8x128xf32>
    %543 = arith.mulf %542, %541 : vector<8x128xf32>
    %cst_157 = arith.constant 5.000000e-01 : f32
    %544 = vector.broadcast %cst_157 : f32 to vector<8x128xf32>
    %545 = arith.addf %543, %544 : vector<8x128xf32>
    %546 = vector.extract_strided_slice %529 {offsets = [0, 256], sizes = [8, 128], strides = [1, 1]} : vector<8x512xf32> to vector<8x128xf32>
    %547 = math.tanh %546 : vector<8x128xf32>
    %548 = vector.extract_strided_slice %529 {offsets = [0, 384], sizes = [8, 128], strides = [1, 1]} : vector<8x512xf32> to vector<8x128xf32>
    %cst_158 = arith.constant 5.000000e-01 : f32
    %549 = vector.broadcast %cst_158 : f32 to vector<8x128xf32>
    %550 = arith.mulf %549, %548 : vector<8x128xf32>
    %551 = math.tanh %550 : vector<8x128xf32>
    %cst_159 = arith.constant 5.000000e-01 : f32
    %552 = vector.broadcast %cst_159 : f32 to vector<8x128xf32>
    %553 = arith.mulf %552, %551 : vector<8x128xf32>
    %cst_160 = arith.constant 5.000000e-01 : f32
    %554 = vector.broadcast %cst_160 : f32 to vector<8x128xf32>
    %555 = arith.addf %553, %554 : vector<8x128xf32>
    %556 = arith.mulf %545, %481 : vector<8x128xf32>
    %557 = arith.mulf %537, %547 : vector<8x128xf32>
    %558 = arith.addf %556, %557 : vector<8x128xf32>
    %559 = math.tanh %558 : vector<8x128xf32>
    %560 = arith.mulf %555, %559 : vector<8x128xf32>
    %561 = vector.shape_cast %18 : vector<1x128xi1> to vector<1x128xi1>
    %562 = vector.broadcast %561 : vector<1x128xi1> to vector<8x128xi1>
    %563 = arith.select %562, %560, %478 : vector<8x128xi1>, vector<8x128xf32>
    %564 = vector.shape_cast %18 : vector<1x128xi1> to vector<1x128xi1>
    %565 = vector.broadcast %564 : vector<1x128xi1> to vector<8x128xi1>
    %566 = arith.select %565, %558, %481 : vector<8x128xi1>, vector<8x128xf32>
    %567 = vector.extract_strided_slice %11 {offsets = [56, 0], sizes = [8, 512], strides = [1, 1]} : vector<96x512xf32> to vector<8x512xf32>
    %568 = arith.truncf %519 : vector<8x128xf32> to vector<8x128xbf16>
    %cst_161 = arith.constant dense<0.000000e+00> : vector<8x512xf32>
    %569 = tpu.matmul %568, %12, %cst_161 {dimension_numbers = #tpu.dot_dimension_numbers<[1], [0], [0], [1], [0, 0, 1, 1], [], []>} : vector<8x128xbf16>, vector<128x512xbf16>, vector<8x512xf32> -> vector<8x512xf32>
    %570 = arith.addf %567, %569 : vector<8x512xf32>
    %571 = vector.extract_strided_slice %570 {offsets = [0, 0], sizes = [8, 128], strides = [1, 1]} : vector<8x512xf32> to vector<8x128xf32>
    %cst_162 = arith.constant 5.000000e-01 : f32
    %572 = vector.broadcast %cst_162 : f32 to vector<8x128xf32>
    %573 = arith.mulf %572, %571 : vector<8x128xf32>
    %574 = math.tanh %573 : vector<8x128xf32>
    %cst_163 = arith.constant 5.000000e-01 : f32
    %575 = vector.broadcast %cst_163 : f32 to vector<8x128xf32>
    %576 = arith.mulf %575, %574 : vector<8x128xf32>
    %cst_164 = arith.constant 5.000000e-01 : f32
    %577 = vector.broadcast %cst_164 : f32 to vector<8x128xf32>
    %578 = arith.addf %576, %577 : vector<8x128xf32>
    %579 = vector.extract_strided_slice %570 {offsets = [0, 128], sizes = [8, 128], strides = [1, 1]} : vector<8x512xf32> to vector<8x128xf32>
    %cst_165 = arith.constant 5.000000e-01 : f32
    %580 = vector.broadcast %cst_165 : f32 to vector<8x128xf32>
    %581 = arith.mulf %580, %579 : vector<8x128xf32>
    %582 = math.tanh %581 : vector<8x128xf32>
    %cst_166 = arith.constant 5.000000e-01 : f32
    %583 = vector.broadcast %cst_166 : f32 to vector<8x128xf32>
    %584 = arith.mulf %583, %582 : vector<8x128xf32>
    %cst_167 = arith.constant 5.000000e-01 : f32
    %585 = vector.broadcast %cst_167 : f32 to vector<8x128xf32>
    %586 = arith.addf %584, %585 : vector<8x128xf32>
    %587 = vector.extract_strided_slice %570 {offsets = [0, 256], sizes = [8, 128], strides = [1, 1]} : vector<8x512xf32> to vector<8x128xf32>
    %588 = math.tanh %587 : vector<8x128xf32>
    %589 = vector.extract_strided_slice %570 {offsets = [0, 384], sizes = [8, 128], strides = [1, 1]} : vector<8x512xf32> to vector<8x128xf32>
    %cst_168 = arith.constant 5.000000e-01 : f32
    %590 = vector.broadcast %cst_168 : f32 to vector<8x128xf32>
    %591 = arith.mulf %590, %589 : vector<8x128xf32>
    %592 = math.tanh %591 : vector<8x128xf32>
    %cst_169 = arith.constant 5.000000e-01 : f32
    %593 = vector.broadcast %cst_169 : f32 to vector<8x128xf32>
    %594 = arith.mulf %593, %592 : vector<8x128xf32>
    %cst_170 = arith.constant 5.000000e-01 : f32
    %595 = vector.broadcast %cst_170 : f32 to vector<8x128xf32>
    %596 = arith.addf %594, %595 : vector<8x128xf32>
    %597 = arith.mulf %586, %522 : vector<8x128xf32>
    %598 = arith.mulf %578, %588 : vector<8x128xf32>
    %599 = arith.addf %597, %598 : vector<8x128xf32>
    %600 = math.tanh %599 : vector<8x128xf32>
    %601 = arith.mulf %596, %600 : vector<8x128xf32>
    %602 = vector.shape_cast %18 : vector<1x128xi1> to vector<1x128xi1>
    %603 = vector.broadcast %602 : vector<1x128xi1> to vector<8x128xi1>
    %604 = arith.select %603, %601, %519 : vector<8x128xi1>, vector<8x128xf32>
    %605 = vector.shape_cast %18 : vector<1x128xi1> to vector<1x128xi1>
    %606 = vector.broadcast %605 : vector<1x128xi1> to vector<8x128xi1>
    %607 = arith.select %606, %599, %522 : vector<8x128xi1>, vector<8x128xf32>
    %608 = arith.truncf %604 : vector<8x128xf32> to vector<8x128xbf16>
    %cst_171 = arith.constant dense<0.000000e+00> : vector<8x512xf32>
    %609 = tpu.matmul %608, %13, %cst_171 {dimension_numbers = #tpu.dot_dimension_numbers<[1], [0], [0], [1], [0, 0, 1, 1], [], []>} : vector<8x128xbf16>, vector<128x512xbf16>, vector<8x512xf32> -> vector<8x512xf32>
    %610 = vector.broadcast %15 : vector<1x512xf32> to vector<8x512xf32>
    %611 = arith.addf %609, %610 : vector<8x512xf32>
    %612 = arith.truncf %563 : vector<8x128xf32> to vector<8x128xbf16>
    %cst_172 = arith.constant dense<0.000000e+00> : vector<8x512xf32>
    %613 = tpu.matmul %612, %14, %cst_172 {dimension_numbers = #tpu.dot_dimension_numbers<[1], [0], [0], [1], [0, 0, 1, 1], [], []>} : vector<8x128xbf16>, vector<128x512xbf16>, vector<8x512xf32> -> vector<8x512xf32>
    %614 = arith.addf %611, %613 : vector<8x512xf32>
    %615 = vector.extract_strided_slice %614 {offsets = [0, 0], sizes = [8, 128], strides = [1, 1]} : vector<8x512xf32> to vector<8x128xf32>
    %cst_173 = arith.constant 5.000000e-01 : f32
    %616 = vector.broadcast %cst_173 : f32 to vector<8x128xf32>
    %617 = arith.mulf %616, %615 : vector<8x128xf32>
    %618 = math.tanh %617 : vector<8x128xf32>
    %cst_174 = arith.constant 5.000000e-01 : f32
    %619 = vector.broadcast %cst_174 : f32 to vector<8x128xf32>
    %620 = arith.mulf %619, %618 : vector<8x128xf32>
    %cst_175 = arith.constant 5.000000e-01 : f32
    %621 = vector.broadcast %cst_175 : f32 to vector<8x128xf32>
    %622 = arith.addf %620, %621 : vector<8x128xf32>
    %623 = vector.extract_strided_slice %614 {offsets = [0, 128], sizes = [8, 128], strides = [1, 1]} : vector<8x512xf32> to vector<8x128xf32>
    %cst_176 = arith.constant 5.000000e-01 : f32
    %624 = vector.broadcast %cst_176 : f32 to vector<8x128xf32>
    %625 = arith.mulf %624, %623 : vector<8x128xf32>
    %626 = math.tanh %625 : vector<8x128xf32>
    %cst_177 = arith.constant 5.000000e-01 : f32
    %627 = vector.broadcast %cst_177 : f32 to vector<8x128xf32>
    %628 = arith.mulf %627, %626 : vector<8x128xf32>
    %cst_178 = arith.constant 5.000000e-01 : f32
    %629 = vector.broadcast %cst_178 : f32 to vector<8x128xf32>
    %630 = arith.addf %628, %629 : vector<8x128xf32>
    %631 = vector.extract_strided_slice %614 {offsets = [0, 256], sizes = [8, 128], strides = [1, 1]} : vector<8x512xf32> to vector<8x128xf32>
    %632 = math.tanh %631 : vector<8x128xf32>
    %633 = vector.extract_strided_slice %614 {offsets = [0, 384], sizes = [8, 128], strides = [1, 1]} : vector<8x512xf32> to vector<8x128xf32>
    %cst_179 = arith.constant 5.000000e-01 : f32
    %634 = vector.broadcast %cst_179 : f32 to vector<8x128xf32>
    %635 = arith.mulf %634, %633 : vector<8x128xf32>
    %636 = math.tanh %635 : vector<8x128xf32>
    %cst_180 = arith.constant 5.000000e-01 : f32
    %637 = vector.broadcast %cst_180 : f32 to vector<8x128xf32>
    %638 = arith.mulf %637, %636 : vector<8x128xf32>
    %cst_181 = arith.constant 5.000000e-01 : f32
    %639 = vector.broadcast %cst_181 : f32 to vector<8x128xf32>
    %640 = arith.addf %638, %639 : vector<8x128xf32>
    %641 = arith.mulf %630, %566 : vector<8x128xf32>
    %642 = arith.mulf %622, %632 : vector<8x128xf32>
    %643 = arith.addf %641, %642 : vector<8x128xf32>
    %644 = math.tanh %643 : vector<8x128xf32>
    %645 = arith.mulf %640, %644 : vector<8x128xf32>
    %646 = vector.shape_cast %18 : vector<1x128xi1> to vector<1x128xi1>
    %647 = vector.broadcast %646 : vector<1x128xi1> to vector<8x128xi1>
    %648 = arith.select %647, %645, %563 : vector<8x128xi1>, vector<8x128xf32>
    %649 = vector.shape_cast %18 : vector<1x128xi1> to vector<1x128xi1>
    %650 = vector.broadcast %649 : vector<1x128xi1> to vector<8x128xi1>
    %651 = arith.select %650, %643, %566 : vector<8x128xi1>, vector<8x128xf32>
    %652 = vector.extract_strided_slice %11 {offsets = [64, 0], sizes = [8, 512], strides = [1, 1]} : vector<96x512xf32> to vector<8x512xf32>
    %653 = arith.truncf %604 : vector<8x128xf32> to vector<8x128xbf16>
    %cst_182 = arith.constant dense<0.000000e+00> : vector<8x512xf32>
    %654 = tpu.matmul %653, %12, %cst_182 {dimension_numbers = #tpu.dot_dimension_numbers<[1], [0], [0], [1], [0, 0, 1, 1], [], []>} : vector<8x128xbf16>, vector<128x512xbf16>, vector<8x512xf32> -> vector<8x512xf32>
    %655 = arith.addf %652, %654 : vector<8x512xf32>
    %656 = vector.extract_strided_slice %655 {offsets = [0, 0], sizes = [8, 128], strides = [1, 1]} : vector<8x512xf32> to vector<8x128xf32>
    %cst_183 = arith.constant 5.000000e-01 : f32
    %657 = vector.broadcast %cst_183 : f32 to vector<8x128xf32>
    %658 = arith.mulf %657, %656 : vector<8x128xf32>
    %659 = math.tanh %658 : vector<8x128xf32>
    %cst_184 = arith.constant 5.000000e-01 : f32
    %660 = vector.broadcast %cst_184 : f32 to vector<8x128xf32>
    %661 = arith.mulf %660, %659 : vector<8x128xf32>
    %cst_185 = arith.constant 5.000000e-01 : f32
    %662 = vector.broadcast %cst_185 : f32 to vector<8x128xf32>
    %663 = arith.addf %661, %662 : vector<8x128xf32>
    %664 = vector.extract_strided_slice %655 {offsets = [0, 128], sizes = [8, 128], strides = [1, 1]} : vector<8x512xf32> to vector<8x128xf32>
    %cst_186 = arith.constant 5.000000e-01 : f32
    %665 = vector.broadcast %cst_186 : f32 to vector<8x128xf32>
    %666 = arith.mulf %665, %664 : vector<8x128xf32>
    %667 = math.tanh %666 : vector<8x128xf32>
    %cst_187 = arith.constant 5.000000e-01 : f32
    %668 = vector.broadcast %cst_187 : f32 to vector<8x128xf32>
    %669 = arith.mulf %668, %667 : vector<8x128xf32>
    %cst_188 = arith.constant 5.000000e-01 : f32
    %670 = vector.broadcast %cst_188 : f32 to vector<8x128xf32>
    %671 = arith.addf %669, %670 : vector<8x128xf32>
    %672 = vector.extract_strided_slice %655 {offsets = [0, 256], sizes = [8, 128], strides = [1, 1]} : vector<8x512xf32> to vector<8x128xf32>
    %673 = math.tanh %672 : vector<8x128xf32>
    %674 = vector.extract_strided_slice %655 {offsets = [0, 384], sizes = [8, 128], strides = [1, 1]} : vector<8x512xf32> to vector<8x128xf32>
    %cst_189 = arith.constant 5.000000e-01 : f32
    %675 = vector.broadcast %cst_189 : f32 to vector<8x128xf32>
    %676 = arith.mulf %675, %674 : vector<8x128xf32>
    %677 = math.tanh %676 : vector<8x128xf32>
    %cst_190 = arith.constant 5.000000e-01 : f32
    %678 = vector.broadcast %cst_190 : f32 to vector<8x128xf32>
    %679 = arith.mulf %678, %677 : vector<8x128xf32>
    %cst_191 = arith.constant 5.000000e-01 : f32
    %680 = vector.broadcast %cst_191 : f32 to vector<8x128xf32>
    %681 = arith.addf %679, %680 : vector<8x128xf32>
    %682 = arith.mulf %671, %607 : vector<8x128xf32>
    %683 = arith.mulf %663, %673 : vector<8x128xf32>
    %684 = arith.addf %682, %683 : vector<8x128xf32>
    %685 = math.tanh %684 : vector<8x128xf32>
    %686 = arith.mulf %681, %685 : vector<8x128xf32>
    %687 = vector.shape_cast %18 : vector<1x128xi1> to vector<1x128xi1>
    %688 = vector.broadcast %687 : vector<1x128xi1> to vector<8x128xi1>
    %689 = arith.select %688, %686, %604 : vector<8x128xi1>, vector<8x128xf32>
    %690 = vector.shape_cast %18 : vector<1x128xi1> to vector<1x128xi1>
    %691 = vector.broadcast %690 : vector<1x128xi1> to vector<8x128xi1>
    %692 = arith.select %691, %684, %607 : vector<8x128xi1>, vector<8x128xf32>
    %693 = arith.truncf %689 : vector<8x128xf32> to vector<8x128xbf16>
    %cst_192 = arith.constant dense<0.000000e+00> : vector<8x512xf32>
    %694 = tpu.matmul %693, %13, %cst_192 {dimension_numbers = #tpu.dot_dimension_numbers<[1], [0], [0], [1], [0, 0, 1, 1], [], []>} : vector<8x128xbf16>, vector<128x512xbf16>, vector<8x512xf32> -> vector<8x512xf32>
    %695 = vector.broadcast %15 : vector<1x512xf32> to vector<8x512xf32>
    %696 = arith.addf %694, %695 : vector<8x512xf32>
    %697 = arith.truncf %648 : vector<8x128xf32> to vector<8x128xbf16>
    %cst_193 = arith.constant dense<0.000000e+00> : vector<8x512xf32>
    %698 = tpu.matmul %697, %14, %cst_193 {dimension_numbers = #tpu.dot_dimension_numbers<[1], [0], [0], [1], [0, 0, 1, 1], [], []>} : vector<8x128xbf16>, vector<128x512xbf16>, vector<8x512xf32> -> vector<8x512xf32>
    %699 = arith.addf %696, %698 : vector<8x512xf32>
    %700 = vector.extract_strided_slice %699 {offsets = [0, 0], sizes = [8, 128], strides = [1, 1]} : vector<8x512xf32> to vector<8x128xf32>
    %cst_194 = arith.constant 5.000000e-01 : f32
    %701 = vector.broadcast %cst_194 : f32 to vector<8x128xf32>
    %702 = arith.mulf %701, %700 : vector<8x128xf32>
    %703 = math.tanh %702 : vector<8x128xf32>
    %cst_195 = arith.constant 5.000000e-01 : f32
    %704 = vector.broadcast %cst_195 : f32 to vector<8x128xf32>
    %705 = arith.mulf %704, %703 : vector<8x128xf32>
    %cst_196 = arith.constant 5.000000e-01 : f32
    %706 = vector.broadcast %cst_196 : f32 to vector<8x128xf32>
    %707 = arith.addf %705, %706 : vector<8x128xf32>
    %708 = vector.extract_strided_slice %699 {offsets = [0, 128], sizes = [8, 128], strides = [1, 1]} : vector<8x512xf32> to vector<8x128xf32>
    %cst_197 = arith.constant 5.000000e-01 : f32
    %709 = vector.broadcast %cst_197 : f32 to vector<8x128xf32>
    %710 = arith.mulf %709, %708 : vector<8x128xf32>
    %711 = math.tanh %710 : vector<8x128xf32>
    %cst_198 = arith.constant 5.000000e-01 : f32
    %712 = vector.broadcast %cst_198 : f32 to vector<8x128xf32>
    %713 = arith.mulf %712, %711 : vector<8x128xf32>
    %cst_199 = arith.constant 5.000000e-01 : f32
    %714 = vector.broadcast %cst_199 : f32 to vector<8x128xf32>
    %715 = arith.addf %713, %714 : vector<8x128xf32>
    %716 = vector.extract_strided_slice %699 {offsets = [0, 256], sizes = [8, 128], strides = [1, 1]} : vector<8x512xf32> to vector<8x128xf32>
    %717 = math.tanh %716 : vector<8x128xf32>
    %718 = vector.extract_strided_slice %699 {offsets = [0, 384], sizes = [8, 128], strides = [1, 1]} : vector<8x512xf32> to vector<8x128xf32>
    %cst_200 = arith.constant 5.000000e-01 : f32
    %719 = vector.broadcast %cst_200 : f32 to vector<8x128xf32>
    %720 = arith.mulf %719, %718 : vector<8x128xf32>
    %721 = math.tanh %720 : vector<8x128xf32>
    %cst_201 = arith.constant 5.000000e-01 : f32
    %722 = vector.broadcast %cst_201 : f32 to vector<8x128xf32>
    %723 = arith.mulf %722, %721 : vector<8x128xf32>
    %cst_202 = arith.constant 5.000000e-01 : f32
    %724 = vector.broadcast %cst_202 : f32 to vector<8x128xf32>
    %725 = arith.addf %723, %724 : vector<8x128xf32>
    %726 = arith.mulf %715, %651 : vector<8x128xf32>
    %727 = arith.mulf %707, %717 : vector<8x128xf32>
    %728 = arith.addf %726, %727 : vector<8x128xf32>
    %729 = math.tanh %728 : vector<8x128xf32>
    %730 = arith.mulf %725, %729 : vector<8x128xf32>
    %731 = vector.shape_cast %18 : vector<1x128xi1> to vector<1x128xi1>
    %732 = vector.broadcast %731 : vector<1x128xi1> to vector<8x128xi1>
    %733 = arith.select %732, %730, %648 : vector<8x128xi1>, vector<8x128xf32>
    %734 = vector.shape_cast %18 : vector<1x128xi1> to vector<1x128xi1>
    %735 = vector.broadcast %734 : vector<1x128xi1> to vector<8x128xi1>
    %736 = arith.select %735, %728, %651 : vector<8x128xi1>, vector<8x128xf32>
    %737 = vector.extract_strided_slice %11 {offsets = [72, 0], sizes = [8, 512], strides = [1, 1]} : vector<96x512xf32> to vector<8x512xf32>
    %738 = arith.truncf %689 : vector<8x128xf32> to vector<8x128xbf16>
    %cst_203 = arith.constant dense<0.000000e+00> : vector<8x512xf32>
    %739 = tpu.matmul %738, %12, %cst_203 {dimension_numbers = #tpu.dot_dimension_numbers<[1], [0], [0], [1], [0, 0, 1, 1], [], []>} : vector<8x128xbf16>, vector<128x512xbf16>, vector<8x512xf32> -> vector<8x512xf32>
    %740 = arith.addf %737, %739 : vector<8x512xf32>
    %741 = vector.extract_strided_slice %740 {offsets = [0, 0], sizes = [8, 128], strides = [1, 1]} : vector<8x512xf32> to vector<8x128xf32>
    %cst_204 = arith.constant 5.000000e-01 : f32
    %742 = vector.broadcast %cst_204 : f32 to vector<8x128xf32>
    %743 = arith.mulf %742, %741 : vector<8x128xf32>
    %744 = math.tanh %743 : vector<8x128xf32>
    %cst_205 = arith.constant 5.000000e-01 : f32
    %745 = vector.broadcast %cst_205 : f32 to vector<8x128xf32>
    %746 = arith.mulf %745, %744 : vector<8x128xf32>
    %cst_206 = arith.constant 5.000000e-01 : f32
    %747 = vector.broadcast %cst_206 : f32 to vector<8x128xf32>
    %748 = arith.addf %746, %747 : vector<8x128xf32>
    %749 = vector.extract_strided_slice %740 {offsets = [0, 128], sizes = [8, 128], strides = [1, 1]} : vector<8x512xf32> to vector<8x128xf32>
    %cst_207 = arith.constant 5.000000e-01 : f32
    %750 = vector.broadcast %cst_207 : f32 to vector<8x128xf32>
    %751 = arith.mulf %750, %749 : vector<8x128xf32>
    %752 = math.tanh %751 : vector<8x128xf32>
    %cst_208 = arith.constant 5.000000e-01 : f32
    %753 = vector.broadcast %cst_208 : f32 to vector<8x128xf32>
    %754 = arith.mulf %753, %752 : vector<8x128xf32>
    %cst_209 = arith.constant 5.000000e-01 : f32
    %755 = vector.broadcast %cst_209 : f32 to vector<8x128xf32>
    %756 = arith.addf %754, %755 : vector<8x128xf32>
    %757 = vector.extract_strided_slice %740 {offsets = [0, 256], sizes = [8, 128], strides = [1, 1]} : vector<8x512xf32> to vector<8x128xf32>
    %758 = math.tanh %757 : vector<8x128xf32>
    %759 = vector.extract_strided_slice %740 {offsets = [0, 384], sizes = [8, 128], strides = [1, 1]} : vector<8x512xf32> to vector<8x128xf32>
    %cst_210 = arith.constant 5.000000e-01 : f32
    %760 = vector.broadcast %cst_210 : f32 to vector<8x128xf32>
    %761 = arith.mulf %760, %759 : vector<8x128xf32>
    %762 = math.tanh %761 : vector<8x128xf32>
    %cst_211 = arith.constant 5.000000e-01 : f32
    %763 = vector.broadcast %cst_211 : f32 to vector<8x128xf32>
    %764 = arith.mulf %763, %762 : vector<8x128xf32>
    %cst_212 = arith.constant 5.000000e-01 : f32
    %765 = vector.broadcast %cst_212 : f32 to vector<8x128xf32>
    %766 = arith.addf %764, %765 : vector<8x128xf32>
    %767 = arith.mulf %756, %692 : vector<8x128xf32>
    %768 = arith.mulf %748, %758 : vector<8x128xf32>
    %769 = arith.addf %767, %768 : vector<8x128xf32>
    %770 = math.tanh %769 : vector<8x128xf32>
    %771 = arith.mulf %766, %770 : vector<8x128xf32>
    %772 = vector.shape_cast %18 : vector<1x128xi1> to vector<1x128xi1>
    %773 = vector.broadcast %772 : vector<1x128xi1> to vector<8x128xi1>
    %774 = arith.select %773, %771, %689 : vector<8x128xi1>, vector<8x128xf32>
    %775 = vector.shape_cast %18 : vector<1x128xi1> to vector<1x128xi1>
    %776 = vector.broadcast %775 : vector<1x128xi1> to vector<8x128xi1>
    %777 = arith.select %776, %769, %692 : vector<8x128xi1>, vector<8x128xf32>
    %778 = arith.truncf %774 : vector<8x128xf32> to vector<8x128xbf16>
    %cst_213 = arith.constant dense<0.000000e+00> : vector<8x512xf32>
    %779 = tpu.matmul %778, %13, %cst_213 {dimension_numbers = #tpu.dot_dimension_numbers<[1], [0], [0], [1], [0, 0, 1, 1], [], []>} : vector<8x128xbf16>, vector<128x512xbf16>, vector<8x512xf32> -> vector<8x512xf32>
    %780 = vector.broadcast %15 : vector<1x512xf32> to vector<8x512xf32>
    %781 = arith.addf %779, %780 : vector<8x512xf32>
    %782 = arith.truncf %733 : vector<8x128xf32> to vector<8x128xbf16>
    %cst_214 = arith.constant dense<0.000000e+00> : vector<8x512xf32>
    %783 = tpu.matmul %782, %14, %cst_214 {dimension_numbers = #tpu.dot_dimension_numbers<[1], [0], [0], [1], [0, 0, 1, 1], [], []>} : vector<8x128xbf16>, vector<128x512xbf16>, vector<8x512xf32> -> vector<8x512xf32>
    %784 = arith.addf %781, %783 : vector<8x512xf32>
    %785 = vector.extract_strided_slice %784 {offsets = [0, 0], sizes = [8, 128], strides = [1, 1]} : vector<8x512xf32> to vector<8x128xf32>
    %cst_215 = arith.constant 5.000000e-01 : f32
    %786 = vector.broadcast %cst_215 : f32 to vector<8x128xf32>
    %787 = arith.mulf %786, %785 : vector<8x128xf32>
    %788 = math.tanh %787 : vector<8x128xf32>
    %cst_216 = arith.constant 5.000000e-01 : f32
    %789 = vector.broadcast %cst_216 : f32 to vector<8x128xf32>
    %790 = arith.mulf %789, %788 : vector<8x128xf32>
    %cst_217 = arith.constant 5.000000e-01 : f32
    %791 = vector.broadcast %cst_217 : f32 to vector<8x128xf32>
    %792 = arith.addf %790, %791 : vector<8x128xf32>
    %793 = vector.extract_strided_slice %784 {offsets = [0, 128], sizes = [8, 128], strides = [1, 1]} : vector<8x512xf32> to vector<8x128xf32>
    %cst_218 = arith.constant 5.000000e-01 : f32
    %794 = vector.broadcast %cst_218 : f32 to vector<8x128xf32>
    %795 = arith.mulf %794, %793 : vector<8x128xf32>
    %796 = math.tanh %795 : vector<8x128xf32>
    %cst_219 = arith.constant 5.000000e-01 : f32
    %797 = vector.broadcast %cst_219 : f32 to vector<8x128xf32>
    %798 = arith.mulf %797, %796 : vector<8x128xf32>
    %cst_220 = arith.constant 5.000000e-01 : f32
    %799 = vector.broadcast %cst_220 : f32 to vector<8x128xf32>
    %800 = arith.addf %798, %799 : vector<8x128xf32>
    %801 = vector.extract_strided_slice %784 {offsets = [0, 256], sizes = [8, 128], strides = [1, 1]} : vector<8x512xf32> to vector<8x128xf32>
    %802 = math.tanh %801 : vector<8x128xf32>
    %803 = vector.extract_strided_slice %784 {offsets = [0, 384], sizes = [8, 128], strides = [1, 1]} : vector<8x512xf32> to vector<8x128xf32>
    %cst_221 = arith.constant 5.000000e-01 : f32
    %804 = vector.broadcast %cst_221 : f32 to vector<8x128xf32>
    %805 = arith.mulf %804, %803 : vector<8x128xf32>
    %806 = math.tanh %805 : vector<8x128xf32>
    %cst_222 = arith.constant 5.000000e-01 : f32
    %807 = vector.broadcast %cst_222 : f32 to vector<8x128xf32>
    %808 = arith.mulf %807, %806 : vector<8x128xf32>
    %cst_223 = arith.constant 5.000000e-01 : f32
    %809 = vector.broadcast %cst_223 : f32 to vector<8x128xf32>
    %810 = arith.addf %808, %809 : vector<8x128xf32>
    %811 = arith.mulf %800, %736 : vector<8x128xf32>
    %812 = arith.mulf %792, %802 : vector<8x128xf32>
    %813 = arith.addf %811, %812 : vector<8x128xf32>
    %814 = math.tanh %813 : vector<8x128xf32>
    %815 = arith.mulf %810, %814 : vector<8x128xf32>
    %816 = vector.shape_cast %18 : vector<1x128xi1> to vector<1x128xi1>
    %817 = vector.broadcast %816 : vector<1x128xi1> to vector<8x128xi1>
    %818 = arith.select %817, %815, %733 : vector<8x128xi1>, vector<8x128xf32>
    %819 = vector.shape_cast %18 : vector<1x128xi1> to vector<1x128xi1>
    %820 = vector.broadcast %819 : vector<1x128xi1> to vector<8x128xi1>
    %821 = arith.select %820, %813, %736 : vector<8x128xi1>, vector<8x128xf32>
    %822 = vector.extract_strided_slice %11 {offsets = [80, 0], sizes = [8, 512], strides = [1, 1]} : vector<96x512xf32> to vector<8x512xf32>
    %823 = arith.truncf %774 : vector<8x128xf32> to vector<8x128xbf16>
    %cst_224 = arith.constant dense<0.000000e+00> : vector<8x512xf32>
    %824 = tpu.matmul %823, %12, %cst_224 {dimension_numbers = #tpu.dot_dimension_numbers<[1], [0], [0], [1], [0, 0, 1, 1], [], []>} : vector<8x128xbf16>, vector<128x512xbf16>, vector<8x512xf32> -> vector<8x512xf32>
    %825 = arith.addf %822, %824 : vector<8x512xf32>
    %826 = vector.extract_strided_slice %825 {offsets = [0, 0], sizes = [8, 128], strides = [1, 1]} : vector<8x512xf32> to vector<8x128xf32>
    %cst_225 = arith.constant 5.000000e-01 : f32
    %827 = vector.broadcast %cst_225 : f32 to vector<8x128xf32>
    %828 = arith.mulf %827, %826 : vector<8x128xf32>
    %829 = math.tanh %828 : vector<8x128xf32>
    %cst_226 = arith.constant 5.000000e-01 : f32
    %830 = vector.broadcast %cst_226 : f32 to vector<8x128xf32>
    %831 = arith.mulf %830, %829 : vector<8x128xf32>
    %cst_227 = arith.constant 5.000000e-01 : f32
    %832 = vector.broadcast %cst_227 : f32 to vector<8x128xf32>
    %833 = arith.addf %831, %832 : vector<8x128xf32>
    %834 = vector.extract_strided_slice %825 {offsets = [0, 128], sizes = [8, 128], strides = [1, 1]} : vector<8x512xf32> to vector<8x128xf32>
    %cst_228 = arith.constant 5.000000e-01 : f32
    %835 = vector.broadcast %cst_228 : f32 to vector<8x128xf32>
    %836 = arith.mulf %835, %834 : vector<8x128xf32>
    %837 = math.tanh %836 : vector<8x128xf32>
    %cst_229 = arith.constant 5.000000e-01 : f32
    %838 = vector.broadcast %cst_229 : f32 to vector<8x128xf32>
    %839 = arith.mulf %838, %837 : vector<8x128xf32>
    %cst_230 = arith.constant 5.000000e-01 : f32
    %840 = vector.broadcast %cst_230 : f32 to vector<8x128xf32>
    %841 = arith.addf %839, %840 : vector<8x128xf32>
    %842 = vector.extract_strided_slice %825 {offsets = [0, 256], sizes = [8, 128], strides = [1, 1]} : vector<8x512xf32> to vector<8x128xf32>
    %843 = math.tanh %842 : vector<8x128xf32>
    %844 = vector.extract_strided_slice %825 {offsets = [0, 384], sizes = [8, 128], strides = [1, 1]} : vector<8x512xf32> to vector<8x128xf32>
    %cst_231 = arith.constant 5.000000e-01 : f32
    %845 = vector.broadcast %cst_231 : f32 to vector<8x128xf32>
    %846 = arith.mulf %845, %844 : vector<8x128xf32>
    %847 = math.tanh %846 : vector<8x128xf32>
    %cst_232 = arith.constant 5.000000e-01 : f32
    %848 = vector.broadcast %cst_232 : f32 to vector<8x128xf32>
    %849 = arith.mulf %848, %847 : vector<8x128xf32>
    %cst_233 = arith.constant 5.000000e-01 : f32
    %850 = vector.broadcast %cst_233 : f32 to vector<8x128xf32>
    %851 = arith.addf %849, %850 : vector<8x128xf32>
    %852 = arith.mulf %841, %777 : vector<8x128xf32>
    %853 = arith.mulf %833, %843 : vector<8x128xf32>
    %854 = arith.addf %852, %853 : vector<8x128xf32>
    %855 = math.tanh %854 : vector<8x128xf32>
    %856 = arith.mulf %851, %855 : vector<8x128xf32>
    %857 = vector.shape_cast %18 : vector<1x128xi1> to vector<1x128xi1>
    %858 = vector.broadcast %857 : vector<1x128xi1> to vector<8x128xi1>
    %859 = arith.select %858, %856, %774 : vector<8x128xi1>, vector<8x128xf32>
    %860 = vector.shape_cast %18 : vector<1x128xi1> to vector<1x128xi1>
    %861 = vector.broadcast %860 : vector<1x128xi1> to vector<8x128xi1>
    %862 = arith.select %861, %854, %777 : vector<8x128xi1>, vector<8x128xf32>
    %863 = arith.truncf %859 : vector<8x128xf32> to vector<8x128xbf16>
    %cst_234 = arith.constant dense<0.000000e+00> : vector<8x512xf32>
    %864 = tpu.matmul %863, %13, %cst_234 {dimension_numbers = #tpu.dot_dimension_numbers<[1], [0], [0], [1], [0, 0, 1, 1], [], []>} : vector<8x128xbf16>, vector<128x512xbf16>, vector<8x512xf32> -> vector<8x512xf32>
    %865 = vector.broadcast %15 : vector<1x512xf32> to vector<8x512xf32>
    %866 = arith.addf %864, %865 : vector<8x512xf32>
    %867 = arith.truncf %818 : vector<8x128xf32> to vector<8x128xbf16>
    %cst_235 = arith.constant dense<0.000000e+00> : vector<8x512xf32>
    %868 = tpu.matmul %867, %14, %cst_235 {dimension_numbers = #tpu.dot_dimension_numbers<[1], [0], [0], [1], [0, 0, 1, 1], [], []>} : vector<8x128xbf16>, vector<128x512xbf16>, vector<8x512xf32> -> vector<8x512xf32>
    %869 = arith.addf %866, %868 : vector<8x512xf32>
    %870 = vector.extract_strided_slice %869 {offsets = [0, 0], sizes = [8, 128], strides = [1, 1]} : vector<8x512xf32> to vector<8x128xf32>
    %cst_236 = arith.constant 5.000000e-01 : f32
    %871 = vector.broadcast %cst_236 : f32 to vector<8x128xf32>
    %872 = arith.mulf %871, %870 : vector<8x128xf32>
    %873 = math.tanh %872 : vector<8x128xf32>
    %cst_237 = arith.constant 5.000000e-01 : f32
    %874 = vector.broadcast %cst_237 : f32 to vector<8x128xf32>
    %875 = arith.mulf %874, %873 : vector<8x128xf32>
    %cst_238 = arith.constant 5.000000e-01 : f32
    %876 = vector.broadcast %cst_238 : f32 to vector<8x128xf32>
    %877 = arith.addf %875, %876 : vector<8x128xf32>
    %878 = vector.extract_strided_slice %869 {offsets = [0, 128], sizes = [8, 128], strides = [1, 1]} : vector<8x512xf32> to vector<8x128xf32>
    %cst_239 = arith.constant 5.000000e-01 : f32
    %879 = vector.broadcast %cst_239 : f32 to vector<8x128xf32>
    %880 = arith.mulf %879, %878 : vector<8x128xf32>
    %881 = math.tanh %880 : vector<8x128xf32>
    %cst_240 = arith.constant 5.000000e-01 : f32
    %882 = vector.broadcast %cst_240 : f32 to vector<8x128xf32>
    %883 = arith.mulf %882, %881 : vector<8x128xf32>
    %cst_241 = arith.constant 5.000000e-01 : f32
    %884 = vector.broadcast %cst_241 : f32 to vector<8x128xf32>
    %885 = arith.addf %883, %884 : vector<8x128xf32>
    %886 = vector.extract_strided_slice %869 {offsets = [0, 256], sizes = [8, 128], strides = [1, 1]} : vector<8x512xf32> to vector<8x128xf32>
    %887 = math.tanh %886 : vector<8x128xf32>
    %888 = vector.extract_strided_slice %869 {offsets = [0, 384], sizes = [8, 128], strides = [1, 1]} : vector<8x512xf32> to vector<8x128xf32>
    %cst_242 = arith.constant 5.000000e-01 : f32
    %889 = vector.broadcast %cst_242 : f32 to vector<8x128xf32>
    %890 = arith.mulf %889, %888 : vector<8x128xf32>
    %891 = math.tanh %890 : vector<8x128xf32>
    %cst_243 = arith.constant 5.000000e-01 : f32
    %892 = vector.broadcast %cst_243 : f32 to vector<8x128xf32>
    %893 = arith.mulf %892, %891 : vector<8x128xf32>
    %cst_244 = arith.constant 5.000000e-01 : f32
    %894 = vector.broadcast %cst_244 : f32 to vector<8x128xf32>
    %895 = arith.addf %893, %894 : vector<8x128xf32>
    %896 = arith.mulf %885, %821 : vector<8x128xf32>
    %897 = arith.mulf %877, %887 : vector<8x128xf32>
    %898 = arith.addf %896, %897 : vector<8x128xf32>
    %899 = math.tanh %898 : vector<8x128xf32>
    %900 = arith.mulf %895, %899 : vector<8x128xf32>
    %901 = vector.shape_cast %18 : vector<1x128xi1> to vector<1x128xi1>
    %902 = vector.broadcast %901 : vector<1x128xi1> to vector<8x128xi1>
    %903 = arith.select %902, %900, %818 : vector<8x128xi1>, vector<8x128xf32>
    %904 = vector.shape_cast %18 : vector<1x128xi1> to vector<1x128xi1>
    %905 = vector.broadcast %904 : vector<1x128xi1> to vector<8x128xi1>
    %906 = arith.select %905, %898, %821 : vector<8x128xi1>, vector<8x128xf32>
    %907 = vector.extract_strided_slice %11 {offsets = [88, 0], sizes = [8, 512], strides = [1, 1]} : vector<96x512xf32> to vector<8x512xf32>
    %908 = arith.truncf %859 : vector<8x128xf32> to vector<8x128xbf16>
    %cst_245 = arith.constant dense<0.000000e+00> : vector<8x512xf32>
    %909 = tpu.matmul %908, %12, %cst_245 {dimension_numbers = #tpu.dot_dimension_numbers<[1], [0], [0], [1], [0, 0, 1, 1], [], []>} : vector<8x128xbf16>, vector<128x512xbf16>, vector<8x512xf32> -> vector<8x512xf32>
    %910 = arith.addf %907, %909 : vector<8x512xf32>
    %911 = vector.extract_strided_slice %910 {offsets = [0, 0], sizes = [8, 128], strides = [1, 1]} : vector<8x512xf32> to vector<8x128xf32>
    %cst_246 = arith.constant 5.000000e-01 : f32
    %912 = vector.broadcast %cst_246 : f32 to vector<8x128xf32>
    %913 = arith.mulf %912, %911 : vector<8x128xf32>
    %914 = math.tanh %913 : vector<8x128xf32>
    %cst_247 = arith.constant 5.000000e-01 : f32
    %915 = vector.broadcast %cst_247 : f32 to vector<8x128xf32>
    %916 = arith.mulf %915, %914 : vector<8x128xf32>
    %cst_248 = arith.constant 5.000000e-01 : f32
    %917 = vector.broadcast %cst_248 : f32 to vector<8x128xf32>
    %918 = arith.addf %916, %917 : vector<8x128xf32>
    %919 = vector.extract_strided_slice %910 {offsets = [0, 128], sizes = [8, 128], strides = [1, 1]} : vector<8x512xf32> to vector<8x128xf32>
    %cst_249 = arith.constant 5.000000e-01 : f32
    %920 = vector.broadcast %cst_249 : f32 to vector<8x128xf32>
    %921 = arith.mulf %920, %919 : vector<8x128xf32>
    %922 = math.tanh %921 : vector<8x128xf32>
    %cst_250 = arith.constant 5.000000e-01 : f32
    %923 = vector.broadcast %cst_250 : f32 to vector<8x128xf32>
    %924 = arith.mulf %923, %922 : vector<8x128xf32>
    %cst_251 = arith.constant 5.000000e-01 : f32
    %925 = vector.broadcast %cst_251 : f32 to vector<8x128xf32>
    %926 = arith.addf %924, %925 : vector<8x128xf32>
    %927 = vector.extract_strided_slice %910 {offsets = [0, 256], sizes = [8, 128], strides = [1, 1]} : vector<8x512xf32> to vector<8x128xf32>
    %928 = math.tanh %927 : vector<8x128xf32>
    %929 = vector.extract_strided_slice %910 {offsets = [0, 384], sizes = [8, 128], strides = [1, 1]} : vector<8x512xf32> to vector<8x128xf32>
    %cst_252 = arith.constant 5.000000e-01 : f32
    %930 = vector.broadcast %cst_252 : f32 to vector<8x128xf32>
    %931 = arith.mulf %930, %929 : vector<8x128xf32>
    %932 = math.tanh %931 : vector<8x128xf32>
    %cst_253 = arith.constant 5.000000e-01 : f32
    %933 = vector.broadcast %cst_253 : f32 to vector<8x128xf32>
    %934 = arith.mulf %933, %932 : vector<8x128xf32>
    %cst_254 = arith.constant 5.000000e-01 : f32
    %935 = vector.broadcast %cst_254 : f32 to vector<8x128xf32>
    %936 = arith.addf %934, %935 : vector<8x128xf32>
    %937 = arith.mulf %926, %862 : vector<8x128xf32>
    %938 = arith.mulf %918, %928 : vector<8x128xf32>
    %939 = arith.addf %937, %938 : vector<8x128xf32>
    %940 = math.tanh %939 : vector<8x128xf32>
    %941 = arith.mulf %936, %940 : vector<8x128xf32>
    %942 = vector.shape_cast %18 : vector<1x128xi1> to vector<1x128xi1>
    %943 = vector.broadcast %942 : vector<1x128xi1> to vector<8x128xi1>
    %944 = arith.select %943, %941, %859 : vector<8x128xi1>, vector<8x128xf32>
    %945 = arith.truncf %944 : vector<8x128xf32> to vector<8x128xbf16>
    %cst_255 = arith.constant dense<0.000000e+00> : vector<8x512xf32>
    %946 = tpu.matmul %945, %13, %cst_255 {dimension_numbers = #tpu.dot_dimension_numbers<[1], [0], [0], [1], [0, 0, 1, 1], [], []>} : vector<8x128xbf16>, vector<128x512xbf16>, vector<8x512xf32> -> vector<8x512xf32>
    %947 = vector.broadcast %15 : vector<1x512xf32> to vector<8x512xf32>
    %948 = arith.addf %946, %947 : vector<8x512xf32>
    %949 = arith.truncf %903 : vector<8x128xf32> to vector<8x128xbf16>
    %cst_256 = arith.constant dense<0.000000e+00> : vector<8x512xf32>
    %950 = tpu.matmul %949, %14, %cst_256 {dimension_numbers = #tpu.dot_dimension_numbers<[1], [0], [0], [1], [0, 0, 1, 1], [], []>} : vector<8x128xbf16>, vector<128x512xbf16>, vector<8x512xf32> -> vector<8x512xf32>
    %951 = arith.addf %948, %950 : vector<8x512xf32>
    %952 = vector.extract_strided_slice %951 {offsets = [0, 0], sizes = [8, 128], strides = [1, 1]} : vector<8x512xf32> to vector<8x128xf32>
    %cst_257 = arith.constant 5.000000e-01 : f32
    %953 = vector.broadcast %cst_257 : f32 to vector<8x128xf32>
    %954 = arith.mulf %953, %952 : vector<8x128xf32>
    %955 = math.tanh %954 : vector<8x128xf32>
    %cst_258 = arith.constant 5.000000e-01 : f32
    %956 = vector.broadcast %cst_258 : f32 to vector<8x128xf32>
    %957 = arith.mulf %956, %955 : vector<8x128xf32>
    %cst_259 = arith.constant 5.000000e-01 : f32
    %958 = vector.broadcast %cst_259 : f32 to vector<8x128xf32>
    %959 = arith.addf %957, %958 : vector<8x128xf32>
    %960 = vector.extract_strided_slice %951 {offsets = [0, 128], sizes = [8, 128], strides = [1, 1]} : vector<8x512xf32> to vector<8x128xf32>
    %cst_260 = arith.constant 5.000000e-01 : f32
    %961 = vector.broadcast %cst_260 : f32 to vector<8x128xf32>
    %962 = arith.mulf %961, %960 : vector<8x128xf32>
    %963 = math.tanh %962 : vector<8x128xf32>
    %cst_261 = arith.constant 5.000000e-01 : f32
    %964 = vector.broadcast %cst_261 : f32 to vector<8x128xf32>
    %965 = arith.mulf %964, %963 : vector<8x128xf32>
    %cst_262 = arith.constant 5.000000e-01 : f32
    %966 = vector.broadcast %cst_262 : f32 to vector<8x128xf32>
    %967 = arith.addf %965, %966 : vector<8x128xf32>
    %968 = vector.extract_strided_slice %951 {offsets = [0, 256], sizes = [8, 128], strides = [1, 1]} : vector<8x512xf32> to vector<8x128xf32>
    %969 = math.tanh %968 : vector<8x128xf32>
    %970 = vector.extract_strided_slice %951 {offsets = [0, 384], sizes = [8, 128], strides = [1, 1]} : vector<8x512xf32> to vector<8x128xf32>
    %cst_263 = arith.constant 5.000000e-01 : f32
    %971 = vector.broadcast %cst_263 : f32 to vector<8x128xf32>
    %972 = arith.mulf %971, %970 : vector<8x128xf32>
    %973 = math.tanh %972 : vector<8x128xf32>
    %cst_264 = arith.constant 5.000000e-01 : f32
    %974 = vector.broadcast %cst_264 : f32 to vector<8x128xf32>
    %975 = arith.mulf %974, %973 : vector<8x128xf32>
    %cst_265 = arith.constant 5.000000e-01 : f32
    %976 = vector.broadcast %cst_265 : f32 to vector<8x128xf32>
    %977 = arith.addf %975, %976 : vector<8x128xf32>
    %978 = arith.mulf %967, %906 : vector<8x128xf32>
    %979 = arith.mulf %959, %969 : vector<8x128xf32>
    %980 = arith.addf %978, %979 : vector<8x128xf32>
    %981 = math.tanh %980 : vector<8x128xf32>
    %982 = arith.mulf %977, %981 : vector<8x128xf32>
    %983 = vector.shape_cast %18 : vector<1x128xi1> to vector<1x128xi1>
    %984 = vector.broadcast %983 : vector<1x128xi1> to vector<8x128xi1>
    %985 = arith.select %984, %982, %903 : vector<8x128xi1>, vector<8x128xf32>
    %c0_266 = arith.constant 0 : index
    %c0_267 = arith.constant 0 : index
    %986 = vector.load %arg7[%c0_266, %c0_267] : memref<2x8xf32, #tpu.memory_space<vmem>>, vector<2x8xf32>
    %cst_268 = arith.constant dense<0.000000e+00> : vector<2x128xf32>
    %987 = tpu.matmul %986, %985, %cst_268 {dimension_numbers = #tpu.dot_dimension_numbers<[1], [0], [0], [1], [0, 0, 1, 1], [], []>} : vector<2x8xf32>, vector<8x128xf32>, vector<2x128xf32> -> vector<2x128xf32>
    %c0_i32_269 = arith.constant 0 : i32
    %988 = tpu.memref_slice %arg21[%c0_i32_269] : memref<3x!tpu.dma_semaphore, #tpu.memory_space<semaphore_mem>> -> memref<1x!tpu.dma_semaphore, #tpu.memory_space<semaphore_mem>>
    %989 = tpu.memref_squeeze %988 : memref<1x!tpu.dma_semaphore, #tpu.memory_space<semaphore_mem>> -> memref<!tpu.dma_semaphore, #tpu.memory_space<semaphore_mem>>
    tpu.wait_dma2 semaphore(%989 : memref<!tpu.dma_semaphore, #tpu.memory_space<semaphore_mem>>) src(%arg9 : memref<256x256xbf16, #tpu.memory_space<any>>) dst(%arg18 : memref<256x256xbf16, #tpu.memory_space<vmem>>)
    %c1_i32_270 = arith.constant 1 : i32
    %990 = tpu.memref_slice %arg21[%c1_i32_270] : memref<3x!tpu.dma_semaphore, #tpu.memory_space<semaphore_mem>> -> memref<1x!tpu.dma_semaphore, #tpu.memory_space<semaphore_mem>>
    %991 = tpu.memref_squeeze %990 : memref<1x!tpu.dma_semaphore, #tpu.memory_space<semaphore_mem>> -> memref<!tpu.dma_semaphore, #tpu.memory_space<semaphore_mem>>
    tpu.wait_dma2 semaphore(%991 : memref<!tpu.dma_semaphore, #tpu.memory_space<semaphore_mem>>) src(%arg11 : memref<256x256xbf16, #tpu.memory_space<any>>) dst(%arg19 : memref<256x256xbf16, #tpu.memory_space<vmem>>)
    %c2_i32_271 = arith.constant 2 : i32
    %992 = tpu.memref_slice %arg21[%c2_i32_271] : memref<3x!tpu.dma_semaphore, #tpu.memory_space<semaphore_mem>> -> memref<1x!tpu.dma_semaphore, #tpu.memory_space<semaphore_mem>>
    %993 = tpu.memref_squeeze %992 : memref<1x!tpu.dma_semaphore, #tpu.memory_space<semaphore_mem>> -> memref<!tpu.dma_semaphore, #tpu.memory_space<semaphore_mem>>
    tpu.wait_dma2 semaphore(%993 : memref<!tpu.dma_semaphore, #tpu.memory_space<semaphore_mem>>) src(%arg13 : memref<256x256xbf16, #tpu.memory_space<any>>) dst(%arg20 : memref<256x256xbf16, #tpu.memory_space<vmem>>)
    %c0_272 = arith.constant 0 : index
    %c0_273 = arith.constant 0 : index
    %994 = vector.load %arg8[%c0_272, %c0_273] : memref<2x128xbf16, #tpu.memory_space<vmem>>, vector<2x128xbf16>
    %c0_274 = arith.constant 0 : index
    %c0_275 = arith.constant 0 : index
    %995 = vector.load %arg18[%c0_274, %c0_275] : memref<256x256xbf16, #tpu.memory_space<vmem>>, vector<128x256xbf16>
    %cst_276 = arith.constant dense<0.000000e+00> : vector<2x256xf32>
    %996 = tpu.matmul %994, %995, %cst_276 {dimension_numbers = #tpu.dot_dimension_numbers<[1], [0], [0], [1], [0, 0, 1, 1], [], []>} : vector<2x128xbf16>, vector<128x256xbf16>, vector<2x256xf32> -> vector<2x256xf32>
    %997 = arith.truncf %987 : vector<2x128xf32> to vector<2x128xbf16>
    %c128 = arith.constant 128 : index
    %c0_277 = arith.constant 0 : index
    %998 = vector.load %arg18[%c128, %c0_277] : memref<256x256xbf16, #tpu.memory_space<vmem>>, vector<128x256xbf16>
    %cst_278 = arith.constant dense<0.000000e+00> : vector<2x256xf32>
    %999 = tpu.matmul %997, %998, %cst_278 {dimension_numbers = #tpu.dot_dimension_numbers<[1], [0], [0], [1], [0, 0, 1, 1], [], []>} : vector<2x128xbf16>, vector<128x256xbf16>, vector<2x256xf32> -> vector<2x256xf32>
    %1000 = arith.addf %996, %999 : vector<2x256xf32>
    %c0_279 = arith.constant 0 : index
    %c0_280 = arith.constant 0 : index
    %1001 = vector.load %arg10[%c0_279, %c0_280] : memref<1x256xf32, #tpu.memory_space<vmem>>, vector<1x256xf32>
    %1002 = vector.broadcast %1001 : vector<1x256xf32> to vector<2x256xf32>
    %1003 = arith.addf %1000, %1002 : vector<2x256xf32>
    %cst_281 = arith.constant 0.000000e+00 : f32
    %1004 = vector.broadcast %cst_281 : f32 to vector<2x256xf32>
    %1005 = arith.maximumf %1003, %1004 : vector<2x256xf32>
    %1006 = arith.truncf %1005 : vector<2x256xf32> to vector<2x256xbf16>
    %c0_282 = arith.constant 0 : index
    %c0_283 = arith.constant 0 : index
    %1007 = vector.load %arg19[%c0_282, %c0_283] : memref<256x256xbf16, #tpu.memory_space<vmem>>, vector<256x256xbf16>
    %cst_284 = arith.constant dense<0.000000e+00> : vector<2x256xf32>
    %1008 = tpu.matmul %1006, %1007, %cst_284 {dimension_numbers = #tpu.dot_dimension_numbers<[1], [0], [0], [1], [0, 0, 1, 1], [], []>} : vector<2x256xbf16>, vector<256x256xbf16>, vector<2x256xf32> -> vector<2x256xf32>
    %c0_285 = arith.constant 0 : index
    %c0_286 = arith.constant 0 : index
    %1009 = vector.load %arg12[%c0_285, %c0_286] : memref<1x256xf32, #tpu.memory_space<vmem>>, vector<1x256xf32>
    %1010 = vector.broadcast %1009 : vector<1x256xf32> to vector<2x256xf32>
    %1011 = arith.addf %1008, %1010 : vector<2x256xf32>
    %cst_287 = arith.constant 0.000000e+00 : f32
    %1012 = vector.broadcast %cst_287 : f32 to vector<2x256xf32>
    %1013 = arith.maximumf %1011, %1012 : vector<2x256xf32>
    %1014 = arith.truncf %1013 : vector<2x256xf32> to vector<2x256xbf16>
    %c0_288 = arith.constant 0 : index
    %c0_289 = arith.constant 0 : index
    %1015 = vector.load %arg20[%c0_288, %c0_289] : memref<256x256xbf16, #tpu.memory_space<vmem>>, vector<256x256xbf16>
    %cst_290 = arith.constant dense<0.000000e+00> : vector<2x256xf32>
    %1016 = tpu.matmul %1014, %1015, %cst_290 {dimension_numbers = #tpu.dot_dimension_numbers<[1], [0], [0], [1], [0, 0, 1, 1], [], []>} : vector<2x256xbf16>, vector<256x256xbf16>, vector<2x256xf32> -> vector<2x256xf32>
    %c0_291 = arith.constant 0 : index
    %c0_292 = arith.constant 0 : index
    %1017 = vector.load %arg14[%c0_291, %c0_292] : memref<1x256xf32, #tpu.memory_space<vmem>>, vector<1x256xf32>
    %1018 = vector.broadcast %1017 : vector<1x256xf32> to vector<2x256xf32>
    %1019 = arith.addf %1016, %1018 : vector<2x256xf32>
    %cst_293 = arith.constant 0.000000e+00 : f32
    %1020 = vector.broadcast %cst_293 : f32 to vector<2x256xf32>
    %1021 = arith.maximumf %1019, %1020 : vector<2x256xf32>
    %c0_294 = arith.constant 0 : index
    %c0_295 = arith.constant 0 : index
    %1022 = vector.load %arg15[%c0_294, %c0_295] : memref<256x1xf32, #tpu.memory_space<vmem>>, vector<256x1xf32>
    %cst_296 = arith.constant dense<0.000000e+00> : vector<2x1xf32>
    %1023 = tpu.matmul %1021, %1022, %cst_296 {dimension_numbers = #tpu.dot_dimension_numbers<[1], [0], [0], [1], [0, 0, 1, 1], [], []>} : vector<2x256xf32>, vector<256x1xf32>, vector<2x1xf32> -> vector<2x1xf32>
    %c0_297 = arith.constant 0 : index
    %c0_298 = arith.constant 0 : index
    %1024 = vector.load %arg16[%c0_297, %c0_298] : memref<1x1xf32, #tpu.memory_space<vmem>>, vector<1x1xf32>
    %1025 = vector.broadcast %1024 : vector<1x1xf32> to vector<2x1xf32>
    %1026 = arith.addf %1023, %1025 : vector<2x1xf32>
    %cst_299 = arith.constant 5.000000e-01 : f32
    %1027 = vector.broadcast %cst_299 : f32 to vector<2x1xf32>
    %1028 = arith.mulf %1027, %1026 : vector<2x1xf32>
    %1029 = math.tanh %1028 : vector<2x1xf32>
    %cst_300 = arith.constant 5.000000e-01 : f32
    %1030 = vector.broadcast %cst_300 : f32 to vector<2x1xf32>
    %1031 = arith.mulf %1030, %1029 : vector<2x1xf32>
    %cst_301 = arith.constant 5.000000e-01 : f32
    %1032 = vector.broadcast %cst_301 : f32 to vector<2x1xf32>
    %1033 = arith.addf %1031, %1032 : vector<2x1xf32>
    %c0_302 = arith.constant 0 : index
    %c0_303 = arith.constant 0 : index
    %1034 = vector.load %arg17[%c0_302, %c0_303] : memref<2x1xf32, #tpu.memory_space<vmem>>, vector<2x1xf32>
    tpu.vector_store %arg17[%c0_302, %c0_303], %1033 {strides = array<i32>} : memref<2x1xf32, #tpu.memory_space<vmem>>, vector<2x1xf32>,
    return
  }
}

</mosaic_0001>

<bundles_post_ra>
// kernel: lstm_model2_forward.1
= control target key start
LH: loop header
LB: loop body
LE: loop exit
PB: predicated region body
PF: predicated region fallthrough
CT: control target
= control target key end

     0   :  { %s8313_s0 = inlined_call_operand.vmem [shape: bf16[96,128], index: 0, kind: input, shape index: {}]   ;;  %s8314_s1 = inlined_call_operand.vmem [shape: bf16[128,512], index: 1, kind: input, shape index: {}]   ;;  %s8315_s2 = inlined_call_operand.hbm [shape: bf16[128,512], index: 2, kind: input, shape index: {}]   ;;  %s8316_s3 = inlined_call_operand.vmem [shape: f32[1,512], index: 3, kind: input, shape index: {}]   ;;  %s8317_s4 = inlined_call_operand.hbm [shape: bf16[128,512], index: 4, kind: input, shape index: {}]   ;;  %s8318_s5 = inlined_call_operand.hbm [shape: bf16[128,512], index: 5, kind: input, shape index: {}]   ;;  %s8319_s6 = inlined_call_operand.vmem [shape: f32[1,512], index: 6, kind: input, shape index: {}]   ;;  %s8320_s7 = inlined_call_operand.vmem [shape: f32[2,8], index: 7, kind: input, shape index: {}]   ;;  %s8321_s8 = inlined_call_operand.vmem [shape: bf16[2,128], index: 8, kind: input, shape index: {}]   ;;  %s8322_s9 = inlined_call_operand.hbm [shape: bf16[256,256], index: 9, kind: input, shape index: {}]   ;;  %s8323_s10 = inlined_call_operand.vmem [shape: f32[1,256], index: 10, kind: input, shape index: {}]   ;;  %s8324_s11 = inlined_call_operand.hbm [shape: bf16[256,256], index: 11, kind: input, shape index: {}]   ;;  %s8325_s12 = inlined_call_operand.vmem [shape: f32[1,256], index: 12, kind: input, shape index: {}]   ;;  %s8326_s13 = inlined_call_operand.hbm [shape: bf16[256,256], index: 13, kind: input, shape index: {}]   ;;  %s8327_s14 = inlined_call_operand.vmem [shape: f32[1,256], index: 14, kind: input, shape index: {}]   ;;  %s8328_s15 = inlined_call_operand.vmem [shape: f32[256,1], index: 15, kind: input, shape index: {}]   ;;  %s8329_s16 = inlined_call_operand.<no memory space> [shape: f32[1,1], index: 16, kind: input, shape index: {}]   ;;  %s8330_s17 = inlined_call_operand.vmem [shape: f32[2,1], index: 17, kind: output, shape index: {}]  }
   0x1   :  { %8491 = sst [smem:[#allocation146_spill]] %s8313_s0  ;;  %v22_v0 = vstv %s8329_s16 }
   0x2   :  { %8492 = sst [smem:[#allocation147_spill]] %s8314_s1  ;;  %23 = vst [vmem:[#allocation6] sm:$0x1] %v22_v0 }
   0x3   :  { %24 = vsyncpa [#allocation8], 0 }
   0x4   :  { %25 = vsyncpa [#allocation10], 0  ;;  %s49_s28 = sshll.u32 %s8317_s4, 4  ;;  %s6056_s29 = smov [#allocation9]   ;;  %s50_s28 = int_to_ptr.hbm [resolvable:$true] %s49_s28 }
   0x5   :  { %s51_s0 = sshll.u32 %s6056_s29, 4  ;;  %s34_s19 = sshll.u32 %s8315_s2, 4  ;;  %s52_s0 = int_to_ptr.vmem [resolvable:$true] %s51_s0  ;;  %s35_s19 = int_to_ptr.hbm [resolvable:$true] %s34_s19 }
   0x6   :  { %s6057_s1 = smov 256   ;;  %s6058_s20 = smov 16  }
   0x7   :  { %57 = dma.hbm_to_vmem [thread:$0]  %s50_s28, 4096, %s52_s0, [#allocation10], %s6057_s1, %s6057_s1, %s6058_s20  }
   0x8   :  { %s6059_s16 = smov [#allocation7]   ;;  %s62_s24 = sshll.u32 %s8318_s5, 4  ;;  %s63_s24 = int_to_ptr.hbm [resolvable:$true] %s62_s24 }
   0x9   :  { %s36_s21 = sshll.u32 %s6059_s16, 4  ;;  %s6060_s4 = smov [#allocation11]   ;;  %s37_s21 = int_to_ptr.vmem [resolvable:$true] %s36_s21 }
   0xa   :  { %42 = dma.hbm_to_vmem [thread:$0]  %s35_s19, 4096, %s37_s21, [#allocation8], %s6057_s1, %s6057_s1, %s6058_s20  }
   0xb   :  { %s64_s25 = sshll.u32 %s6060_s4, 4  ;;  %s65_s25 = int_to_ptr.vmem [resolvable:$true] %s64_s25 }
   0xc   :  { %70 = dma.hbm_to_vmem [thread:$0]  %s63_s24, 4096, %s65_s25, [#allocation10], %s6057_s1, %s6057_s1, %s6058_s20  }
   0xd   :  { %6046 = dma.done.wait [#allocation8], 4096  }
   0xe   :  { %6047 = vsyncadd [#allocation8], 4294963200 }
   0xf   :  { %6048 = dma.done.wait [#allocation10], 8192  }
  0x10   :  { %6049 = vsyncadd [#allocation10], 4294959104  ;;  %s8493_s27 = sld [smem:[#allocation147_spill]]  ;;  %s107_s2 = sshll.u32 %s8322_s9, 4  ;;  %vm3592_vm1 = vcmask 64512   ;;  %s108_s2 = int_to_ptr.hbm [resolvable:$true] %s107_s2 }
  0x11   :  { %s8494_s5 = sld [smem:[#allocation146_spill]]  ;;  %s6062_s26 = smov [#allocation2]  }
  0x12   :  { %s109_s28 = sshll.u32 %s6062_s26, 4  ;;  %s6063_s0 = smov [#allocation3]   ;;  %s110_s28 = int_to_ptr.vmem [resolvable:$true] %s109_s28 }
  0x13   :  { %112 = dma.hbm_to_vmem [thread:$0]  %s108_s2, 4096, %s110_s28, [#allocation5] }
  0x14   :  { %s123_s30 = sshll.u32 %s6063_s0, 4  ;;  %s135_s1 = sshll.u32 %s8326_s13, 4  ;;  %s124_s30 = int_to_ptr.vmem [resolvable:$true] %s123_s30  ;;  %s136_s1 = int_to_ptr.hbm [resolvable:$true] %s135_s1 }
  0x15   :  { %s6064_s9 = smov [#allocation4]  }
  0x16   :  { %v4634_v1 = vld [vmem:[%s8493_s27 + $0xe0] sm:$0xf]  ;;  %v5456_v2 = vld [vmem:[%s8493_s27 + $0xec] sm:$0xf0]  ;;  %v5454_v3 = vld [vmem:[%s8493_s27 + $0xe4] sm:$0xf] }
  0x17   :  { %v4635_v4 = vor.u32 %v5456_v2, %v4634_v1  ;;  %v4636_v5 = vld [vmem:[%s8493_s27 + $0xf0] sm:$0xf0]  ;;  %v4642_v6 = vld [vmem:[%s8493_s27 + $0xe8] sm:$0xf]  ;;  %v5457_v7 = vld [vmem:[%s8493_s27 + $0xf4] sm:$0xf0] }
  0x18   :  { %v4639_v8 = vor.u32 %v5454_v3, %v4636_v5  ;;  %v4643_v9 = vor.u32 %v5457_v7, %v4642_v6  ;;  %v5455_v10 = vld [vmem:[%s8493_s27 + $0xec] sm:$0xf]  ;;  %v4644_v11 = vld [vmem:[%s8493_s27 + $0xf8] sm:$0xf0]  ;;  %v4618_v12 = vld [vmem:[%s8493_s27 + $0xc0] sm:$0xf] }
  0x19   :  { %391 = vmatpush.bf16.msra.mxu0 %v4635_v4  ;;  %v4647_v13 = vor.u32 %v5455_v10, %v4644_v11  ;;  %v5452_v14 = vld [vmem:[%s8493_s27 + $0xcc] sm:$0xf0]  ;;  %v5450_v15 = vld [vmem:[%s8493_s27 + $0xc4] sm:$0xf]  ;;  %v4620_v16 = vld [vmem:[%s8493_s27 + $0xd0] sm:$0xf0] }
  0x1a   :  { %430 = vmatpush.bf16.msra.mxu1 %v4639_v8  ;;  %469 = vmatpush.bf16.msra.mxu2 %v4643_v9  ;;  %v4619_v17 = vor.u32 %v5452_v14, %v4618_v12  ;;  %v4623_v18 = vor.u32 %v5450_v15, %v4620_v16  ;;  %v4626_v19 = vld [vmem:[%s8493_s27 + $0xc8] sm:$0xf]  ;;  %v5453_v20 = vld [vmem:[%s8493_s27 + $0xd4] sm:$0xf0]  ;;  %v5451_v21 = vld [vmem:[%s8493_s27 + $0xcc] sm:$0xf] }
  0x1b   :  { %508 = vmatpush.bf16.msra.mxu3 %v4647_v13  ;;  %v4627_v22 = vor.u32 %v5453_v20, %v4626_v19  ;;  %v4628_v23 = vld [vmem:[%s8493_s27 + $0xd8] sm:$0xf0]  ;;  %v4602_v24 = vld [vmem:[%s8493_s27 + $0xa0] sm:$0xf]  ;;  %v5448_v25 = vld [vmem:[%s8493_s27 + $0xac] sm:$0xf0] }
  0x1c   :  { %v4631_v26 = vor.u32 %v5451_v21, %v4628_v23  ;;  %v5446_v27 = vld [vmem:[%s8493_s27 + $0xa4] sm:$0xf]  ;;  %v4604_v28 = vld [vmem:[%s8493_s27 + $0xb0] sm:$0xf0]  ;;  %v4610_v29 = vld [vmem:[%s8493_s27 + $0xa8] sm:$0xf]  ;;  %v4603_v30 = vor.u32 %v5448_v25, %v4602_v24 }
  0x1d   :  { %392 = vmatpush.bf16.msra.mxu0 %v4619_v17  ;;  %v5449_v31 = vld [vmem:[%s8493_s27 + $0xb4] sm:$0xf0]  ;;  %v5447_v32 = vld [vmem:[%s8493_s27 + $0xac] sm:$0xf]  ;;  %v4612_v33 = vld [vmem:[%s8493_s27 + $0xb8] sm:$0xf0]  ;;  %v4607_v34 = vor.u32 %v5446_v27, %v4604_v28 }
  0x1e   :  { %431 = vmatpush.bf16.msra.mxu1 %v4623_v18  ;;  %470 = vmatpush.bf16.msra.mxu2 %v4627_v22  ;;  %v4611_v35 = vor.u32 %v5449_v31, %v4610_v29  ;;  %v4586_v36 = vld [vmem:[%s8493_s27 + $0x80] sm:$0xf]  ;;  %v5444_v37 = vld [vmem:[%s8493_s27 + $0x8c] sm:$0xf0]  ;;  %v5442_v38 = vld [vmem:[%s8493_s27 + $0x84] sm:$0xf]  ;;  %v4615_v39 = vor.u32 %v5447_v32, %v4612_v33 }
  0x1f   :  { %509 = vmatpush.bf16.msra.mxu3 %v4631_v26  ;;  %v4588_v40 = vld [vmem:[%s8493_s27 + $0x90] sm:$0xf0]  ;;  %v4594_v41 = vld [vmem:[%s8493_s27 + $0x88] sm:$0xf]  ;;  %v5445_v42 = vld [vmem:[%s8493_s27 + $0x94] sm:$0xf0]  ;;  %v4587_v45 = vor.u32 %v5444_v37, %v4586_v36 }
  0x20   :  { %v5443_v43 = vld [vmem:[%s8493_s27 + $0x8c] sm:$0xf]  ;;  %v4596_v44 = vld [vmem:[%s8493_s27 + $0x98] sm:$0xf0]  ;;  %v4591_v46 = vor.u32 %v5442_v38, %v4588_v40  ;;  %v4595_v47 = vor.u32 %v5445_v42, %v4594_v41  ;;  %v4570_v48 = vld [vmem:[%s8493_s27 + $0x60] sm:$0xf] }
  0x21   :  { %393 = vmatpush.bf16.msra.mxu0 %v4603_v30  ;;  %v5440_v49 = vld [vmem:[%s8493_s27 + $0x6c] sm:$0xf0]  ;;  %v5438_v50 = vld [vmem:[%s8493_s27 + $0x64] sm:$0xf]  ;;  %v4599_v51 = vor.u32 %v5443_v43, %v4596_v44  ;;  %v4572_v52 = vld [vmem:[%s8493_s27 + $0x70] sm:$0xf0] }
  0x22   :  { %432 = vmatpush.bf16.msra.mxu1 %v4607_v34  ;;  %471 = vmatpush.bf16.msra.mxu2 %v4611_v35  ;;  %v4578_v53 = vld [vmem:[%s8493_s27 + $0x68] sm:$0xf]  ;;  %v5441_v54 = vld [vmem:[%s8493_s27 + $0x74] sm:$0xf0]  ;;  %v5439_v55 = vld [vmem:[%s8493_s27 + $0x6c] sm:$0xf]  ;;  %v4571_v57 = vor.u32 %v5440_v49, %v4570_v48  ;;  %v4575_v58 = vor.u32 %v5438_v50, %v4572_v52 }
  0x23   :  { %510 = vmatpush.bf16.msra.mxu3 %v4615_v39  ;;  %v4580_v56 = vld [vmem:[%s8493_s27 + $0x78] sm:$0xf0]  ;;  %v4579_v59 = vor.u32 %v5441_v54, %v4578_v53  ;;  %v4554_v60 = vld [vmem:[%s8493_s27 + $0x40] sm:$0xf]  ;;  %v5436_v61 = vld [vmem:[%s8493_s27 + $0x4c] sm:$0xf0] }
  0x24   :  { %v5434_v62 = vld [vmem:[%s8493_s27 + $0x44] sm:$0xf]  ;;  %v4583_v63 = vor.u32 %v5439_v55, %v4580_v56  ;;  %v4556_v0 = vld [vmem:[%s8493_s27 + $0x50] sm:$0xf0]  ;;  %v4562_v1 = vld [vmem:[%s8493_s27 + $0x48] sm:$0xf]  ;;  %v4555_v5 = vor.u32 %v5436_v61, %v4554_v60 }
  0x25   :  { %394 = vmatpush.bf16.msra.mxu0 %v4587_v45  ;;  %v5437_v2 = vld [vmem:[%s8493_s27 + $0x54] sm:$0xf0]  ;;  %v5435_v3 = vld [vmem:[%s8493_s27 + $0x4c] sm:$0xf]  ;;  %v4564_v4 = vld [vmem:[%s8493_s27 + $0x58] sm:$0xf0]  ;;  %v4559_v6 = vor.u32 %v5434_v62, %v4556_v0 }
  0x26   :  { %433 = vmatpush.bf16.msra.mxu1 %v4591_v46  ;;  %472 = vmatpush.bf16.msra.mxu2 %v4595_v47  ;;  %v4563_v7 = vor.u32 %v5437_v2, %v4562_v1  ;;  %v4538_v8 = vld [vmem:[%s8493_s27 + $0x20] sm:$0xf]  ;;  %v5432_v9 = vld [vmem:[%s8493_s27 + $0x2c] sm:$0xf0]  ;;  %v5430_v10 = vld [vmem:[%s8493_s27 + $0x24] sm:$0xf]  ;;  %v4567_v11 = vor.u32 %v5435_v3, %v4564_v4 }
  0x27   :  { %511 = vmatpush.bf16.msra.mxu3 %v4599_v51  ;;  %v4540_v12 = vld [vmem:[%s8493_s27 + $0x30] sm:$0xf0]  ;;  %v4546_v13 = vld [vmem:[%s8493_s27 + $0x28] sm:$0xf]  ;;  %v5433_v14 = vld [vmem:[%s8493_s27 + $0x34] sm:$0xf0]  ;;  %v4539_v17 = vor.u32 %v5432_v9, %v4538_v8 }
  0x28   :  { %v5431_v15 = vld [vmem:[%s8493_s27 + $0x2c] sm:$0xf]  ;;  %v4548_v16 = vld [vmem:[%s8493_s27 + $0x38] sm:$0xf0]  ;;  %v4522_v18 = vld [vmem:[%s8493_s27] sm:$0xf]  ;;  %v4543_v19 = vor.u32 %v5430_v10, %v4540_v12  ;;  %v4547_v20 = vor.u32 %v5433_v14, %v4546_v13 }
  0x29   :  { %395 = vmatpush.bf16.msra.mxu0 %v4571_v57  ;;  %v5428_v21 = vld [vmem:[%s8493_s27 + $0xc] sm:$0xf0]  ;;  %v5426_v22 = vld [vmem:[%s8493_s27 + $0x4] sm:$0xf]  ;;  %v4524_v23 = vld [vmem:[%s8493_s27 + $0x10] sm:$0xf0]  ;;  %v4551_v24 = vor.u32 %v5431_v15, %v4548_v16 }
  0x2a   :  { %434 = vmatpush.bf16.msra.mxu1 %v4575_v58  ;;  %473 = vmatpush.bf16.msra.mxu2 %v4579_v59  ;;  %v4530_v25 = vld [vmem:[%s8493_s27 + $0x8] sm:$0xf]  ;;  %v5429_v26 = vld [vmem:[%s8493_s27 + $0x14] sm:$0xf0]  ;;  %v5427_v27 = vld [vmem:[%s8493_s27 + $0xc] sm:$0xf]  ;;  %v4523_v31 = vor.u32 %v5428_v21, %v4522_v18  ;;  %v4527_v34 = vor.u32 %v5426_v22, %v4524_v23 }
  0x2b   :  { %512 = vmatpush.bf16.msra.mxu3 %v4583_v63  ;;  %v4532_v28 = vld [vmem:[%s8493_s27 + $0x18] sm:$0xf0]  ;;  %v4762_v29 = vld [vmem:[#allocation7 + $0xe0] sm:$0xf]  ;;  %v5488_v30 = vld [vmem:[#allocation7 + $0xec] sm:$0xf0]  ;;  %v4531_v35 = vor.u32 %v5429_v26, %v4530_v25 }
  0x2c   :  { %v5486_v32 = vld [vmem:[#allocation7 + $0xe4] sm:$0xf]  ;;  %v4764_v33 = vld [vmem:[#allocation7 + $0xf0] sm:$0xf0]  ;;  %v4535_v37 = vor.u32 %v5427_v27, %v4532_v28  ;;  %v6362_v38 = vor.u32 %v5488_v30, %v4762_v29  ;;  %v4770_v39 = vld [vmem:[#allocation7 + $0xe8] sm:$0xf] }
  0x2d   :  { %396 = vmatpush.bf16.msra.mxu0 %v4555_v5  ;;  %v5420_v36 = vld [vmem:[%s8494_s5] sm:$0xff]  ;;  %v5489_v40 = vld [vmem:[#allocation7 + $0xf4] sm:$0xf0]  ;;  %v5487_v41 = vld [vmem:[#allocation7 + $0xec] sm:$0xf]  ;;  %v6364_v42 = vor.u32 %v5486_v32, %v4764_v33  ;;  %s121_s27 = sshll.u32 %s8324_s11, 4  ;;  %s122_s27 = int_to_ptr.hbm [resolvable:$true] %s121_s27 }
  0x2e   :  { %435 = vmatpush.bf16.msra.mxu1 %v4559_v6  ;;  %474 = vmatpush.bf16.msra.mxu2 %v4563_v7  ;;  %v4772_v43 = vld [vmem:[#allocation7 + $0xf8] sm:$0xf0]  ;;  %v4746_v44 = vld [vmem:[#allocation7 + $0xc0] sm:$0xf]  ;;  %v5484_v45 = vld [vmem:[#allocation7 + $0xcc] sm:$0xf0]  ;;  %v6366_v48 = vor.u32 %v5489_v40, %v4770_v39 }
  0x2f   :  { %513 = vmatpush.bf16.msra.mxu3 %v4567_v11  ;;  %v5482_v46 = vld [vmem:[#allocation7 + $0xc4] sm:$0xf]  ;;  %v4748_v47 = vld [vmem:[#allocation7 + $0xd0] sm:$0xf0]  ;;  %v6369_v49 = vor.u32 %v5487_v41, %v4772_v43  ;;  %v6371_v50 = vor.u32 %v5484_v45, %v4746_v44  ;;  %v4754_v51 = vld [vmem:[#allocation7 + $0xc8] sm:$0xf] }
  0x30   :  { %v5485_v52 = vld [vmem:[#allocation7 + $0xd4] sm:$0xf0]  ;;  %v6374_v53 = vor.u32 %v5482_v46, %v4748_v47  ;;  %v5483_v55 = vld [vmem:[#allocation7 + $0xcc] sm:$0xf]  ;;  %v4756_v56 = vld [vmem:[#allocation7 + $0xd8] sm:$0xf0] }
  0x31   :  { %397 = vmatpush.bf16.msra.mxu0 %v4539_v17  ;;  %v6377_v54 = vor.u32 %v5485_v52, %v4754_v51  ;;  %v4730_v57 = vld [vmem:[#allocation7 + $0xa0] sm:$0xf]  ;;  %v6381_v58 = vor.u32 %v5483_v55, %v4756_v56  ;;  %v5480_v59 = vld [vmem:[#allocation7 + $0xac] sm:$0xf0]  ;;  %v5478_v60 = vld [vmem:[#allocation7 + $0xa4] sm:$0xf] }
  0x32   :  { %436 = vmatpush.bf16.msra.mxu1 %v4543_v19  ;;  %475 = vmatpush.bf16.msra.mxu2 %v4547_v20  ;;  %v4732_v61 = vld [vmem:[#allocation7 + $0xb0] sm:$0xf0]  ;;  %v6384_v62 = vor.u32 %v5480_v59, %v4730_v57  ;;  %v4738_v0 = vld [vmem:[#allocation7 + $0xa8] sm:$0xf]  ;;  %v5481_v1 = vld [vmem:[#allocation7 + $0xb4] sm:$0xf0] }
  0x33   :  { %514 = vmatpush.bf16.msra.mxu3 %v4551_v24  ;;  %v6386_v63 = vor.u32 %v5478_v60, %v4732_v61  ;;  %v5479_v2 = vld [vmem:[#allocation7 + $0xac] sm:$0xf]  ;;  %v4740_v3 = vld [vmem:[#allocation7 + $0xb8] sm:$0xf0]  ;;  %v6389_v4 = vor.u32 %v5481_v1, %v4738_v0  ;;  %v4714_v7 = vld [vmem:[#allocation7 + $0x80] sm:$0xf] }
  0x34   :  { %v6393_v5 = vor.u32 %v5479_v2, %v4740_v3  ;;  %v5421_v6 = vld [vmem:[%s8494_s5 + $0x8] sm:$0xff]  ;;  %v5476_v8 = vld [vmem:[#allocation7 + $0x8c] sm:$0xf0]  ;;  %v4716_v11 = vld [vmem:[#allocation7 + $0x90] sm:$0xf0]  ;;  %s137_s20 = sshll.u32 %s6064_s9, 4  ;;  %s138_s20 = int_to_ptr.vmem [resolvable:$true] %s137_s20 }
  0x35   :  { %398 = vmatpush.bf16.msra.mxu0 %v4523_v31  ;;  %v5474_v9 = vld [vmem:[#allocation7 + $0x84] sm:$0xf]  ;;  %v6401_v10 = vor.u32 %v5476_v8, %v4714_v7  ;;  %v4722_v12 = vld [vmem:[#allocation7 + $0x88] sm:$0xf]  ;;  %v5477_v13 = vld [vmem:[#allocation7 + $0x94] sm:$0xf0] }
  0x36   :  { %437 = vmatpush.bf16.msra.mxu1 %v4527_v34  ;;  %476 = vmatpush.bf16.msra.mxu2 %v4531_v35  ;;  %v6403_v14 = vor.u32 %v5474_v9, %v4716_v11  ;;  %v6405_v15 = vor.u32 %v5477_v13, %v4722_v12  ;;  %v5475_v16 = vld [vmem:[#allocation7 + $0x8c] sm:$0xf]  ;;  %v4724_v17 = vld [vmem:[#allocation7 + $0x98] sm:$0xf0]  ;;  %v4698_v18 = vld [vmem:[#allocation7 + $0x60] sm:$0xf] }
  0x37   :  { %515 = vmatpush.bf16.msra.mxu3 %v4535_v37  ;;  %v6408_v19 = vor.u32 %v5475_v16, %v4724_v17  ;;  %v5472_v20 = vld [vmem:[#allocation7 + $0x6c] sm:$0xf0]  ;;  %v5470_v21 = vld [vmem:[#allocation7 + $0x64] sm:$0xf]  ;;  %v4700_v22 = vld [vmem:[#allocation7 + $0x70] sm:$0xf0] }
  0x38   :  { %399 = vmatmul.bf16.vlgmr.msra.gmra.mxu0 %v5420_v36  ;;  %v6412_v23 = vor.u32 %v5472_v20, %v4698_v18  ;;  %v6414_v24 = vor.u32 %v5470_v21, %v4700_v22  ;;  %v4706_v25 = vld [vmem:[#allocation7 + $0x68] sm:$0xf]  ;;  %v5473_v26 = vld [vmem:[#allocation7 + $0x74] sm:$0xf0]  ;;  %v5422_v28 = vld [vmem:[%s8494_s5 + $0x10] sm:$0xff] }
  0x39   :  { %807 = vmatpush.bf16.msrb.mxu0 %v6362_v38  ;;  %438 = vmatmul.bf16.vlgmr.msra.gmra.mxu1 %v5420_v36  ;;  %v6417_v27 = vor.u32 %v5473_v26, %v4706_v25  ;;  %v5471_v29 = vld [vmem:[#allocation7 + $0x6c] sm:$0xf]  ;;  %v4708_v30 = vld [vmem:[#allocation7 + $0x78] sm:$0xf0]  ;;  %v4682_v31 = vld [vmem:[#allocation7 + $0x40] sm:$0xf] }
  0x3a   :  { %820 = vmatpush.bf16.msrb.mxu1 %v6364_v42  ;;  %477 = vmatmul.bf16.vlgmr.msra.gmra.mxu2 %v5420_v36  ;;  %v6425_v32 = vor.u32 %v5471_v29, %v4708_v30  ;;  %v5468_v33 = vld [vmem:[#allocation7 + $0x4c] sm:$0xf0]  ;;  %v5466_v34 = vld [vmem:[#allocation7 + $0x44] sm:$0xf]  ;;  %v4684_v35 = vld [vmem:[#allocation7 + $0x50] sm:$0xf0] }
  0x3b   :  { %516 = vmatmul.bf16.vlgmr.msra.gmra.mxu3 %v5420_v36  ;;  %833 = vmatpush.bf16.msrb.mxu2 %v6366_v48  ;;  %v6427_v36 = vor.u32 %v5468_v33, %v4682_v31  ;;  %v6429_v37 = vor.u32 %v5466_v34, %v4684_v35  ;;  %v4690_v39 = vld [vmem:[#allocation7 + $0x48] sm:$0xf]  ;;  %v5469_v40 = vld [vmem:[#allocation7 + $0x54] sm:$0xf0]  ;;  %v5467_v44 = vld [vmem:[#allocation7 + $0x4c] sm:$0xf] }
  0x3c   :  { %846 = vmatpush.bf16.msrb.mxu3 %v6369_v49  ;;  %v6432_v41 = vor.u32 %v5469_v40, %v4690_v39  ;;  %v5423_v43 = vld [vmem:[%s8494_s5 + $0x18] sm:$0xff]  ;;  %v4666_v46 = vld [vmem:[#allocation7 + $0x20] sm:$0xf]  ;;  %v5464_v51 = vld [vmem:[#allocation7 + $0x2c] sm:$0xf0]  ;;  %v8333_v25 = vmov 0  }
  0x3d   :  { %808 = vmatpush.bf16.msrb.mxu0 %v6371_v50  ;;  %v4692_v45 = vld [vmem:[#allocation7 + $0x58] sm:$0xf0]  ;;  %v5462_v52 = vld [vmem:[#allocation7 + $0x24] sm:$0xf]  ;;  %v4668_v55 = vld [vmem:[#allocation7 + $0x30] sm:$0xf0]  ;;  %v6442_v56 = vor.u32 %v5464_v51, %v4666_v46 }
  0x3e   :  { %821 = vmatpush.bf16.msrb.mxu1 %v6374_v53  ;;  %v6440_v47 = vor.u32 %v5467_v44, %v4692_v45  ;;  %v6444_v57 = vor.u32 %v5462_v52, %v4668_v55  ;;  %v4674_v59 = vld [vmem:[#allocation7 + $0x28] sm:$0xf]  ;;  %v5465_v60 = vld [vmem:[#allocation7 + $0x34] sm:$0xf0]  ;;  %v5463_v61 = vld [vmem:[#allocation7 + $0x2c] sm:$0xf] }
  0x3f   :  { %834 = vmatpush.bf16.msrb.mxu2 %v6377_v54  ;;  %v6447_v0 = vor.u32 %v5465_v60, %v4674_v59  ;;  %v4676_v1 = vld [vmem:[#allocation7 + $0x38] sm:$0xf0]  ;;  %v4650_v2 = vld [vmem:[#allocation7] sm:$0xf]  ;;  %v5460_v3 = vld [vmem:[#allocation7 + $0xc] sm:$0xf0] }
  0x40   :  { %847 = vmatpush.bf16.msrb.mxu3 %v6381_v58  ;;  %8495 = vst [vmem:[#allocation25_spill] sm:$0xff] %v6444_v57  ;;  %v6453_v7 = vor.u32 %v5460_v3, %v4650_v2  ;;  %v5458_v8 = vld [vmem:[#allocation7 + $0x4] sm:$0xf]  ;;  %v4652_v9 = vld [vmem:[#allocation7 + $0x10] sm:$0xf0] }
  0x41   :  { %809 = vmatpush.bf16.msrb.mxu0 %v6384_v62  ;;  %8496 = vst [vmem:[#allocation26_spill] sm:$0xff] %v6447_v0  ;;  %v4658_v11 = vld [vmem:[#allocation7 + $0x8] sm:$0xf]  ;;  %v6456_v12 = vor.u32 %v5458_v8, %v4652_v9  ;;  %v5461_v13 = vld [vmem:[#allocation7 + $0x14] sm:$0xf0]  ;;  %v5424_v21 = vld [vmem:[%s8494_s5 + $0x20] sm:$0xff] }
  0x42   :  { %822 = vmatpush.bf16.msrb.mxu1 %v6386_v63  ;;  %8498 = vst [vmem:[#allocation28_spill] sm:$0xff] %v6453_v7  ;;  %v5459_v16 = vld [vmem:[#allocation7 + $0xc] sm:$0xf]  ;;  %v4660_v17 = vld [vmem:[#allocation7 + $0x18] sm:$0xf0]  ;;  %v6458_v18 = vor.u32 %v5461_v13, %v4658_v11 }
  0x43   :  { %835 = vmatpush.bf16.msrb.mxu2 %v6389_v4  ;;  %8499 = vst [vmem:[#allocation29_spill] sm:$0xff] %v6456_v12  ;;  %v6461_v20 = vor.u32 %v5459_v16, %v4660_v17  ;;  %v5425_v22 = vld [vmem:[%s8494_s5 + $0x28] sm:$0xff]  ;;  %v4890_v60 = vld [vmem:[#allocation9 + $0xe0] sm:$0xf]  ;;  %v4892_v3 = vld [vmem:[#allocation9 + $0xf0] sm:$0xf0] }
  0x44   :  { %848 = vmatpush.bf16.msrb.mxu3 %v6393_v5  ;;  %8500 = vst [vmem:[#allocation30_spill] sm:$0xff] %v6458_v18  ;;  %v4898_v8 = vld [vmem:[#allocation9 + $0xe8] sm:$0xf]  ;;  %v5521_v9 = vld [vmem:[#allocation9 + $0xf4] sm:$0xf0] }
  0x45   :  { %810 = vmatpush.bf16.msrb.mxu0 %v6401_v10  ;;  %8501 = vst [vmem:[#allocation31_spill] sm:$0xff] %v6461_v20  ;;  %v6519_v16 = vor.u32 %v5521_v9, %v4898_v8  ;;  %v5519_v17 = vld [vmem:[#allocation9 + $0xec] sm:$0xf]  ;;  %v4876_v9 = vld [vmem:[#allocation9 + $0xd0] sm:$0xf0] }
  0x46   :  { %823 = vmatpush.bf16.msrb.mxu1 %v6403_v14  ;;  %126 = dma.hbm_to_vmem [thread:$0]  %s122_s27, 4096, %s124_s30, [#allocation5 + $0x1] }
  0x47   :  { %836 = vmatpush.bf16.msrb.mxu2 %v6405_v15  ;;  %8519 = vst [vmem:[#allocation49_spill] sm:$0xff] %v6519_v16  ;;  %140 = dma.hbm_to_vmem [thread:$0]  %s136_s1, 4096, %s138_s20, [#allocation5 + $0x2] }
  0x48   :  { %404 = vmatmul.bf16.gmra.mxu0 %v5421_v6  ;;  %849 = vmatpush.bf16.msrb.mxu3 %v6408_v19 }
  0x49   :  { %443 = vmatmul.bf16.gmra.mxu1 %v5421_v6  ;;  %811 = vmatpush.bf16.msrb.mxu0 %v6412_v23 }
  0x4a   :  { %482 = vmatmul.bf16.gmra.mxu2 %v5421_v6  ;;  %824 = vmatpush.bf16.msrb.mxu1 %v6414_v24 }
  0x4b   :  { %521 = vmatmul.bf16.gmra.mxu3 %v5421_v6  ;;  %837 = vmatpush.bf16.msrb.mxu2 %v6417_v27  ;;  %v6451_v6 = vor.u32 %v5463_v61, %v4676_v1  ;;  %v5520_v61 = vld [vmem:[#allocation9 + $0xec] sm:$0xf0]  ;;  %v5518_v1 = vld [vmem:[#allocation9 + $0xe4] sm:$0xf] }
  0x4c   :  { %850 = vmatpush.bf16.msrb.mxu3 %v6425_v32  ;;  %v6513_v2 = vor.u32 %v5520_v61, %v4890_v60  ;;  %v6517_v13 = vor.u32 %v5518_v1, %v4892_v3  ;;  %v4874_v61 = vld [vmem:[#allocation9 + $0xc0] sm:$0xf]  ;;  %v5516_v1 = vld [vmem:[#allocation9 + $0xcc] sm:$0xf0]  ;;  %v5514_v3 = vld [vmem:[#allocation9 + $0xc4] sm:$0xf] }
  0x4d   :  { %812 = vmatpush.bf16.msrb.mxu0 %v6427_v36  ;;  %8497 = vst [vmem:[#allocation27_spill] sm:$0xff] %v6451_v6  ;;  %v6533_v8 = vor.u32 %v5516_v1, %v4874_v61  ;;  %v5512_v61 = vld [vmem:[#allocation9 + $0xac] sm:$0xf0]  ;;  %v5510_v1 = vld [vmem:[#allocation9 + $0xa4] sm:$0xf] }
  0x4e   :  { %825 = vmatpush.bf16.msrb.mxu1 %v6429_v37  ;;  %8516 = vst [vmem:[#allocation46_spill] sm:$0xff] %v6513_v2 }
  0x4f   :  { %838 = vmatpush.bf16.msrb.mxu2 %v6432_v41  ;;  %8518 = vst [vmem:[#allocation48_spill] sm:$0xff] %v6517_v13 }
  0x50   :  { %851 = vmatpush.bf16.msrb.mxu3 %v6440_v47  ;;  %8524 = vst [vmem:[#allocation54_spill] sm:$0xff] %v6533_v8 }
  0x51   :  { %813 = vmatpush.bf16.msrb.mxu0 %v6442_v56 }
  0x52   :  { %826 = vmatpush.bf16.msrb.mxu1 %v6444_v57 }
  0x53   :  { %839 = vmatpush.bf16.msrb.mxu2 %v6447_v0 }
  0x54   :  { %852 = vmatpush.bf16.msrb.mxu3 %v6451_v6 }
  0x55   :  { %814 = vmatpush.bf16.msrb.mxu0 %v6453_v7 }
  0x56   :  { %827 = vmatpush.bf16.msrb.mxu1 %v6456_v12 }
  0x57   :  { %840 = vmatpush.bf16.msrb.mxu2 %v6458_v18 }
  0x58   :  { %409 = vmatmul.bf16.gmra.mxu0 %v5422_v28  ;;  %853 = vmatpush.bf16.msrb.mxu3 %v6461_v20 }
  0x59   :  { %448 = vmatmul.bf16.gmra.mxu1 %v5422_v28  ;;  %1051 = vmatpush.bf16.msra.mxu0 %v6513_v2 }
  0x5a   :  { %487 = vmatmul.bf16.gmra.mxu2 %v5422_v28  ;;  %1064 = vmatpush.bf16.msra.mxu1 %v6517_v13 }
  0x5b   :  { %526 = vmatmul.bf16.gmra.mxu3 %v5422_v28  ;;  %1077 = vmatpush.bf16.msra.mxu2 %v6519_v16 }
  0x5d   :  { %1052 = vmatpush.bf16.msra.mxu0 %v6533_v8 }
  0x68   :  { %414 = vmatmul.bf16.gmra.mxu0 %v5423_v43 }
  0x69   :  { %453 = vmatmul.bf16.gmra.mxu1 %v5423_v43 }
  0x6a   :  { %492 = vmatmul.bf16.gmra.mxu2 %v5423_v43 }
  0x6b   :  { %531 = vmatmul.bf16.gmra.mxu3 %v5423_v43 }
  0x78   :  { %419 = vmatmul.bf16.gmra.mxu0 %v5424_v21 }
  0x79   :  { %458 = vmatmul.bf16.gmra.mxu1 %v5424_v21 }
  0x7a   :  { %497 = vmatmul.bf16.gmra.mxu2 %v5424_v21 }
  0x7b   :  { %536 = vmatmul.bf16.gmra.mxu3 %v5424_v21  ;;  %v4900_v21 = vld [vmem:[#allocation9 + $0xf8] sm:$0xf0] }
  0x88   :  { %424 = vmatmul.bf16.gmra.mxu0 %v5425_v22 }
  0x89   :  { %463 = vmatmul.bf16.gmra.mxu1 %v5425_v22 }
  0x8a   :  { %502 = vmatmul.bf16.gmra.mxu2 %v5425_v22 }
  0x8b   :  { %541 = vmatmul.bf16.gmra.mxu3 %v5425_v22 }
  0x98   :  { %815 = vmatmul.bf16.vlgmr.msrb.gmra.mxu0 %v8333_v25 }
  0x99   :  { %828 = vmatmul.bf16.vlgmr.msrb.gmra.mxu1 %v8333_v25 }
  0x9a   :  { %841 = vmatmul.bf16.vlgmr.msrb.gmra.mxu2 %v8333_v25 }
  0x9b   :  { %854 = vmatmul.bf16.vlgmr.msrb.gmra.mxu3 %v8333_v25 }
  0xb5   :  { %v6477_v26 = vpop.f32.mrf.mxu0 }
  0xb6   :  { %v6479_v28 = vpop.f32.mrf.mxu1 }
  0xbd   :  { %v6481_v29 = vpop.f32.mrf.mxu2  ;;  %v6485_v31 = vpop.f32.mrf.mxu0 }
  0xbe   :  { %v6483_v30 = vpop.f32.mrf.mxu3  ;;  %8502 = vst [vmem:[#allocation32_spill] sm:$0xff] %v6485_v31  ;;  %v6487_v33 = vpop.f32.mrf.mxu1  ;;  %v4836_v31 = vld [vmem:[#allocation9 + $0x78] sm:$0xf0] }
  0xbf   :  { %8503 = vst [vmem:[#allocation33_spill] sm:$0xff] %v6487_v33 }
  0xc5   :  { %v6489_v34 = vpop.f32.mrf.mxu2  ;;  %v6493_v39 = vpop.f32.mrf.mxu0 }
  0xc6   :  { %8504 = vst [vmem:[#allocation34_spill] sm:$0xff] %v6489_v34  ;;  %v6491_v35 = vpop.f32.mrf.mxu3  ;;  %v6495_v40 = vpop.f32.mrf.mxu1 }
  0xc7   :  { %8505 = vst [vmem:[#allocation35_spill] sm:$0xff] %v6491_v35  ;;  %v4826_v35 = vld [vmem:[#allocation9 + $0x60] sm:$0xf] }
  0xc8   :  { %8506 = vst [vmem:[#allocation36_spill] sm:$0xff] %v6493_v39 }
  0xc9   :  { %8507 = vst [vmem:[#allocation37_spill] sm:$0xff] %v6495_v40 }
  0xcd   :  { %v6497_v43 = vpop.f32.mrf.mxu2  ;;  %v6501_v45 = vpop.f32.mrf.mxu0 }
  0xce   :  { %8508 = vst [vmem:[#allocation38_spill] sm:$0xff] %v6497_v43  ;;  %v6499_v44 = vpop.f32.mrf.mxu3  ;;  %v6503_v46 = vpop.f32.mrf.mxu1 }
  0xcf   :  { %8509 = vst [vmem:[#allocation39_spill] sm:$0xff] %v6499_v44 }
  0xd0   :  { %8510 = vst [vmem:[#allocation40_spill] sm:$0xff] %v6501_v45  ;;  %v4868_v45 = vld [vmem:[#allocation9 + $0xb8] sm:$0xf0] }
  0xd1   :  { %8511 = vst [vmem:[#allocation41_spill] sm:$0xff] %v6503_v46 }
  0xd5   :  { %v6505_v51 = vpop.f32.mrf.mxu2  ;;  %v6509_v55 = vpop.f32.mrf.mxu0 }
  0xd6   :  { %8512 = vst [vmem:[#allocation42_spill] sm:$0xff] %v6505_v51  ;;  %v6507_v52 = vpop.f32.mrf.mxu3  ;;  %v6511_v59 = vpop.f32.mrf.mxu1 }
  0xd7   :  { %8513 = vst [vmem:[#allocation43_spill] sm:$0xff] %v6507_v52  ;;  %v4858_v52 = vld [vmem:[#allocation9 + $0xa0] sm:$0xf] }
  0xd8   :  { %8514 = vst [vmem:[#allocation44_spill] sm:$0xff] %v6509_v55  ;;  %v6545_v51 = vor.u32 %v5512_v61, %v4858_v52  ;;  %v4842_v61 = vld [vmem:[#allocation9 + $0x80] sm:$0xf] }
  0xd9   :  { %8515 = vst [vmem:[#allocation45_spill] sm:$0xff] %v6511_v59  ;;  %v6526_v59 = vor.u32 %v5519_v17, %v4900_v21  ;;  %v5515_v21 = vld [vmem:[#allocation9 + $0xcc] sm:$0xf] }
  0xda   :  { %8528 = vst [vmem:[#allocation58_spill] sm:$0xff] %v6545_v51  ;;  %1053 = vmatpush.bf16.msra.mxu0 %v6545_v51 }
  0xdb   :  { %8522 = vst [vmem:[#allocation52_spill] sm:$0xff] %v6526_v59  ;;  %1090 = vmatpush.bf16.msra.mxu3 %v6526_v59 }
  0xdd   :  { %v6515_v11 = vpop.f32.mrf.mxu2  ;;  %v6523_v25 = vpop.f32.mrf.mxu0 }
  0xde   :  { %8517 = vst [vmem:[#allocation47_spill] sm:$0xff] %v6515_v11  ;;  %v6521_v22 = vpop.f32.mrf.mxu3  ;;  %v6528_v60 = vpop.f32.mrf.mxu1  ;;  %v6535_v11 = vor.u32 %v5514_v3, %v4876_v9  ;;  %v4860_v3 = vld [vmem:[#allocation9 + $0xb0] sm:$0xf0] }
  0xdf   :  { %8520 = vst [vmem:[#allocation50_spill] sm:$0xff] %v6521_v22  ;;  %v4882_v22 = vld [vmem:[#allocation9 + $0xc8] sm:$0xf]  ;;  %v6549_v46 = vor.u32 %v5510_v1, %v4860_v3  ;;  %v5508_v1 = vld [vmem:[#allocation9 + $0x8c] sm:$0xf0] }
  0xe0   :  { %8521 = vst [vmem:[#allocation51_spill] sm:$0xff] %v6523_v25  ;;  %v5517_v25 = vld [vmem:[#allocation9 + $0xd4] sm:$0xf0]  ;;  %1065 = vmatpush.bf16.msra.mxu1 %v6535_v11  ;;  %v5506_v3 = vld [vmem:[#allocation9 + $0x84] sm:$0xf] }
  0xe1   :  { %8523 = vst [vmem:[#allocation53_spill] sm:$0xff] %v6528_v60  ;;  %v6537_v17 = vor.u32 %v5517_v25, %v4882_v22  ;;  %v4884_v60 = vld [vmem:[#allocation9 + $0xd8] sm:$0xf0]  ;;  %v4866_v25 = vld [vmem:[#allocation9 + $0xa8] sm:$0xf] }
  0xe2   :  { %8525 = vst [vmem:[#allocation55_spill] sm:$0xff] %v6535_v11  ;;  %v6540_v55 = vor.u32 %v5515_v21, %v4884_v60  ;;  %v5513_v22 = vld [vmem:[#allocation9 + $0xb4] sm:$0xf0]  ;;  %v5511_v21 = vld [vmem:[#allocation9 + $0xac] sm:$0xf] }
  0xe3   :  { %8526 = vst [vmem:[#allocation56_spill] sm:$0xff] %v6537_v17  ;;  %1078 = vmatpush.bf16.msra.mxu2 %v6537_v17  ;;  %v6551_v60 = vor.u32 %v5513_v22, %v4866_v25  ;;  %v6558_v40 = vor.u32 %v5511_v21, %v4868_v45  ;;  %v6565_v25 = vor.u32 %v5508_v1, %v4842_v61  ;;  %v4844_v22 = vld [vmem:[#allocation9 + $0x90] sm:$0xf0]  ;;  %v5507_v21 = vld [vmem:[#allocation9 + $0x8c] sm:$0xf] }
  0xe4   :  { %8527 = vst [vmem:[#allocation57_spill] sm:$0xff] %v6540_v55  ;;  %1091 = vmatpush.bf16.msra.mxu3 %v6540_v55  ;;  %1066 = vmatpush.bf16.msra.mxu1 %v6549_v46  ;;  %v5504_v61 = vld [vmem:[#allocation9 + $0x6c] sm:$0xf0]  ;;  %v5502_v1 = vld [vmem:[#allocation9 + $0x64] sm:$0xf] }
  0xe5   :  { %v6547_v9 = vpop.f32.mrf.mxu2  ;;  %8530 = vst [vmem:[#allocation60_spill] sm:$0xff] %v6549_v46  ;;  %v6555_v43 = vpop.f32.mrf.mxu0  ;;  %1054 = vmatpush.bf16.msra.mxu0 %v6565_v25  ;;  %v6577_v34 = vor.u32 %v5504_v61, %v4826_v35  ;;  %v4810_v61 = vld [vmem:[#allocation9 + $0x40] sm:$0xf] }
  0xe6   :  { %8529 = vst [vmem:[#allocation59_spill] sm:$0xff] %v6547_v9  ;;  %v6553_v44 = vpop.f32.mrf.mxu3  ;;  %v6560_v52 = vpop.f32.mrf.mxu1  ;;  %v6567_v9 = vor.u32 %v5506_v3, %v4844_v22  ;;  %v4828_v3 = vld [vmem:[#allocation9 + $0x70] sm:$0xf0] }
  0xe7   :  { %8531 = vst [vmem:[#allocation61_spill] sm:$0xff] %v6551_v60  ;;  %1079 = vmatpush.bf16.msra.mxu2 %v6551_v60  ;;  %v6581_v33 = vor.u32 %v5502_v1, %v4828_v3  ;;  %v5500_v1 = vld [vmem:[#allocation9 + $0x4c] sm:$0xf0]  ;;  %v5498_v3 = vld [vmem:[#allocation9 + $0x44] sm:$0xf] }
  0xe8   :  { %8532 = vst [vmem:[#allocation62_spill] sm:$0xff] %v6553_v44  ;;  %1092 = vmatpush.bf16.msra.mxu3 %v6558_v40  ;;  %v4850_v44 = vld [vmem:[#allocation9 + $0x88] sm:$0xf]  ;;  %1067 = vmatpush.bf16.msra.mxu1 %v6567_v9 }
  0xe9   :  { %8533 = vst [vmem:[#allocation63_spill] sm:$0xff] %v6555_v43  ;;  %v5509_v43 = vld [vmem:[#allocation9 + $0x94] sm:$0xf0]  ;;  %1055 = vmatpush.bf16.msra.mxu0 %v6577_v34 }
  0xea   :  { %8534 = vst [vmem:[#allocation64_spill] sm:$0xff] %v6558_v40  ;;  %v6569_v45 = vor.u32 %v5509_v43, %v4850_v44  ;;  %v4834_v43 = vld [vmem:[#allocation9 + $0x68] sm:$0xf]  ;;  %v5505_v44 = vld [vmem:[#allocation9 + $0x74] sm:$0xf0] }
  0xeb   :  { %8535 = vst [vmem:[#allocation65_spill] sm:$0xff] %v6560_v52  ;;  %v4852_v52 = vld [vmem:[#allocation9 + $0x98] sm:$0xf0]  ;;  %v5020_v40 = vld [vmem:[#allocation11 + $0xf0] sm:$0xf0] }
  0xec   :  { %8536 = vst [vmem:[#allocation66_spill] sm:$0xff] %v6565_v25  ;;  %v6572_v39 = vor.u32 %v5507_v21, %v4852_v52  ;;  %1080 = vmatpush.bf16.msra.mxu2 %v6569_v45  ;;  %v6583_v52 = vor.u32 %v5505_v44, %v4834_v43  ;;  %v5503_v21 = vld [vmem:[#allocation9 + $0x6c] sm:$0xf]  ;;  %1068 = vmatpush.bf16.msra.mxu1 %v6581_v33  ;;  %v4812_v44 = vld [vmem:[#allocation9 + $0x50] sm:$0xf0] }
  0xed   :  { %8537 = vst [vmem:[#allocation67_spill] sm:$0xff] %v6567_v9  ;;  %v6579_v22 = vpop.f32.mrf.mxu2  ;;  %v6597_v43 = vor.u32 %v5500_v1, %v4810_v61  ;;  %v5496_v61 = vld [vmem:[#allocation9 + $0x2c] sm:$0xf0]  ;;  %v5494_v1 = vld [vmem:[#allocation9 + $0x24] sm:$0xf] }
  0xee   :  { %8538 = vst [vmem:[#allocation68_spill] sm:$0xff] %v6569_v45  ;;  %1093 = vmatpush.bf16.msra.mxu3 %v6572_v39  ;;  %v6585_v9 = vpop.f32.mrf.mxu3  ;;  %v6587_v45 = vpop.f32.mrf.mxu0  ;;  %v5550_v25 = vld [vmem:[#allocation11 + $0xe4] sm:$0xf] }
  0xef   :  { %8539 = vst [vmem:[#allocation69_spill] sm:$0xff] %v6572_v39  ;;  %v6590_v39 = vor.u32 %v5503_v21, %v4836_v31  ;;  %v6592_v35 = vpop.f32.mrf.mxu1  ;;  %v5499_v21 = vld [vmem:[#allocation9 + $0x4c] sm:$0xf]  ;;  %1056 = vmatpush.bf16.msra.mxu0 %v6597_v43 }
  0xf0   :  { %8540 = vst [vmem:[#allocation70_spill] sm:$0xff] %v6577_v34  ;;  %1081 = vmatpush.bf16.msra.mxu2 %v6583_v52 }
  0xf1   :  { %8541 = vst [vmem:[#allocation71_spill] sm:$0xff] %v6579_v22  ;;  %v6599_v22 = vor.u32 %v5498_v3, %v4812_v44  ;;  %v4796_v3 = vld [vmem:[#allocation9 + $0x30] sm:$0xf0] }
  0xf2   :  { %8542 = vst [vmem:[#allocation72_spill] sm:$0xff] %v6581_v33  ;;  %1094 = vmatpush.bf16.msra.mxu3 %v6590_v39  ;;  %v6613_v34 = vor.u32 %v5494_v1, %v4796_v3  ;;  %v5492_v1 = vld [vmem:[#allocation9 + $0xc] sm:$0xf0]  ;;  %v5490_v3 = vld [vmem:[#allocation9 + $0x4] sm:$0xf] }
  0xf3   :  { %8543 = vst [vmem:[#allocation73_spill] sm:$0xff] %v6583_v52  ;;  %1069 = vmatpush.bf16.msra.mxu1 %v6599_v22 }
  0xf4   :  { %8544 = vst [vmem:[#allocation74_spill] sm:$0xff] %v6585_v9  ;;  %v4818_v9 = vld [vmem:[#allocation9 + $0x48] sm:$0xf] }
  0xf5   :  { %8545 = vst [vmem:[#allocation75_spill] sm:$0xff] %v6587_v45  ;;  %v5501_v45 = vld [vmem:[#allocation9 + $0x54] sm:$0xf0]  ;;  %v6611_v44 = vpop.f32.mrf.mxu2 }
  0xf6   :  { %8546 = vst [vmem:[#allocation76_spill] sm:$0xff] %v6590_v39  ;;  %v6601_v31 = vor.u32 %v5501_v45, %v4818_v9  ;;  %v4794_v39 = vld [vmem:[#allocation9 + $0x20] sm:$0xf]  ;;  %v4802_v9 = vld [vmem:[#allocation9 + $0x28] sm:$0xf] }
  0xf7   :  { %8547 = vst [vmem:[#allocation77_spill] sm:$0xff] %v6592_v35  ;;  %v4820_v35 = vld [vmem:[#allocation9 + $0x58] sm:$0xf0]  ;;  %v6609_v52 = vor.u32 %v5496_v61, %v4794_v39  ;;  %v5497_v45 = vld [vmem:[#allocation9 + $0x34] sm:$0xf0]  ;;  %v6624_v39 = vpop.f32.mrf.mxu1  ;;  %1070 = vmatpush.bf16.msra.mxu1 %v6613_v34 }
  0xf8   :  { %8548 = vst [vmem:[#allocation78_spill] sm:$0xff] %v6597_v43  ;;  %v6604_v33 = vor.u32 %v5499_v21, %v4820_v35  ;;  %1082 = vmatpush.bf16.msra.mxu2 %v6601_v31  ;;  %v6615_v35 = vor.u32 %v5497_v45, %v4802_v9  ;;  %v5495_v21 = vld [vmem:[#allocation9 + $0x2c] sm:$0xf]  ;;  %v6617_v43 = vpop.f32.mrf.mxu3  ;;  %v4778_v61 = vld [vmem:[#allocation9] sm:$0xf] }
  0xf9   :  { %8549 = vst [vmem:[#allocation79_spill] sm:$0xff] %v6599_v22  ;;  %v4804_v22 = vld [vmem:[#allocation9 + $0x38] sm:$0xf0]  ;;  %1057 = vmatpush.bf16.msra.mxu0 %v6609_v52  ;;  %v6629_v9 = vor.u32 %v5492_v1, %v4778_v61  ;;  %v4780_v45 = vld [vmem:[#allocation9 + $0x10] sm:$0xf0]  ;;  %v6642_v1 = vor.u32 %v5550_v25, %v5020_v40 }
  0xfa   :  { %8550 = vst [vmem:[#allocation80_spill] sm:$0xff] %v6601_v31  ;;  %1095 = vmatpush.bf16.msra.mxu3 %v6604_v33  ;;  %v6619_v31 = vpop.f32.mrf.mxu0  ;;  %v5546_v25 = vld [vmem:[#allocation11 + $0xc4] sm:$0xf] }
  0xfb   :  { %8551 = vst [vmem:[#allocation81_spill] sm:$0xff] %v6604_v33  ;;  %v6622_v33 = vor.u32 %v5495_v21, %v4804_v22  ;;  %v5491_v21 = vld [vmem:[#allocation9 + $0xc] sm:$0xf] }
  0xfc   :  { %8552 = vst [vmem:[#allocation82_spill] sm:$0xff] %v6609_v52  ;;  %1083 = vmatpush.bf16.msra.mxu2 %v6615_v35  ;;  %v5018_v52 = vld [vmem:[#allocation11 + $0xe0] sm:$0xf] }
  0xfd   :  { %8553 = vst [vmem:[#allocation83_spill] sm:$0xff] %v6611_v44  ;;  %v6631_v44 = vor.u32 %v5490_v3, %v4780_v45  ;;  %1058 = vmatpush.bf16.msra.mxu0 %v6629_v9  ;;  %v5551_v3 = vld [vmem:[#allocation11 + $0xec] sm:$0xf] }
  0xfe   :  { %8554 = vst [vmem:[#allocation84_spill] sm:$0xff] %v6613_v34  ;;  %1096 = vmatpush.bf16.msra.mxu3 %v6622_v33  ;;  %v5552_v34 = vld [vmem:[#allocation11 + $0xec] sm:$0xf0] }
  0xff   :  { %8555 = vst [vmem:[#allocation85_spill] sm:$0xff] %v6615_v35  ;;  %1071 = vmatpush.bf16.msra.mxu1 %v6631_v44  ;;  %v6640_v61 = vor.u32 %v5552_v34, %v5018_v52  ;;  %v5004_v52 = vld [vmem:[#allocation11 + $0xd0] sm:$0xf0]  ;;  %v6662_v60 = vpop.f32.mrf.mxu1 }
 0x100   :  { %8556 = vst [vmem:[#allocation86_spill] sm:$0xff] %v6617_v43  ;;  %v4786_v43 = vld [vmem:[#allocation9 + $0x8] sm:$0xf] }
 0x101   :  { %8557 = vst [vmem:[#allocation87_spill] sm:$0xff] %v6619_v31  ;;  %v5493_v31 = vld [vmem:[#allocation9 + $0x14] sm:$0xf0]  ;;  %1263 = vmatpush.bf16.msrb.mxu0 %v6640_v61 }
 0x102   :  { %8558 = vst [vmem:[#allocation88_spill] sm:$0xff] %v6622_v33  ;;  %v6633_v22 = vor.u32 %v5493_v31, %v4786_v43  ;;  %v5026_v43 = vld [vmem:[#allocation11 + $0xe8] sm:$0xf]  ;;  %v5553_v31 = vld [vmem:[#allocation11 + $0xf4] sm:$0xf0]  ;;  %v6647_v33 = vpop.f32.mrf.mxu2 }
 0x103   :  { %8559 = vst [vmem:[#allocation89_spill] sm:$0xff] %v6624_v39  ;;  %v4788_v39 = vld [vmem:[#allocation9 + $0x18] sm:$0xf0]  ;;  %v6645_v45 = vor.u32 %v5553_v31, %v5026_v43  ;;  %1276 = vmatpush.bf16.msrb.mxu1 %v6642_v1  ;;  %v6657_v43 = vpop.f32.mrf.mxu0  ;;  %v6660_v31 = vor.u32 %v5546_v25, %v5004_v52  ;;  %v4988_v52 = vld [vmem:[#allocation11 + $0xb0] sm:$0xf0] }
 0x104   :  { %8560 = vst [vmem:[#allocation90_spill] sm:$0xff] %v6629_v9  ;;  %v6636_v35 = vor.u32 %v5491_v21, %v4788_v39  ;;  %1084 = vmatpush.bf16.msra.mxu2 %v6633_v22  ;;  %v5028_v39 = vld [vmem:[#allocation11 + $0xf8] sm:$0xf0]  ;;  %v5002_v21 = vld [vmem:[#allocation11 + $0xc0] sm:$0xf] }
 0x105   :  { %8561 = vst [vmem:[#allocation91_spill] sm:$0xff] %v6631_v44  ;;  %v5548_v9 = vld [vmem:[#allocation11 + $0xcc] sm:$0xf0]  ;;  %v6651_v34 = vor.u32 %v5551_v3, %v5028_v39  ;;  %v6655_v44 = vpop.f32.mrf.mxu3  ;;  %v4986_v39 = vld [vmem:[#allocation11 + $0xa0] sm:$0xf] }
 0x106   :  { %8562 = vst [vmem:[#allocation92_spill] sm:$0xff] %v6633_v22  ;;  %1097 = vmatpush.bf16.msra.mxu3 %v6636_v35  ;;  %v6653_v40 = vor.u32 %v5548_v9, %v5002_v21  ;;  %v5010_v22 = vld [vmem:[#allocation11 + $0xc8] sm:$0xf]  ;;  %v5544_v21 = vld [vmem:[#allocation11 + $0xac] sm:$0xf0] }
 0x107   :  { %8563 = vst [vmem:[#allocation93_spill] sm:$0xff] %v6636_v35  ;;  %v5547_v35 = vld [vmem:[#allocation11 + $0xcc] sm:$0xf]  ;;  %1277 = vmatpush.bf16.msrb.mxu1 %v6660_v31  ;;  %v6671_v25 = vor.u32 %v5544_v21, %v4986_v39 }
 0x108   :  { %8564 = vst [vmem:[#allocation94_spill] sm:$0xff] %v6640_v61  ;;  %1289 = vmatpush.bf16.msrb.mxu2 %v6645_v45  ;;  %v5012_v61 = vld [vmem:[#allocation11 + $0xd8] sm:$0xf0]  ;;  %1264 = vmatpush.bf16.msrb.mxu0 %v6653_v40 }
 0x109   :  { %8565 = vst [vmem:[#allocation95_spill] sm:$0xff] %v6642_v1  ;;  %v6667_v3 = vor.u32 %v5547_v35, %v5012_v61  ;;  %v5543_v35 = vld [vmem:[#allocation11 + $0xac] sm:$0xf]  ;;  %v5534_v1 = vld [vmem:[#allocation11 + $0x64] sm:$0xf] }
 0x10a   :  { %8566 = vst [vmem:[#allocation96_spill] sm:$0xff] %v6645_v45  ;;  %1302 = vmatpush.bf16.msrb.mxu3 %v6651_v34  ;;  %v5545_v45 = vld [vmem:[#allocation11 + $0xb4] sm:$0xf0]  ;;  %v6681_v39 = vpop.f32.mrf.mxu2 }
 0x10b   :  { %8567 = vst [vmem:[#allocation97_spill] sm:$0xff] %v6647_v33  ;;  %v5549_v33 = vld [vmem:[#allocation11 + $0xd4] sm:$0xf0] }
 0x10c   :  { %8568 = vst [vmem:[#allocation98_spill] sm:$0xff] %v6651_v34  ;;  %v6665_v9 = vor.u32 %v5549_v33, %v5010_v22  ;;  %v4996_v22 = vld [vmem:[#allocation11 + $0xb8] sm:$0xf0]  ;;  %v5540_v34 = vld [vmem:[#allocation11 + $0x8c] sm:$0xf0]  ;;  %1265 = vmatpush.bf16.msrb.mxu0 %v6671_v25 }
 0x10d   :  { %8569 = vst [vmem:[#allocation99_spill] sm:$0xff] %v6653_v40  ;;  %v6679_v61 = vor.u32 %v5543_v35, %v4996_v22  ;;  %v4970_v40 = vld [vmem:[#allocation11 + $0x80] sm:$0xf] }
 0x10e   :  { %8570 = vst [vmem:[#allocation100_spill] sm:$0xff] %v6655_v44  ;;  %v5542_v44 = vld [vmem:[#allocation11 + $0xa4] sm:$0xf]  ;;  %1290 = vmatpush.bf16.msrb.mxu2 %v6665_v9  ;;  %1303 = vmatpush.bf16.msrb.mxu3 %v6667_v3  ;;  %v6685_v21 = vor.u32 %v5540_v34, %v4970_v40  ;;  %v4954_v40 = vld [vmem:[#allocation11 + $0x60] sm:$0xf] }
 0x10f   :  { %8571 = vst [vmem:[#allocation101_spill] sm:$0xff] %v6657_v43  ;;  %v4994_v43 = vld [vmem:[#allocation11 + $0xa8] sm:$0xf] }
 0x110   :  { %8572 = vst [vmem:[#allocation102_spill] sm:$0xff] %v6660_v31  ;;  %v6676_v33 = vor.u32 %v5545_v45, %v4994_v43  ;;  %v5538_v31 = vld [vmem:[#allocation11 + $0x84] sm:$0xf]  ;;  %v4978_v45 = vld [vmem:[#allocation11 + $0x88] sm:$0xf]  ;;  %1266 = vmatpush.bf16.msrb.mxu0 %v6685_v21 }
 0x111   :  { %8573 = vst [vmem:[#allocation103_spill] sm:$0xff] %v6662_v60  ;;  %v6674_v60 = vor.u32 %v5542_v44, %v4988_v52  ;;  %v4972_v44 = vld [vmem:[#allocation11 + $0x90] sm:$0xf0]  ;;  %v5541_v43 = vld [vmem:[#allocation11 + $0x94] sm:$0xf0]  ;;  %v6687_v52 = vpop.f32.mrf.mxu3 }
 0x112   :  { %8574 = vst [vmem:[#allocation104_spill] sm:$0xff] %v6665_v9  ;;  %v6689_v9 = vpop.f32.mrf.mxu0  ;;  %1291 = vmatpush.bf16.msrb.mxu2 %v6676_v33  ;;  %v6692_v35 = vor.u32 %v5538_v31, %v4972_v44  ;;  %v6694_v22 = vor.u32 %v5541_v43, %v4978_v45  ;;  %1304 = vmatpush.bf16.msrb.mxu3 %v6679_v61  ;;  %v4956_v31 = vld [vmem:[#allocation11 + $0x70] sm:$0xf0]  ;;  %v4962_v44 = vld [vmem:[#allocation11 + $0x68] sm:$0xf] }
 0x113   :  { %8575 = vst [vmem:[#allocation105_spill] sm:$0xff] %v6667_v3  ;;  %1278 = vmatpush.bf16.msrb.mxu1 %v6674_v60  ;;  %v4980_v3 = vld [vmem:[#allocation11 + $0x98] sm:$0xf0]  ;;  %v5537_v45 = vld [vmem:[#allocation11 + $0x74] sm:$0xf0]  ;;  %v6706_v43 = vor.u32 %v5534_v1, %v4956_v31 }
 0x114   :  { %8576 = vst [vmem:[#allocation106_spill] sm:$0xff] %v6671_v25  ;;  %v6696_v25 = vpop.f32.mrf.mxu1  ;;  %v4940_v31 = vld [vmem:[#allocation11 + $0x50] sm:$0xf0] }
 0x115   :  { %8577 = vst [vmem:[#allocation107_spill] sm:$0xff] %v6674_v60  ;;  %v5536_v60 = vld [vmem:[#allocation11 + $0x6c] sm:$0xf0] }
 0x116   :  { %8578 = vst [vmem:[#allocation108_spill] sm:$0xff] %v6676_v33  ;;  %1292 = vmatpush.bf16.msrb.mxu2 %v6694_v22 }
 0x117   :  { %8579 = vst [vmem:[#allocation109_spill] sm:$0xff] %v6679_v61  ;;  %1279 = vmatpush.bf16.msrb.mxu1 %v6692_v35  ;;  %v6718_v61 = vpop.f32.mrf.mxu2 }
 0x118   :  { %8580 = vst [vmem:[#allocation110_spill] sm:$0xff] %v6681_v39  ;;  %v5539_v39 = vld [vmem:[#allocation11 + $0x8c] sm:$0xf] }
 0x119   :  { %8581 = vst [vmem:[#allocation111_spill] sm:$0xff] %v6685_v21  ;;  %v6699_v34 = vor.u32 %v5539_v39, %v4980_v3  ;;  %v5535_v3 = vld [vmem:[#allocation11 + $0x6c] sm:$0xf]  ;;  %v4964_v39 = vld [vmem:[#allocation11 + $0x78] sm:$0xf0] }
 0x11a   :  { %8582 = vst [vmem:[#allocation112_spill] sm:$0xff] %v6687_v52  ;;  %v6713_v52 = vld [vmem:[%s8316_s3] sm:$0xf]  ;;  %v5530_v21 = vld [vmem:[#allocation11 + $0x44] sm:$0xf]  ;;  %v6726_v33 = vpop.f32.mrf.mxu0 }
 0x11b   :  { %8583 = vst [vmem:[#allocation113_spill] sm:$0xff] %v6689_v9  ;;  %v6703_v9 = vor.u32 %v5536_v60, %v4954_v40  ;;  %1305 = vmatpush.bf16.msrb.mxu3 %v6699_v34  ;;  %v6716_v60 = vor.u32 %v5535_v3, %v4964_v39  ;;  %v4938_v40 = vld [vmem:[#allocation11 + $0x40] sm:$0xf]  ;;  %1280 = vmatpush.bf16.msrb.mxu1 %v6706_v43 }
 0x11c   :  { %8584 = vst [vmem:[#allocation114_spill] sm:$0xff] %v6692_v35  ;;  %v5532_v35 = vld [vmem:[#allocation11 + $0x4c] sm:$0xf0]  ;;  %v6729_v3 = vor.u32 %v5530_v21, %v4940_v31  ;;  %v4924_v31 = vld [vmem:[#allocation11 + $0x30] sm:$0xf0] }
 0x11d   :  { %8585 = vst [vmem:[#allocation115_spill] sm:$0xff] %v6694_v22  ;;  %1267 = vmatpush.bf16.msrb.mxu0 %v6703_v9  ;;  %v6722_v1 = vor.u32 %v5532_v35, %v4938_v40  ;;  %v6724_v22 = vpop.f32.mrf.mxu3  ;;  %v6736_v35 = vpop.f32.mrf.mxu1 }
 0x11e   :  { %8586 = vst [vmem:[#allocation116_spill] sm:$0xff] %v6696_v25  ;;  %v6708_v25 = vor.u32 %v5537_v45, %v4962_v44  ;;  %v4946_v44 = vld [vmem:[#allocation11 + $0x48] sm:$0xf]  ;;  %v5533_v45 = vld [vmem:[#allocation11 + $0x54] sm:$0xf0] }
 0x11f   :  { %8587 = vst [vmem:[#allocation117_spill] sm:$0xff] %v6699_v34  ;;  %v6731_v39 = vor.u32 %v5533_v45, %v4946_v44  ;;  %v4948_v34 = vld [vmem:[#allocation11 + $0x58] sm:$0xf0]  ;;  %1306 = vmatpush.bf16.msrb.mxu3 %v6716_v60  ;;  %1281 = vmatpush.bf16.msrb.mxu1 %v6729_v3  ;;  %v4930_v44 = vld [vmem:[#allocation11 + $0x28] sm:$0xf]  ;;  %v6758_v51 = vpop.f32.mrf.mxu2 }
 0x120   :  { %8588 = vst [vmem:[#allocation118_spill] sm:$0xff] %v6703_v9  ;;  %1293 = vmatpush.bf16.msrb.mxu2 %v6708_v25  ;;  %v6734_v9 = vperm.slane %v6713_v52, 0  ;;  %v5529_v45 = vld [vmem:[#allocation11 + $0x34] sm:$0xf0] }
 0x121   :  { %8589 = vst [vmem:[#allocation119_spill] sm:$0xff] %v6706_v43  ;;  %v5528_v43 = vld [vmem:[#allocation11 + $0x2c] sm:$0xf0]  ;;  %1268 = vmatpush.bf16.msrb.mxu0 %v6722_v1 }
 0x122   :  { %8590 = vst [vmem:[#allocation120_spill] sm:$0xff] %v6708_v25  ;;  %v6746_v25 = vperm.slane %v6713_v52, 1  ;;  %v401_v46 = vadd.f32 %v6477_v26, %v6734_v9 }
 0x123   :  { %8591 = vst [vmem:[#allocation121_spill] sm:$0xff] %v6716_v60  ;;  %v4932_v60 = vld [vmem:[#allocation11 + $0x38] sm:$0xf0] }
 0x124   :  { %8592 = vst [vmem:[#allocation122_spill] sm:$0xff] %v6718_v61  ;;  %v5531_v61 = vld [vmem:[#allocation11 + $0x4c] sm:$0xf]  ;;  %1294 = vmatpush.bf16.msrb.mxu2 %v6731_v39 }
 0x125   :  { %8593 = vst [vmem:[#allocation123_spill] sm:$0xff] %v6722_v1  ;;  %v6739_v40 = vor.u32 %v5531_v61, %v4948_v34  ;;  %v6751_v61 = vor.u32 %v5529_v45, %v4930_v44  ;;  %v5527_v34 = vld [vmem:[#allocation11 + $0x2c] sm:$0xf]  ;;  %v4914_v44 = vld [vmem:[#allocation11 + $0x8] sm:$0xf] }
 0x126   :  { %8594 = vst [vmem:[#allocation124_spill] sm:$0xff] %v6724_v22  ;;  %v4922_v22 = vld [vmem:[#allocation11 + $0x20] sm:$0xf]  ;;  %v6754_v1 = vor.u32 %v5527_v34, %v4932_v60  ;;  %v5525_v45 = vld [vmem:[#allocation11 + $0x14] sm:$0xf0]  ;;  %v440_v60 = vadd.f32 %v6479_v28, %v6746_v25  ;;  %v6766_v34 = vpop.f32.mrf.mxu3 }
 0x127   :  { %8595 = vst [vmem:[#allocation125_spill] sm:$0xff] %v6726_v33  ;;  %v5526_v33 = vld [vmem:[#allocation11 + $0x24] sm:$0xf]  ;;  %v6743_v21 = vor.u32 %v5528_v43, %v4922_v22  ;;  %1307 = vmatpush.bf16.msrb.mxu3 %v6739_v40  ;;  %v4906_v22 = vld [vmem:[#allocation11] sm:$0xf] }
 0x128   :  { %8596 = vst [vmem:[#allocation126_spill] sm:$0xff] %v6729_v3  ;;  %v5524_v43 = vld [vmem:[#allocation11 + $0xc] sm:$0xf0]  ;;  %v5522_v3 = vld [vmem:[#allocation11 + $0x4] sm:$0xf]  ;;  %1295 = vmatpush.bf16.msrb.mxu2 %v6751_v61 }
 0x129   :  { %8597 = vst [vmem:[#allocation127_spill] sm:$0xff] %v6731_v39  ;;  %1269 = vmatpush.bf16.msrb.mxu0 %v6743_v21  ;;  %v6777_v39 = vperm.slane %v6713_v52, 2 }
 0x12a   :  { %8598 = vst [vmem:[#allocation128_spill] sm:$0xff] %v6734_v9  ;;  %v5523_v9 = vld [vmem:[#allocation11 + $0xc] sm:$0xf] }
 0x12b   :  { %8599 = vst [vmem:[#allocation129_spill] sm:$0xff] %v6736_v35  ;;  %v6749_v35 = vor.u32 %v5526_v33, %v4924_v31  ;;  %v6762_v33 = vor.u32 %v5524_v43, %v4906_v22  ;;  %v4908_v31 = vld [vmem:[#allocation11 + $0x10] sm:$0xf0]  ;;  %v829_v22 = vpop.f32.mrf.mxu1  ;;  %1308 = vmatpush.bf16.msrb.mxu3 %v6754_v1 }
 0x12c   :  { %8600 = vst [vmem:[#allocation130_spill] sm:$0xff] %v6739_v40  ;;  %v816_v40 = vpop.f32.mrf.mxu0  ;;  %v6769_v26 = vor.u32 %v5522_v3, %v4908_v31  ;;  %v860_v28 = vadd.f32 %v829_v22, %v440_v60 }
 0x12d   :  { %8601 = vst [vmem:[#allocation131_spill] sm:$0xff] %v6743_v21  ;;  %1282 = vmatpush.bf16.msrb.mxu1 %v6749_v35  ;;  %v4916_v21 = vld [vmem:[#allocation11 + $0x18] sm:$0xf0]  ;;  %1270 = vmatpush.bf16.msrb.mxu0 %v6762_v33 }
 0x12e   :  { %8602 = vst [vmem:[#allocation132_spill] sm:$0xff] %v6746_v25  ;;  %v6774_v43 = vor.u32 %v5523_v9, %v4916_v21  ;;  %v867_v3 = vmul.f32 0.5, %v860_v28 }
 0x12f   :  { %8603 = vst [vmem:[#allocation133_spill] sm:$0xff] %v6749_v35  ;;  %v859_v35 = vadd.f32 %v816_v40, %v401_v46  ;;  %v479_v46 = vadd.f32 %v6481_v29, %v6777_v39 }
 0x130   :  { %8604 = vst [vmem:[#allocation134_spill] sm:$0xff] %v6751_v61  ;;  %1309 = vmatpush.bf16.msrb.mxu3 %v6774_v43 }
 0x131   :  { %8605 = vst [vmem:[#allocation135_spill] sm:$0xff] %v6754_v1  ;;  %v863_v25 = vmul.f32 0.5, %v859_v35  ;;  %1283 = vmatpush.bf16.msrb.mxu1 %v6769_v26  ;;  %v855_v35 = vpop.f32.mrf.mxu3 }
 0x132   :  { %8606 = vst [vmem:[#allocation136_spill] sm:$0xff] %v6758_v51  ;;  %v6771_v51 = vor.u32 %v5525_v45, %v4914_v44 }
 0x133   :  { %8607 = vst [vmem:[#allocation137_spill] sm:$0xff] %v6762_v33  ;;  %5659 = vtanh.f32 %v863_v25  ;;  %v831_v44 = vpop.f32.mrf.mxu1 }
 0x134   :  { %8608 = vst [vmem:[#allocation138_spill] sm:$0xff] %v6766_v34  ;;  %v6780_v34 = vperm.slane %v6713_v52, 3  ;;  %1296 = vmatpush.bf16.msrb.mxu2 %v6771_v51  ;;  %5661 = vtanh.f32 %v867_v3  ;;  %v842_v52 = vpop.f32.mrf.mxu2  ;;  %v818_v21 = vpop.f32.mrf.mxu0  ;;  %v8620_v44 = vld [vmem:[#allocation67_spill] sm:$0xff] }
 0x135   :  { %8609 = vst [vmem:[#allocation139_spill] sm:$0xff] %v6769_v26  ;;  %v861_v40 = vadd.f32 %v842_v52, %v479_v46 }
 0x136   :  { %8610 = vst [vmem:[#allocation140_spill] sm:$0xff] %v6771_v51  ;;  %v518_v9 = vadd.f32 %v6483_v30, %v6780_v34 }
 0x137   :  { %8611 = vst [vmem:[#allocation141_spill] sm:$0xff] %v6774_v43  ;;  %5663 = vtanh.f32 %v861_v40 }
 0x138   :  { %8612 = vst [vmem:[#allocation142_spill] sm:$0xff] %v6777_v39  ;;  %v862_v31 = vadd.f32 %v855_v35, %v518_v9 }
 0x139   :  { %8613 = vst [vmem:[#allocation143_spill] sm:$0xff] %v6780_v34  ;;  %v5660_v45 = vpop.eup %5659  ;;  %v857_v39 = vpop.f32.mrf.mxu3 }
 0x13a   :  { %v872_v60 = vmul.f32 0.5, %v862_v31  ;;  %v5662_v22 = vpop.eup %5661  ;;  %v865_v25 = vmul.f32 0.5, %v5660_v45  ;;  %v8615_v39 = vld [vmem:[#allocation58_spill] sm:$0xff]  ;;  %v8621_v45 = vld [vmem:[#allocation68_spill] sm:$0xff] }
 0x13b   :  { %v869_v28 = vmul.f32 0.5, %v5662_v22  ;;  %v8619_v31 = vld [vmem:[#allocation66_spill] sm:$0xff] }
 0x13c   :  { %5665 = vtanh.f32 %v872_v60  ;;  %v866_v43 = vadd.f32 0.5, %v865_v25  ;;  %v844_v29 = vpop.f32.mrf.mxu2  ;;  %v8622_v60 = vld [vmem:[#allocation69_spill] sm:$0xff]  ;;  %v8623_v22 = vld [vmem:[#allocation70_spill] sm:$0xff]  ;;  %v8624_v25 = vld [vmem:[#allocation72_spill] sm:$0xff] }
 0x13d   :  { %v870_v51 = vadd.f32 0.5, %v869_v28  ;;  %v5664_v3 = vpop.eup %5663  ;;  %v8625_v28 = vld [vmem:[#allocation73_spill] sm:$0xff]  ;;  %v8626_v29 = vld [vmem:[#allocation76_spill] sm:$0xff] }
 0x13e   :  { %v877_v30 = vmul.f32 %v5664_v3, %v866_v43  ;;  %v8618_v43 = vld [vmem:[#allocation64_spill] sm:$0xff]  ;;  %v8627_v3 = vld [vmem:[#allocation78_spill] sm:$0xff] }
 0x13f   :  { %v876_v26 = vmul.f32 0.0, %v870_v51  ;;  %v8614_v51 = vmov 0  }
 0x141   :  { %v6790_v46 = vadd.f32 %v877_v30, %v876_v26  ;;  %v8617_v26 = vld [vmem:[#allocation61_spill] sm:$0xff]  ;;  %v8628_v30 = vld [vmem:[#allocation79_spill] sm:$0xff] }
 0x142   :  { %v5666_v34 = vpop.eup %5665 }
 0x143   :  { %5667 = vtanh.f32 %v6790_v46  ;;  %v874_v9 = vmul.f32 0.5, %v5666_v34  ;;  %v8616_v34 = vld [vmem:[#allocation60_spill] sm:$0xff] }
 0x145   :  { %v875_v52 = vadd.f32 0.5, %v874_v9  ;;  %v8629_v9 = vld [vmem:[#allocation80_spill] sm:$0xff] }
 0x149   :  { %v5668_v40 = vpop.eup %5667 }
 0x14a   :  { %v880_v35 = vmul.f32 %v5668_v40, %v875_v52  ;;  %v8630_v52 = vld [vmem:[#allocation81_spill] sm:$0xff]  ;;  %v8631_v40 = vld [vmem:[#allocation82_spill] sm:$0xff] }
 0x14c   :  { %v881_v21 = vpack.c.bf16 %v880_v35, %v880_v35  ;;  %v8632_v35 = vld [vmem:[#allocation84_spill] sm:$0xff] }
 0x14e   :  { %1059 = vmatmul.bf16.vlgmr.msra.gmra.mxu0 %v881_v21  ;;  %1072 = vmatmul.bf16.vlgmr.msra.gmra.mxu1 %v881_v21 }
 0x14f   :  { %1085 = vmatmul.bf16.vlgmr.msra.gmra.mxu2 %v881_v21  ;;  %1098 = vmatmul.bf16.vlgmr.msra.gmra.mxu3 %v881_v21 }
 0x150   :  { %1337 = vmatpush.bf16.msra.mxu0 %v6362_v38  ;;  %1350 = vmatpush.bf16.msra.mxu1 %v6364_v42 }
 0x151   :  { %1363 = vmatpush.bf16.msra.mxu2 %v6366_v48  ;;  %1376 = vmatpush.bf16.msra.mxu3 %v6369_v49 }
 0x154   :  { %1338 = vmatpush.bf16.msra.mxu0 %v6371_v50  ;;  %1351 = vmatpush.bf16.msra.mxu1 %v6374_v53 }
 0x155   :  { %1364 = vmatpush.bf16.msra.mxu2 %v6377_v54  ;;  %1377 = vmatpush.bf16.msra.mxu3 %v6381_v58 }
 0x158   :  { %1339 = vmatpush.bf16.msra.mxu0 %v6384_v62  ;;  %1352 = vmatpush.bf16.msra.mxu1 %v6386_v63 }
 0x159   :  { %1365 = vmatpush.bf16.msra.mxu2 %v6389_v4  ;;  %1378 = vmatpush.bf16.msra.mxu3 %v6393_v5 }
 0x15c   :  { %1340 = vmatpush.bf16.msra.mxu0 %v6401_v10  ;;  %1353 = vmatpush.bf16.msra.mxu1 %v6403_v14 }
 0x15d   :  { %1366 = vmatpush.bf16.msra.mxu2 %v6405_v15  ;;  %1379 = vmatpush.bf16.msra.mxu3 %v6408_v19 }
 0x15e   :  { %1271 = vmatmul.bf16.vlgmr.msrb.gmra.mxu0 %v8614_v51  ;;  %1284 = vmatmul.bf16.vlgmr.msrb.gmra.mxu1 %v8614_v51 }
 0x15f   :  { %1297 = vmatmul.bf16.vlgmr.msrb.gmra.mxu2 %v8614_v51  ;;  %1310 = vmatmul.bf16.vlgmr.msrb.gmra.mxu3 %v8614_v51  ;;  %v8634_v51 = vld [vmem:[#allocation88_spill] sm:$0xff] }
 0x160   :  { %1341 = vmatpush.bf16.msra.mxu0 %v6412_v23  ;;  %1354 = vmatpush.bf16.msra.mxu1 %v6414_v24 }
 0x161   :  { %1367 = vmatpush.bf16.msra.mxu2 %v6417_v27  ;;  %1380 = vmatpush.bf16.msra.mxu3 %v6425_v32 }
 0x164   :  { %1342 = vmatpush.bf16.msra.mxu0 %v6427_v36  ;;  %1355 = vmatpush.bf16.msra.mxu1 %v6429_v37 }
 0x165   :  { %1368 = vmatpush.bf16.msra.mxu2 %v6432_v41  ;;  %1381 = vmatpush.bf16.msra.mxu3 %v6440_v47 }
 0x168   :  { %1343 = vmatpush.bf16.msra.mxu0 %v6442_v56  ;;  %1356 = vmatpush.bf16.msra.mxu1 %v6444_v57 }
 0x169   :  { %1369 = vmatpush.bf16.msra.mxu2 %v6447_v0  ;;  %1382 = vmatpush.bf16.msra.mxu3 %v6451_v6 }
 0x16c   :  { %1344 = vmatpush.bf16.msra.mxu0 %v6453_v7  ;;  %1357 = vmatpush.bf16.msra.mxu1 %v6456_v12 }
 0x16d   :  { %1370 = vmatpush.bf16.msra.mxu2 %v6458_v18  ;;  %1383 = vmatpush.bf16.msra.mxu3 %v6461_v20 }
 0x16f   :  { %1345 = vmatmul.bf16.vlgmr.msra.gmra.mxu0 %v881_v21  ;;  %1358 = vmatmul.bf16.vlgmr.msra.gmra.mxu1 %v881_v21 }
 0x170   :  { %1412 = vmatpush.bf16.msrb.mxu0 %v6513_v2  ;;  %1425 = vmatpush.bf16.msrb.mxu1 %v6517_v13 }
 0x171   :  { %1371 = vmatmul.bf16.vlgmr.msra.gmra.mxu2 %v881_v21  ;;  %1384 = vmatmul.bf16.vlgmr.msra.gmra.mxu3 %v881_v21  ;;  %v8633_v21 = vld [vmem:[#allocation85_spill] sm:$0xff] }
 0x172   :  { %1438 = vmatpush.bf16.msrb.mxu2 %v6519_v16  ;;  %1451 = vmatpush.bf16.msrb.mxu3 %v6526_v59 }
 0x174   :  { %1413 = vmatpush.bf16.msrb.mxu0 %v6533_v8  ;;  %1426 = vmatpush.bf16.msrb.mxu1 %v6535_v11 }
 0x176   :  { %1439 = vmatpush.bf16.msrb.mxu2 %v6537_v17  ;;  %1452 = vmatpush.bf16.msrb.mxu3 %v6540_v55 }
 0x178   :  { %1414 = vmatpush.bf16.msrb.mxu0 %v8615_v39  ;;  %1427 = vmatpush.bf16.msrb.mxu1 %v8616_v34  ;;  %v8673_v34 = vld [vmem:[#allocation33_spill] sm:$0xff] }
 0x17a   :  { %1440 = vmatpush.bf16.msrb.mxu2 %v8617_v26  ;;  %1453 = vmatpush.bf16.msrb.mxu3 %v8618_v43  ;;  %v8672_v26 = vld [vmem:[#allocation132_spill] sm:$0xff] }
 0x17b   :  { %v442_v39 = vadd.f32 %v8673_v34, %v8672_v26 }
 0x17c   :  { %1415 = vmatpush.bf16.msrb.mxu0 %v8619_v31  ;;  %1428 = vmatpush.bf16.msrb.mxu1 %v8620_v44  ;;  %v8671_v31 = vld [vmem:[#allocation32_spill] sm:$0xff] }
 0x17e   :  { %1441 = vmatpush.bf16.msrb.mxu2 %v8621_v45  ;;  %1454 = vmatpush.bf16.msrb.mxu3 %v8622_v60 }
 0x180   :  { %1416 = vmatpush.bf16.msrb.mxu0 %v8623_v22  ;;  %1429 = vmatpush.bf16.msrb.mxu1 %v8624_v25  ;;  %v8635_v25 = vld [vmem:[#allocation90_spill] sm:$0xff] }
 0x182   :  { %1442 = vmatpush.bf16.msrb.mxu2 %v8625_v28  ;;  %1455 = vmatpush.bf16.msrb.mxu3 %v8626_v29  ;;  %v8636_v28 = vld [vmem:[#allocation91_spill] sm:$0xff]  ;;  %v8637_v29 = vld [vmem:[#allocation94_spill] sm:$0xff] }
 0x184   :  { %1417 = vmatpush.bf16.msrb.mxu0 %v8627_v3  ;;  %1430 = vmatpush.bf16.msrb.mxu1 %v8628_v30  ;;  %v8638_v3 = vld [vmem:[#allocation95_spill] sm:$0xff]  ;;  %v8639_v30 = vld [vmem:[#allocation92_spill] sm:$0xff] }
 0x186   :  { %1443 = vmatpush.bf16.msrb.mxu2 %v8629_v9  ;;  %1456 = vmatpush.bf16.msrb.mxu3 %v8630_v52  ;;  %v8640_v9 = vld [vmem:[#allocation93_spill] sm:$0xff]  ;;  %v8641_v52 = vld [vmem:[#allocation96_spill] sm:$0xff] }
 0x188   :  { %1418 = vmatpush.bf16.msrb.mxu0 %v8631_v40  ;;  %1431 = vmatpush.bf16.msrb.mxu1 %v8632_v35  ;;  %v8642_v40 = vld [vmem:[#allocation98_spill] sm:$0xff]  ;;  %v8643_v35 = vld [vmem:[#allocation99_spill] sm:$0xff] }
 0x18a   :  { %1444 = vmatpush.bf16.msrb.mxu2 %v8633_v21  ;;  %1457 = vmatpush.bf16.msrb.mxu3 %v8634_v51  ;;  %v8644_v21 = vld [vmem:[#allocation102_spill] sm:$0xff]  ;;  %v8645_v51 = vld [vmem:[#allocation104_spill] sm:$0xff] }
 0x18c   :  { %1419 = vmatpush.bf16.msrb.mxu0 %v8635_v25  ;;  %1432 = vmatpush.bf16.msrb.mxu1 %v8636_v28  ;;  %v8646_v25 = vld [vmem:[#allocation105_spill] sm:$0xff]  ;;  %v8647_v28 = vld [vmem:[#allocation106_spill] sm:$0xff] }
 0x18e   :  { %1445 = vmatpush.bf16.msrb.mxu2 %v8639_v30  ;;  %1458 = vmatpush.bf16.msrb.mxu3 %v8640_v9  ;;  %v8650_v30 = vld [vmem:[#allocation109_spill] sm:$0xff]  ;;  %v8651_v9 = vld [vmem:[#allocation111_spill] sm:$0xff] }
 0x190   :  { %1465 = vmatpush.bf16.msra.mxu0 %v8637_v29  ;;  %1478 = vmatpush.bf16.msra.mxu1 %v8638_v3  ;;  %v8648_v29 = vld [vmem:[#allocation107_spill] sm:$0xff]  ;;  %v8649_v3 = vld [vmem:[#allocation108_spill] sm:$0xff] }
 0x192   :  { %1491 = vmatpush.bf16.msra.mxu2 %v8641_v52  ;;  %1504 = vmatpush.bf16.msra.mxu3 %v8642_v40  ;;  %v8652_v52 = vld [vmem:[#allocation114_spill] sm:$0xff]  ;;  %v8653_v40 = vld [vmem:[#allocation115_spill] sm:$0xff] }
 0x194   :  { %1466 = vmatpush.bf16.msra.mxu0 %v8643_v35  ;;  %1479 = vmatpush.bf16.msra.mxu1 %v8644_v21  ;;  %v8654_v35 = vld [vmem:[#allocation117_spill] sm:$0xff]  ;;  %v8655_v21 = vld [vmem:[#allocation118_spill] sm:$0xff] }
 0x196   :  { %1492 = vmatpush.bf16.msra.mxu2 %v8645_v51  ;;  %1505 = vmatpush.bf16.msra.mxu3 %v8646_v25  ;;  %v8656_v51 = vld [vmem:[#allocation119_spill] sm:$0xff]  ;;  %v8657_v25 = vld [vmem:[#allocation120_spill] sm:$0xff] }
 0x198   :  { %1467 = vmatpush.bf16.msra.mxu0 %v8647_v28  ;;  %1480 = vmatpush.bf16.msra.mxu1 %v8648_v29  ;;  %v8658_v28 = vld [vmem:[#allocation121_spill] sm:$0xff]  ;;  %v8659_v29 = vld [vmem:[#allocation123_spill] sm:$0xff] }
 0x19a   :  { %1493 = vmatpush.bf16.msra.mxu2 %v8649_v3  ;;  %1506 = vmatpush.bf16.msra.mxu3 %v8650_v30  ;;  %v8660_v3 = vld [vmem:[#allocation126_spill] sm:$0xff]  ;;  %v8661_v30 = vld [vmem:[#allocation127_spill] sm:$0xff] }
 0x19c   :  { %1468 = vmatpush.bf16.msra.mxu0 %v8651_v9  ;;  %1481 = vmatpush.bf16.msra.mxu1 %v8652_v52  ;;  %v8662_v9 = vld [vmem:[#allocation130_spill] sm:$0xff]  ;;  %v8663_v52 = vld [vmem:[#allocation131_spill] sm:$0xff] }
 0x19e   :  { %1494 = vmatpush.bf16.msra.mxu2 %v8653_v40  ;;  %1507 = vmatpush.bf16.msra.mxu3 %v8654_v35  ;;  %v8664_v40 = vld [vmem:[#allocation133_spill] sm:$0xff] }
 0x1a0   :  { %1469 = vmatpush.bf16.msra.mxu0 %v8655_v21  ;;  %1482 = vmatpush.bf16.msra.mxu1 %v8656_v51 }
 0x1a2   :  { %1495 = vmatpush.bf16.msra.mxu2 %v8657_v25  ;;  %1508 = vmatpush.bf16.msra.mxu3 %v8658_v28  ;;  %v8665_v25 = vld [vmem:[#allocation139_spill] sm:$0xff]  ;;  %v8666_v28 = vld [vmem:[#allocation140_spill] sm:$0xff] }
 0x1a4   :  { %1470 = vmatpush.bf16.msra.mxu0 %v8659_v29  ;;  %1483 = vmatpush.bf16.msra.mxu1 %v8660_v3  ;;  %v8667_v29 = vld [vmem:[#allocation141_spill] sm:$0xff] }
 0x1a6   :  { %1496 = vmatpush.bf16.msra.mxu2 %v8661_v30  ;;  %1509 = vmatpush.bf16.msra.mxu3 %v8662_v9 }
 0x1a8   :  { %1471 = vmatpush.bf16.msra.mxu0 %v8663_v52  ;;  %1484 = vmatpush.bf16.msra.mxu1 %v8664_v40 }
 0x1aa   :  { %1497 = vmatpush.bf16.msra.mxu2 %v6751_v61  ;;  %1510 = vmatpush.bf16.msra.mxu3 %v6754_v1 }
 0x1ac   :  { %1472 = vmatpush.bf16.msra.mxu0 %v6762_v33  ;;  %1485 = vmatpush.bf16.msra.mxu1 %v8665_v25  ;;  %v643_v33 = vld [vmem:[%s8319_s6] sm:$0xf] }
 0x1ad   :  { %v6896_v45 = vperm.slane %v643_v33, 0 }
 0x1ae   :  { %1498 = vmatpush.bf16.msra.mxu2 %v8666_v28  ;;  %1511 = vmatpush.bf16.msra.mxu3 %v8667_v29  ;;  %v6898_v29 = vperm.slane %v643_v33, 1 }
 0x1af   :  { %8668 = vst [vmem:[#allocation144_spill] sm:$0xff] %v6896_v45 }
 0x1b0   :  { %8669 = vst [vmem:[#allocation145_spill] sm:$0xff] %v6898_v29 }
 0x1cb   :  { %v1060_v3 = vpop.f32.mrf.mxu0  ;;  %v1073_v30 = vpop.f32.mrf.mxu1 }
 0x1cc   :  { %v1061_v44 = vadd.f32 %v1060_v3, %v6896_v45  ;;  %v8677_v45 = vld [vmem:[#allocation35_spill] sm:$0xff] }
 0x1d2   :  { %v1086_v51 = vpop.f32.mrf.mxu2  ;;  %v1099_v9 = vpop.f32.mrf.mxu3 }
 0x1d3   :  { %v1062_v21 = vpop.f32.mrf.mxu0  ;;  %v1075_v52 = vpop.f32.mrf.mxu1 }
 0x1d4   :  { %v1074_v52 = vadd.f32 %v1073_v30, %v6898_v29  ;;  %v8670_v21 = vld [vmem:[#allocation128_spill] sm:$0xff]  ;;  %v8674_v30 = vld [vmem:[#allocation142_spill] sm:$0xff]  ;;  %v8676_v29 = vld [vmem:[#allocation143_spill] sm:$0xff] }
 0x1d5   :  { %v403_v43 = vadd.f32 %v8671_v31, %v8670_v21  ;;  %v520_v31 = vadd.f32 %v8677_v45, %v8676_v29  ;;  %v6910_v21 = vperm.slane %v643_v33, 2 }
 0x1da   :  { %v1088_v35 = vpop.f32.mrf.mxu2  ;;  %v1101_v40 = vpop.f32.mrf.mxu3 }
 0x1db   :  { %v1272_v22 = vpop.f32.mrf.mxu0  ;;  %v1285_v61 = vpop.f32.mrf.mxu1 }
 0x1dc   :  { %v1315_v55 = vadd.f32 %v1272_v22, %v1061_v44  ;;  %v1316_v17 = vadd.f32 %v1285_v61, %v1074_v52  ;;  %v6913_v22 = vperm.slane %v643_v33, 3 }
 0x1de   :  { %v1319_v59 = vmul.f32 0.5, %v1315_v55  ;;  %v1323_v3 = vmul.f32 0.5, %v1316_v17 }
 0x1e2   :  { %v1298_v1 = vpop.f32.mrf.mxu2  ;;  %v1311_v25 = vpop.f32.mrf.mxu3 }
 0x1e3   :  { %v1274_v60 = vpop.f32.mrf.mxu0  ;;  %v1287_v28 = vpop.f32.mrf.mxu1 }
 0x1ea   :  { %v1300_v35 = vpop.f32.mrf.mxu2  ;;  %v1313_v40 = vpop.f32.mrf.mxu3 }
 0x1eb   :  { %v8675_v35 = vld [vmem:[#allocation34_spill] sm:$0xff] }
 0x1ec   :  { %v1346_v60 = vpop.f32.mrf.mxu0  ;;  %v1359_v28 = vpop.f32.mrf.mxu1  ;;  %v481_v40 = vadd.f32 %v8675_v35, %v8674_v30 }
 0x1ed   :  { %v1389_v11 = vadd.f32 %v1346_v60, %v403_v43  ;;  %v1390_v8 = vadd.f32 %v1359_v28, %v442_v39 }
 0x1ef   :  { %v1393_v16 = vmul.f32 0.5, %v1389_v11  ;;  %v1397_v13 = vmul.f32 0.5, %v1390_v8  ;;  %v1087_v8 = vadd.f32 %v1086_v51, %v6910_v21 }
 0x1f1   :  { %5669 = vtanh.f32 %v1393_v16  ;;  %v1317_v45 = vadd.f32 %v1298_v1, %v1087_v8 }
 0x1f2   :  { %5671 = vtanh.f32 %v1397_v13 }
 0x1f3   :  { %5673 = vtanh.f32 %v1319_v59 }
 0x1f4   :  { %v1372_v61 = vpop.f32.mrf.mxu2  ;;  %v1385_v34 = vpop.f32.mrf.mxu3  ;;  %5675 = vtanh.f32 %v1323_v3 }
 0x1f5   :  { %v1391_v43 = vadd.f32 %v1372_v61, %v481_v40  ;;  %v1392_v39 = vadd.f32 %v1385_v34, %v520_v31  ;;  %v1348_v55 = vpop.f32.mrf.mxu0  ;;  %v1361_v11 = vpop.f32.mrf.mxu1  ;;  %v1100_v61 = vadd.f32 %v1099_v9, %v6913_v22 }
 0x1f7   :  { %5677 = vtanh.f32 %v1391_v43  ;;  %v1402_v16 = vmul.f32 0.5, %v1392_v39  ;;  %v5670_v17 = vpop.eup %5669  ;;  %v1318_v1 = vadd.f32 %v1311_v25, %v1100_v61  ;;  %v8678_v61 = vld [vmem:[#allocation48_spill] sm:$0xff] }
 0x1f8   :  { %v5672_v44 = vpop.eup %5671  ;;  %v1395_v52 = vmul.f32 0.5, %v5670_v17 }
 0x1f9   :  { %v5674_v60 = vpop.eup %5673  ;;  %v1399_v13 = vmul.f32 0.5, %v5672_v44  ;;  %5679 = vtanh.f32 %v1402_v16  ;;  %v1328_v44 = vmul.f32 0.5, %v1318_v1  ;;  %v8684_v1 = vld [vmem:[#allocation57_spill] sm:$0xff] }
 0x1fa   :  { %v5676_v59 = vpop.eup %5675  ;;  %v1396_v28 = vadd.f32 0.5, %v1395_v52  ;;  %5681 = vtanh.f32 %v1317_v45  ;;  %v1321_v51 = vmul.f32 0.5, %v5674_v60 }
 0x1fb   :  { %v1400_v3 = vadd.f32 0.5, %v1399_v13  ;;  %v1325_v34 = vmul.f32 0.5, %v5676_v59 }
 0x1fc   :  { %v1374_v35 = vpop.f32.mrf.mxu2  ;;  %v1387_v40 = vpop.f32.mrf.mxu3  ;;  %v1322_v11 = vadd.f32 0.5, %v1321_v51  ;;  %v8679_v51 = vld [vmem:[#allocation49_spill] sm:$0xff] }
 0x1fd   :  { %v5678_v31 = vpop.eup %5677  ;;  %v1406_v43 = vmul.f32 %v1400_v3, %v6790_v46  ;;  %v1326_v8 = vadd.f32 0.5, %v1325_v34  ;;  %v8680_v34 = vld [vmem:[#allocation52_spill] sm:$0xff] }
 0x1fe   :  { %v1407_v33 = vmul.f32 %v5678_v31, %v1396_v28 }
 0x1ff   :  { %v5680_v39 = vpop.eup %5679  ;;  %v1332_v52 = vmul.f32 0.0, %v1326_v8  ;;  %v8686_v8 = vld [vmem:[#allocation60_spill] sm:$0xff] }
 0x200   :  { %v6917_v55 = vadd.f32 %v1407_v33, %v1406_v43  ;;  %v5682_v16 = vpop.eup %5681  ;;  %v1404_v17 = vmul.f32 0.5, %v5680_v39  ;;  %v8681_v43 = vld [vmem:[#allocation54_spill] sm:$0xff]  ;;  %v8682_v33 = vld [vmem:[#allocation55_spill] sm:$0xff]  ;;  %v8683_v39 = vld [vmem:[#allocation56_spill] sm:$0xff] }
 0x201   :  { %v1333_v13 = vmul.f32 %v5682_v16, %v1322_v11  ;;  %v8685_v11 = vld [vmem:[#allocation58_spill] sm:$0xff]  ;;  %v8687_v16 = vld [vmem:[#allocation61_spill] sm:$0xff] }
 0x202   :  { %5683 = vtanh.f32 %v6917_v55  ;;  %v1405_v9 = vadd.f32 0.5, %v1404_v17  ;;  %v8688_v17 = vld [vmem:[#allocation64_spill] sm:$0xff] }
 0x203   :  { %5685 = vtanh.f32 %v1328_v44  ;;  %v6920_v59 = vadd.f32 %v1333_v13, %v1332_v52  ;;  %v8689_v44 = vld [vmem:[#allocation66_spill] sm:$0xff]  ;;  %v8690_v52 = vld [vmem:[#allocation67_spill] sm:$0xff]  ;;  %v8691_v13 = vld [vmem:[#allocation68_spill] sm:$0xff] }
 0x205   :  { %5687 = vtanh.f32 %v6920_v59 }
 0x208   :  { %v5684_v45 = vpop.eup %5683 }
 0x209   :  { %v1410_v60 = vmul.f32 %v5684_v45, %v1405_v9  ;;  %v5686_v25 = vpop.eup %5685  ;;  %v8692_v9 = vld [vmem:[#allocation69_spill] sm:$0xff]  ;;  %v8693_v45 = vld [vmem:[#allocation70_spill] sm:$0xff] }
 0x20a   :  { %v1330_v28 = vmul.f32 0.5, %v5686_v25  ;;  %v8696_v25 = vld [vmem:[#allocation76_spill] sm:$0xff] }
 0x20b   :  { %v1411_v46 = vpack.c.bf16 %v1410_v60, %v1410_v60  ;;  %v5688_v3 = vpop.eup %5687  ;;  %v8694_v60 = vld [vmem:[#allocation72_spill] sm:$0xff] }
 0x20c   :  { %v1331_v35 = vadd.f32 0.5, %v1330_v28  ;;  %v8697_v28 = vld [vmem:[#allocation78_spill] sm:$0xff] }
 0x20d   :  { %1420 = vmatmul.bf16.vlgmr.msrb.gmra.mxu0 %v1411_v46  ;;  %1433 = vmatmul.bf16.vlgmr.msrb.gmra.mxu1 %v1411_v46 }
 0x20e   :  { %1446 = vmatmul.bf16.vlgmr.msrb.gmra.mxu2 %v1411_v46  ;;  %1459 = vmatmul.bf16.vlgmr.msrb.gmra.mxu3 %v1411_v46  ;;  %v1336_v40 = vmul.f32 %v5688_v3, %v1331_v35  ;;  %v8698_v3 = vld [vmem:[#allocation79_spill] sm:$0xff]  ;;  %v8699_v35 = vld [vmem:[#allocation80_spill] sm:$0xff] }
 0x20f   :  { %1539 = vmatpush.bf16.msrb.mxu0 %v6362_v38  ;;  %1552 = vmatpush.bf16.msrb.mxu1 %v6364_v42 }
 0x210   :  { %1565 = vmatpush.bf16.msrb.mxu2 %v6366_v48  ;;  %1578 = vmatpush.bf16.msrb.mxu3 %v6369_v49  ;;  %v1464_v31 = vpack.c.bf16 %v1336_v40, %v1336_v40  ;;  %v8700_v40 = vld [vmem:[#allocation81_spill] sm:$0xff] }
 0x213   :  { %1540 = vmatpush.bf16.msrb.mxu0 %v6371_v50  ;;  %1553 = vmatpush.bf16.msrb.mxu1 %v6374_v53 }
 0x214   :  { %1566 = vmatpush.bf16.msrb.mxu2 %v6377_v54  ;;  %1579 = vmatpush.bf16.msrb.mxu3 %v6381_v58 }
 0x217   :  { %1541 = vmatpush.bf16.msrb.mxu0 %v6384_v62  ;;  %1554 = vmatpush.bf16.msrb.mxu1 %v6386_v63 }
 0x218   :  { %1567 = vmatpush.bf16.msrb.mxu2 %v6389_v4  ;;  %1580 = vmatpush.bf16.msrb.mxu3 %v6393_v5 }
 0x21b   :  { %1542 = vmatpush.bf16.msrb.mxu0 %v6401_v10  ;;  %1555 = vmatpush.bf16.msrb.mxu1 %v6403_v14 }
 0x21c   :  { %1568 = vmatpush.bf16.msrb.mxu2 %v6405_v15  ;;  %1581 = vmatpush.bf16.msrb.mxu3 %v6408_v19 }
 0x21d   :  { %1473 = vmatmul.bf16.vlgmr.msra.gmra.mxu0 %v1464_v31  ;;  %1486 = vmatmul.bf16.vlgmr.msra.gmra.mxu1 %v1464_v31 }
 0x21e   :  { %1499 = vmatmul.bf16.vlgmr.msra.gmra.mxu2 %v1464_v31  ;;  %1512 = vmatmul.bf16.vlgmr.msra.gmra.mxu3 %v1464_v31  ;;  %v8701_v31 = vld [vmem:[#allocation82_spill] sm:$0xff] }
 0x21f   :  { %1543 = vmatpush.bf16.msrb.mxu0 %v6412_v23  ;;  %1556 = vmatpush.bf16.msrb.mxu1 %v6414_v24 }
 0x220   :  { %1569 = vmatpush.bf16.msrb.mxu2 %v6417_v27  ;;  %1582 = vmatpush.bf16.msrb.mxu3 %v6425_v32 }
 0x223   :  { %1544 = vmatpush.bf16.msrb.mxu0 %v6427_v36  ;;  %1557 = vmatpush.bf16.msrb.mxu1 %v6429_v37 }
 0x224   :  { %1570 = vmatpush.bf16.msrb.mxu2 %v6432_v41  ;;  %1583 = vmatpush.bf16.msrb.mxu3 %v6440_v47 }
 0x227   :  { %1545 = vmatpush.bf16.msrb.mxu0 %v6442_v56  ;;  %1558 = vmatpush.bf16.msrb.mxu1 %v6444_v57 }
 0x228   :  { %1571 = vmatpush.bf16.msrb.mxu2 %v6447_v0  ;;  %1584 = vmatpush.bf16.msrb.mxu3 %v6451_v6 }
 0x22b   :  { %1546 = vmatpush.bf16.msrb.mxu0 %v6453_v7  ;;  %1559 = vmatpush.bf16.msrb.mxu1 %v6456_v12 }
 0x22c   :  { %1572 = vmatpush.bf16.msrb.mxu2 %v6458_v18  ;;  %1585 = vmatpush.bf16.msrb.mxu3 %v6461_v20 }
 0x22e   :  { %1547 = vmatmul.bf16.vlgmr.msrb.gmra.mxu0 %v1411_v46  ;;  %1560 = vmatmul.bf16.vlgmr.msrb.gmra.mxu1 %v1411_v46 }
 0x22f   :  { %1614 = vmatpush.bf16.msra.mxu0 %v6513_v2  ;;  %1627 = vmatpush.bf16.msra.mxu1 %v8678_v61 }
 0x230   :  { %1573 = vmatmul.bf16.vlgmr.msrb.gmra.mxu2 %v1411_v46  ;;  %1586 = vmatmul.bf16.vlgmr.msrb.gmra.mxu3 %v1411_v46  ;;  %v8695_v46 = vld [vmem:[#allocation73_spill] sm:$0xff] }
 0x231   :  { %1640 = vmatpush.bf16.msra.mxu2 %v8679_v51  ;;  %1653 = vmatpush.bf16.msra.mxu3 %v8680_v34  ;;  %v8744_v34 = vld [vmem:[#allocation36_spill] sm:$0xff] }
 0x233   :  { %1615 = vmatpush.bf16.msra.mxu0 %v8681_v43  ;;  %1628 = vmatpush.bf16.msra.mxu1 %v8682_v33  ;;  %v8743_v43 = vld [vmem:[#allocation128_spill] sm:$0xff] }
 0x234   :  { %v406_v51 = vadd.f32 %v8744_v34, %v8743_v43 }
 0x235   :  { %1641 = vmatpush.bf16.msra.mxu2 %v8683_v39  ;;  %1654 = vmatpush.bf16.msra.mxu3 %v8684_v1  ;;  %v8741_v1 = vld [vmem:[#allocation144_spill] sm:$0xff]  ;;  %v8742_v39 = vld [vmem:[#allocation145_spill] sm:$0xff] }
 0x237   :  { %1616 = vmatpush.bf16.msra.mxu0 %v8685_v11  ;;  %1629 = vmatpush.bf16.msra.mxu1 %v8686_v8 }
 0x239   :  { %1642 = vmatpush.bf16.msra.mxu2 %v8687_v16  ;;  %1655 = vmatpush.bf16.msra.mxu3 %v8688_v17 }
 0x23b   :  { %1617 = vmatpush.bf16.msra.mxu0 %v8689_v44  ;;  %1630 = vmatpush.bf16.msra.mxu1 %v8690_v52 }
 0x23d   :  { %1643 = vmatpush.bf16.msra.mxu2 %v8691_v13  ;;  %1656 = vmatpush.bf16.msra.mxu3 %v8692_v9  ;;  %v8702_v13 = vld [vmem:[#allocation84_spill] sm:$0xff]  ;;  %v8703_v9 = vld [vmem:[#allocation85_spill] sm:$0xff] }
 0x23f   :  { %1618 = vmatpush.bf16.msra.mxu0 %v8693_v45  ;;  %1631 = vmatpush.bf16.msra.mxu1 %v8694_v60  ;;  %v8704_v45 = vld [vmem:[#allocation88_spill] sm:$0xff]  ;;  %v8705_v60 = vld [vmem:[#allocation90_spill] sm:$0xff] }
 0x241   :  { %1644 = vmatpush.bf16.msra.mxu2 %v8695_v46  ;;  %1657 = vmatpush.bf16.msra.mxu3 %v8696_v25  ;;  %v8706_v46 = vld [vmem:[#allocation91_spill] sm:$0xff]  ;;  %v8707_v25 = vld [vmem:[#allocation94_spill] sm:$0xff] }
 0x243   :  { %1619 = vmatpush.bf16.msra.mxu0 %v8697_v28  ;;  %1632 = vmatpush.bf16.msra.mxu1 %v8698_v3  ;;  %v8708_v28 = vld [vmem:[#allocation95_spill] sm:$0xff]  ;;  %v8709_v3 = vld [vmem:[#allocation92_spill] sm:$0xff] }
 0x245   :  { %1645 = vmatpush.bf16.msra.mxu2 %v8699_v35  ;;  %1658 = vmatpush.bf16.msra.mxu3 %v8700_v40  ;;  %v8710_v35 = vld [vmem:[#allocation93_spill] sm:$0xff]  ;;  %v8711_v40 = vld [vmem:[#allocation96_spill] sm:$0xff] }
 0x247   :  { %1620 = vmatpush.bf16.msra.mxu0 %v8701_v31  ;;  %1633 = vmatpush.bf16.msra.mxu1 %v8702_v13  ;;  %v8712_v31 = vld [vmem:[#allocation98_spill] sm:$0xff]  ;;  %v8713_v13 = vld [vmem:[#allocation99_spill] sm:$0xff] }
 0x249   :  { %1646 = vmatpush.bf16.msra.mxu2 %v8703_v9  ;;  %1659 = vmatpush.bf16.msra.mxu3 %v8704_v45  ;;  %v8714_v9 = vld [vmem:[#allocation102_spill] sm:$0xff]  ;;  %v8715_v45 = vld [vmem:[#allocation104_spill] sm:$0xff] }
 0x24b   :  { %1621 = vmatpush.bf16.msra.mxu0 %v8705_v60  ;;  %1634 = vmatpush.bf16.msra.mxu1 %v8706_v46  ;;  %v8716_v60 = vld [vmem:[#allocation105_spill] sm:$0xff]  ;;  %v8717_v46 = vld [vmem:[#allocation106_spill] sm:$0xff] }
 0x24d   :  { %1647 = vmatpush.bf16.msra.mxu2 %v8709_v3  ;;  %1660 = vmatpush.bf16.msra.mxu3 %v8710_v35  ;;  %v8720_v3 = vld [vmem:[#allocation109_spill] sm:$0xff]  ;;  %v8721_v35 = vld [vmem:[#allocation111_spill] sm:$0xff] }
 0x24f   :  { %1667 = vmatpush.bf16.msrb.mxu0 %v8707_v25  ;;  %1680 = vmatpush.bf16.msrb.mxu1 %v8708_v28  ;;  %v8718_v25 = vld [vmem:[#allocation107_spill] sm:$0xff]  ;;  %v8719_v28 = vld [vmem:[#allocation108_spill] sm:$0xff] }
 0x251   :  { %1693 = vmatpush.bf16.msrb.mxu2 %v8711_v40  ;;  %1706 = vmatpush.bf16.msrb.mxu3 %v8712_v31  ;;  %v8722_v40 = vld [vmem:[#allocation114_spill] sm:$0xff]  ;;  %v8723_v31 = vld [vmem:[#allocation115_spill] sm:$0xff] }
 0x253   :  { %1668 = vmatpush.bf16.msrb.mxu0 %v8713_v13  ;;  %1681 = vmatpush.bf16.msrb.mxu1 %v8714_v9  ;;  %v8724_v13 = vld [vmem:[#allocation117_spill] sm:$0xff]  ;;  %v8725_v9 = vld [vmem:[#allocation118_spill] sm:$0xff] }
 0x255   :  { %1694 = vmatpush.bf16.msrb.mxu2 %v8715_v45  ;;  %1707 = vmatpush.bf16.msrb.mxu3 %v8716_v60  ;;  %v8726_v45 = vld [vmem:[#allocation119_spill] sm:$0xff]  ;;  %v8727_v60 = vld [vmem:[#allocation120_spill] sm:$0xff] }
 0x257   :  { %1669 = vmatpush.bf16.msrb.mxu0 %v8717_v46  ;;  %1682 = vmatpush.bf16.msrb.mxu1 %v8718_v25  ;;  %v8728_v46 = vld [vmem:[#allocation121_spill] sm:$0xff]  ;;  %v8729_v25 = vld [vmem:[#allocation123_spill] sm:$0xff] }
 0x259   :  { %1695 = vmatpush.bf16.msrb.mxu2 %v8719_v28  ;;  %1708 = vmatpush.bf16.msrb.mxu3 %v8720_v3  ;;  %v8730_v28 = vld [vmem:[#allocation126_spill] sm:$0xff]  ;;  %v8731_v3 = vld [vmem:[#allocation127_spill] sm:$0xff] }
 0x25b   :  { %1670 = vmatpush.bf16.msrb.mxu0 %v8721_v35  ;;  %1683 = vmatpush.bf16.msrb.mxu1 %v8722_v40  ;;  %v8732_v35 = vld [vmem:[#allocation130_spill] sm:$0xff]  ;;  %v8733_v40 = vld [vmem:[#allocation131_spill] sm:$0xff] }
 0x25d   :  { %1696 = vmatpush.bf16.msrb.mxu2 %v8723_v31  ;;  %1709 = vmatpush.bf16.msrb.mxu3 %v8724_v13  ;;  %v8734_v31 = vld [vmem:[#allocation133_spill] sm:$0xff]  ;;  %v8735_v13 = vld [vmem:[#allocation134_spill] sm:$0xff] }
 0x25f   :  { %1671 = vmatpush.bf16.msrb.mxu0 %v8725_v9  ;;  %1684 = vmatpush.bf16.msrb.mxu1 %v8726_v45  ;;  %v8736_v9 = vld [vmem:[#allocation135_spill] sm:$0xff]  ;;  %v8737_v45 = vld [vmem:[#allocation137_spill] sm:$0xff] }
 0x261   :  { %1697 = vmatpush.bf16.msrb.mxu2 %v8727_v60  ;;  %1710 = vmatpush.bf16.msrb.mxu3 %v8728_v46  ;;  %v8738_v60 = vld [vmem:[#allocation139_spill] sm:$0xff]  ;;  %v8739_v46 = vld [vmem:[#allocation140_spill] sm:$0xff] }
 0x263   :  { %1672 = vmatpush.bf16.msrb.mxu0 %v8729_v25  ;;  %1685 = vmatpush.bf16.msrb.mxu1 %v8730_v28  ;;  %v8740_v25 = vld [vmem:[#allocation141_spill] sm:$0xff] }
 0x265   :  { %1698 = vmatpush.bf16.msrb.mxu2 %v8731_v3  ;;  %1711 = vmatpush.bf16.msrb.mxu3 %v8732_v35 }
 0x267   :  { %1673 = vmatpush.bf16.msrb.mxu0 %v8733_v40  ;;  %1686 = vmatpush.bf16.msrb.mxu1 %v8734_v31 }
 0x269   :  { %1699 = vmatpush.bf16.msrb.mxu2 %v8735_v13  ;;  %1712 = vmatpush.bf16.msrb.mxu3 %v8736_v9 }
 0x26b   :  { %1674 = vmatpush.bf16.msrb.mxu0 %v8737_v45  ;;  %1687 = vmatpush.bf16.msrb.mxu1 %v8738_v60 }
 0x26d   :  { %1700 = vmatpush.bf16.msrb.mxu2 %v8739_v46  ;;  %1713 = vmatpush.bf16.msrb.mxu3 %v8740_v25 }
 0x28a   :  { %v1421_v28 = vpop.f32.mrf.mxu0  ;;  %v1434_v3 = vpop.f32.mrf.mxu1 }
 0x28b   :  { %v1422_v60 = vadd.f32 %v1421_v28, %v8741_v1  ;;  %v1435_v46 = vadd.f32 %v1434_v3, %v8742_v39  ;;  %v8747_v3 = vld [vmem:[#allocation39_spill] sm:$0xff] }
 0x28c   :  { %v523_v34 = vadd.f32 %v8747_v3, %v8676_v29 }
 0x291   :  { %v1447_v52 = vpop.f32.mrf.mxu2  ;;  %v1460_v35 = vpop.f32.mrf.mxu3 }
 0x292   :  { %v1423_v44 = vpop.f32.mrf.mxu0  ;;  %v1436_v40 = vpop.f32.mrf.mxu1 }
 0x293   :  { %v8745_v44 = vld [vmem:[#allocation37_spill] sm:$0xff] }
 0x294   :  { %v445_v40 = vadd.f32 %v8745_v44, %v8672_v26 }
 0x299   :  { %v1449_v17 = vpop.f32.mrf.mxu2  ;;  %v1462_v31 = vpop.f32.mrf.mxu3 }
 0x29a   :  { %v1474_v16 = vpop.f32.mrf.mxu0  ;;  %v1487_v13 = vpop.f32.mrf.mxu1 }
 0x29b   :  { %v1517_v17 = vadd.f32 %v1474_v16, %v1422_v60  ;;  %v1518_v31 = vadd.f32 %v1487_v13, %v1435_v46 }
 0x29d   :  { %v1525_v28 = vmul.f32 0.5, %v1518_v31 }
 0x2a1   :  { %v1500_v8 = vpop.f32.mrf.mxu2  ;;  %v1513_v9 = vpop.f32.mrf.mxu3 }
 0x2a2   :  { %v1476_v11 = vpop.f32.mrf.mxu0  ;;  %v1489_v45 = vpop.f32.mrf.mxu1 }
 0x2a3   :  { %v1521_v11 = vmul.f32 0.5, %v1517_v17 }
 0x2a9   :  { %v1502_v33 = vpop.f32.mrf.mxu2  ;;  %v1515_v25 = vpop.f32.mrf.mxu3 }
 0x2aa   :  { %v8746_v33 = vld [vmem:[#allocation38_spill] sm:$0xff] }
 0x2ab   :  { %v1548_v61 = vpop.f32.mrf.mxu0  ;;  %v1561_v2 = vpop.f32.mrf.mxu1  ;;  %v484_v25 = vadd.f32 %v8746_v33, %v8674_v30 }
 0x2ac   :  { %v1591_v20 = vadd.f32 %v1548_v61, %v406_v51  ;;  %v1592_v18 = vadd.f32 %v1561_v2, %v445_v40 }
 0x2ae   :  { %v1595_v45 = vmul.f32 0.5, %v1591_v20  ;;  %v1599_v12 = vmul.f32 0.5, %v1592_v18  ;;  %v1448_v20 = vadd.f32 %v1447_v52, %v6910_v21 }
 0x2b0   :  { %5689 = vtanh.f32 %v1595_v45  ;;  %v1519_v40 = vadd.f32 %v1500_v8, %v1448_v20 }
 0x2b1   :  { %5691 = vtanh.f32 %v1599_v12 }
 0x2b2   :  { %5693 = vtanh.f32 %v1521_v11 }
 0x2b3   :  { %v1574_v44 = vpop.f32.mrf.mxu2  ;;  %v1587_v16 = vpop.f32.mrf.mxu3  ;;  %5695 = vtanh.f32 %v1525_v28 }
 0x2b4   :  { %v1593_v13 = vadd.f32 %v1574_v44, %v484_v25  ;;  %v1594_v60 = vadd.f32 %v1587_v16, %v523_v34  ;;  %v1550_v61 = vpop.f32.mrf.mxu0  ;;  %v1563_v2 = vpop.f32.mrf.mxu1  ;;  %v1461_v34 = vadd.f32 %v1460_v35, %v6913_v22 }
 0x2b6   :  { %5697 = vtanh.f32 %v1593_v13  ;;  %v1604_v18 = vmul.f32 0.5, %v1594_v60  ;;  %v5690_v51 = vpop.eup %5689  ;;  %v1520_v8 = vadd.f32 %v1513_v9, %v1461_v34  ;;  %v8749_v34 = vld [vmem:[#allocation30_spill] sm:$0xff] }
 0x2b7   :  { %v5692_v46 = vpop.eup %5691  ;;  %v1597_v17 = vmul.f32 0.5, %v5690_v51 }
 0x2b8   :  { %v5694_v31 = vpop.eup %5693  ;;  %v1601_v45 = vmul.f32 0.5, %v5692_v46  ;;  %5699 = vtanh.f32 %v1604_v18  ;;  %v1530_v46 = vmul.f32 0.5, %v1520_v8  ;;  %v8755_v8 = vld [vmem:[#allocation54_spill] sm:$0xff] }
 0x2b9   :  { %v5696_v12 = vpop.eup %5695  ;;  %v1598_v11 = vadd.f32 0.5, %v1597_v17  ;;  %5701 = vtanh.f32 %v1519_v40  ;;  %v1523_v44 = vmul.f32 0.5, %v5694_v31 }
 0x2ba   :  { %v1602_v33 = vadd.f32 0.5, %v1601_v45  ;;  %v1527_v52 = vmul.f32 0.5, %v5696_v12 }
 0x2bb   :  { %v1576_v3 = vpop.f32.mrf.mxu2  ;;  %v1589_v28 = vpop.f32.mrf.mxu3  ;;  %v1524_v2 = vadd.f32 0.5, %v1523_v44  ;;  %v8750_v44 = vld [vmem:[#allocation31_spill] sm:$0xff] }
 0x2bc   :  { %v5698_v25 = vpop.eup %5697  ;;  %v1608_v16 = vmul.f32 %v1602_v33, %v6917_v55  ;;  %v1528_v20 = vadd.f32 0.5, %v1527_v52  ;;  %v8751_v52 = vld [vmem:[#allocation46_spill] sm:$0xff] }
 0x2bd   :  { %v1609_v13 = vmul.f32 %v5698_v25, %v1598_v11  ;;  %v8748_v25 = vld [vmem:[#allocation29_spill] sm:$0xff] }
 0x2be   :  { %v5700_v60 = vpop.eup %5699  ;;  %v1534_v17 = vmul.f32 %v1528_v20, %v6920_v59  ;;  %v8757_v20 = vld [vmem:[#allocation56_spill] sm:$0xff] }
 0x2bf   :  { %v7032_v61 = vadd.f32 %v1609_v13, %v1608_v16  ;;  %v5702_v18 = vpop.eup %5701  ;;  %v1606_v51 = vmul.f32 0.5, %v5700_v60  ;;  %v8752_v16 = vld [vmem:[#allocation48_spill] sm:$0xff]  ;;  %v8753_v13 = vld [vmem:[#allocation49_spill] sm:$0xff] }
 0x2c0   :  { %v1535_v35 = vmul.f32 %v5702_v18, %v1524_v2  ;;  %v8754_v60 = vld [vmem:[#allocation52_spill] sm:$0xff]  ;;  %v8756_v2 = vld [vmem:[#allocation55_spill] sm:$0xff]  ;;  %v8758_v18 = vld [vmem:[#allocation57_spill] sm:$0xff] }
 0x2c1   :  { %5703 = vtanh.f32 %v7032_v61  ;;  %v1607_v40 = vadd.f32 0.5, %v1606_v51  ;;  %v8759_v51 = vld [vmem:[#allocation58_spill] sm:$0xff] }
 0x2c2   :  { %5705 = vtanh.f32 %v1530_v46  ;;  %v7036_v55 = vadd.f32 %v1535_v35, %v1534_v17  ;;  %v8760_v46 = vld [vmem:[#allocation60_spill] sm:$0xff]  ;;  %v8761_v17 = vld [vmem:[#allocation61_spill] sm:$0xff] }
 0x2c3   :  { %v8762_v35 = vld [vmem:[#allocation64_spill] sm:$0xff] }
 0x2c4   :  { %5707 = vtanh.f32 %v7036_v55 }
 0x2c7   :  { %v5704_v31 = vpop.eup %5703 }
 0x2c8   :  { %v1612_v45 = vmul.f32 %v5704_v31, %v1607_v40  ;;  %v5706_v9 = vpop.eup %5705  ;;  %v8763_v40 = vld [vmem:[#allocation66_spill] sm:$0xff]  ;;  %v8764_v31 = vld [vmem:[#allocation67_spill] sm:$0xff] }
 0x2c9   :  { %v1532_v59 = vmul.f32 0.5, %v5706_v9  ;;  %v8767_v9 = vld [vmem:[#allocation70_spill] sm:$0xff] }
 0x2ca   :  { %v1613_v12 = vpack.c.bf16 %v1612_v45, %v1612_v45  ;;  %v5708_v11 = vpop.eup %5707  ;;  %v8765_v45 = vld [vmem:[#allocation68_spill] sm:$0xff] }
 0x2cb   :  { %v1533_v33 = vadd.f32 0.5, %v1532_v59  ;;  %v8768_v59 = vld [vmem:[#allocation72_spill] sm:$0xff] }
 0x2cc   :  { %1622 = vmatmul.bf16.vlgmr.msra.gmra.mxu0 %v1613_v12  ;;  %1635 = vmatmul.bf16.vlgmr.msra.gmra.mxu1 %v1613_v12 }
 0x2cd   :  { %1648 = vmatmul.bf16.vlgmr.msra.gmra.mxu2 %v1613_v12  ;;  %1661 = vmatmul.bf16.vlgmr.msra.gmra.mxu3 %v1613_v12  ;;  %v1538_v3 = vmul.f32 %v5708_v11, %v1533_v33  ;;  %v8769_v11 = vld [vmem:[#allocation73_spill] sm:$0xff]  ;;  %v8770_v33 = vld [vmem:[#allocation76_spill] sm:$0xff] }
 0x2ce   :  { %1741 = vmatpush.bf16.msra.mxu0 %v6362_v38  ;;  %1754 = vmatpush.bf16.msra.mxu1 %v6364_v42 }
 0x2cf   :  { %1767 = vmatpush.bf16.msra.mxu2 %v6366_v48  ;;  %1780 = vmatpush.bf16.msra.mxu3 %v6369_v49  ;;  %v1666_v28 = vpack.c.bf16 %v1538_v3, %v1538_v3  ;;  %v8771_v3 = vld [vmem:[#allocation78_spill] sm:$0xff] }
 0x2d2   :  { %1742 = vmatpush.bf16.msra.mxu0 %v6371_v50  ;;  %1755 = vmatpush.bf16.msra.mxu1 %v6374_v53 }
 0x2d3   :  { %1768 = vmatpush.bf16.msra.mxu2 %v6377_v54  ;;  %1781 = vmatpush.bf16.msra.mxu3 %v6381_v58 }
 0x2d6   :  { %1743 = vmatpush.bf16.msra.mxu0 %v6384_v62  ;;  %1756 = vmatpush.bf16.msra.mxu1 %v6386_v63 }
 0x2d7   :  { %1769 = vmatpush.bf16.msra.mxu2 %v6389_v4  ;;  %1782 = vmatpush.bf16.msra.mxu3 %v6393_v5 }
 0x2da   :  { %1744 = vmatpush.bf16.msra.mxu0 %v6401_v10  ;;  %1757 = vmatpush.bf16.msra.mxu1 %v6403_v14 }
 0x2db   :  { %1770 = vmatpush.bf16.msra.mxu2 %v6405_v15  ;;  %1783 = vmatpush.bf16.msra.mxu3 %v6408_v19 }
 0x2dc   :  { %1675 = vmatmul.bf16.vlgmr.msrb.gmra.mxu0 %v1666_v28  ;;  %1688 = vmatmul.bf16.vlgmr.msrb.gmra.mxu1 %v1666_v28 }
 0x2dd   :  { %1701 = vmatmul.bf16.vlgmr.msrb.gmra.mxu2 %v1666_v28  ;;  %1714 = vmatmul.bf16.vlgmr.msrb.gmra.mxu3 %v1666_v28  ;;  %v8772_v28 = vld [vmem:[#allocation79_spill] sm:$0xff] }
 0x2de   :  { %1745 = vmatpush.bf16.msra.mxu0 %v6412_v23  ;;  %1758 = vmatpush.bf16.msra.mxu1 %v6414_v24 }
 0x2df   :  { %1771 = vmatpush.bf16.msra.mxu2 %v6417_v27  ;;  %1784 = vmatpush.bf16.msra.mxu3 %v6425_v32 }
 0x2e2   :  { %1746 = vmatpush.bf16.msra.mxu0 %v6427_v36  ;;  %1759 = vmatpush.bf16.msra.mxu1 %v6429_v37 }
 0x2e3   :  { %1772 = vmatpush.bf16.msra.mxu2 %v6432_v41  ;;  %1785 = vmatpush.bf16.msra.mxu3 %v6440_v47 }
 0x2e6   :  { %1747 = vmatpush.bf16.msra.mxu0 %v6442_v56  ;;  %1760 = vmatpush.bf16.msra.mxu1 %v6444_v57 }
 0x2e7   :  { %1773 = vmatpush.bf16.msra.mxu2 %v6447_v0  ;;  %1786 = vmatpush.bf16.msra.mxu3 %v6451_v6 }
 0x2ea   :  { %1748 = vmatpush.bf16.msra.mxu0 %v6453_v7  ;;  %1761 = vmatpush.bf16.msra.mxu1 %v8748_v25 }
 0x2eb   :  { %1774 = vmatpush.bf16.msra.mxu2 %v8749_v34  ;;  %1787 = vmatpush.bf16.msra.mxu3 %v8750_v44 }
 0x2ed   :  { %1749 = vmatmul.bf16.vlgmr.msra.gmra.mxu0 %v1613_v12  ;;  %1762 = vmatmul.bf16.vlgmr.msra.gmra.mxu1 %v1613_v12 }
 0x2ee   :  { %1816 = vmatpush.bf16.msrb.mxu0 %v8751_v52  ;;  %1829 = vmatpush.bf16.msrb.mxu1 %v8752_v16 }
 0x2ef   :  { %1775 = vmatmul.bf16.vlgmr.msra.gmra.mxu2 %v1613_v12  ;;  %1788 = vmatmul.bf16.vlgmr.msra.gmra.mxu3 %v1613_v12  ;;  %v8766_v12 = vld [vmem:[#allocation69_spill] sm:$0xff] }
 0x2f0   :  { %1842 = vmatpush.bf16.msrb.mxu2 %v8753_v13  ;;  %1855 = vmatpush.bf16.msrb.mxu3 %v8754_v60  ;;  %v8815_v60 = vld [vmem:[#allocation40_spill] sm:$0xff] }
 0x2f1   :  { %v408_v13 = vadd.f32 %v8815_v60, %v8743_v43 }
 0x2f2   :  { %1817 = vmatpush.bf16.msrb.mxu0 %v8755_v8  ;;  %1830 = vmatpush.bf16.msrb.mxu1 %v8756_v2 }
 0x2f4   :  { %1843 = vmatpush.bf16.msrb.mxu2 %v8757_v20  ;;  %1856 = vmatpush.bf16.msrb.mxu3 %v8758_v18 }
 0x2f6   :  { %1818 = vmatpush.bf16.msrb.mxu0 %v8759_v51  ;;  %1831 = vmatpush.bf16.msrb.mxu1 %v8760_v46 }
 0x2f8   :  { %1844 = vmatpush.bf16.msrb.mxu2 %v8761_v17  ;;  %1857 = vmatpush.bf16.msrb.mxu3 %v8762_v35  ;;  %v8773_v35 = vld [vmem:[#allocation80_spill] sm:$0xff] }
 0x2fa   :  { %1819 = vmatpush.bf16.msrb.mxu0 %v8763_v40  ;;  %1832 = vmatpush.bf16.msrb.mxu1 %v8764_v31  ;;  %v8774_v40 = vld [vmem:[#allocation81_spill] sm:$0xff]  ;;  %v8775_v31 = vld [vmem:[#allocation82_spill] sm:$0xff] }
 0x2fc   :  { %1845 = vmatpush.bf16.msrb.mxu2 %v8765_v45  ;;  %1858 = vmatpush.bf16.msrb.mxu3 %v8766_v12  ;;  %v8776_v45 = vld [vmem:[#allocation84_spill] sm:$0xff]  ;;  %v8777_v12 = vld [vmem:[#allocation85_spill] sm:$0xff] }
 0x2fe   :  { %1820 = vmatpush.bf16.msrb.mxu0 %v8767_v9  ;;  %1833 = vmatpush.bf16.msrb.mxu1 %v8768_v59  ;;  %v8778_v9 = vld [vmem:[#allocation88_spill] sm:$0xff]  ;;  %v8779_v59 = vld [vmem:[#allocation90_spill] sm:$0xff] }
 0x300   :  { %1846 = vmatpush.bf16.msrb.mxu2 %v8769_v11  ;;  %1859 = vmatpush.bf16.msrb.mxu3 %v8770_v33  ;;  %v8780_v11 = vld [vmem:[#allocation91_spill] sm:$0xff]  ;;  %v8781_v33 = vld [vmem:[#allocation94_spill] sm:$0xff] }
 0x302   :  { %1821 = vmatpush.bf16.msrb.mxu0 %v8771_v3  ;;  %1834 = vmatpush.bf16.msrb.mxu1 %v8772_v28  ;;  %v8782_v3 = vld [vmem:[#allocation95_spill] sm:$0xff]  ;;  %v8783_v28 = vld [vmem:[#allocation92_spill] sm:$0xff] }
 0x304   :  { %1847 = vmatpush.bf16.msrb.mxu2 %v8773_v35  ;;  %1860 = vmatpush.bf16.msrb.mxu3 %v8774_v40  ;;  %v8784_v35 = vld [vmem:[#allocation93_spill] sm:$0xff]  ;;  %v8785_v40 = vld [vmem:[#allocation96_spill] sm:$0xff] }
 0x306   :  { %1822 = vmatpush.bf16.msrb.mxu0 %v8775_v31  ;;  %1835 = vmatpush.bf16.msrb.mxu1 %v8776_v45  ;;  %v8786_v31 = vld [vmem:[#allocation98_spill] sm:$0xff]  ;;  %v8787_v45 = vld [vmem:[#allocation99_spill] sm:$0xff] }
 0x308   :  { %1848 = vmatpush.bf16.msrb.mxu2 %v8777_v12  ;;  %1861 = vmatpush.bf16.msrb.mxu3 %v8778_v9  ;;  %v8788_v12 = vld [vmem:[#allocation102_spill] sm:$0xff]  ;;  %v8789_v9 = vld [vmem:[#allocation104_spill] sm:$0xff] }
 0x30a   :  { %1823 = vmatpush.bf16.msrb.mxu0 %v8779_v59  ;;  %1836 = vmatpush.bf16.msrb.mxu1 %v8780_v11  ;;  %v8790_v59 = vld [vmem:[#allocation105_spill] sm:$0xff]  ;;  %v8791_v11 = vld [vmem:[#allocation106_spill] sm:$0xff] }
 0x30c   :  { %1849 = vmatpush.bf16.msrb.mxu2 %v8783_v28  ;;  %1862 = vmatpush.bf16.msrb.mxu3 %v8784_v35  ;;  %v8794_v28 = vld [vmem:[#allocation109_spill] sm:$0xff]  ;;  %v8795_v35 = vld [vmem:[#allocation111_spill] sm:$0xff] }
 0x30e   :  { %1869 = vmatpush.bf16.msra.mxu0 %v8781_v33  ;;  %1882 = vmatpush.bf16.msra.mxu1 %v8782_v3  ;;  %v8792_v33 = vld [vmem:[#allocation107_spill] sm:$0xff]  ;;  %v8793_v3 = vld [vmem:[#allocation108_spill] sm:$0xff] }
 0x310   :  { %1895 = vmatpush.bf16.msra.mxu2 %v8785_v40  ;;  %1908 = vmatpush.bf16.msra.mxu3 %v8786_v31  ;;  %v8796_v40 = vld [vmem:[#allocation114_spill] sm:$0xff]  ;;  %v8797_v31 = vld [vmem:[#allocation115_spill] sm:$0xff] }
 0x312   :  { %1870 = vmatpush.bf16.msra.mxu0 %v8787_v45  ;;  %1883 = vmatpush.bf16.msra.mxu1 %v8788_v12  ;;  %v8798_v45 = vld [vmem:[#allocation117_spill] sm:$0xff]  ;;  %v8799_v12 = vld [vmem:[#allocation118_spill] sm:$0xff] }
 0x314   :  { %1896 = vmatpush.bf16.msra.mxu2 %v8789_v9  ;;  %1909 = vmatpush.bf16.msra.mxu3 %v8790_v59  ;;  %v8800_v9 = vld [vmem:[#allocation119_spill] sm:$0xff]  ;;  %v8801_v59 = vld [vmem:[#allocation120_spill] sm:$0xff] }
 0x316   :  { %1871 = vmatpush.bf16.msra.mxu0 %v8791_v11  ;;  %1884 = vmatpush.bf16.msra.mxu1 %v8792_v33  ;;  %v8802_v11 = vld [vmem:[#allocation121_spill] sm:$0xff]  ;;  %v8803_v33 = vld [vmem:[#allocation123_spill] sm:$0xff] }
 0x318   :  { %1897 = vmatpush.bf16.msra.mxu2 %v8793_v3  ;;  %1910 = vmatpush.bf16.msra.mxu3 %v8794_v28  ;;  %v8804_v3 = vld [vmem:[#allocation126_spill] sm:$0xff]  ;;  %v8805_v28 = vld [vmem:[#allocation127_spill] sm:$0xff] }
 0x31a   :  { %1872 = vmatpush.bf16.msra.mxu0 %v8795_v35  ;;  %1885 = vmatpush.bf16.msra.mxu1 %v8796_v40  ;;  %v8806_v35 = vld [vmem:[#allocation130_spill] sm:$0xff]  ;;  %v8807_v40 = vld [vmem:[#allocation131_spill] sm:$0xff] }
 0x31c   :  { %1898 = vmatpush.bf16.msra.mxu2 %v8797_v31  ;;  %1911 = vmatpush.bf16.msra.mxu3 %v8798_v45  ;;  %v8808_v31 = vld [vmem:[#allocation133_spill] sm:$0xff]  ;;  %v8809_v45 = vld [vmem:[#allocation134_spill] sm:$0xff] }
 0x31e   :  { %1873 = vmatpush.bf16.msra.mxu0 %v8799_v12  ;;  %1886 = vmatpush.bf16.msra.mxu1 %v8800_v9  ;;  %v8810_v12 = vld [vmem:[#allocation135_spill] sm:$0xff]  ;;  %v8811_v9 = vld [vmem:[#allocation137_spill] sm:$0xff] }
 0x320   :  { %1899 = vmatpush.bf16.msra.mxu2 %v8801_v59  ;;  %1912 = vmatpush.bf16.msra.mxu3 %v8802_v11  ;;  %v8812_v59 = vld [vmem:[#allocation139_spill] sm:$0xff]  ;;  %v8813_v11 = vld [vmem:[#allocation140_spill] sm:$0xff] }
 0x322   :  { %1874 = vmatpush.bf16.msra.mxu0 %v8803_v33  ;;  %1887 = vmatpush.bf16.msra.mxu1 %v8804_v3  ;;  %v8814_v33 = vld [vmem:[#allocation141_spill] sm:$0xff] }
 0x324   :  { %1900 = vmatpush.bf16.msra.mxu2 %v8805_v28  ;;  %1913 = vmatpush.bf16.msra.mxu3 %v8806_v35 }
 0x326   :  { %1875 = vmatpush.bf16.msra.mxu0 %v8807_v40  ;;  %1888 = vmatpush.bf16.msra.mxu1 %v8808_v31 }
 0x328   :  { %1901 = vmatpush.bf16.msra.mxu2 %v8809_v45  ;;  %1914 = vmatpush.bf16.msra.mxu3 %v8810_v12 }
 0x32a   :  { %1876 = vmatpush.bf16.msra.mxu0 %v8811_v9  ;;  %1889 = vmatpush.bf16.msra.mxu1 %v8812_v59 }
 0x32c   :  { %1902 = vmatpush.bf16.msra.mxu2 %v8813_v11  ;;  %1915 = vmatpush.bf16.msra.mxu3 %v8814_v33 }
 0x349   :  { %v1623_v3 = vpop.f32.mrf.mxu0  ;;  %v1636_v28 = vpop.f32.mrf.mxu1 }
 0x34a   :  { %v1624_v59 = vadd.f32 %v1623_v3, %v8741_v1  ;;  %v1637_v11 = vadd.f32 %v1636_v28, %v8742_v39  ;;  %v8818_v28 = vld [vmem:[#allocation43_spill] sm:$0xff] }
 0x34b   :  { %v525_v60 = vadd.f32 %v8818_v28, %v8676_v29 }
 0x350   :  { %v1649_v17 = vpop.f32.mrf.mxu2  ;;  %v1662_v35 = vpop.f32.mrf.mxu3 }
 0x351   :  { %v1625_v46 = vpop.f32.mrf.mxu0  ;;  %v1638_v40 = vpop.f32.mrf.mxu1 }
 0x352   :  { %v8816_v46 = vld [vmem:[#allocation41_spill] sm:$0xff] }
 0x353   :  { %v447_v40 = vadd.f32 %v8816_v46, %v8672_v26 }
 0x358   :  { %v1651_v51 = vpop.f32.mrf.mxu2  ;;  %v1664_v31 = vpop.f32.mrf.mxu3 }
 0x359   :  { %v1676_v18 = vpop.f32.mrf.mxu0  ;;  %v1689_v45 = vpop.f32.mrf.mxu1 }
 0x35a   :  { %v1719_v51 = vadd.f32 %v1676_v18, %v1624_v59  ;;  %v1720_v31 = vadd.f32 %v1689_v45, %v1637_v11 }
 0x35c   :  { %v1727_v3 = vmul.f32 0.5, %v1720_v31 }
 0x360   :  { %v1702_v20 = vpop.f32.mrf.mxu2  ;;  %v1715_v12 = vpop.f32.mrf.mxu3 }
 0x361   :  { %v1678_v2 = vpop.f32.mrf.mxu0  ;;  %v1691_v9 = vpop.f32.mrf.mxu1 }
 0x362   :  { %v1723_v2 = vmul.f32 0.5, %v1719_v51 }
 0x368   :  { %v1704_v8 = vpop.f32.mrf.mxu2  ;;  %v1717_v33 = vpop.f32.mrf.mxu3 }
 0x369   :  { %v8817_v8 = vld [vmem:[#allocation42_spill] sm:$0xff] }
 0x36a   :  { %v1750_v16 = vpop.f32.mrf.mxu0  ;;  %v1763_v52 = vpop.f32.mrf.mxu1  ;;  %v486_v33 = vadd.f32 %v8817_v8, %v8674_v30 }
 0x36b   :  { %v1793_v44 = vadd.f32 %v1750_v16, %v408_v13  ;;  %v1794_v34 = vadd.f32 %v1763_v52, %v447_v40 }
 0x36d   :  { %v1797_v9 = vmul.f32 0.5, %v1793_v44  ;;  %v1801_v25 = vmul.f32 0.5, %v1794_v34  ;;  %v1650_v44 = vadd.f32 %v1649_v17, %v6910_v21 }
 0x36f   :  { %5709 = vtanh.f32 %v1797_v9  ;;  %v1721_v40 = vadd.f32 %v1702_v20, %v1650_v44 }
 0x370   :  { %5711 = vtanh.f32 %v1801_v25 }
 0x371   :  { %5713 = vtanh.f32 %v1723_v2 }
 0x372   :  { %v1776_v46 = vpop.f32.mrf.mxu2  ;;  %v1789_v18 = vpop.f32.mrf.mxu3  ;;  %5715 = vtanh.f32 %v1727_v3 }
 0x373   :  { %v1795_v45 = vadd.f32 %v1776_v46, %v486_v33  ;;  %v1796_v59 = vadd.f32 %v1789_v18, %v525_v60  ;;  %v1752_v16 = vpop.f32.mrf.mxu0  ;;  %v1765_v52 = vpop.f32.mrf.mxu1  ;;  %v1663_v60 = vadd.f32 %v1662_v35, %v6913_v22 }
 0x375   :  { %5717 = vtanh.f32 %v1795_v45  ;;  %v1806_v34 = vmul.f32 0.5, %v1796_v59  ;;  %v5710_v13 = vpop.eup %5709  ;;  %v1722_v20 = vadd.f32 %v1715_v12, %v1663_v60  ;;  %v8820_v60 = vld [vmem:[#allocation30_spill] sm:$0xff] }
 0x376   :  { %v5712_v11 = vpop.eup %5711  ;;  %v1799_v51 = vmul.f32 0.5, %v5710_v13 }
 0x377   :  { %v5714_v31 = vpop.eup %5713  ;;  %v1803_v9 = vmul.f32 0.5, %v5712_v11  ;;  %5719 = vtanh.f32 %v1806_v34  ;;  %v1732_v11 = vmul.f32 0.5, %v1722_v20  ;;  %v8826_v20 = vld [vmem:[#allocation54_spill] sm:$0xff] }
 0x378   :  { %v5716_v25 = vpop.eup %5715  ;;  %v1800_v2 = vadd.f32 0.5, %v1799_v51  ;;  %5721 = vtanh.f32 %v1721_v40  ;;  %v1725_v46 = vmul.f32 0.5, %v5714_v31 }
 0x379   :  { %v1804_v8 = vadd.f32 0.5, %v1803_v9  ;;  %v1729_v17 = vmul.f32 0.5, %v5716_v25 }
 0x37a   :  { %v1778_v28 = vpop.f32.mrf.mxu2  ;;  %v1791_v3 = vpop.f32.mrf.mxu3  ;;  %v1726_v52 = vadd.f32 0.5, %v1725_v46  ;;  %v8821_v46 = vld [vmem:[#allocation31_spill] sm:$0xff] }
 0x37b   :  { %v5718_v33 = vpop.eup %5717  ;;  %v1810_v18 = vmul.f32 %v1804_v8, %v7032_v61  ;;  %v1730_v44 = vadd.f32 0.5, %v1729_v17  ;;  %v8822_v17 = vld [vmem:[#allocation46_spill] sm:$0xff] }
 0x37c   :  { %v1811_v45 = vmul.f32 %v5718_v33, %v1800_v2  ;;  %v8819_v33 = vld [vmem:[#allocation29_spill] sm:$0xff] }
 0x37d   :  { %v5720_v59 = vpop.eup %5719  ;;  %v1736_v51 = vmul.f32 %v1730_v44, %v7036_v55  ;;  %v8828_v44 = vld [vmem:[#allocation56_spill] sm:$0xff] }
 0x37e   :  { %v7148_v16 = vadd.f32 %v1811_v45, %v1810_v18  ;;  %v5722_v34 = vpop.eup %5721  ;;  %v1808_v13 = vmul.f32 0.5, %v5720_v59  ;;  %v8823_v18 = vld [vmem:[#allocation48_spill] sm:$0xff]  ;;  %v8824_v45 = vld [vmem:[#allocation49_spill] sm:$0xff] }
 0x37f   :  { %v1737_v35 = vmul.f32 %v5722_v34, %v1726_v52  ;;  %v8825_v59 = vld [vmem:[#allocation52_spill] sm:$0xff]  ;;  %v8827_v52 = vld [vmem:[#allocation55_spill] sm:$0xff]  ;;  %v8829_v34 = vld [vmem:[#allocation57_spill] sm:$0xff] }
 0x380   :  { %5723 = vtanh.f32 %v7148_v16  ;;  %v1809_v40 = vadd.f32 0.5, %v1808_v13  ;;  %v8830_v13 = vld [vmem:[#allocation58_spill] sm:$0xff] }
 0x381   :  { %5725 = vtanh.f32 %v1732_v11  ;;  %v7154_v61 = vadd.f32 %v1737_v35, %v1736_v51  ;;  %v8831_v11 = vld [vmem:[#allocation60_spill] sm:$0xff]  ;;  %v8832_v51 = vld [vmem:[#allocation61_spill] sm:$0xff] }
 0x382   :  { %v8833_v35 = vld [vmem:[#allocation64_spill] sm:$0xff] }
 0x383   :  { %5727 = vtanh.f32 %v7154_v61 }
 0x386   :  { %v5724_v31 = vpop.eup %5723 }
 0x387   :  { %v7152_v9 = vmul.f32 %v5724_v31, %v1809_v40  ;;  %v5726_v25 = vpop.eup %5725  ;;  %v8834_v40 = vld [vmem:[#allocation66_spill] sm:$0xff]  ;;  %v8835_v31 = vld [vmem:[#allocation67_spill] sm:$0xff] }
 0x388   :  { %v1734_v55 = vmul.f32 0.5, %v5726_v25  ;;  %v8837_v25 = vld [vmem:[#allocation69_spill] sm:$0xff] }
 0x389   :  { %v1815_v12 = vpack.c.bf16 %v7152_v9, %v7152_v9  ;;  %v5728_v2 = vpop.eup %5727 }
 0x38a   :  { %v1735_v8 = vadd.f32 0.5, %v1734_v55  ;;  %v8838_v55 = vld [vmem:[#allocation70_spill] sm:$0xff] }
 0x38b   :  { %1824 = vmatmul.bf16.vlgmr.msrb.gmra.mxu0 %v1815_v12  ;;  %1837 = vmatmul.bf16.vlgmr.msrb.gmra.mxu1 %v1815_v12 }
 0x38c   :  { %1850 = vmatmul.bf16.vlgmr.msrb.gmra.mxu2 %v1815_v12  ;;  %1863 = vmatmul.bf16.vlgmr.msrb.gmra.mxu3 %v1815_v12  ;;  %v1740_v28 = vmul.f32 %v5728_v2, %v1735_v8  ;;  %v8839_v2 = vld [vmem:[#allocation72_spill] sm:$0xff]  ;;  %v8840_v8 = vld [vmem:[#allocation73_spill] sm:$0xff] }
 0x38d   :  { %1943 = vmatpush.bf16.msrb.mxu0 %v6362_v38  ;;  %1956 = vmatpush.bf16.msrb.mxu1 %v6364_v42 }
 0x38e   :  { %1969 = vmatpush.bf16.msrb.mxu2 %v6366_v48  ;;  %1982 = vmatpush.bf16.msrb.mxu3 %v6369_v49  ;;  %v1868_v3 = vpack.c.bf16 %v1740_v28, %v1740_v28  ;;  %v8841_v28 = vld [vmem:[#allocation76_spill] sm:$0xff] }
 0x391   :  { %1944 = vmatpush.bf16.msrb.mxu0 %v6371_v50  ;;  %1957 = vmatpush.bf16.msrb.mxu1 %v6374_v53 }
 0x392   :  { %1970 = vmatpush.bf16.msrb.mxu2 %v6377_v54  ;;  %1983 = vmatpush.bf16.msrb.mxu3 %v6381_v58 }
 0x395   :  { %1945 = vmatpush.bf16.msrb.mxu0 %v6384_v62  ;;  %1958 = vmatpush.bf16.msrb.mxu1 %v6386_v63 }
 0x396   :  { %1971 = vmatpush.bf16.msrb.mxu2 %v6389_v4  ;;  %1984 = vmatpush.bf16.msrb.mxu3 %v6393_v5 }
 0x399   :  { %1946 = vmatpush.bf16.msrb.mxu0 %v6401_v10  ;;  %1959 = vmatpush.bf16.msrb.mxu1 %v6403_v14 }
 0x39a   :  { %1972 = vmatpush.bf16.msrb.mxu2 %v6405_v15  ;;  %1985 = vmatpush.bf16.msrb.mxu3 %v6408_v19 }
 0x39b   :  { %1877 = vmatmul.bf16.vlgmr.msra.gmra.mxu0 %v1868_v3  ;;  %1890 = vmatmul.bf16.vlgmr.msra.gmra.mxu1 %v1868_v3 }
 0x39c   :  { %1903 = vmatmul.bf16.vlgmr.msra.gmra.mxu2 %v1868_v3  ;;  %1916 = vmatmul.bf16.vlgmr.msra.gmra.mxu3 %v1868_v3  ;;  %v8842_v3 = vld [vmem:[#allocation78_spill] sm:$0xff] }
 0x39d   :  { %1947 = vmatpush.bf16.msrb.mxu0 %v6412_v23  ;;  %1960 = vmatpush.bf16.msrb.mxu1 %v6414_v24 }
 0x39e   :  { %1973 = vmatpush.bf16.msrb.mxu2 %v6417_v27  ;;  %1986 = vmatpush.bf16.msrb.mxu3 %v6425_v32 }
 0x3a1   :  { %1948 = vmatpush.bf16.msrb.mxu0 %v6427_v36  ;;  %1961 = vmatpush.bf16.msrb.mxu1 %v6429_v37 }
 0x3a2   :  { %1974 = vmatpush.bf16.msrb.mxu2 %v6432_v41  ;;  %1987 = vmatpush.bf16.msrb.mxu3 %v6440_v47 }
 0x3a5   :  { %1949 = vmatpush.bf16.msrb.mxu0 %v6442_v56  ;;  %1962 = vmatpush.bf16.msrb.mxu1 %v6444_v57 }
 0x3a6   :  { %1975 = vmatpush.bf16.msrb.mxu2 %v6447_v0  ;;  %1988 = vmatpush.bf16.msrb.mxu3 %v6451_v6 }
 0x3a9   :  { %1950 = vmatpush.bf16.msrb.mxu0 %v6453_v7  ;;  %1963 = vmatpush.bf16.msrb.mxu1 %v8819_v33 }
 0x3aa   :  { %1976 = vmatpush.bf16.msrb.mxu2 %v8820_v60  ;;  %1989 = vmatpush.bf16.msrb.mxu3 %v8821_v46 }
 0x3ac   :  { %1951 = vmatmul.bf16.vlgmr.msrb.gmra.mxu0 %v1815_v12  ;;  %1964 = vmatmul.bf16.vlgmr.msrb.gmra.mxu1 %v1815_v12 }
 0x3ad   :  { %2022 = vmatpush.bf16.msra.mxu0 %v8822_v17  ;;  %2035 = vmatpush.bf16.msra.mxu1 %v8823_v18  ;;  %v8887_v18 = vld [vmem:[#allocation45_spill] sm:$0xff] }
 0x3ae   :  { %1977 = vmatmul.bf16.vlgmr.msrb.gmra.mxu2 %v1815_v12  ;;  %1990 = vmatmul.bf16.vlgmr.msrb.gmra.mxu3 %v1815_v12  ;;  %v8836_v12 = vld [vmem:[#allocation68_spill] sm:$0xff]  ;;  %v450_v17 = vadd.f32 %v8887_v18, %v8672_v26 }
 0x3af   :  { %2048 = vmatpush.bf16.msra.mxu2 %v8824_v45  ;;  %2061 = vmatpush.bf16.msra.mxu3 %v8825_v59 }
 0x3b1   :  { %2023 = vmatpush.bf16.msra.mxu0 %v8826_v20  ;;  %2036 = vmatpush.bf16.msra.mxu1 %v8827_v52 }
 0x3b3   :  { %2049 = vmatpush.bf16.msra.mxu2 %v8828_v44  ;;  %2062 = vmatpush.bf16.msra.mxu3 %v8829_v34 }
 0x3b5   :  { %2024 = vmatpush.bf16.msra.mxu0 %v8830_v13  ;;  %2037 = vmatpush.bf16.msra.mxu1 %v8831_v11 }
 0x3b7   :  { %2050 = vmatpush.bf16.msra.mxu2 %v8832_v51  ;;  %2063 = vmatpush.bf16.msra.mxu3 %v8833_v35  ;;  %v8843_v51 = vld [vmem:[#allocation79_spill] sm:$0xff]  ;;  %v8844_v35 = vld [vmem:[#allocation80_spill] sm:$0xff] }
 0x3b9   :  { %2025 = vmatpush.bf16.msra.mxu0 %v8834_v40  ;;  %2038 = vmatpush.bf16.msra.mxu1 %v8835_v31  ;;  %v8845_v40 = vld [vmem:[#allocation81_spill] sm:$0xff]  ;;  %v8846_v31 = vld [vmem:[#allocation82_spill] sm:$0xff] }
 0x3bb   :  { %2051 = vmatpush.bf16.msra.mxu2 %v8836_v12  ;;  %2064 = vmatpush.bf16.msra.mxu3 %v8837_v25  ;;  %v8847_v12 = vld [vmem:[#allocation84_spill] sm:$0xff]  ;;  %v8848_v25 = vld [vmem:[#allocation85_spill] sm:$0xff] }
 0x3bd   :  { %2026 = vmatpush.bf16.msra.mxu0 %v8838_v55  ;;  %2039 = vmatpush.bf16.msra.mxu1 %v8839_v2  ;;  %v8849_v55 = vld [vmem:[#allocation88_spill] sm:$0xff]  ;;  %v8850_v2 = vld [vmem:[#allocation90_spill] sm:$0xff] }
 0x3bf   :  { %2052 = vmatpush.bf16.msra.mxu2 %v8840_v8  ;;  %2065 = vmatpush.bf16.msra.mxu3 %v8841_v28  ;;  %v8851_v8 = vld [vmem:[#allocation91_spill] sm:$0xff]  ;;  %v8852_v28 = vld [vmem:[#allocation94_spill] sm:$0xff] }
 0x3c1   :  { %2027 = vmatpush.bf16.msra.mxu0 %v8842_v3  ;;  %2040 = vmatpush.bf16.msra.mxu1 %v8843_v51  ;;  %v8853_v3 = vld [vmem:[#allocation95_spill] sm:$0xff]  ;;  %v8854_v51 = vld [vmem:[#allocation92_spill] sm:$0xff] }
 0x3c3   :  { %2053 = vmatpush.bf16.msra.mxu2 %v8844_v35  ;;  %2066 = vmatpush.bf16.msra.mxu3 %v8845_v40  ;;  %v8855_v35 = vld [vmem:[#allocation93_spill] sm:$0xff]  ;;  %v8856_v40 = vld [vmem:[#allocation96_spill] sm:$0xff] }
 0x3c5   :  { %2028 = vmatpush.bf16.msra.mxu0 %v8846_v31  ;;  %2041 = vmatpush.bf16.msra.mxu1 %v8847_v12  ;;  %v8857_v31 = vld [vmem:[#allocation98_spill] sm:$0xff]  ;;  %v8858_v12 = vld [vmem:[#allocation99_spill] sm:$0xff] }
 0x3c7   :  { %2054 = vmatpush.bf16.msra.mxu2 %v8848_v25  ;;  %2067 = vmatpush.bf16.msra.mxu3 %v8849_v55  ;;  %v8859_v25 = vld [vmem:[#allocation102_spill] sm:$0xff]  ;;  %v8860_v55 = vld [vmem:[#allocation104_spill] sm:$0xff] }
 0x3c9   :  { %2029 = vmatpush.bf16.msra.mxu0 %v8850_v2  ;;  %2042 = vmatpush.bf16.msra.mxu1 %v8851_v8  ;;  %v8861_v2 = vld [vmem:[#allocation105_spill] sm:$0xff]  ;;  %v8862_v8 = vld [vmem:[#allocation106_spill] sm:$0xff] }
 0x3cb   :  { %2055 = vmatpush.bf16.msra.mxu2 %v8854_v51  ;;  %2068 = vmatpush.bf16.msra.mxu3 %v8855_v35  ;;  %v8865_v51 = vld [vmem:[#allocation109_spill] sm:$0xff]  ;;  %v8866_v35 = vld [vmem:[#allocation111_spill] sm:$0xff] }
 0x3cd   :  { %2075 = vmatpush.bf16.msrb.mxu0 %v8852_v28  ;;  %2088 = vmatpush.bf16.msrb.mxu1 %v8853_v3  ;;  %v8863_v28 = vld [vmem:[#allocation107_spill] sm:$0xff]  ;;  %v8864_v3 = vld [vmem:[#allocation108_spill] sm:$0xff] }
 0x3cf   :  { %2101 = vmatpush.bf16.msrb.mxu2 %v8856_v40  ;;  %2114 = vmatpush.bf16.msrb.mxu3 %v8857_v31  ;;  %v8867_v40 = vld [vmem:[#allocation114_spill] sm:$0xff]  ;;  %v8868_v31 = vld [vmem:[#allocation115_spill] sm:$0xff] }
 0x3d1   :  { %2076 = vmatpush.bf16.msrb.mxu0 %v8858_v12  ;;  %2089 = vmatpush.bf16.msrb.mxu1 %v8859_v25  ;;  %v8869_v12 = vld [vmem:[#allocation117_spill] sm:$0xff]  ;;  %v8870_v25 = vld [vmem:[#allocation118_spill] sm:$0xff] }
 0x3d3   :  { %2102 = vmatpush.bf16.msrb.mxu2 %v8860_v55  ;;  %2115 = vmatpush.bf16.msrb.mxu3 %v8861_v2  ;;  %v8871_v55 = vld [vmem:[#allocation119_spill] sm:$0xff]  ;;  %v8872_v2 = vld [vmem:[#allocation120_spill] sm:$0xff] }
 0x3d5   :  { %2077 = vmatpush.bf16.msrb.mxu0 %v8862_v8  ;;  %2090 = vmatpush.bf16.msrb.mxu1 %v8863_v28  ;;  %v8873_v8 = vld [vmem:[#allocation121_spill] sm:$0xff]  ;;  %v8874_v28 = vld [vmem:[#allocation123_spill] sm:$0xff] }
 0x3d7   :  { %2103 = vmatpush.bf16.msrb.mxu2 %v8864_v3  ;;  %2116 = vmatpush.bf16.msrb.mxu3 %v8865_v51  ;;  %v8875_v3 = vld [vmem:[#allocation126_spill] sm:$0xff]  ;;  %v8876_v51 = vld [vmem:[#allocation127_spill] sm:$0xff] }
 0x3d9   :  { %2078 = vmatpush.bf16.msrb.mxu0 %v8866_v35  ;;  %2091 = vmatpush.bf16.msrb.mxu1 %v8867_v40  ;;  %v8877_v35 = vld [vmem:[#allocation130_spill] sm:$0xff]  ;;  %v8878_v40 = vld [vmem:[#allocation131_spill] sm:$0xff] }
 0x3db   :  { %2104 = vmatpush.bf16.msrb.mxu2 %v8868_v31  ;;  %2117 = vmatpush.bf16.msrb.mxu3 %v8869_v12  ;;  %v8879_v31 = vld [vmem:[#allocation133_spill] sm:$0xff]  ;;  %v8880_v12 = vld [vmem:[#allocation134_spill] sm:$0xff] }
 0x3dd   :  { %2079 = vmatpush.bf16.msrb.mxu0 %v8870_v25  ;;  %2092 = vmatpush.bf16.msrb.mxu1 %v8871_v55  ;;  %v8881_v25 = vld [vmem:[#allocation135_spill] sm:$0xff]  ;;  %v8882_v55 = vld [vmem:[#allocation137_spill] sm:$0xff] }
 0x3df   :  { %2105 = vmatpush.bf16.msrb.mxu2 %v8872_v2  ;;  %2118 = vmatpush.bf16.msrb.mxu3 %v8873_v8  ;;  %v8883_v2 = vld [vmem:[#allocation139_spill] sm:$0xff]  ;;  %v8884_v8 = vld [vmem:[#allocation140_spill] sm:$0xff] }
 0x3e1   :  { %2080 = vmatpush.bf16.msrb.mxu0 %v8874_v28  ;;  %2093 = vmatpush.bf16.msrb.mxu1 %v8875_v3  ;;  %v8885_v28 = vld [vmem:[#allocation141_spill] sm:$0xff] }
 0x3e3   :  { %2106 = vmatpush.bf16.msrb.mxu2 %v8876_v51  ;;  %2119 = vmatpush.bf16.msrb.mxu3 %v8877_v35 }
 0x3e5   :  { %2081 = vmatpush.bf16.msrb.mxu0 %v8878_v40  ;;  %2094 = vmatpush.bf16.msrb.mxu1 %v8879_v31 }
 0x3e7   :  { %2107 = vmatpush.bf16.msrb.mxu2 %v8880_v12  ;;  %2120 = vmatpush.bf16.msrb.mxu3 %v8881_v25 }
 0x3e9   :  { %2082 = vmatpush.bf16.msrb.mxu0 %v8882_v55  ;;  %2095 = vmatpush.bf16.msrb.mxu1 %v8883_v2 }
 0x3eb   :  { %2108 = vmatpush.bf16.msrb.mxu2 %v8884_v8  ;;  %2121 = vmatpush.bf16.msrb.mxu3 %v8885_v28  ;;  %v8886_v28 = vld [vmem:[#allocation44_spill] sm:$0xff] }
 0x3ec   :  { %v411_v45 = vadd.f32 %v8886_v28, %v8743_v43  ;;  %v8889_v28 = vld [vmem:[#allocation50_spill] sm:$0xff] }
 0x3ed   :  { %v528_v43 = vadd.f32 %v8889_v28, %v8676_v29 }
 0x408   :  { %v1825_v3 = vpop.f32.mrf.mxu0  ;;  %v1838_v51 = vpop.f32.mrf.mxu1 }
 0x409   :  { %v1826_v2 = vadd.f32 %v1825_v3, %v8741_v1 }
 0x40f   :  { %v1851_v11 = vpop.f32.mrf.mxu2  ;;  %v1864_v35 = vpop.f32.mrf.mxu3 }
 0x410   :  { %v1827_v13 = vpop.f32.mrf.mxu0  ;;  %v1840_v40 = vpop.f32.mrf.mxu1 }
 0x411   :  { %v1839_v13 = vadd.f32 %v1838_v51, %v8742_v39 }
 0x417   :  { %v1853_v34 = vpop.f32.mrf.mxu2  ;;  %v1866_v31 = vpop.f32.mrf.mxu3 }
 0x418   :  { %v1878_v44 = vpop.f32.mrf.mxu0  ;;  %v1891_v12 = vpop.f32.mrf.mxu1 }
 0x419   :  { %v1921_v34 = vadd.f32 %v1878_v44, %v1826_v2  ;;  %v1922_v46 = vadd.f32 %v1891_v12, %v1839_v13 }
 0x41b   :  { %v1925_v7 = vmul.f32 0.5, %v1921_v34  ;;  %v1929_v3 = vmul.f32 0.5, %v1922_v46  ;;  %v1852_v46 = vadd.f32 %v1851_v11, %v6910_v21 }
 0x41f   :  { %v1904_v52 = vpop.f32.mrf.mxu2  ;;  %v1917_v25 = vpop.f32.mrf.mxu3 }
 0x420   :  { %v1880_v20 = vpop.f32.mrf.mxu0  ;;  %v1893_v55 = vpop.f32.mrf.mxu1  ;;  %v1923_v34 = vadd.f32 %v1904_v52, %v1852_v46 }
 0x427   :  { %v1906_v59 = vpop.f32.mrf.mxu2  ;;  %v1919_v8 = vpop.f32.mrf.mxu3 }
 0x428   :  { %v8888_v59 = vld [vmem:[#allocation47_spill] sm:$0xff] }
 0x429   :  { %v1952_v40 = vpop.f32.mrf.mxu0  ;;  %v1965_v31 = vpop.f32.mrf.mxu1  ;;  %v489_v8 = vadd.f32 %v8888_v59, %v8674_v30 }
 0x42a   :  { %v1995_v60 = vadd.f32 %v1952_v40, %v411_v45  ;;  %v1996_v33 = vadd.f32 %v1965_v31, %v450_v17 }
 0x42c   :  { %v1999_v20 = vmul.f32 0.5, %v1995_v60  ;;  %v2003_v55 = vmul.f32 0.5, %v1996_v33 }
 0x42e   :  { %5729 = vtanh.f32 %v1999_v20 }
 0x42f   :  { %5731 = vtanh.f32 %v2003_v55 }
 0x430   :  { %5733 = vtanh.f32 %v1925_v7 }
 0x431   :  { %v1978_v18 = vpop.f32.mrf.mxu2  ;;  %v1991_v51 = vpop.f32.mrf.mxu3  ;;  %5735 = vtanh.f32 %v1929_v3 }
 0x432   :  { %v1997_v44 = vadd.f32 %v1978_v18, %v489_v8  ;;  %v1998_v2 = vadd.f32 %v1991_v51, %v528_v43  ;;  %v1954_v12 = vpop.f32.mrf.mxu0  ;;  %v1967_v45 = vpop.f32.mrf.mxu1  ;;  %v1865_v18 = vadd.f32 %v1864_v35, %v6913_v22 }
 0x433   :  { %v644_v12 = vlaneseq }
 0x434   :  { %5737 = vtanh.f32 %v1997_v44  ;;  %v2008_v33 = vmul.f32 0.5, %v1998_v2  ;;  %v5730_v60 = vpop.eup %5729  ;;  %v1924_v52 = vadd.f32 %v1917_v25, %v1865_v18  ;;  %v8890_v18 = vld [vmem:[#allocation28_spill] sm:$0xff] }
 0x435   :  { %v5732_v17 = vpop.eup %5731  ;;  %v2001_v13 = vmul.f32 0.5, %v5730_v60 }
 0x436   :  { %v2005_v40 = vmul.f32 0.5, %v5732_v17  ;;  %5739 = vtanh.f32 %v2008_v33  ;;  %v5734_v31 = vpop.eup %5733  ;;  %v1934_v17 = vmul.f32 0.5, %v1924_v52  ;;  %v8894_v52 = vld [vmem:[#allocation46_spill] sm:$0xff] }
 0x437   :  { %v2002_v20 = vadd.f32 0.5, %v2001_v13  ;;  %v5736_v55 = vpop.eup %5735  ;;  %5741 = vtanh.f32 %v1923_v34  ;;  %v1927_v51 = vmul.f32 0.5, %v5734_v31  ;;  %v7271_v13 = vand.u32 127, %v644_v12  ;;  %v8895_v12 = vld [vmem:[#allocation48_spill] sm:$0xff] }
 0x438   :  { %v2006_v59 = vadd.f32 0.5, %v2005_v40  ;;  %v1931_v11 = vmul.f32 0.5, %v5736_v55 }
 0x439   :  { %v1980_v7 = vpop.f32.mrf.mxu2  ;;  %v1993_v8 = vpop.f32.mrf.mxu3  ;;  %v1928_v45 = vadd.f32 0.5, %v1927_v51  ;;  %vm646_vm0 = vcmp.ge.s32.totalorder %v7271_v13, 96  ;;  %v8891_v51 = vld [vmem:[#allocation29_spill] sm:$0xff] }
 0x43a   :  { %v5738_v43 = vpop.eup %5737  ;;  %v2012_v3 = vmul.f32 %v2006_v59, %v7148_v16  ;;  %v1932_v33 = vadd.f32 0.5, %v1931_v11  ;;  %v8892_v11 = vld [vmem:[#allocation30_spill] sm:$0xff] }
 0x43b   :  { %v2013_v28 = vmul.f32 %v5738_v43, %v2002_v20 }
 0x43c   :  { %v5740_v44 = vpop.eup %5739  ;;  %v1938_v34 = vmul.f32 %v1932_v33, %v7154_v61  ;;  %v8897_v33 = vld [vmem:[#allocation52_spill] sm:$0xff] }
 0x43d   :  { %v7268_v2 = vadd.f32 %v2013_v28, %v2012_v3  ;;  %v2010_v60 = vmul.f32 0.5, %v5740_v44  ;;  %v5742_v46 = vpop.eup %5741  ;;  %v8893_v44 = vld [vmem:[#allocation31_spill] sm:$0xff] }
 0x43e   :  { %v1939_v40 = vmul.f32 %v5742_v46, %v1928_v45  ;;  %v8896_v45 = vld [vmem:[#allocation49_spill] sm:$0xff]  ;;  %v8899_v46 = vld [vmem:[#allocation55_spill] sm:$0xff] }
 0x43f   :  { %5743 = vtanh.f32 %v7268_v2  ;;  %v2011_v35 = vadd.f32 0.5, %v2010_v60  ;;  %v8898_v60 = vld [vmem:[#allocation54_spill] sm:$0xff] }
 0x440   :  { %5745 = vtanh.f32 %v1934_v17  ;;  %v7275_v25 = vadd.f32 %v1939_v40, %v1938_v34  ;;  %v8900_v17 = vld [vmem:[#allocation56_spill] sm:$0xff]  ;;  %v8901_v34 = vld [vmem:[#allocation57_spill] sm:$0xff]  ;;  %v8902_v40 = vld [vmem:[#allocation58_spill] sm:$0xff] }
 0x442   :  { %5747 = vtanh.f32 %v7275_v25 }
 0x445   :  { %v5744_v31 = vpop.eup %5743 }
 0x446   :  { %v2016_v20 = vmul.f32 %v5744_v31, %v2011_v35  ;;  %v5746_v7 = vpop.eup %5745  ;;  %v8903_v35 = vld [vmem:[#allocation60_spill] sm:$0xff]  ;;  %v8904_v31 = vld [vmem:[#allocation61_spill] sm:$0xff] }
 0x447   :  { %v1936_v61 = vmul.f32 0.5, %v5746_v7  ;;  %v8908_v7 = vld [vmem:[#allocation68_spill] sm:$0xff] }
 0x448   :  { %v2019_v55 = vsel %vm646_vm0, %v2016_v20, %v7152_v9  ;;  %v5748_v8 = vpop.eup %5747  ;;  %v8905_v20 = vld [vmem:[#allocation64_spill] sm:$0xff] }
 0x449   :  { %v2021_v59 = vpack.c.bf16 %v2019_v55, %v2019_v55  ;;  %v1937_v43 = vadd.f32 0.5, %v1936_v61  ;;  %v8906_v55 = vld [vmem:[#allocation66_spill] sm:$0xff]  ;;  %v8909_v61 = vld [vmem:[#allocation69_spill] sm:$0xff] }
 0x44b   :  { %2030 = vmatmul.bf16.vlgmr.msra.gmra.mxu0 %v2021_v59  ;;  %2043 = vmatmul.bf16.vlgmr.msra.gmra.mxu1 %v2021_v59  ;;  %v7289_v3 = vmul.f32 %v5748_v8, %v1937_v43  ;;  %v8910_v8 = vld [vmem:[#allocation70_spill] sm:$0xff]  ;;  %v8911_v43 = vld [vmem:[#allocation72_spill] sm:$0xff] }
 0x44c   :  { %2056 = vmatmul.bf16.vlgmr.msra.gmra.mxu2 %v2021_v59  ;;  %2069 = vmatmul.bf16.vlgmr.msra.gmra.mxu3 %v2021_v59 }
 0x44d   :  { %2151 = vmatpush.bf16.msra.mxu0 %v6362_v38  ;;  %2164 = vmatpush.bf16.msra.mxu1 %v6364_v42  ;;  %v2074_v28 = vpack.c.bf16 %v7289_v3, %v7289_v3 }
 0x44e   :  { %2177 = vmatpush.bf16.msra.mxu2 %v6366_v48  ;;  %2190 = vmatpush.bf16.msra.mxu3 %v6369_v49 }
 0x451   :  { %2152 = vmatpush.bf16.msra.mxu0 %v6371_v50  ;;  %2165 = vmatpush.bf16.msra.mxu1 %v6374_v53 }
 0x452   :  { %2178 = vmatpush.bf16.msra.mxu2 %v6377_v54  ;;  %2191 = vmatpush.bf16.msra.mxu3 %v6381_v58 }
 0x455   :  { %2153 = vmatpush.bf16.msra.mxu0 %v6384_v62  ;;  %2166 = vmatpush.bf16.msra.mxu1 %v6386_v63 }
 0x456   :  { %2179 = vmatpush.bf16.msra.mxu2 %v6389_v4  ;;  %2192 = vmatpush.bf16.msra.mxu3 %v6393_v5 }
 0x459   :  { %2154 = vmatpush.bf16.msra.mxu0 %v6401_v10  ;;  %2167 = vmatpush.bf16.msra.mxu1 %v6403_v14 }
 0x45a   :  { %2180 = vmatpush.bf16.msra.mxu2 %v6405_v15  ;;  %2193 = vmatpush.bf16.msra.mxu3 %v6408_v19 }
 0x45b   :  { %2083 = vmatmul.bf16.vlgmr.msrb.gmra.mxu0 %v2074_v28  ;;  %2096 = vmatmul.bf16.vlgmr.msrb.gmra.mxu1 %v2074_v28 }
 0x45c   :  { %2109 = vmatmul.bf16.vlgmr.msrb.gmra.mxu2 %v2074_v28  ;;  %2122 = vmatmul.bf16.vlgmr.msrb.gmra.mxu3 %v2074_v28  ;;  %v8912_v28 = vld [vmem:[#allocation73_spill] sm:$0xff] }
 0x45d   :  { %2155 = vmatpush.bf16.msra.mxu0 %v6412_v23  ;;  %2168 = vmatpush.bf16.msra.mxu1 %v6414_v24 }
 0x45e   :  { %2181 = vmatpush.bf16.msra.mxu2 %v6417_v27  ;;  %2194 = vmatpush.bf16.msra.mxu3 %v6425_v32 }
 0x461   :  { %2156 = vmatpush.bf16.msra.mxu0 %v6427_v36  ;;  %2169 = vmatpush.bf16.msra.mxu1 %v6429_v37 }
 0x462   :  { %2182 = vmatpush.bf16.msra.mxu2 %v6432_v41  ;;  %2195 = vmatpush.bf16.msra.mxu3 %v6440_v47 }
 0x465   :  { %2157 = vmatpush.bf16.msra.mxu0 %v6442_v56  ;;  %2170 = vmatpush.bf16.msra.mxu1 %v6444_v57 }
 0x466   :  { %2183 = vmatpush.bf16.msra.mxu2 %v6447_v0  ;;  %2196 = vmatpush.bf16.msra.mxu3 %v6451_v6 }
 0x469   :  { %2158 = vmatpush.bf16.msra.mxu0 %v8890_v18  ;;  %2171 = vmatpush.bf16.msra.mxu1 %v8891_v51  ;;  %v8959_v51 = vld [vmem:[#allocation51_spill] sm:$0xff] }
 0x46a   :  { %2184 = vmatpush.bf16.msra.mxu2 %v8892_v11  ;;  %2197 = vmatpush.bf16.msra.mxu3 %v8893_v44  ;;  %v8958_v11 = vld [vmem:[#allocation128_spill] sm:$0xff] }
 0x46c   :  { %2159 = vmatmul.bf16.vlgmr.msra.gmra.mxu0 %v2021_v59  ;;  %2172 = vmatmul.bf16.vlgmr.msra.gmra.mxu1 %v2021_v59 }
 0x46d   :  { %2228 = vmatpush.bf16.msrb.mxu0 %v8894_v52  ;;  %2241 = vmatpush.bf16.msrb.mxu1 %v8895_v12 }
 0x46e   :  { %2185 = vmatmul.bf16.vlgmr.msra.gmra.mxu2 %v2021_v59  ;;  %2198 = vmatmul.bf16.vlgmr.msra.gmra.mxu3 %v2021_v59  ;;  %v8907_v59 = vld [vmem:[#allocation67_spill] sm:$0xff] }
 0x46f   :  { %2254 = vmatpush.bf16.msrb.mxu2 %v8896_v45  ;;  %2267 = vmatpush.bf16.msrb.mxu3 %v8897_v33 }
 0x471   :  { %2229 = vmatpush.bf16.msrb.mxu0 %v8898_v60  ;;  %2242 = vmatpush.bf16.msrb.mxu1 %v8899_v46 }
 0x473   :  { %2255 = vmatpush.bf16.msrb.mxu2 %v8900_v17  ;;  %2268 = vmatpush.bf16.msrb.mxu3 %v8901_v34 }
 0x475   :  { %2230 = vmatpush.bf16.msrb.mxu0 %v8902_v40  ;;  %2243 = vmatpush.bf16.msrb.mxu1 %v8903_v35  ;;  %v8913_v40 = vld [vmem:[#allocation76_spill] sm:$0xff]  ;;  %v8914_v35 = vld [vmem:[#allocation78_spill] sm:$0xff] }
 0x477   :  { %2256 = vmatpush.bf16.msrb.mxu2 %v8904_v31  ;;  %2269 = vmatpush.bf16.msrb.mxu3 %v8905_v20  ;;  %v8915_v31 = vld [vmem:[#allocation79_spill] sm:$0xff]  ;;  %v8916_v20 = vld [vmem:[#allocation80_spill] sm:$0xff] }
 0x479   :  { %2231 = vmatpush.bf16.msrb.mxu0 %v8906_v55  ;;  %2244 = vmatpush.bf16.msrb.mxu1 %v8907_v59  ;;  %v8917_v55 = vld [vmem:[#allocation81_spill] sm:$0xff]  ;;  %v8918_v59 = vld [vmem:[#allocation82_spill] sm:$0xff] }
 0x47b   :  { %2257 = vmatpush.bf16.msrb.mxu2 %v8908_v7  ;;  %2270 = vmatpush.bf16.msrb.mxu3 %v8909_v61  ;;  %v8919_v7 = vld [vmem:[#allocation84_spill] sm:$0xff]  ;;  %v8920_v61 = vld [vmem:[#allocation85_spill] sm:$0xff] }
 0x47d   :  { %2232 = vmatpush.bf16.msrb.mxu0 %v8910_v8  ;;  %2245 = vmatpush.bf16.msrb.mxu1 %v8911_v43  ;;  %v8921_v8 = vld [vmem:[#allocation88_spill] sm:$0xff]  ;;  %v8922_v43 = vld [vmem:[#allocation90_spill] sm:$0xff] }
 0x47f   :  { %2258 = vmatpush.bf16.msrb.mxu2 %v8912_v28  ;;  %2271 = vmatpush.bf16.msrb.mxu3 %v8913_v40  ;;  %v8923_v28 = vld [vmem:[#allocation91_spill] sm:$0xff]  ;;  %v8924_v40 = vld [vmem:[#allocation94_spill] sm:$0xff] }
 0x481   :  { %2233 = vmatpush.bf16.msrb.mxu0 %v8914_v35  ;;  %2246 = vmatpush.bf16.msrb.mxu1 %v8915_v31  ;;  %v8925_v35 = vld [vmem:[#allocation95_spill] sm:$0xff]  ;;  %v8926_v31 = vld [vmem:[#allocation92_spill] sm:$0xff] }
 0x483   :  { %2259 = vmatpush.bf16.msrb.mxu2 %v8916_v20  ;;  %2272 = vmatpush.bf16.msrb.mxu3 %v8917_v55  ;;  %v8927_v20 = vld [vmem:[#allocation93_spill] sm:$0xff]  ;;  %v8928_v55 = vld [vmem:[#allocation96_spill] sm:$0xff] }
 0x485   :  { %2234 = vmatpush.bf16.msrb.mxu0 %v8918_v59  ;;  %2247 = vmatpush.bf16.msrb.mxu1 %v8919_v7  ;;  %v8929_v59 = vld [vmem:[#allocation98_spill] sm:$0xff]  ;;  %v8930_v7 = vld [vmem:[#allocation99_spill] sm:$0xff] }
 0x487   :  { %2260 = vmatpush.bf16.msrb.mxu2 %v8920_v61  ;;  %2273 = vmatpush.bf16.msrb.mxu3 %v8921_v8  ;;  %v8931_v61 = vld [vmem:[#allocation102_spill] sm:$0xff]  ;;  %v8932_v8 = vld [vmem:[#allocation104_spill] sm:$0xff] }
 0x489   :  { %2235 = vmatpush.bf16.msrb.mxu0 %v8922_v43  ;;  %2248 = vmatpush.bf16.msrb.mxu1 %v8923_v28  ;;  %v8933_v43 = vld [vmem:[#allocation105_spill] sm:$0xff]  ;;  %v8934_v28 = vld [vmem:[#allocation106_spill] sm:$0xff] }
 0x48b   :  { %2261 = vmatpush.bf16.msrb.mxu2 %v8926_v31  ;;  %2274 = vmatpush.bf16.msrb.mxu3 %v8927_v20  ;;  %v8937_v31 = vld [vmem:[#allocation109_spill] sm:$0xff]  ;;  %v8938_v20 = vld [vmem:[#allocation111_spill] sm:$0xff] }
 0x48d   :  { %2281 = vmatpush.bf16.msra.mxu0 %v8924_v40  ;;  %2294 = vmatpush.bf16.msra.mxu1 %v8925_v35  ;;  %v8935_v40 = vld [vmem:[#allocation107_spill] sm:$0xff]  ;;  %v8936_v35 = vld [vmem:[#allocation108_spill] sm:$0xff] }
 0x48f   :  { %2307 = vmatpush.bf16.msra.mxu2 %v8928_v55  ;;  %2320 = vmatpush.bf16.msra.mxu3 %v8929_v59  ;;  %v8939_v55 = vld [vmem:[#allocation114_spill] sm:$0xff]  ;;  %v8940_v59 = vld [vmem:[#allocation115_spill] sm:$0xff] }
 0x491   :  { %2282 = vmatpush.bf16.msra.mxu0 %v8930_v7  ;;  %2295 = vmatpush.bf16.msra.mxu1 %v8931_v61  ;;  %v8941_v7 = vld [vmem:[#allocation117_spill] sm:$0xff]  ;;  %v8942_v61 = vld [vmem:[#allocation118_spill] sm:$0xff] }
 0x493   :  { %2308 = vmatpush.bf16.msra.mxu2 %v8932_v8  ;;  %2321 = vmatpush.bf16.msra.mxu3 %v8933_v43  ;;  %v8943_v8 = vld [vmem:[#allocation119_spill] sm:$0xff]  ;;  %v8944_v43 = vld [vmem:[#allocation120_spill] sm:$0xff] }
 0x495   :  { %2283 = vmatpush.bf16.msra.mxu0 %v8934_v28  ;;  %2296 = vmatpush.bf16.msra.mxu1 %v8935_v40  ;;  %v8945_v28 = vld [vmem:[#allocation121_spill] sm:$0xff]  ;;  %v8946_v40 = vld [vmem:[#allocation123_spill] sm:$0xff] }
 0x497   :  { %2309 = vmatpush.bf16.msra.mxu2 %v8936_v35  ;;  %2322 = vmatpush.bf16.msra.mxu3 %v8937_v31  ;;  %v8947_v35 = vld [vmem:[#allocation126_spill] sm:$0xff]  ;;  %v8948_v31 = vld [vmem:[#allocation127_spill] sm:$0xff] }
 0x499   :  { %2284 = vmatpush.bf16.msra.mxu0 %v8938_v20  ;;  %2297 = vmatpush.bf16.msra.mxu1 %v8939_v55  ;;  %v8949_v20 = vld [vmem:[#allocation130_spill] sm:$0xff]  ;;  %v8950_v55 = vld [vmem:[#allocation131_spill] sm:$0xff] }
 0x49b   :  { %2310 = vmatpush.bf16.msra.mxu2 %v8940_v59  ;;  %2323 = vmatpush.bf16.msra.mxu3 %v8941_v7  ;;  %v8951_v59 = vld [vmem:[#allocation133_spill] sm:$0xff]  ;;  %v8952_v7 = vld [vmem:[#allocation134_spill] sm:$0xff] }
 0x49d   :  { %2285 = vmatpush.bf16.msra.mxu0 %v8942_v61  ;;  %2298 = vmatpush.bf16.msra.mxu1 %v8943_v8  ;;  %v8953_v61 = vld [vmem:[#allocation135_spill] sm:$0xff]  ;;  %v8954_v8 = vld [vmem:[#allocation137_spill] sm:$0xff] }
 0x49f   :  { %2311 = vmatpush.bf16.msra.mxu2 %v8944_v43  ;;  %2324 = vmatpush.bf16.msra.mxu3 %v8945_v28  ;;  %v8955_v43 = vld [vmem:[#allocation139_spill] sm:$0xff]  ;;  %v8956_v28 = vld [vmem:[#allocation140_spill] sm:$0xff] }
 0x4a1   :  { %2286 = vmatpush.bf16.msra.mxu0 %v8946_v40  ;;  %2299 = vmatpush.bf16.msra.mxu1 %v8947_v35  ;;  %v8957_v40 = vld [vmem:[#allocation141_spill] sm:$0xff] }
 0x4a3   :  { %2312 = vmatpush.bf16.msra.mxu2 %v8948_v31  ;;  %2325 = vmatpush.bf16.msra.mxu3 %v8949_v20 }
 0x4a5   :  { %2287 = vmatpush.bf16.msra.mxu0 %v8950_v55  ;;  %2300 = vmatpush.bf16.msra.mxu1 %v8951_v59 }
 0x4a7   :  { %2313 = vmatpush.bf16.msra.mxu2 %v8952_v7  ;;  %2326 = vmatpush.bf16.msra.mxu3 %v8953_v61 }
 0x4a9   :  { %2288 = vmatpush.bf16.msra.mxu0 %v8954_v8  ;;  %2301 = vmatpush.bf16.msra.mxu1 %v8955_v43 }
 0x4ab   :  { %2314 = vmatpush.bf16.msra.mxu2 %v8956_v28  ;;  %2327 = vmatpush.bf16.msra.mxu3 %v8957_v40 }
 0x4c8   :  { %v2031_v35 = vpop.f32.mrf.mxu0  ;;  %v2044_v31 = vpop.f32.mrf.mxu1 }
 0x4c9   :  { %v2032_v43 = vadd.f32 %v2031_v35, %v8741_v1  ;;  %v2045_v28 = vadd.f32 %v2044_v31, %v8742_v39 }
 0x4cf   :  { %v2057_v34 = vpop.f32.mrf.mxu2  ;;  %v2070_v20 = vpop.f32.mrf.mxu3 }
 0x4d0   :  { %v2033_v17 = vpop.f32.mrf.mxu0  ;;  %v2046_v55 = vpop.f32.mrf.mxu1 }
 0x4d1   :  { %v413_v17 = vadd.f32 %v8959_v51, %v8958_v11 }
 0x4d7   :  { %v2059_v46 = vpop.f32.mrf.mxu2  ;;  %v2072_v59 = vpop.f32.mrf.mxu3 }
 0x4d8   :  { %v2084_v60 = vpop.f32.mrf.mxu0  ;;  %v2097_v7 = vpop.f32.mrf.mxu1  ;;  %v8960_v46 = vld [vmem:[#allocation53_spill] sm:$0xff] }
 0x4d9   :  { %v2127_v12 = vadd.f32 %v2084_v60, %v2032_v43  ;;  %v2128_v40 = vadd.f32 %v2097_v7, %v2045_v28  ;;  %v452_v55 = vadd.f32 %v8960_v46, %v8672_v26  ;;  %v8962_v60 = vld [vmem:[#allocation62_spill] sm:$0xff] }
 0x4da   :  { %v530_v51 = vadd.f32 %v8962_v60, %v8676_v29 }
 0x4db   :  { %v2131_v59 = vmul.f32 0.5, %v2127_v12  ;;  %v2135_v18 = vmul.f32 0.5, %v2128_v40  ;;  %v2058_v12 = vadd.f32 %v2057_v34, %v6910_v21 }
 0x4dd   :  { %5749 = vtanh.f32 %v2131_v59 }
 0x4de   :  { %5751 = vtanh.f32 %v2135_v18 }
 0x4df   :  { %v2110_v33 = vpop.f32.mrf.mxu2  ;;  %v2123_v61 = vpop.f32.mrf.mxu3 }
 0x4e0   :  { %v2086_v45 = vpop.f32.mrf.mxu0  ;;  %v2099_v8 = vpop.f32.mrf.mxu1  ;;  %v2129_v46 = vadd.f32 %v2110_v33, %v2058_v12  ;;  %v2020_v33 = vsel %vm646_vm0, %v7268_v2, %v7148_v16 }
 0x4e3   :  { %v5750_v28 = vpop.eup %5749 }
 0x4e7   :  { %v2112_v52 = vpop.f32.mrf.mxu2  ;;  %v2125_v44 = vpop.f32.mrf.mxu3 }
 0x4e8   :  { %v8961_v52 = vld [vmem:[#allocation59_spill] sm:$0xff] }
 0x4e9   :  { %v2160_v6 = vpop.f32.mrf.mxu0  ;;  %v2173_v0 = vpop.f32.mrf.mxu1  ;;  %v491_v44 = vadd.f32 %v8961_v52, %v8674_v30  ;;  %v2133_v52 = vmul.f32 0.5, %v5750_v28 }
 0x4ea   :  { %v2203_v45 = vadd.f32 %v2160_v6, %v413_v17  ;;  %v2204_v8 = vadd.f32 %v2173_v0, %v452_v55  ;;  %v5752_v17 = vpop.eup %5751 }
 0x4eb   :  { %v2137_v34 = vmul.f32 0.5, %v5752_v17 }
 0x4ec   :  { %v2207_v35 = vmul.f32 0.5, %v2203_v45  ;;  %v2211_v1 = vmul.f32 0.5, %v2204_v8 }
 0x4ee   :  { %5753 = vtanh.f32 %v2207_v35  ;;  %v2071_v35 = vadd.f32 %v2070_v20, %v6913_v22 }
 0x4ef   :  { %5755 = vtanh.f32 %v2211_v1 }
 0x4f1   :  { %v2186_v31 = vpop.f32.mrf.mxu2  ;;  %v2199_v7 = vpop.f32.mrf.mxu3 }
 0x4f2   :  { %v2205_v40 = vadd.f32 %v2186_v31, %v491_v44  ;;  %v2206_v43 = vadd.f32 %v2199_v7, %v530_v51  ;;  %v2162_v6 = vpop.f32.mrf.mxu0  ;;  %v2175_v0 = vpop.f32.mrf.mxu1  ;;  %v2130_v7 = vadd.f32 %v2123_v61, %v2071_v35 }
 0x4f3   :  { %v2134_v6 = vadd.f32 0.5, %v2133_v52  ;;  %v2138_v0 = vadd.f32 0.5, %v2137_v34 }
 0x4f4   :  { %5757 = vtanh.f32 %v2205_v40  ;;  %v2216_v18 = vmul.f32 0.5, %v2206_v43  ;;  %v5754_v55 = vpop.eup %5753  ;;  %v2140_v28 = vmul.f32 0.5, %v2130_v7  ;;  %v8964_v7 = vld [vmem:[#allocation27_spill] sm:$0xff] }
 0x4f5   :  { %v5756_v59 = vpop.eup %5755  ;;  %v2209_v45 = vmul.f32 0.5, %v5754_v55 }
 0x4f6   :  { %v2213_v8 = vmul.f32 0.5, %v5756_v59  ;;  %5759 = vtanh.f32 %v2216_v18  ;;  %v2144_v18 = vmul.f32 %v2138_v0, %v7275_v25  ;;  %v8969_v0 = vld [vmem:[#allocation46_spill] sm:$0xff] }
 0x4f7   :  { %5761 = vtanh.f32 %v2129_v46  ;;  %v2210_v1 = vadd.f32 0.5, %v2209_v45 }
 0x4f8   :  { %v2214_v44 = vadd.f32 0.5, %v2213_v8 }
 0x4f9   :  { %v2188_v60 = vpop.f32.mrf.mxu2  ;;  %v2201_v51 = vpop.f32.mrf.mxu3 }
 0x4fa   :  { %v5758_v31 = vpop.eup %5757  ;;  %v2220_v12 = vmul.f32 %v2214_v44, %v2020_v33  ;;  %v8963_v33 = vld [vmem:[#allocation26_spill] sm:$0xff] }
 0x4fb   :  { %v2221_v40 = vmul.f32 %v5758_v31, %v2210_v1 }
 0x4fc   :  { %v5760_v43 = vpop.eup %5759 }
 0x4fd   :  { %v7397_v46 = vadd.f32 %v2221_v40, %v2220_v12  ;;  %v5762_v20 = vpop.eup %5761  ;;  %v2218_v17 = vmul.f32 0.5, %v5760_v43  ;;  %v8965_v12 = vld [vmem:[#allocation28_spill] sm:$0xff]  ;;  %v8966_v40 = vld [vmem:[#allocation29_spill] sm:$0xff]  ;;  %v8967_v43 = vld [vmem:[#allocation30_spill] sm:$0xff] }
 0x4fe   :  { %v2145_v55 = vmul.f32 %v5762_v20, %v2134_v6  ;;  %v8968_v6 = vld [vmem:[#allocation31_spill] sm:$0xff]  ;;  %v8970_v20 = vld [vmem:[#allocation48_spill] sm:$0xff] }
 0x4ff   :  { %5763 = vtanh.f32 %v7397_v46  ;;  %v2219_v59 = vadd.f32 0.5, %v2218_v17  ;;  %v8972_v17 = vld [vmem:[#allocation52_spill] sm:$0xff] }
 0x500   :  { %5765 = vtanh.f32 %v2140_v28  ;;  %v7401_v2 = vadd.f32 %v2145_v55, %v2144_v18  ;;  %v8971_v28 = vld [vmem:[#allocation49_spill] sm:$0xff]  ;;  %v8973_v18 = vld [vmem:[#allocation54_spill] sm:$0xff]  ;;  %v8974_v55 = vld [vmem:[#allocation55_spill] sm:$0xff] }
 0x502   :  { %5767 = vtanh.f32 %v7401_v2 }
 0x505   :  { %v5764_v45 = vpop.eup %5763 }
 0x506   :  { %v2224_v61 = vmul.f32 %v5764_v45, %v2219_v59  ;;  %v5766_v1 = vpop.eup %5765  ;;  %v8975_v59 = vld [vmem:[#allocation56_spill] sm:$0xff]  ;;  %v8976_v45 = vld [vmem:[#allocation57_spill] sm:$0xff] }
 0x507   :  { %v2142_v52 = vmul.f32 0.5, %v5766_v1  ;;  %v8979_v1 = vld [vmem:[#allocation61_spill] sm:$0xff] }
 0x508   :  { %v2225_v8 = vsel %vm646_vm0, %v2224_v61, %v7152_v9  ;;  %v5768_v34 = vpop.eup %5767  ;;  %v8977_v61 = vld [vmem:[#allocation58_spill] sm:$0xff] }
 0x509   :  { %v2227_v35 = vpack.c.bf16 %v2225_v8, %v2225_v8  ;;  %v2143_v44 = vadd.f32 0.5, %v2142_v52  ;;  %v8978_v8 = vld [vmem:[#allocation60_spill] sm:$0xff] }
 0x50a   :  { %v8980_v52 = vld [vmem:[#allocation64_spill] sm:$0xff] }
 0x50b   :  { %2236 = vmatmul.bf16.vlgmr.msrb.gmra.mxu0 %v2227_v35  ;;  %2249 = vmatmul.bf16.vlgmr.msrb.gmra.mxu1 %v2227_v35  ;;  %v2148_v60 = vmul.f32 %v5768_v34, %v2143_v44  ;;  %v8982_v34 = vld [vmem:[#allocation67_spill] sm:$0xff]  ;;  %v8983_v44 = vld [vmem:[#allocation68_spill] sm:$0xff] }
 0x50c   :  { %2262 = vmatmul.bf16.vlgmr.msrb.gmra.mxu2 %v2227_v35  ;;  %2275 = vmatmul.bf16.vlgmr.msrb.gmra.mxu3 %v2227_v35 }
 0x50d   :  { %2357 = vmatpush.bf16.msrb.mxu0 %v6362_v38  ;;  %2370 = vmatpush.bf16.msrb.mxu1 %v6364_v42  ;;  %v2149_v51 = vsel %vm646_vm0, %v2148_v60, %v7289_v3  ;;  %v8984_v60 = vld [vmem:[#allocation69_spill] sm:$0xff] }
 0x50e   :  { %2383 = vmatpush.bf16.msrb.mxu2 %v6366_v48  ;;  %2396 = vmatpush.bf16.msrb.mxu3 %v6369_v49  ;;  %v2280_v31 = vpack.c.bf16 %v2149_v51, %v2149_v51  ;;  %v8985_v51 = vld [vmem:[#allocation70_spill] sm:$0xff] }
 0x511   :  { %2358 = vmatpush.bf16.msrb.mxu0 %v6371_v50  ;;  %2371 = vmatpush.bf16.msrb.mxu1 %v6374_v53 }
 0x512   :  { %2384 = vmatpush.bf16.msrb.mxu2 %v6377_v54  ;;  %2397 = vmatpush.bf16.msrb.mxu3 %v6381_v58 }
 0x515   :  { %2359 = vmatpush.bf16.msrb.mxu0 %v6384_v62  ;;  %2372 = vmatpush.bf16.msrb.mxu1 %v6386_v63 }
 0x516   :  { %2385 = vmatpush.bf16.msrb.mxu2 %v6389_v4  ;;  %2398 = vmatpush.bf16.msrb.mxu3 %v6393_v5 }
 0x519   :  { %2360 = vmatpush.bf16.msrb.mxu0 %v6401_v10  ;;  %2373 = vmatpush.bf16.msrb.mxu1 %v6403_v14 }
 0x51a   :  { %2386 = vmatpush.bf16.msrb.mxu2 %v6405_v15  ;;  %2399 = vmatpush.bf16.msrb.mxu3 %v6408_v19 }
 0x51b   :  { %2289 = vmatmul.bf16.vlgmr.msra.gmra.mxu0 %v2280_v31  ;;  %2302 = vmatmul.bf16.vlgmr.msra.gmra.mxu1 %v2280_v31 }
 0x51c   :  { %2315 = vmatmul.bf16.vlgmr.msra.gmra.mxu2 %v2280_v31  ;;  %2328 = vmatmul.bf16.vlgmr.msra.gmra.mxu3 %v2280_v31  ;;  %v8986_v31 = vld [vmem:[#allocation72_spill] sm:$0xff] }
 0x51d   :  { %2361 = vmatpush.bf16.msrb.mxu0 %v6412_v23  ;;  %2374 = vmatpush.bf16.msrb.mxu1 %v6414_v24 }
 0x51e   :  { %2387 = vmatpush.bf16.msrb.mxu2 %v6417_v27  ;;  %2400 = vmatpush.bf16.msrb.mxu3 %v6425_v32 }
 0x521   :  { %2362 = vmatpush.bf16.msrb.mxu0 %v6427_v36  ;;  %2375 = vmatpush.bf16.msrb.mxu1 %v6429_v37 }
 0x522   :  { %2388 = vmatpush.bf16.msrb.mxu2 %v6432_v41  ;;  %2401 = vmatpush.bf16.msrb.mxu3 %v6440_v47 }
 0x525   :  { %2363 = vmatpush.bf16.msrb.mxu0 %v6442_v56  ;;  %2376 = vmatpush.bf16.msrb.mxu1 %v6444_v57 }
 0x526   :  { %2389 = vmatpush.bf16.msrb.mxu2 %v8963_v33  ;;  %2402 = vmatpush.bf16.msrb.mxu3 %v8964_v7 }
 0x529   :  { %2364 = vmatpush.bf16.msrb.mxu0 %v8965_v12  ;;  %2377 = vmatpush.bf16.msrb.mxu1 %v8966_v40  ;;  %v9034_v12 = vld [vmem:[#allocation63_spill] sm:$0xff] }
 0x52a   :  { %2390 = vmatpush.bf16.msrb.mxu2 %v8967_v43  ;;  %2403 = vmatpush.bf16.msrb.mxu3 %v8968_v6 }
 0x52c   :  { %2365 = vmatmul.bf16.vlgmr.msrb.gmra.mxu0 %v2227_v35  ;;  %2378 = vmatmul.bf16.vlgmr.msrb.gmra.mxu1 %v2227_v35 }
 0x52d   :  { %2434 = vmatpush.bf16.msra.mxu0 %v8969_v0  ;;  %2447 = vmatpush.bf16.msra.mxu1 %v8970_v20  ;;  %v9033_v0 = vld [vmem:[#allocation144_spill] sm:$0xff] }
 0x52e   :  { %2391 = vmatmul.bf16.vlgmr.msrb.gmra.mxu2 %v2227_v35  ;;  %2404 = vmatmul.bf16.vlgmr.msrb.gmra.mxu3 %v2227_v35  ;;  %v8981_v35 = vld [vmem:[#allocation66_spill] sm:$0xff] }
 0x52f   :  { %2460 = vmatpush.bf16.msra.mxu2 %v8971_v28  ;;  %2473 = vmatpush.bf16.msra.mxu3 %v8972_v17 }
 0x531   :  { %2435 = vmatpush.bf16.msra.mxu0 %v8973_v18  ;;  %2448 = vmatpush.bf16.msra.mxu1 %v8974_v55 }
 0x533   :  { %2461 = vmatpush.bf16.msra.mxu2 %v8975_v59  ;;  %2474 = vmatpush.bf16.msra.mxu3 %v8976_v45  ;;  %v8987_v45 = vld [vmem:[#allocation73_spill] sm:$0xff] }
 0x535   :  { %2436 = vmatpush.bf16.msra.mxu0 %v8977_v61  ;;  %2449 = vmatpush.bf16.msra.mxu1 %v8978_v8  ;;  %v8988_v61 = vld [vmem:[#allocation76_spill] sm:$0xff]  ;;  %v8989_v8 = vld [vmem:[#allocation78_spill] sm:$0xff] }
 0x537   :  { %2462 = vmatpush.bf16.msra.mxu2 %v8979_v1  ;;  %2475 = vmatpush.bf16.msra.mxu3 %v8980_v52  ;;  %v8990_v1 = vld [vmem:[#allocation79_spill] sm:$0xff]  ;;  %v8991_v52 = vld [vmem:[#allocation80_spill] sm:$0xff] }
 0x539   :  { %2437 = vmatpush.bf16.msra.mxu0 %v8981_v35  ;;  %2450 = vmatpush.bf16.msra.mxu1 %v8982_v34  ;;  %v8992_v35 = vld [vmem:[#allocation81_spill] sm:$0xff]  ;;  %v8993_v34 = vld [vmem:[#allocation82_spill] sm:$0xff] }
 0x53b   :  { %2463 = vmatpush.bf16.msra.mxu2 %v8983_v44  ;;  %2476 = vmatpush.bf16.msra.mxu3 %v8984_v60  ;;  %v8994_v44 = vld [vmem:[#allocation84_spill] sm:$0xff]  ;;  %v8995_v60 = vld [vmem:[#allocation85_spill] sm:$0xff] }
 0x53d   :  { %2438 = vmatpush.bf16.msra.mxu0 %v8985_v51  ;;  %2451 = vmatpush.bf16.msra.mxu1 %v8986_v31  ;;  %v8996_v51 = vld [vmem:[#allocation88_spill] sm:$0xff]  ;;  %v8997_v31 = vld [vmem:[#allocation90_spill] sm:$0xff] }
 0x53f   :  { %2464 = vmatpush.bf16.msra.mxu2 %v8987_v45  ;;  %2477 = vmatpush.bf16.msra.mxu3 %v8988_v61  ;;  %v8998_v45 = vld [vmem:[#allocation91_spill] sm:$0xff]  ;;  %v8999_v61 = vld [vmem:[#allocation94_spill] sm:$0xff] }
 0x541   :  { %2439 = vmatpush.bf16.msra.mxu0 %v8989_v8  ;;  %2452 = vmatpush.bf16.msra.mxu1 %v8990_v1  ;;  %v9000_v8 = vld [vmem:[#allocation95_spill] sm:$0xff]  ;;  %v9001_v1 = vld [vmem:[#allocation92_spill] sm:$0xff] }
 0x543   :  { %2465 = vmatpush.bf16.msra.mxu2 %v8991_v52  ;;  %2478 = vmatpush.bf16.msra.mxu3 %v8992_v35  ;;  %v9002_v52 = vld [vmem:[#allocation93_spill] sm:$0xff]  ;;  %v9003_v35 = vld [vmem:[#allocation96_spill] sm:$0xff] }
 0x545   :  { %2440 = vmatpush.bf16.msra.mxu0 %v8993_v34  ;;  %2453 = vmatpush.bf16.msra.mxu1 %v8994_v44  ;;  %v9004_v34 = vld [vmem:[#allocation98_spill] sm:$0xff]  ;;  %v9005_v44 = vld [vmem:[#allocation99_spill] sm:$0xff] }
 0x547   :  { %2466 = vmatpush.bf16.msra.mxu2 %v8995_v60  ;;  %2479 = vmatpush.bf16.msra.mxu3 %v8996_v51  ;;  %v9006_v60 = vld [vmem:[#allocation102_spill] sm:$0xff]  ;;  %v9007_v51 = vld [vmem:[#allocation104_spill] sm:$0xff] }
 0x549   :  { %2441 = vmatpush.bf16.msra.mxu0 %v8997_v31  ;;  %2454 = vmatpush.bf16.msra.mxu1 %v8998_v45  ;;  %v9008_v31 = vld [vmem:[#allocation105_spill] sm:$0xff]  ;;  %v9009_v45 = vld [vmem:[#allocation106_spill] sm:$0xff] }
 0x54b   :  { %2467 = vmatpush.bf16.msra.mxu2 %v9001_v1  ;;  %2480 = vmatpush.bf16.msra.mxu3 %v9002_v52  ;;  %v9012_v1 = vld [vmem:[#allocation109_spill] sm:$0xff]  ;;  %v9013_v52 = vld [vmem:[#allocation111_spill] sm:$0xff] }
 0x54d   :  { %2487 = vmatpush.bf16.msrb.mxu0 %v8999_v61  ;;  %2500 = vmatpush.bf16.msrb.mxu1 %v9000_v8  ;;  %v9010_v61 = vld [vmem:[#allocation107_spill] sm:$0xff]  ;;  %v9011_v8 = vld [vmem:[#allocation108_spill] sm:$0xff] }
 0x54f   :  { %2513 = vmatpush.bf16.msrb.mxu2 %v9003_v35  ;;  %2526 = vmatpush.bf16.msrb.mxu3 %v9004_v34  ;;  %v9014_v35 = vld [vmem:[#allocation114_spill] sm:$0xff]  ;;  %v9015_v34 = vld [vmem:[#allocation115_spill] sm:$0xff] }
 0x551   :  { %2488 = vmatpush.bf16.msrb.mxu0 %v9005_v44  ;;  %2501 = vmatpush.bf16.msrb.mxu1 %v9006_v60  ;;  %v9016_v44 = vld [vmem:[#allocation117_spill] sm:$0xff]  ;;  %v9017_v60 = vld [vmem:[#allocation118_spill] sm:$0xff] }
 0x553   :  { %2514 = vmatpush.bf16.msrb.mxu2 %v9007_v51  ;;  %2527 = vmatpush.bf16.msrb.mxu3 %v9008_v31  ;;  %v9018_v51 = vld [vmem:[#allocation119_spill] sm:$0xff]  ;;  %v9019_v31 = vld [vmem:[#allocation120_spill] sm:$0xff] }
 0x555   :  { %2489 = vmatpush.bf16.msrb.mxu0 %v9009_v45  ;;  %2502 = vmatpush.bf16.msrb.mxu1 %v9010_v61  ;;  %v9020_v45 = vld [vmem:[#allocation121_spill] sm:$0xff]  ;;  %v9021_v61 = vld [vmem:[#allocation123_spill] sm:$0xff] }
 0x557   :  { %2515 = vmatpush.bf16.msrb.mxu2 %v9011_v8  ;;  %2528 = vmatpush.bf16.msrb.mxu3 %v9012_v1  ;;  %v9022_v8 = vld [vmem:[#allocation126_spill] sm:$0xff]  ;;  %v9023_v1 = vld [vmem:[#allocation127_spill] sm:$0xff] }
 0x559   :  { %2490 = vmatpush.bf16.msrb.mxu0 %v9013_v52  ;;  %2503 = vmatpush.bf16.msrb.mxu1 %v9014_v35  ;;  %v9024_v52 = vld [vmem:[#allocation130_spill] sm:$0xff]  ;;  %v9025_v35 = vld [vmem:[#allocation131_spill] sm:$0xff] }
 0x55b   :  { %2516 = vmatpush.bf16.msrb.mxu2 %v9015_v34  ;;  %2529 = vmatpush.bf16.msrb.mxu3 %v9016_v44  ;;  %v9026_v34 = vld [vmem:[#allocation133_spill] sm:$0xff]  ;;  %v9027_v44 = vld [vmem:[#allocation134_spill] sm:$0xff] }
 0x55d   :  { %2491 = vmatpush.bf16.msrb.mxu0 %v9017_v60  ;;  %2504 = vmatpush.bf16.msrb.mxu1 %v9018_v51  ;;  %v9028_v60 = vld [vmem:[#allocation135_spill] sm:$0xff]  ;;  %v9029_v51 = vld [vmem:[#allocation137_spill] sm:$0xff] }
 0x55f   :  { %2517 = vmatpush.bf16.msrb.mxu2 %v9019_v31  ;;  %2530 = vmatpush.bf16.msrb.mxu3 %v9020_v45  ;;  %v9030_v31 = vld [vmem:[#allocation139_spill] sm:$0xff]  ;;  %v9031_v45 = vld [vmem:[#allocation140_spill] sm:$0xff] }
 0x561   :  { %2492 = vmatpush.bf16.msrb.mxu0 %v9021_v61  ;;  %2505 = vmatpush.bf16.msrb.mxu1 %v9022_v8  ;;  %v9032_v61 = vld [vmem:[#allocation141_spill] sm:$0xff] }
 0x563   :  { %2518 = vmatpush.bf16.msrb.mxu2 %v9023_v1  ;;  %2531 = vmatpush.bf16.msrb.mxu3 %v9024_v52 }
 0x565   :  { %2493 = vmatpush.bf16.msrb.mxu0 %v9025_v35  ;;  %2506 = vmatpush.bf16.msrb.mxu1 %v9026_v34 }
 0x567   :  { %2519 = vmatpush.bf16.msrb.mxu2 %v9027_v44  ;;  %2532 = vmatpush.bf16.msrb.mxu3 %v9028_v60 }
 0x569   :  { %2494 = vmatpush.bf16.msrb.mxu0 %v9029_v51  ;;  %2507 = vmatpush.bf16.msrb.mxu1 %v9030_v31 }
 0x56b   :  { %2520 = vmatpush.bf16.msrb.mxu2 %v9031_v45  ;;  %2533 = vmatpush.bf16.msrb.mxu3 %v9032_v61 }
 0x588   :  { %v2237_v8 = vpop.f32.mrf.mxu0  ;;  %v2250_v1 = vpop.f32.mrf.mxu1 }
 0x589   :  { %v2238_v31 = vadd.f32 %v2237_v8, %v9033_v0  ;;  %v2251_v45 = vadd.f32 %v2250_v1, %v8742_v39 }
 0x58f   :  { %v2263_v59 = vpop.f32.mrf.mxu2  ;;  %v2276_v52 = vpop.f32.mrf.mxu3 }
 0x590   :  { %v2239_v55 = vpop.f32.mrf.mxu0  ;;  %v2252_v35 = vpop.f32.mrf.mxu1 }
 0x591   :  { %v416_v55 = vadd.f32 %v9034_v12, %v8958_v11 }
 0x597   :  { %v2265_v18 = vpop.f32.mrf.mxu2  ;;  %v2278_v34 = vpop.f32.mrf.mxu3 }
 0x598   :  { %v2290_v17 = vpop.f32.mrf.mxu0  ;;  %v2303_v44 = vpop.f32.mrf.mxu1  ;;  %v9035_v18 = vld [vmem:[#allocation65_spill] sm:$0xff] }
 0x599   :  { %v2333_v6 = vadd.f32 %v2290_v17, %v2238_v31  ;;  %v2334_v61 = vadd.f32 %v2303_v44, %v2251_v45  ;;  %v455_v35 = vadd.f32 %v9035_v18, %v8672_v26  ;;  %v9037_v17 = vld [vmem:[#allocation74_spill] sm:$0xff] }
 0x59a   :  { %v533_v12 = vadd.f32 %v9037_v17, %v8676_v29 }
 0x59b   :  { %v2337_v34 = vmul.f32 0.5, %v2333_v6  ;;  %v2341_v7 = vmul.f32 0.5, %v2334_v61  ;;  %v2264_v6 = vadd.f32 %v2263_v59, %v6910_v21 }
 0x59d   :  { %5769 = vtanh.f32 %v2337_v34 }
 0x59e   :  { %5771 = vtanh.f32 %v2341_v7 }
 0x59f   :  { %v2316_v28 = vpop.f32.mrf.mxu2  ;;  %v2329_v60 = vpop.f32.mrf.mxu3 }
 0x5a0   :  { %v2292_v20 = vpop.f32.mrf.mxu0  ;;  %v2305_v51 = vpop.f32.mrf.mxu1  ;;  %v2335_v18 = vadd.f32 %v2316_v28, %v2264_v6  ;;  %v2226_v28 = vsel %vm646_vm0, %v7397_v46, %v7148_v16 }
 0x5a3   :  { %v5770_v31 = vpop.eup %5769 }
 0x5a7   :  { %v2318_v43 = vpop.f32.mrf.mxu2  ;;  %v2331_v40 = vpop.f32.mrf.mxu3 }
 0x5a8   :  { %v9036_v43 = vld [vmem:[#allocation71_spill] sm:$0xff] }
 0x5a9   :  { %v2366_v33 = vpop.f32.mrf.mxu0  ;;  %v2379_v57 = vpop.f32.mrf.mxu1  ;;  %v494_v40 = vadd.f32 %v9036_v43, %v8674_v30  ;;  %v2339_v43 = vmul.f32 0.5, %v5770_v31 }
 0x5aa   :  { %v2409_v20 = vadd.f32 %v2366_v33, %v416_v55  ;;  %v2410_v51 = vadd.f32 %v2379_v57, %v455_v35  ;;  %v5772_v55 = vpop.eup %5771 }
 0x5ab   :  { %v2343_v59 = vmul.f32 0.5, %v5772_v55  ;;  %v2150_v55 = vsel %vm646_vm0, %v7401_v2, %v7275_v25 }
 0x5ac   :  { %v2413_v8 = vmul.f32 0.5, %v2409_v20  ;;  %v2417_v0 = vmul.f32 0.5, %v2410_v51 }
 0x5ae   :  { %5773 = vtanh.f32 %v2413_v8  ;;  %v2277_v8 = vadd.f32 %v2276_v52, %v6913_v22 }
 0x5af   :  { %5775 = vtanh.f32 %v2417_v0 }
 0x5b1   :  { %v2392_v45 = vpop.f32.mrf.mxu2  ;;  %v2405_v1 = vpop.f32.mrf.mxu3 }
 0x5b2   :  { %v2411_v61 = vadd.f32 %v2392_v45, %v494_v40  ;;  %v2412_v44 = vadd.f32 %v2405_v1, %v533_v12  ;;  %v2368_v33 = vpop.f32.mrf.mxu0  ;;  %v2381_v57 = vpop.f32.mrf.mxu1  ;;  %v2336_v1 = vadd.f32 %v2329_v60, %v2277_v8 }
 0x5b3   :  { %v2340_v33 = vadd.f32 0.5, %v2339_v43  ;;  %v2344_v57 = vadd.f32 0.5, %v2343_v59 }
 0x5b4   :  { %5777 = vtanh.f32 %v2411_v61  ;;  %v2422_v7 = vmul.f32 0.5, %v2412_v44  ;;  %v5774_v35 = vpop.eup %5773  ;;  %v2346_v31 = vmul.f32 0.5, %v2336_v1  ;;  %v9039_v1 = vld [vmem:[#allocation26_spill] sm:$0xff] }
 0x5b5   :  { %v5776_v34 = vpop.eup %5775  ;;  %v2415_v20 = vmul.f32 0.5, %v5774_v35  ;;  %v2350_v35 = vmul.f32 %v2344_v57, %v2150_v55  ;;  %v9044_v57 = vld [vmem:[#allocation31_spill] sm:$0xff]  ;;  %v9047_v55 = vld [vmem:[#allocation49_spill] sm:$0xff] }
 0x5b6   :  { %v2419_v51 = vmul.f32 0.5, %v5776_v34  ;;  %5779 = vtanh.f32 %v2422_v7 }
 0x5b7   :  { %5781 = vtanh.f32 %v2335_v18  ;;  %v2416_v0 = vadd.f32 0.5, %v2415_v20 }
 0x5b8   :  { %v2420_v40 = vadd.f32 0.5, %v2419_v51 }
 0x5b9   :  { %v2394_v17 = vpop.f32.mrf.mxu2  ;;  %v2407_v12 = vpop.f32.mrf.mxu3 }
 0x5ba   :  { %v5778_v45 = vpop.eup %5777  ;;  %v2426_v6 = vmul.f32 %v2420_v40, %v2226_v28  ;;  %v9038_v28 = vld [vmem:[#allocation25_spill] sm:$0xff] }
 0x5bb   :  { %v2427_v61 = vmul.f32 %v5778_v45, %v2416_v0 }
 0x5bc   :  { %v5780_v44 = vpop.eup %5779 }
 0x5bd   :  { %v7522_v18 = vadd.f32 %v2427_v61, %v2426_v6  ;;  %v5782_v52 = vpop.eup %5781  ;;  %v2424_v7 = vmul.f32 0.5, %v5780_v44  ;;  %v9040_v6 = vld [vmem:[#allocation27_spill] sm:$0xff]  ;;  %v9041_v61 = vld [vmem:[#allocation28_spill] sm:$0xff]  ;;  %v9042_v44 = vld [vmem:[#allocation29_spill] sm:$0xff] }
 0x5be   :  { %v2351_v46 = vmul.f32 %v5782_v52, %v2340_v33  ;;  %v9043_v33 = vld [vmem:[#allocation30_spill] sm:$0xff] }
 0x5bf   :  { %5783 = vtanh.f32 %v7522_v18  ;;  %v2425_v60 = vadd.f32 0.5, %v2424_v7  ;;  %v9045_v52 = vld [vmem:[#allocation46_spill] sm:$0xff]  ;;  %v9048_v7 = vld [vmem:[#allocation52_spill] sm:$0xff] }
 0x5c0   :  { %5785 = vtanh.f32 %v2346_v31  ;;  %v7529_v20 = vadd.f32 %v2351_v46, %v2350_v35  ;;  %v9046_v31 = vld [vmem:[#allocation48_spill] sm:$0xff]  ;;  %v9049_v35 = vld [vmem:[#allocation54_spill] sm:$0xff]  ;;  %v9050_v46 = vld [vmem:[#allocation55_spill] sm:$0xff] }
 0x5c2   :  { %5787 = vtanh.f32 %v7529_v20 }
 0x5c5   :  { %v5784_v34 = vpop.eup %5783 }
 0x5c6   :  { %v2430_v51 = vmul.f32 %v5784_v34, %v2425_v60  ;;  %v5786_v8 = vpop.eup %5785  ;;  %v9051_v60 = vld [vmem:[#allocation56_spill] sm:$0xff]  ;;  %v9052_v34 = vld [vmem:[#allocation57_spill] sm:$0xff] }
 0x5c7   :  { %v2348_v2 = vmul.f32 0.5, %v5786_v8  ;;  %v9055_v8 = vld [vmem:[#allocation61_spill] sm:$0xff] }
 0x5c8   :  { %v2431_v0 = vsel %vm646_vm0, %v2430_v51, %v7152_v9  ;;  %v5788_v59 = vpop.eup %5787  ;;  %v9053_v51 = vld [vmem:[#allocation58_spill] sm:$0xff] }
 0x5c9   :  { %v2433_v43 = vpack.c.bf16 %v2431_v0, %v2431_v0  ;;  %v2349_v40 = vadd.f32 0.5, %v2348_v2  ;;  %v9054_v0 = vld [vmem:[#allocation60_spill] sm:$0xff] }
 0x5ca   :  { %v9056_v2 = vld [vmem:[#allocation64_spill] sm:$0xff] }
 0x5cb   :  { %2442 = vmatmul.bf16.vlgmr.msra.gmra.mxu0 %v2433_v43  ;;  %2455 = vmatmul.bf16.vlgmr.msra.gmra.mxu1 %v2433_v43  ;;  %v2354_v17 = vmul.f32 %v5788_v59, %v2349_v40  ;;  %v9058_v59 = vld [vmem:[#allocation67_spill] sm:$0xff]  ;;  %v9059_v40 = vld [vmem:[#allocation68_spill] sm:$0xff] }
 0x5cc   :  { %2468 = vmatmul.bf16.vlgmr.msra.gmra.mxu2 %v2433_v43  ;;  %2481 = vmatmul.bf16.vlgmr.msra.gmra.mxu3 %v2433_v43 }
 0x5cd   :  { %2563 = vmatpush.bf16.msra.mxu0 %v6362_v38  ;;  %2576 = vmatpush.bf16.msra.mxu1 %v6364_v42  ;;  %v2355_v12 = vsel %vm646_vm0, %v2354_v17, %v7289_v3  ;;  %v9060_v17 = vld [vmem:[#allocation69_spill] sm:$0xff] }
 0x5ce   :  { %2589 = vmatpush.bf16.msra.mxu2 %v6366_v48  ;;  %2602 = vmatpush.bf16.msra.mxu3 %v6369_v49  ;;  %v2486_v45 = vpack.c.bf16 %v2355_v12, %v2355_v12  ;;  %v9061_v12 = vld [vmem:[#allocation70_spill] sm:$0xff] }
 0x5d1   :  { %2564 = vmatpush.bf16.msra.mxu0 %v6371_v50  ;;  %2577 = vmatpush.bf16.msra.mxu1 %v6374_v53 }
 0x5d2   :  { %2590 = vmatpush.bf16.msra.mxu2 %v6377_v54  ;;  %2603 = vmatpush.bf16.msra.mxu3 %v6381_v58 }
 0x5d5   :  { %2565 = vmatpush.bf16.msra.mxu0 %v6384_v62  ;;  %2578 = vmatpush.bf16.msra.mxu1 %v6386_v63 }
 0x5d6   :  { %2591 = vmatpush.bf16.msra.mxu2 %v6389_v4  ;;  %2604 = vmatpush.bf16.msra.mxu3 %v6393_v5 }
 0x5d9   :  { %2566 = vmatpush.bf16.msra.mxu0 %v6401_v10  ;;  %2579 = vmatpush.bf16.msra.mxu1 %v6403_v14 }
 0x5da   :  { %2592 = vmatpush.bf16.msra.mxu2 %v6405_v15  ;;  %2605 = vmatpush.bf16.msra.mxu3 %v6408_v19 }
 0x5db   :  { %2495 = vmatmul.bf16.vlgmr.msrb.gmra.mxu0 %v2486_v45  ;;  %2508 = vmatmul.bf16.vlgmr.msrb.gmra.mxu1 %v2486_v45 }
 0x5dc   :  { %2521 = vmatmul.bf16.vlgmr.msrb.gmra.mxu2 %v2486_v45  ;;  %2534 = vmatmul.bf16.vlgmr.msrb.gmra.mxu3 %v2486_v45  ;;  %v9062_v45 = vld [vmem:[#allocation72_spill] sm:$0xff] }
 0x5dd   :  { %2567 = vmatpush.bf16.msra.mxu0 %v6412_v23  ;;  %2580 = vmatpush.bf16.msra.mxu1 %v6414_v24 }
 0x5de   :  { %2593 = vmatpush.bf16.msra.mxu2 %v6417_v27  ;;  %2606 = vmatpush.bf16.msra.mxu3 %v6425_v32 }
 0x5e1   :  { %2568 = vmatpush.bf16.msra.mxu0 %v6427_v36  ;;  %2581 = vmatpush.bf16.msra.mxu1 %v6429_v37 }
 0x5e2   :  { %2594 = vmatpush.bf16.msra.mxu2 %v6432_v41  ;;  %2607 = vmatpush.bf16.msra.mxu3 %v6440_v47 }
 0x5e5   :  { %2569 = vmatpush.bf16.msra.mxu0 %v6442_v56  ;;  %2582 = vmatpush.bf16.msra.mxu1 %v9038_v28 }
 0x5e6   :  { %2595 = vmatpush.bf16.msra.mxu2 %v9039_v1  ;;  %2608 = vmatpush.bf16.msra.mxu3 %v9040_v6 }
 0x5e9   :  { %2570 = vmatpush.bf16.msra.mxu0 %v9041_v61  ;;  %2583 = vmatpush.bf16.msra.mxu1 %v9042_v44  ;;  %v9110_v61 = vld [vmem:[#allocation75_spill] sm:$0xff] }
 0x5ea   :  { %2596 = vmatpush.bf16.msra.mxu2 %v9043_v33  ;;  %2609 = vmatpush.bf16.msra.mxu3 %v9044_v57 }
 0x5ec   :  { %2571 = vmatmul.bf16.vlgmr.msra.gmra.mxu0 %v2433_v43  ;;  %2584 = vmatmul.bf16.vlgmr.msra.gmra.mxu1 %v2433_v43 }
 0x5ed   :  { %2640 = vmatpush.bf16.msrb.mxu0 %v9045_v52  ;;  %2653 = vmatpush.bf16.msrb.mxu1 %v9046_v31  ;;  %v9109_v52 = vld [vmem:[#allocation144_spill] sm:$0xff] }
 0x5ee   :  { %2597 = vmatmul.bf16.vlgmr.msra.gmra.mxu2 %v2433_v43  ;;  %2610 = vmatmul.bf16.vlgmr.msra.gmra.mxu3 %v2433_v43  ;;  %v9057_v43 = vld [vmem:[#allocation66_spill] sm:$0xff] }
 0x5ef   :  { %2666 = vmatpush.bf16.msrb.mxu2 %v9047_v55  ;;  %2679 = vmatpush.bf16.msrb.mxu3 %v9048_v7 }
 0x5f1   :  { %2641 = vmatpush.bf16.msrb.mxu0 %v9049_v35  ;;  %2654 = vmatpush.bf16.msrb.mxu1 %v9050_v46 }
 0x5f3   :  { %2667 = vmatpush.bf16.msrb.mxu2 %v9051_v60  ;;  %2680 = vmatpush.bf16.msrb.mxu3 %v9052_v34  ;;  %v9063_v34 = vld [vmem:[#allocation73_spill] sm:$0xff] }
 0x5f5   :  { %2642 = vmatpush.bf16.msrb.mxu0 %v9053_v51  ;;  %2655 = vmatpush.bf16.msrb.mxu1 %v9054_v0  ;;  %v9064_v51 = vld [vmem:[#allocation76_spill] sm:$0xff]  ;;  %v9065_v0 = vld [vmem:[#allocation78_spill] sm:$0xff] }
 0x5f7   :  { %2668 = vmatpush.bf16.msrb.mxu2 %v9055_v8  ;;  %2681 = vmatpush.bf16.msrb.mxu3 %v9056_v2  ;;  %v9066_v8 = vld [vmem:[#allocation79_spill] sm:$0xff]  ;;  %v9067_v2 = vld [vmem:[#allocation80_spill] sm:$0xff] }
 0x5f9   :  { %2643 = vmatpush.bf16.msrb.mxu0 %v9057_v43  ;;  %2656 = vmatpush.bf16.msrb.mxu1 %v9058_v59  ;;  %v9068_v43 = vld [vmem:[#allocation81_spill] sm:$0xff]  ;;  %v9069_v59 = vld [vmem:[#allocation82_spill] sm:$0xff] }
 0x5fb   :  { %2669 = vmatpush.bf16.msrb.mxu2 %v9059_v40  ;;  %2682 = vmatpush.bf16.msrb.mxu3 %v9060_v17  ;;  %v9070_v40 = vld [vmem:[#allocation84_spill] sm:$0xff]  ;;  %v9071_v17 = vld [vmem:[#allocation85_spill] sm:$0xff] }
 0x5fd   :  { %2644 = vmatpush.bf16.msrb.mxu0 %v9061_v12  ;;  %2657 = vmatpush.bf16.msrb.mxu1 %v9062_v45  ;;  %v9072_v12 = vld [vmem:[#allocation88_spill] sm:$0xff]  ;;  %v9073_v45 = vld [vmem:[#allocation90_spill] sm:$0xff] }
 0x5ff   :  { %2670 = vmatpush.bf16.msrb.mxu2 %v9063_v34  ;;  %2683 = vmatpush.bf16.msrb.mxu3 %v9064_v51  ;;  %v9074_v34 = vld [vmem:[#allocation91_spill] sm:$0xff]  ;;  %v9075_v51 = vld [vmem:[#allocation94_spill] sm:$0xff] }
 0x601   :  { %2645 = vmatpush.bf16.msrb.mxu0 %v9065_v0  ;;  %2658 = vmatpush.bf16.msrb.mxu1 %v9066_v8  ;;  %v9076_v0 = vld [vmem:[#allocation95_spill] sm:$0xff]  ;;  %v9077_v8 = vld [vmem:[#allocation92_spill] sm:$0xff] }
 0x603   :  { %2671 = vmatpush.bf16.msrb.mxu2 %v9067_v2  ;;  %2684 = vmatpush.bf16.msrb.mxu3 %v9068_v43  ;;  %v9078_v2 = vld [vmem:[#allocation93_spill] sm:$0xff]  ;;  %v9079_v43 = vld [vmem:[#allocation96_spill] sm:$0xff] }
 0x605   :  { %2646 = vmatpush.bf16.msrb.mxu0 %v9069_v59  ;;  %2659 = vmatpush.bf16.msrb.mxu1 %v9070_v40  ;;  %v9080_v59 = vld [vmem:[#allocation98_spill] sm:$0xff]  ;;  %v9081_v40 = vld [vmem:[#allocation99_spill] sm:$0xff] }
 0x607   :  { %2672 = vmatpush.bf16.msrb.mxu2 %v9071_v17  ;;  %2685 = vmatpush.bf16.msrb.mxu3 %v9072_v12  ;;  %v9082_v17 = vld [vmem:[#allocation102_spill] sm:$0xff]  ;;  %v9083_v12 = vld [vmem:[#allocation104_spill] sm:$0xff] }
 0x609   :  { %2647 = vmatpush.bf16.msrb.mxu0 %v9073_v45  ;;  %2660 = vmatpush.bf16.msrb.mxu1 %v9074_v34  ;;  %v9084_v45 = vld [vmem:[#allocation105_spill] sm:$0xff]  ;;  %v9085_v34 = vld [vmem:[#allocation106_spill] sm:$0xff] }
 0x60b   :  { %2673 = vmatpush.bf16.msrb.mxu2 %v9077_v8  ;;  %2686 = vmatpush.bf16.msrb.mxu3 %v9078_v2  ;;  %v9088_v8 = vld [vmem:[#allocation109_spill] sm:$0xff]  ;;  %v9089_v2 = vld [vmem:[#allocation111_spill] sm:$0xff] }
 0x60d   :  { %2693 = vmatpush.bf16.msra.mxu0 %v9075_v51  ;;  %2706 = vmatpush.bf16.msra.mxu1 %v9076_v0  ;;  %v9086_v51 = vld [vmem:[#allocation107_spill] sm:$0xff]  ;;  %v9087_v0 = vld [vmem:[#allocation108_spill] sm:$0xff] }
 0x60f   :  { %2719 = vmatpush.bf16.msra.mxu2 %v9079_v43  ;;  %2732 = vmatpush.bf16.msra.mxu3 %v9080_v59  ;;  %v9090_v43 = vld [vmem:[#allocation114_spill] sm:$0xff]  ;;  %v9091_v59 = vld [vmem:[#allocation115_spill] sm:$0xff] }
 0x611   :  { %2694 = vmatpush.bf16.msra.mxu0 %v9081_v40  ;;  %2707 = vmatpush.bf16.msra.mxu1 %v9082_v17  ;;  %v9092_v40 = vld [vmem:[#allocation117_spill] sm:$0xff]  ;;  %v9093_v17 = vld [vmem:[#allocation118_spill] sm:$0xff] }
 0x613   :  { %2720 = vmatpush.bf16.msra.mxu2 %v9083_v12  ;;  %2733 = vmatpush.bf16.msra.mxu3 %v9084_v45  ;;  %v9094_v12 = vld [vmem:[#allocation119_spill] sm:$0xff]  ;;  %v9095_v45 = vld [vmem:[#allocation120_spill] sm:$0xff] }
 0x615   :  { %2695 = vmatpush.bf16.msra.mxu0 %v9085_v34  ;;  %2708 = vmatpush.bf16.msra.mxu1 %v9086_v51  ;;  %v9096_v34 = vld [vmem:[#allocation121_spill] sm:$0xff]  ;;  %v9097_v51 = vld [vmem:[#allocation123_spill] sm:$0xff] }
 0x617   :  { %2721 = vmatpush.bf16.msra.mxu2 %v9087_v0  ;;  %2734 = vmatpush.bf16.msra.mxu3 %v9088_v8  ;;  %v9098_v0 = vld [vmem:[#allocation126_spill] sm:$0xff]  ;;  %v9099_v8 = vld [vmem:[#allocation127_spill] sm:$0xff] }
 0x619   :  { %2696 = vmatpush.bf16.msra.mxu0 %v9089_v2  ;;  %2709 = vmatpush.bf16.msra.mxu1 %v9090_v43  ;;  %v9100_v2 = vld [vmem:[#allocation130_spill] sm:$0xff]  ;;  %v9101_v43 = vld [vmem:[#allocation131_spill] sm:$0xff] }
 0x61b   :  { %2722 = vmatpush.bf16.msra.mxu2 %v9091_v59  ;;  %2735 = vmatpush.bf16.msra.mxu3 %v9092_v40  ;;  %v9102_v59 = vld [vmem:[#allocation133_spill] sm:$0xff]  ;;  %v9103_v40 = vld [vmem:[#allocation134_spill] sm:$0xff] }
 0x61d   :  { %2697 = vmatpush.bf16.msra.mxu0 %v9093_v17  ;;  %2710 = vmatpush.bf16.msra.mxu1 %v9094_v12  ;;  %v9104_v17 = vld [vmem:[#allocation135_spill] sm:$0xff]  ;;  %v9105_v12 = vld [vmem:[#allocation137_spill] sm:$0xff] }
 0x61f   :  { %2723 = vmatpush.bf16.msra.mxu2 %v9095_v45  ;;  %2736 = vmatpush.bf16.msra.mxu3 %v9096_v34  ;;  %v9106_v45 = vld [vmem:[#allocation139_spill] sm:$0xff]  ;;  %v9107_v34 = vld [vmem:[#allocation140_spill] sm:$0xff] }
 0x621   :  { %2698 = vmatpush.bf16.msra.mxu0 %v9097_v51  ;;  %2711 = vmatpush.bf16.msra.mxu1 %v9098_v0  ;;  %v9108_v51 = vld [vmem:[#allocation141_spill] sm:$0xff] }
 0x623   :  { %2724 = vmatpush.bf16.msra.mxu2 %v9099_v8  ;;  %2737 = vmatpush.bf16.msra.mxu3 %v9100_v2 }
 0x625   :  { %2699 = vmatpush.bf16.msra.mxu0 %v9101_v43  ;;  %2712 = vmatpush.bf16.msra.mxu1 %v9102_v59 }
 0x627   :  { %2725 = vmatpush.bf16.msra.mxu2 %v9103_v40  ;;  %2738 = vmatpush.bf16.msra.mxu3 %v9104_v17 }
 0x629   :  { %2700 = vmatpush.bf16.msra.mxu0 %v9105_v12  ;;  %2713 = vmatpush.bf16.msra.mxu1 %v9106_v45 }
 0x62b   :  { %2726 = vmatpush.bf16.msra.mxu2 %v9107_v34  ;;  %2739 = vmatpush.bf16.msra.mxu3 %v9108_v51 }
 0x648   :  { %v2443_v0 = vpop.f32.mrf.mxu0  ;;  %v2456_v8 = vpop.f32.mrf.mxu1 }
 0x649   :  { %v2444_v45 = vadd.f32 %v2443_v0, %v9109_v52  ;;  %v2457_v34 = vadd.f32 %v2456_v8, %v8742_v39 }
 0x64f   :  { %v2469_v60 = vpop.f32.mrf.mxu2  ;;  %v2482_v2 = vpop.f32.mrf.mxu3 }
 0x650   :  { %v2445_v46 = vpop.f32.mrf.mxu0  ;;  %v2458_v43 = vpop.f32.mrf.mxu1 }
 0x651   :  { %v418_v46 = vadd.f32 %v9110_v61, %v8958_v11 }
 0x657   :  { %v2471_v35 = vpop.f32.mrf.mxu2  ;;  %v2484_v59 = vpop.f32.mrf.mxu3 }
 0x658   :  { %v2496_v7 = vpop.f32.mrf.mxu0  ;;  %v2509_v40 = vpop.f32.mrf.mxu1  ;;  %v9111_v35 = vld [vmem:[#allocation77_spill] sm:$0xff] }
 0x659   :  { %v2539_v57 = vadd.f32 %v2496_v7, %v2444_v45  ;;  %v2540_v51 = vadd.f32 %v2509_v40, %v2457_v34  ;;  %v457_v43 = vadd.f32 %v9111_v35, %v8672_v26  ;;  %v9113_v7 = vld [vmem:[#allocation86_spill] sm:$0xff] }
 0x65a   :  { %v535_v61 = vadd.f32 %v9113_v7, %v8676_v29 }
 0x65b   :  { %v2543_v59 = vmul.f32 0.5, %v2539_v57  ;;  %v2547_v6 = vmul.f32 0.5, %v2540_v51  ;;  %v2470_v57 = vadd.f32 %v2469_v60, %v6910_v21 }
 0x65d   :  { %5789 = vtanh.f32 %v2543_v59 }
 0x65e   :  { %5791 = vtanh.f32 %v2547_v6 }
 0x65f   :  { %v2522_v55 = vpop.f32.mrf.mxu2  ;;  %v2535_v17 = vpop.f32.mrf.mxu3 }
 0x660   :  { %v2498_v31 = vpop.f32.mrf.mxu0  ;;  %v2511_v12 = vpop.f32.mrf.mxu1  ;;  %v2541_v35 = vadd.f32 %v2522_v55, %v2470_v57  ;;  %v2432_v55 = vsel %vm646_vm0, %v7522_v18, %v7148_v16 }
 0x663   :  { %v5790_v45 = vpop.eup %5789 }
 0x667   :  { %v2524_v33 = vpop.f32.mrf.mxu2  ;;  %v2537_v44 = vpop.f32.mrf.mxu3 }
 0x668   :  { %v9112_v33 = vld [vmem:[#allocation83_spill] sm:$0xff] }
 0x669   :  { %v2572_v1 = vpop.f32.mrf.mxu0  ;;  %v2585_v28 = vpop.f32.mrf.mxu1  ;;  %v496_v44 = vadd.f32 %v9112_v33, %v8674_v30  ;;  %v2545_v33 = vmul.f32 0.5, %v5790_v45 }
 0x66a   :  { %v2615_v31 = vadd.f32 %v2572_v1, %v418_v46  ;;  %v2616_v12 = vadd.f32 %v2585_v28, %v457_v43  ;;  %v5792_v46 = vpop.eup %5791 }
 0x66b   :  { %v2549_v60 = vmul.f32 0.5, %v5792_v46  ;;  %v2356_v46 = vsel %vm646_vm0, %v7529_v20, %v7275_v25 }
 0x66c   :  { %v2619_v0 = vmul.f32 0.5, %v2615_v31  ;;  %v2623_v52 = vmul.f32 0.5, %v2616_v12 }
 0x66e   :  { %5793 = vtanh.f32 %v2619_v0  ;;  %v2483_v0 = vadd.f32 %v2482_v2, %v6913_v22 }
 0x66f   :  { %5795 = vtanh.f32 %v2623_v52 }
 0x671   :  { %v2598_v34 = vpop.f32.mrf.mxu2  ;;  %v2611_v8 = vpop.f32.mrf.mxu3 }
 0x672   :  { %v2617_v51 = vadd.f32 %v2598_v34, %v496_v44  ;;  %v2618_v40 = vadd.f32 %v2611_v8, %v535_v61  ;;  %v2574_v1 = vpop.f32.mrf.mxu0  ;;  %v2587_v28 = vpop.f32.mrf.mxu1  ;;  %v2542_v8 = vadd.f32 %v2535_v17, %v2483_v0 }
 0x673   :  { %v2546_v1 = vadd.f32 0.5, %v2545_v33  ;;  %v2550_v28 = vadd.f32 0.5, %v2549_v60 }
 0x674   :  { %5797 = vtanh.f32 %v2617_v51  ;;  %v2628_v6 = vmul.f32 0.5, %v2618_v40  ;;  %v5794_v43 = vpop.eup %5793  ;;  %v2552_v45 = vmul.f32 0.5, %v2542_v8  ;;  %v9115_v8 = vld [vmem:[#allocation26_spill] sm:$0xff] }
 0x675   :  { %v5796_v59 = vpop.eup %5795  ;;  %v2621_v31 = vmul.f32 0.5, %v5794_v43  ;;  %v2556_v43 = vmul.f32 %v2550_v28, %v2356_v46  ;;  %v9120_v28 = vld [vmem:[#allocation31_spill] sm:$0xff]  ;;  %v9123_v46 = vld [vmem:[#allocation49_spill] sm:$0xff] }
 0x676   :  { %v2625_v12 = vmul.f32 0.5, %v5796_v59  ;;  %5799 = vtanh.f32 %v2628_v6 }
 0x677   :  { %5801 = vtanh.f32 %v2541_v35  ;;  %v2622_v52 = vadd.f32 0.5, %v2621_v31 }
 0x678   :  { %v2626_v44 = vadd.f32 0.5, %v2625_v12 }
 0x679   :  { %v2600_v7 = vpop.f32.mrf.mxu2  ;;  %v2613_v61 = vpop.f32.mrf.mxu3 }
 0x67a   :  { %v5798_v34 = vpop.eup %5797  ;;  %v2632_v57 = vmul.f32 %v2626_v44, %v2432_v55  ;;  %v9114_v55 = vld [vmem:[#allocation25_spill] sm:$0xff] }
 0x67b   :  { %v2633_v51 = vmul.f32 %v5798_v34, %v2622_v52 }
 0x67c   :  { %v5800_v40 = vpop.eup %5799 }
 0x67d   :  { %v7650_v35 = vadd.f32 %v2633_v51, %v2632_v57  ;;  %v5802_v2 = vpop.eup %5801  ;;  %v2630_v6 = vmul.f32 0.5, %v5800_v40  ;;  %v9116_v57 = vld [vmem:[#allocation27_spill] sm:$0xff]  ;;  %v9117_v51 = vld [vmem:[#allocation28_spill] sm:$0xff]  ;;  %v9118_v40 = vld [vmem:[#allocation29_spill] sm:$0xff] }
 0x67e   :  { %v2557_v18 = vmul.f32 %v5802_v2, %v2546_v1  ;;  %v9119_v1 = vld [vmem:[#allocation30_spill] sm:$0xff] }
 0x67f   :  { %5803 = vtanh.f32 %v7650_v35  ;;  %v2631_v17 = vadd.f32 0.5, %v2630_v6  ;;  %v9121_v2 = vld [vmem:[#allocation46_spill] sm:$0xff]  ;;  %v9124_v6 = vld [vmem:[#allocation52_spill] sm:$0xff] }
 0x680   :  { %5805 = vtanh.f32 %v2552_v45  ;;  %v7657_v31 = vadd.f32 %v2557_v18, %v2556_v43  ;;  %v9122_v45 = vld [vmem:[#allocation48_spill] sm:$0xff]  ;;  %v9125_v43 = vld [vmem:[#allocation54_spill] sm:$0xff]  ;;  %v9126_v18 = vld [vmem:[#allocation55_spill] sm:$0xff] }
 0x682   :  { %5807 = vtanh.f32 %v7657_v31 }
 0x685   :  { %v5804_v59 = vpop.eup %5803 }
 0x686   :  { %v2636_v12 = vmul.f32 %v5804_v59, %v2631_v17  ;;  %v5806_v0 = vpop.eup %5805  ;;  %v9127_v17 = vld [vmem:[#allocation56_spill] sm:$0xff]  ;;  %v9128_v59 = vld [vmem:[#allocation57_spill] sm:$0xff] }
 0x687   :  { %v2554_v20 = vmul.f32 0.5, %v5806_v0  ;;  %v9131_v0 = vld [vmem:[#allocation61_spill] sm:$0xff] }
 0x688   :  { %v2637_v52 = vsel %vm646_vm0, %v2636_v12, %v7152_v9  ;;  %v5808_v60 = vpop.eup %5807  ;;  %v9129_v12 = vld [vmem:[#allocation58_spill] sm:$0xff] }
 0x689   :  { %v2639_v33 = vpack.c.bf16 %v2637_v52, %v2637_v52  ;;  %v2555_v44 = vadd.f32 0.5, %v2554_v20  ;;  %v9130_v52 = vld [vmem:[#allocation60_spill] sm:$0xff] }
 0x68a   :  { %v9132_v20 = vld [vmem:[#allocation64_spill] sm:$0xff] }
 0x68b   :  { %2648 = vmatmul.bf16.vlgmr.msrb.gmra.mxu0 %v2639_v33  ;;  %2661 = vmatmul.bf16.vlgmr.msrb.gmra.mxu1 %v2639_v33  ;;  %v2560_v7 = vmul.f32 %v5808_v60, %v2555_v44  ;;  %v9134_v60 = vld [vmem:[#allocation67_spill] sm:$0xff]  ;;  %v9135_v44 = vld [vmem:[#allocation68_spill] sm:$0xff] }
 0x68c   :  { %2674 = vmatmul.bf16.vlgmr.msrb.gmra.mxu2 %v2639_v33  ;;  %2687 = vmatmul.bf16.vlgmr.msrb.gmra.mxu3 %v2639_v33 }
 0x68d   :  { %2769 = vmatpush.bf16.msrb.mxu0 %v6362_v38  ;;  %2782 = vmatpush.bf16.msrb.mxu1 %v6364_v42  ;;  %v2561_v61 = vsel %vm646_vm0, %v2560_v7, %v7289_v3  ;;  %v9136_v7 = vld [vmem:[#allocation69_spill] sm:$0xff] }
 0x68e   :  { %2795 = vmatpush.bf16.msrb.mxu2 %v6366_v48  ;;  %2808 = vmatpush.bf16.msrb.mxu3 %v6369_v49  ;;  %v2692_v34 = vpack.c.bf16 %v2561_v61, %v2561_v61  ;;  %v9137_v61 = vld [vmem:[#allocation70_spill] sm:$0xff] }
 0x691   :  { %2770 = vmatpush.bf16.msrb.mxu0 %v6371_v50  ;;  %2783 = vmatpush.bf16.msrb.mxu1 %v6374_v53 }
 0x692   :  { %2796 = vmatpush.bf16.msrb.mxu2 %v6377_v54  ;;  %2809 = vmatpush.bf16.msrb.mxu3 %v6381_v58 }
 0x695   :  { %2771 = vmatpush.bf16.msrb.mxu0 %v6384_v62  ;;  %2784 = vmatpush.bf16.msrb.mxu1 %v6386_v63 }
 0x696   :  { %2797 = vmatpush.bf16.msrb.mxu2 %v6389_v4  ;;  %2810 = vmatpush.bf16.msrb.mxu3 %v6393_v5 }
 0x699   :  { %2772 = vmatpush.bf16.msrb.mxu0 %v6401_v10  ;;  %2785 = vmatpush.bf16.msrb.mxu1 %v6403_v14 }
 0x69a   :  { %2798 = vmatpush.bf16.msrb.mxu2 %v6405_v15  ;;  %2811 = vmatpush.bf16.msrb.mxu3 %v6408_v19 }
 0x69b   :  { %2701 = vmatmul.bf16.vlgmr.msra.gmra.mxu0 %v2692_v34  ;;  %2714 = vmatmul.bf16.vlgmr.msra.gmra.mxu1 %v2692_v34 }
 0x69c   :  { %2727 = vmatmul.bf16.vlgmr.msra.gmra.mxu2 %v2692_v34  ;;  %2740 = vmatmul.bf16.vlgmr.msra.gmra.mxu3 %v2692_v34  ;;  %v9138_v34 = vld [vmem:[#allocation72_spill] sm:$0xff] }
 0x69d   :  { %2773 = vmatpush.bf16.msrb.mxu0 %v6412_v23  ;;  %2786 = vmatpush.bf16.msrb.mxu1 %v6414_v24 }
 0x69e   :  { %2799 = vmatpush.bf16.msrb.mxu2 %v6417_v27  ;;  %2812 = vmatpush.bf16.msrb.mxu3 %v6425_v32 }
 0x6a1   :  { %2774 = vmatpush.bf16.msrb.mxu0 %v6427_v36  ;;  %2787 = vmatpush.bf16.msrb.mxu1 %v6429_v37 }
 0x6a2   :  { %2800 = vmatpush.bf16.msrb.mxu2 %v6432_v41  ;;  %2813 = vmatpush.bf16.msrb.mxu3 %v6440_v47 }
 0x6a5   :  { %2775 = vmatpush.bf16.msrb.mxu0 %v6442_v56  ;;  %2788 = vmatpush.bf16.msrb.mxu1 %v9114_v55 }
 0x6a6   :  { %2801 = vmatpush.bf16.msrb.mxu2 %v9115_v8  ;;  %2814 = vmatpush.bf16.msrb.mxu3 %v9116_v57 }
 0x6a9   :  { %2776 = vmatpush.bf16.msrb.mxu0 %v9117_v51  ;;  %2789 = vmatpush.bf16.msrb.mxu1 %v9118_v40  ;;  %v9186_v51 = vld [vmem:[#allocation87_spill] sm:$0xff] }
 0x6aa   :  { %2802 = vmatpush.bf16.msrb.mxu2 %v9119_v1  ;;  %2815 = vmatpush.bf16.msrb.mxu3 %v9120_v28 }
 0x6ac   :  { %2777 = vmatmul.bf16.vlgmr.msrb.gmra.mxu0 %v2639_v33  ;;  %2790 = vmatmul.bf16.vlgmr.msrb.gmra.mxu1 %v2639_v33 }
 0x6ad   :  { %2846 = vmatpush.bf16.msra.mxu0 %v9121_v2  ;;  %2859 = vmatpush.bf16.msra.mxu1 %v9122_v45  ;;  %v9185_v2 = vld [vmem:[#allocation144_spill] sm:$0xff] }
 0x6ae   :  { %2803 = vmatmul.bf16.vlgmr.msrb.gmra.mxu2 %v2639_v33  ;;  %2816 = vmatmul.bf16.vlgmr.msrb.gmra.mxu3 %v2639_v33  ;;  %v9133_v33 = vld [vmem:[#allocation66_spill] sm:$0xff] }
 0x6af   :  { %2872 = vmatpush.bf16.msra.mxu2 %v9123_v46  ;;  %2885 = vmatpush.bf16.msra.mxu3 %v9124_v6 }
 0x6b1   :  { %2847 = vmatpush.bf16.msra.mxu0 %v9125_v43  ;;  %2860 = vmatpush.bf16.msra.mxu1 %v9126_v18 }
 0x6b3   :  { %2873 = vmatpush.bf16.msra.mxu2 %v9127_v17  ;;  %2886 = vmatpush.bf16.msra.mxu3 %v9128_v59  ;;  %v9139_v59 = vld [vmem:[#allocation73_spill] sm:$0xff] }
 0x6b5   :  { %2848 = vmatpush.bf16.msra.mxu0 %v9129_v12  ;;  %2861 = vmatpush.bf16.msra.mxu1 %v9130_v52  ;;  %v9140_v12 = vld [vmem:[#allocation76_spill] sm:$0xff]  ;;  %v9141_v52 = vld [vmem:[#allocation78_spill] sm:$0xff] }
 0x6b7   :  { %2874 = vmatpush.bf16.msra.mxu2 %v9131_v0  ;;  %2887 = vmatpush.bf16.msra.mxu3 %v9132_v20  ;;  %v9142_v0 = vld [vmem:[#allocation79_spill] sm:$0xff]  ;;  %v9143_v20 = vld [vmem:[#allocation80_spill] sm:$0xff] }
 0x6b9   :  { %2849 = vmatpush.bf16.msra.mxu0 %v9133_v33  ;;  %2862 = vmatpush.bf16.msra.mxu1 %v9134_v60  ;;  %v9144_v33 = vld [vmem:[#allocation81_spill] sm:$0xff]  ;;  %v9145_v60 = vld [vmem:[#allocation82_spill] sm:$0xff] }
 0x6bb   :  { %2875 = vmatpush.bf16.msra.mxu2 %v9135_v44  ;;  %2888 = vmatpush.bf16.msra.mxu3 %v9136_v7  ;;  %v9146_v44 = vld [vmem:[#allocation84_spill] sm:$0xff]  ;;  %v9147_v7 = vld [vmem:[#allocation85_spill] sm:$0xff] }
 0x6bd   :  { %2850 = vmatpush.bf16.msra.mxu0 %v9137_v61  ;;  %2863 = vmatpush.bf16.msra.mxu1 %v9138_v34  ;;  %v9148_v61 = vld [vmem:[#allocation88_spill] sm:$0xff]  ;;  %v9149_v34 = vld [vmem:[#allocation90_spill] sm:$0xff] }
 0x6bf   :  { %2876 = vmatpush.bf16.msra.mxu2 %v9139_v59  ;;  %2889 = vmatpush.bf16.msra.mxu3 %v9140_v12  ;;  %v9150_v59 = vld [vmem:[#allocation91_spill] sm:$0xff]  ;;  %v9151_v12 = vld [vmem:[#allocation94_spill] sm:$0xff] }
 0x6c1   :  { %2851 = vmatpush.bf16.msra.mxu0 %v9141_v52  ;;  %2864 = vmatpush.bf16.msra.mxu1 %v9142_v0  ;;  %v9152_v52 = vld [vmem:[#allocation95_spill] sm:$0xff]  ;;  %v9153_v0 = vld [vmem:[#allocation92_spill] sm:$0xff] }
 0x6c3   :  { %2877 = vmatpush.bf16.msra.mxu2 %v9143_v20  ;;  %2890 = vmatpush.bf16.msra.mxu3 %v9144_v33  ;;  %v9154_v20 = vld [vmem:[#allocation93_spill] sm:$0xff]  ;;  %v9155_v33 = vld [vmem:[#allocation96_spill] sm:$0xff] }
 0x6c5   :  { %2852 = vmatpush.bf16.msra.mxu0 %v9145_v60  ;;  %2865 = vmatpush.bf16.msra.mxu1 %v9146_v44  ;;  %v9156_v60 = vld [vmem:[#allocation98_spill] sm:$0xff]  ;;  %v9157_v44 = vld [vmem:[#allocation99_spill] sm:$0xff] }
 0x6c7   :  { %2878 = vmatpush.bf16.msra.mxu2 %v9147_v7  ;;  %2891 = vmatpush.bf16.msra.mxu3 %v9148_v61  ;;  %v9158_v7 = vld [vmem:[#allocation102_spill] sm:$0xff]  ;;  %v9159_v61 = vld [vmem:[#allocation104_spill] sm:$0xff] }
 0x6c9   :  { %2853 = vmatpush.bf16.msra.mxu0 %v9149_v34  ;;  %2866 = vmatpush.bf16.msra.mxu1 %v9150_v59  ;;  %v9160_v34 = vld [vmem:[#allocation105_spill] sm:$0xff]  ;;  %v9161_v59 = vld [vmem:[#allocation106_spill] sm:$0xff] }
 0x6cb   :  { %2879 = vmatpush.bf16.msra.mxu2 %v9153_v0  ;;  %2892 = vmatpush.bf16.msra.mxu3 %v9154_v20  ;;  %v9164_v0 = vld [vmem:[#allocation109_spill] sm:$0xff]  ;;  %v9165_v20 = vld [vmem:[#allocation111_spill] sm:$0xff] }
 0x6cd   :  { %2899 = vmatpush.bf16.msrb.mxu0 %v9151_v12  ;;  %2912 = vmatpush.bf16.msrb.mxu1 %v9152_v52  ;;  %v9162_v12 = vld [vmem:[#allocation107_spill] sm:$0xff]  ;;  %v9163_v52 = vld [vmem:[#allocation108_spill] sm:$0xff] }
 0x6cf   :  { %2925 = vmatpush.bf16.msrb.mxu2 %v9155_v33  ;;  %2938 = vmatpush.bf16.msrb.mxu3 %v9156_v60  ;;  %v9166_v33 = vld [vmem:[#allocation114_spill] sm:$0xff]  ;;  %v9167_v60 = vld [vmem:[#allocation115_spill] sm:$0xff] }
 0x6d1   :  { %2900 = vmatpush.bf16.msrb.mxu0 %v9157_v44  ;;  %2913 = vmatpush.bf16.msrb.mxu1 %v9158_v7  ;;  %v9168_v44 = vld [vmem:[#allocation117_spill] sm:$0xff]  ;;  %v9169_v7 = vld [vmem:[#allocation118_spill] sm:$0xff] }
 0x6d3   :  { %2926 = vmatpush.bf16.msrb.mxu2 %v9159_v61  ;;  %2939 = vmatpush.bf16.msrb.mxu3 %v9160_v34  ;;  %v9170_v61 = vld [vmem:[#allocation119_spill] sm:$0xff]  ;;  %v9171_v34 = vld [vmem:[#allocation120_spill] sm:$0xff] }
 0x6d5   :  { %2901 = vmatpush.bf16.msrb.mxu0 %v9161_v59  ;;  %2914 = vmatpush.bf16.msrb.mxu1 %v9162_v12  ;;  %v9172_v59 = vld [vmem:[#allocation121_spill] sm:$0xff]  ;;  %v9173_v12 = vld [vmem:[#allocation123_spill] sm:$0xff] }
 0x6d7   :  { %2927 = vmatpush.bf16.msrb.mxu2 %v9163_v52  ;;  %2940 = vmatpush.bf16.msrb.mxu3 %v9164_v0  ;;  %v9174_v52 = vld [vmem:[#allocation126_spill] sm:$0xff]  ;;  %v9175_v0 = vld [vmem:[#allocation127_spill] sm:$0xff] }
 0x6d9   :  { %2902 = vmatpush.bf16.msrb.mxu0 %v9165_v20  ;;  %2915 = vmatpush.bf16.msrb.mxu1 %v9166_v33  ;;  %v9176_v20 = vld [vmem:[#allocation130_spill] sm:$0xff]  ;;  %v9177_v33 = vld [vmem:[#allocation131_spill] sm:$0xff] }
 0x6db   :  { %2928 = vmatpush.bf16.msrb.mxu2 %v9167_v60  ;;  %2941 = vmatpush.bf16.msrb.mxu3 %v9168_v44  ;;  %v9178_v60 = vld [vmem:[#allocation133_spill] sm:$0xff]  ;;  %v9179_v44 = vld [vmem:[#allocation134_spill] sm:$0xff] }
 0x6dd   :  { %2903 = vmatpush.bf16.msrb.mxu0 %v9169_v7  ;;  %2916 = vmatpush.bf16.msrb.mxu1 %v9170_v61  ;;  %v9180_v7 = vld [vmem:[#allocation135_spill] sm:$0xff]  ;;  %v9181_v61 = vld [vmem:[#allocation137_spill] sm:$0xff] }
 0x6df   :  { %2929 = vmatpush.bf16.msrb.mxu2 %v9171_v34  ;;  %2942 = vmatpush.bf16.msrb.mxu3 %v9172_v59  ;;  %v9182_v34 = vld [vmem:[#allocation139_spill] sm:$0xff]  ;;  %v9183_v59 = vld [vmem:[#allocation140_spill] sm:$0xff] }
 0x6e1   :  { %2904 = vmatpush.bf16.msrb.mxu0 %v9173_v12  ;;  %2917 = vmatpush.bf16.msrb.mxu1 %v9174_v52  ;;  %v9184_v12 = vld [vmem:[#allocation141_spill] sm:$0xff] }
 0x6e3   :  { %2930 = vmatpush.bf16.msrb.mxu2 %v9175_v0  ;;  %2943 = vmatpush.bf16.msrb.mxu3 %v9176_v20 }
 0x6e5   :  { %2905 = vmatpush.bf16.msrb.mxu0 %v9177_v33  ;;  %2918 = vmatpush.bf16.msrb.mxu1 %v9178_v60 }
 0x6e7   :  { %2931 = vmatpush.bf16.msrb.mxu2 %v9179_v44  ;;  %2944 = vmatpush.bf16.msrb.mxu3 %v9180_v7 }
 0x6e9   :  { %2906 = vmatpush.bf16.msrb.mxu0 %v9181_v61  ;;  %2919 = vmatpush.bf16.msrb.mxu1 %v9182_v34 }
 0x6eb   :  { %2932 = vmatpush.bf16.msrb.mxu2 %v9183_v59  ;;  %2945 = vmatpush.bf16.msrb.mxu3 %v9184_v12 }
 0x708   :  { %v2649_v52 = vpop.f32.mrf.mxu0  ;;  %v2662_v0 = vpop.f32.mrf.mxu1 }
 0x709   :  { %v2650_v34 = vadd.f32 %v2649_v52, %v9185_v2  ;;  %v2663_v59 = vadd.f32 %v2662_v0, %v8742_v39 }
 0x70f   :  { %v2675_v17 = vpop.f32.mrf.mxu2  ;;  %v2688_v20 = vpop.f32.mrf.mxu3 }
 0x710   :  { %v2651_v18 = vpop.f32.mrf.mxu0  ;;  %v2664_v33 = vpop.f32.mrf.mxu1 }
 0x711   :  { %v421_v18 = vadd.f32 %v9186_v51, %v8958_v11 }
 0x717   :  { %v2677_v43 = vpop.f32.mrf.mxu2  ;;  %v2690_v60 = vpop.f32.mrf.mxu3 }
 0x718   :  { %v2702_v6 = vpop.f32.mrf.mxu0  ;;  %v2715_v44 = vpop.f32.mrf.mxu1  ;;  %v9187_v43 = vld [vmem:[#allocation89_spill] sm:$0xff] }
 0x719   :  { %v2745_v28 = vadd.f32 %v2702_v6, %v2650_v34  ;;  %v2746_v12 = vadd.f32 %v2715_v44, %v2663_v59  ;;  %v460_v33 = vadd.f32 %v9187_v43, %v8672_v26  ;;  %v9189_v6 = vld [vmem:[#allocation100_spill] sm:$0xff] }
 0x71a   :  { %v538_v51 = vadd.f32 %v9189_v6, %v8676_v29 }
 0x71b   :  { %v2749_v60 = vmul.f32 0.5, %v2745_v28  ;;  %v2753_v57 = vmul.f32 0.5, %v2746_v12  ;;  %v2676_v28 = vadd.f32 %v2675_v17, %v6910_v21 }
 0x71d   :  { %5809 = vtanh.f32 %v2749_v60 }
 0x71e   :  { %5811 = vtanh.f32 %v2753_v57 }
 0x71f   :  { %v2728_v46 = vpop.f32.mrf.mxu2  ;;  %v2741_v7 = vpop.f32.mrf.mxu3 }
 0x720   :  { %v2704_v45 = vpop.f32.mrf.mxu0  ;;  %v2717_v61 = vpop.f32.mrf.mxu1  ;;  %v2747_v43 = vadd.f32 %v2728_v46, %v2676_v28  ;;  %v2638_v46 = vsel %vm646_vm0, %v7650_v35, %v7148_v16 }
 0x723   :  { %v5810_v34 = vpop.eup %5809 }
 0x727   :  { %v2730_v1 = vpop.f32.mrf.mxu2  ;;  %v2743_v40 = vpop.f32.mrf.mxu3 }
 0x728   :  { %v9188_v1 = vld [vmem:[#allocation97_spill] sm:$0xff] }
 0x729   :  { %v2778_v8 = vpop.f32.mrf.mxu0  ;;  %v2791_v55 = vpop.f32.mrf.mxu1  ;;  %v499_v40 = vadd.f32 %v9188_v1, %v8674_v30  ;;  %v2751_v1 = vmul.f32 0.5, %v5810_v34 }
 0x72a   :  { %v2821_v45 = vadd.f32 %v2778_v8, %v421_v18  ;;  %v2822_v61 = vadd.f32 %v2791_v55, %v460_v33  ;;  %v5812_v18 = vpop.eup %5811 }
 0x72b   :  { %v2755_v17 = vmul.f32 0.5, %v5812_v18  ;;  %v2562_v18 = vsel %vm646_vm0, %v7657_v31, %v7275_v25 }
 0x72c   :  { %v2825_v52 = vmul.f32 0.5, %v2821_v45  ;;  %v2829_v2 = vmul.f32 0.5, %v2822_v61 }
 0x72e   :  { %5813 = vtanh.f32 %v2825_v52  ;;  %v2689_v52 = vadd.f32 %v2688_v20, %v6913_v22 }
 0x72f   :  { %5815 = vtanh.f32 %v2829_v2 }
 0x731   :  { %v2804_v59 = vpop.f32.mrf.mxu2  ;;  %v2817_v0 = vpop.f32.mrf.mxu3 }
 0x732   :  { %v2823_v12 = vadd.f32 %v2804_v59, %v499_v40  ;;  %v2824_v44 = vadd.f32 %v2817_v0, %v538_v51  ;;  %v2780_v8 = vpop.f32.mrf.mxu0  ;;  %v2793_v55 = vpop.f32.mrf.mxu1  ;;  %v2748_v0 = vadd.f32 %v2741_v7, %v2689_v52 }
 0x733   :  { %v2752_v8 = vadd.f32 0.5, %v2751_v1  ;;  %v2756_v55 = vadd.f32 0.5, %v2755_v17 }
 0x734   :  { %5817 = vtanh.f32 %v2823_v12  ;;  %v2834_v57 = vmul.f32 0.5, %v2824_v44  ;;  %v5814_v33 = vpop.eup %5813  ;;  %v2758_v34 = vmul.f32 0.5, %v2748_v0  ;;  %v9191_v0 = vld [vmem:[#allocation26_spill] sm:$0xff] }
 0x735   :  { %v5816_v60 = vpop.eup %5815  ;;  %v2827_v45 = vmul.f32 0.5, %v5814_v33  ;;  %v2762_v33 = vmul.f32 %v2756_v55, %v2562_v18  ;;  %v9196_v55 = vld [vmem:[#allocation31_spill] sm:$0xff]  ;;  %v9199_v18 = vld [vmem:[#allocation49_spill] sm:$0xff] }
 0x736   :  { %v2831_v61 = vmul.f32 0.5, %v5816_v60  ;;  %5819 = vtanh.f32 %v2834_v57 }
 0x737   :  { %5821 = vtanh.f32 %v2747_v43  ;;  %v2828_v2 = vadd.f32 0.5, %v2827_v45 }
 0x738   :  { %v2832_v40 = vadd.f32 0.5, %v2831_v61 }
 0x739   :  { %v2806_v6 = vpop.f32.mrf.mxu2  ;;  %v2819_v51 = vpop.f32.mrf.mxu3 }
 0x73a   :  { %v5818_v59 = vpop.eup %5817  ;;  %v2838_v28 = vmul.f32 %v2832_v40, %v2638_v46  ;;  %v9190_v46 = vld [vmem:[#allocation25_spill] sm:$0xff] }
 0x73b   :  { %v2839_v12 = vmul.f32 %v5818_v59, %v2828_v2 }
 0x73c   :  { %v5820_v44 = vpop.eup %5819 }
 0x73d   :  { %v7778_v43 = vadd.f32 %v2839_v12, %v2838_v28  ;;  %v5822_v20 = vpop.eup %5821  ;;  %v2836_v57 = vmul.f32 0.5, %v5820_v44  ;;  %v9192_v28 = vld [vmem:[#allocation27_spill] sm:$0xff]  ;;  %v9193_v12 = vld [vmem:[#allocation28_spill] sm:$0xff]  ;;  %v9194_v44 = vld [vmem:[#allocation29_spill] sm:$0xff] }
 0x73e   :  { %v2763_v35 = vmul.f32 %v5822_v20, %v2752_v8  ;;  %v9195_v8 = vld [vmem:[#allocation30_spill] sm:$0xff] }
 0x73f   :  { %5823 = vtanh.f32 %v7778_v43  ;;  %v2837_v7 = vadd.f32 0.5, %v2836_v57  ;;  %v9197_v20 = vld [vmem:[#allocation46_spill] sm:$0xff]  ;;  %v9200_v57 = vld [vmem:[#allocation52_spill] sm:$0xff] }
 0x740   :  { %5825 = vtanh.f32 %v2758_v34  ;;  %v7785_v45 = vadd.f32 %v2763_v35, %v2762_v33  ;;  %v9198_v34 = vld [vmem:[#allocation48_spill] sm:$0xff]  ;;  %v9201_v33 = vld [vmem:[#allocation54_spill] sm:$0xff]  ;;  %v9202_v35 = vld [vmem:[#allocation55_spill] sm:$0xff] }
 0x742   :  { %5827 = vtanh.f32 %v7785_v45 }
 0x745   :  { %v5824_v60 = vpop.eup %5823 }
 0x746   :  { %v2842_v61 = vmul.f32 %v5824_v60, %v2837_v7  ;;  %v5826_v52 = vpop.eup %5825  ;;  %v9203_v7 = vld [vmem:[#allocation56_spill] sm:$0xff]  ;;  %v9204_v60 = vld [vmem:[#allocation57_spill] sm:$0xff] }
 0x747   :  { %v2760_v31 = vmul.f32 0.5, %v5826_v52  ;;  %v9207_v52 = vld [vmem:[#allocation61_spill] sm:$0xff] }
 0x748   :  { %v2843_v2 = vsel %vm646_vm0, %v2842_v61, %v7152_v9  ;;  %v5828_v17 = vpop.eup %5827  ;;  %v9205_v61 = vld [vmem:[#allocation58_spill] sm:$0xff] }
 0x749   :  { %v2845_v1 = vpack.c.bf16 %v2843_v2, %v2843_v2  ;;  %v2761_v40 = vadd.f32 0.5, %v2760_v31  ;;  %v9206_v2 = vld [vmem:[#allocation60_spill] sm:$0xff] }
 0x74a   :  { %v9208_v31 = vld [vmem:[#allocation64_spill] sm:$0xff] }
 0x74b   :  { %2854 = vmatmul.bf16.vlgmr.msra.gmra.mxu0 %v2845_v1  ;;  %2867 = vmatmul.bf16.vlgmr.msra.gmra.mxu1 %v2845_v1  ;;  %v2766_v6 = vmul.f32 %v5828_v17, %v2761_v40  ;;  %v9210_v17 = vld [vmem:[#allocation67_spill] sm:$0xff]  ;;  %v9211_v40 = vld [vmem:[#allocation68_spill] sm:$0xff] }
 0x74c   :  { %2880 = vmatmul.bf16.vlgmr.msra.gmra.mxu2 %v2845_v1  ;;  %2893 = vmatmul.bf16.vlgmr.msra.gmra.mxu3 %v2845_v1 }
 0x74d   :  { %2975 = vmatpush.bf16.msra.mxu0 %v6362_v38  ;;  %2988 = vmatpush.bf16.msra.mxu1 %v6364_v42  ;;  %v2767_v51 = vsel %vm646_vm0, %v2766_v6, %v7289_v3  ;;  %v9212_v6 = vld [vmem:[#allocation69_spill] sm:$0xff] }
 0x74e   :  { %3001 = vmatpush.bf16.msra.mxu2 %v6366_v48  ;;  %3014 = vmatpush.bf16.msra.mxu3 %v6369_v49  ;;  %v2898_v59 = vpack.c.bf16 %v2767_v51, %v2767_v51  ;;  %v9213_v51 = vld [vmem:[#allocation70_spill] sm:$0xff] }
 0x751   :  { %2976 = vmatpush.bf16.msra.mxu0 %v6371_v50  ;;  %2989 = vmatpush.bf16.msra.mxu1 %v6374_v53 }
 0x752   :  { %3002 = vmatpush.bf16.msra.mxu2 %v6377_v54  ;;  %3015 = vmatpush.bf16.msra.mxu3 %v6381_v58 }
 0x755   :  { %2977 = vmatpush.bf16.msra.mxu0 %v6384_v62  ;;  %2990 = vmatpush.bf16.msra.mxu1 %v6386_v63 }
 0x756   :  { %3003 = vmatpush.bf16.msra.mxu2 %v6389_v4  ;;  %3016 = vmatpush.bf16.msra.mxu3 %v6393_v5 }
 0x759   :  { %2978 = vmatpush.bf16.msra.mxu0 %v6401_v10  ;;  %2991 = vmatpush.bf16.msra.mxu1 %v6403_v14 }
 0x75a   :  { %3004 = vmatpush.bf16.msra.mxu2 %v6405_v15  ;;  %3017 = vmatpush.bf16.msra.mxu3 %v6408_v19 }
 0x75b   :  { %2907 = vmatmul.bf16.vlgmr.msrb.gmra.mxu0 %v2898_v59  ;;  %2920 = vmatmul.bf16.vlgmr.msrb.gmra.mxu1 %v2898_v59 }
 0x75c   :  { %2933 = vmatmul.bf16.vlgmr.msrb.gmra.mxu2 %v2898_v59  ;;  %2946 = vmatmul.bf16.vlgmr.msrb.gmra.mxu3 %v2898_v59  ;;  %v9214_v59 = vld [vmem:[#allocation72_spill] sm:$0xff] }
 0x75d   :  { %2979 = vmatpush.bf16.msra.mxu0 %v6412_v23  ;;  %2992 = vmatpush.bf16.msra.mxu1 %v6414_v24 }
 0x75e   :  { %3005 = vmatpush.bf16.msra.mxu2 %v6417_v27  ;;  %3018 = vmatpush.bf16.msra.mxu3 %v6425_v32 }
 0x761   :  { %2980 = vmatpush.bf16.msra.mxu0 %v6427_v36  ;;  %2993 = vmatpush.bf16.msra.mxu1 %v6429_v37 }
 0x762   :  { %3006 = vmatpush.bf16.msra.mxu2 %v6432_v41  ;;  %3019 = vmatpush.bf16.msra.mxu3 %v6440_v47 }
 0x765   :  { %2981 = vmatpush.bf16.msra.mxu0 %v6442_v56  ;;  %2994 = vmatpush.bf16.msra.mxu1 %v9190_v46 }
 0x766   :  { %3007 = vmatpush.bf16.msra.mxu2 %v9191_v0  ;;  %3020 = vmatpush.bf16.msra.mxu3 %v9192_v28 }
 0x769   :  { %2982 = vmatpush.bf16.msra.mxu0 %v9193_v12  ;;  %2995 = vmatpush.bf16.msra.mxu1 %v9194_v44  ;;  %v9262_v12 = vld [vmem:[#allocation101_spill] sm:$0xff] }
 0x76a   :  { %3008 = vmatpush.bf16.msra.mxu2 %v9195_v8  ;;  %3021 = vmatpush.bf16.msra.mxu3 %v9196_v55 }
 0x76c   :  { %2983 = vmatmul.bf16.vlgmr.msra.gmra.mxu0 %v2845_v1  ;;  %2996 = vmatmul.bf16.vlgmr.msra.gmra.mxu1 %v2845_v1 }
 0x76d   :  { %3052 = vmatpush.bf16.msrb.mxu0 %v9197_v20  ;;  %3065 = vmatpush.bf16.msrb.mxu1 %v9198_v34  ;;  %v9261_v20 = vld [vmem:[#allocation144_spill] sm:$0xff] }
 0x76e   :  { %3009 = vmatmul.bf16.vlgmr.msra.gmra.mxu2 %v2845_v1  ;;  %3022 = vmatmul.bf16.vlgmr.msra.gmra.mxu3 %v2845_v1  ;;  %v9209_v1 = vld [vmem:[#allocation66_spill] sm:$0xff] }
 0x76f   :  { %3078 = vmatpush.bf16.msrb.mxu2 %v9199_v18  ;;  %3091 = vmatpush.bf16.msrb.mxu3 %v9200_v57 }
 0x771   :  { %3053 = vmatpush.bf16.msrb.mxu0 %v9201_v33  ;;  %3066 = vmatpush.bf16.msrb.mxu1 %v9202_v35 }
 0x773   :  { %3079 = vmatpush.bf16.msrb.mxu2 %v9203_v7  ;;  %3092 = vmatpush.bf16.msrb.mxu3 %v9204_v60  ;;  %v9215_v60 = vld [vmem:[#allocation73_spill] sm:$0xff] }
 0x775   :  { %3054 = vmatpush.bf16.msrb.mxu0 %v9205_v61  ;;  %3067 = vmatpush.bf16.msrb.mxu1 %v9206_v2  ;;  %v9216_v61 = vld [vmem:[#allocation76_spill] sm:$0xff]  ;;  %v9217_v2 = vld [vmem:[#allocation78_spill] sm:$0xff] }
 0x777   :  { %3080 = vmatpush.bf16.msrb.mxu2 %v9207_v52  ;;  %3093 = vmatpush.bf16.msrb.mxu3 %v9208_v31  ;;  %v9218_v52 = vld [vmem:[#allocation79_spill] sm:$0xff]  ;;  %v9219_v31 = vld [vmem:[#allocation80_spill] sm:$0xff] }
 0x779   :  { %3055 = vmatpush.bf16.msrb.mxu0 %v9209_v1  ;;  %3068 = vmatpush.bf16.msrb.mxu1 %v9210_v17  ;;  %v9220_v1 = vld [vmem:[#allocation81_spill] sm:$0xff]  ;;  %v9221_v17 = vld [vmem:[#allocation82_spill] sm:$0xff] }
 0x77b   :  { %3081 = vmatpush.bf16.msrb.mxu2 %v9211_v40  ;;  %3094 = vmatpush.bf16.msrb.mxu3 %v9212_v6  ;;  %v9222_v40 = vld [vmem:[#allocation84_spill] sm:$0xff]  ;;  %v9223_v6 = vld [vmem:[#allocation85_spill] sm:$0xff] }
 0x77d   :  { %3056 = vmatpush.bf16.msrb.mxu0 %v9213_v51  ;;  %3069 = vmatpush.bf16.msrb.mxu1 %v9214_v59  ;;  %v9224_v51 = vld [vmem:[#allocation88_spill] sm:$0xff]  ;;  %v9225_v59 = vld [vmem:[#allocation90_spill] sm:$0xff] }
 0x77f   :  { %3082 = vmatpush.bf16.msrb.mxu2 %v9215_v60  ;;  %3095 = vmatpush.bf16.msrb.mxu3 %v9216_v61  ;;  %v9226_v60 = vld [vmem:[#allocation91_spill] sm:$0xff]  ;;  %v9227_v61 = vld [vmem:[#allocation94_spill] sm:$0xff] }
 0x781   :  { %3057 = vmatpush.bf16.msrb.mxu0 %v9217_v2  ;;  %3070 = vmatpush.bf16.msrb.mxu1 %v9218_v52  ;;  %v9228_v2 = vld [vmem:[#allocation95_spill] sm:$0xff]  ;;  %v9229_v52 = vld [vmem:[#allocation92_spill] sm:$0xff] }
 0x783   :  { %3083 = vmatpush.bf16.msrb.mxu2 %v9219_v31  ;;  %3096 = vmatpush.bf16.msrb.mxu3 %v9220_v1  ;;  %v9230_v31 = vld [vmem:[#allocation93_spill] sm:$0xff]  ;;  %v9231_v1 = vld [vmem:[#allocation96_spill] sm:$0xff] }
 0x785   :  { %3058 = vmatpush.bf16.msrb.mxu0 %v9221_v17  ;;  %3071 = vmatpush.bf16.msrb.mxu1 %v9222_v40  ;;  %v9232_v17 = vld [vmem:[#allocation98_spill] sm:$0xff]  ;;  %v9233_v40 = vld [vmem:[#allocation99_spill] sm:$0xff] }
 0x787   :  { %3084 = vmatpush.bf16.msrb.mxu2 %v9223_v6  ;;  %3097 = vmatpush.bf16.msrb.mxu3 %v9224_v51  ;;  %v9234_v6 = vld [vmem:[#allocation102_spill] sm:$0xff]  ;;  %v9235_v51 = vld [vmem:[#allocation104_spill] sm:$0xff] }
 0x789   :  { %3059 = vmatpush.bf16.msrb.mxu0 %v9225_v59  ;;  %3072 = vmatpush.bf16.msrb.mxu1 %v9226_v60  ;;  %v9236_v59 = vld [vmem:[#allocation105_spill] sm:$0xff]  ;;  %v9237_v60 = vld [vmem:[#allocation106_spill] sm:$0xff] }
 0x78b   :  { %3085 = vmatpush.bf16.msrb.mxu2 %v9229_v52  ;;  %3098 = vmatpush.bf16.msrb.mxu3 %v9230_v31  ;;  %v9240_v52 = vld [vmem:[#allocation109_spill] sm:$0xff]  ;;  %v9241_v31 = vld [vmem:[#allocation111_spill] sm:$0xff] }
 0x78d   :  { %3105 = vmatpush.bf16.msra.mxu0 %v9227_v61  ;;  %3118 = vmatpush.bf16.msra.mxu1 %v9228_v2  ;;  %v9238_v61 = vld [vmem:[#allocation107_spill] sm:$0xff]  ;;  %v9239_v2 = vld [vmem:[#allocation108_spill] sm:$0xff] }
 0x78f   :  { %3131 = vmatpush.bf16.msra.mxu2 %v9231_v1  ;;  %3144 = vmatpush.bf16.msra.mxu3 %v9232_v17  ;;  %v9242_v1 = vld [vmem:[#allocation114_spill] sm:$0xff]  ;;  %v9243_v17 = vld [vmem:[#allocation115_spill] sm:$0xff] }
 0x791   :  { %3106 = vmatpush.bf16.msra.mxu0 %v9233_v40  ;;  %3119 = vmatpush.bf16.msra.mxu1 %v9234_v6  ;;  %v9244_v40 = vld [vmem:[#allocation117_spill] sm:$0xff]  ;;  %v9245_v6 = vld [vmem:[#allocation118_spill] sm:$0xff] }
 0x793   :  { %3132 = vmatpush.bf16.msra.mxu2 %v9235_v51  ;;  %3145 = vmatpush.bf16.msra.mxu3 %v9236_v59  ;;  %v9246_v51 = vld [vmem:[#allocation119_spill] sm:$0xff]  ;;  %v9247_v59 = vld [vmem:[#allocation120_spill] sm:$0xff] }
 0x795   :  { %3107 = vmatpush.bf16.msra.mxu0 %v9237_v60  ;;  %3120 = vmatpush.bf16.msra.mxu1 %v9238_v61  ;;  %v9248_v60 = vld [vmem:[#allocation121_spill] sm:$0xff]  ;;  %v9249_v61 = vld [vmem:[#allocation123_spill] sm:$0xff] }
 0x797   :  { %3133 = vmatpush.bf16.msra.mxu2 %v9239_v2  ;;  %3146 = vmatpush.bf16.msra.mxu3 %v9240_v52  ;;  %v9250_v2 = vld [vmem:[#allocation126_spill] sm:$0xff]  ;;  %v9251_v52 = vld [vmem:[#allocation127_spill] sm:$0xff] }
 0x799   :  { %3108 = vmatpush.bf16.msra.mxu0 %v9241_v31  ;;  %3121 = vmatpush.bf16.msra.mxu1 %v9242_v1  ;;  %v9252_v31 = vld [vmem:[#allocation130_spill] sm:$0xff]  ;;  %v9253_v1 = vld [vmem:[#allocation131_spill] sm:$0xff] }
 0x79b   :  { %3134 = vmatpush.bf16.msra.mxu2 %v9243_v17  ;;  %3147 = vmatpush.bf16.msra.mxu3 %v9244_v40  ;;  %v9254_v17 = vld [vmem:[#allocation133_spill] sm:$0xff]  ;;  %v9255_v40 = vld [vmem:[#allocation134_spill] sm:$0xff] }
 0x79d   :  { %3109 = vmatpush.bf16.msra.mxu0 %v9245_v6  ;;  %3122 = vmatpush.bf16.msra.mxu1 %v9246_v51  ;;  %v9256_v6 = vld [vmem:[#allocation135_spill] sm:$0xff]  ;;  %v9257_v51 = vld [vmem:[#allocation137_spill] sm:$0xff] }
 0x79f   :  { %3135 = vmatpush.bf16.msra.mxu2 %v9247_v59  ;;  %3148 = vmatpush.bf16.msra.mxu3 %v9248_v60  ;;  %v9258_v59 = vld [vmem:[#allocation139_spill] sm:$0xff]  ;;  %v9259_v60 = vld [vmem:[#allocation140_spill] sm:$0xff] }
 0x7a1   :  { %3110 = vmatpush.bf16.msra.mxu0 %v9249_v61  ;;  %3123 = vmatpush.bf16.msra.mxu1 %v9250_v2  ;;  %v9260_v61 = vld [vmem:[#allocation141_spill] sm:$0xff] }
 0x7a3   :  { %3136 = vmatpush.bf16.msra.mxu2 %v9251_v52  ;;  %3149 = vmatpush.bf16.msra.mxu3 %v9252_v31 }
 0x7a5   :  { %3111 = vmatpush.bf16.msra.mxu0 %v9253_v1  ;;  %3124 = vmatpush.bf16.msra.mxu1 %v9254_v17 }
 0x7a7   :  { %3137 = vmatpush.bf16.msra.mxu2 %v9255_v40  ;;  %3150 = vmatpush.bf16.msra.mxu3 %v9256_v6 }
 0x7a9   :  { %3112 = vmatpush.bf16.msra.mxu0 %v9257_v51  ;;  %3125 = vmatpush.bf16.msra.mxu1 %v9258_v59 }
 0x7ab   :  { %3138 = vmatpush.bf16.msra.mxu2 %v9259_v60  ;;  %3151 = vmatpush.bf16.msra.mxu3 %v9260_v61 }
 0x7c8   :  { %v2855_v2 = vpop.f32.mrf.mxu0  ;;  %v2868_v52 = vpop.f32.mrf.mxu1 }
 0x7c9   :  { %v2856_v59 = vadd.f32 %v2855_v2, %v9261_v20  ;;  %v2869_v60 = vadd.f32 %v2868_v52, %v8742_v39 }
 0x7cf   :  { %v2881_v7 = vpop.f32.mrf.mxu2  ;;  %v2894_v31 = vpop.f32.mrf.mxu3 }
 0x7d0   :  { %v2857_v35 = vpop.f32.mrf.mxu0  ;;  %v2870_v1 = vpop.f32.mrf.mxu1 }
 0x7d1   :  { %v423_v35 = vadd.f32 %v9262_v12, %v8958_v11 }
 0x7d7   :  { %v2883_v33 = vpop.f32.mrf.mxu2  ;;  %v2896_v17 = vpop.f32.mrf.mxu3 }
 0x7d8   :  { %v2908_v57 = vpop.f32.mrf.mxu0  ;;  %v2921_v40 = vpop.f32.mrf.mxu1  ;;  %v9263_v33 = vld [vmem:[#allocation103_spill] sm:$0xff] }
 0x7d9   :  { %v2951_v55 = vadd.f32 %v2908_v57, %v2856_v59  ;;  %v2952_v61 = vadd.f32 %v2921_v40, %v2869_v60  ;;  %v462_v1 = vadd.f32 %v9263_v33, %v8672_v26  ;;  %v9265_v57 = vld [vmem:[#allocation112_spill] sm:$0xff] }
 0x7da   :  { %v540_v12 = vadd.f32 %v9265_v57, %v8676_v29 }
 0x7db   :  { %v2955_v17 = vmul.f32 0.5, %v2951_v55  ;;  %v2959_v28 = vmul.f32 0.5, %v2952_v61  ;;  %v2882_v55 = vadd.f32 %v2881_v7, %v6910_v21 }
 0x7dd   :  { %5829 = vtanh.f32 %v2955_v17 }
 0x7de   :  { %5831 = vtanh.f32 %v2959_v28 }
 0x7df   :  { %v2934_v18 = vpop.f32.mrf.mxu2  ;;  %v2947_v6 = vpop.f32.mrf.mxu3 }
 0x7e0   :  { %v2910_v34 = vpop.f32.mrf.mxu0  ;;  %v2923_v51 = vpop.f32.mrf.mxu1  ;;  %v2953_v33 = vadd.f32 %v2934_v18, %v2882_v55  ;;  %v2844_v18 = vsel %vm646_vm0, %v7778_v43, %v7148_v16 }
 0x7e3   :  { %v5830_v59 = vpop.eup %5829 }
 0x7e7   :  { %v2936_v8 = vpop.f32.mrf.mxu2  ;;  %v2949_v44 = vpop.f32.mrf.mxu3 }
 0x7e8   :  { %v9264_v8 = vld [vmem:[#allocation110_spill] sm:$0xff] }
 0x7e9   :  { %v2984_v0 = vpop.f32.mrf.mxu0  ;;  %v2997_v46 = vpop.f32.mrf.mxu1  ;;  %v501_v44 = vadd.f32 %v9264_v8, %v8674_v30  ;;  %v2957_v8 = vmul.f32 0.5, %v5830_v59 }
 0x7ea   :  { %v3027_v34 = vadd.f32 %v2984_v0, %v423_v35  ;;  %v3028_v51 = vadd.f32 %v2997_v46, %v462_v1  ;;  %v5832_v35 = vpop.eup %5831 }
 0x7eb   :  { %v2961_v7 = vmul.f32 0.5, %v5832_v35  ;;  %v2768_v35 = vsel %vm646_vm0, %v7785_v45, %v7275_v25 }
 0x7ec   :  { %v3031_v2 = vmul.f32 0.5, %v3027_v34  ;;  %v3035_v20 = vmul.f32 0.5, %v3028_v51 }
 0x7ee   :  { %5833 = vtanh.f32 %v3031_v2  ;;  %v2895_v2 = vadd.f32 %v2894_v31, %v6913_v22 }
 0x7ef   :  { %5835 = vtanh.f32 %v3035_v20 }
 0x7f1   :  { %v3010_v60 = vpop.f32.mrf.mxu2  ;;  %v3023_v52 = vpop.f32.mrf.mxu3 }
 0x7f2   :  { %v3029_v61 = vadd.f32 %v3010_v60, %v501_v44  ;;  %v3030_v40 = vadd.f32 %v3023_v52, %v540_v12  ;;  %v2986_v0 = vpop.f32.mrf.mxu0  ;;  %v2999_v46 = vpop.f32.mrf.mxu1  ;;  %v2954_v52 = vadd.f32 %v2947_v6, %v2895_v2 }
 0x7f3   :  { %v2958_v0 = vadd.f32 0.5, %v2957_v8  ;;  %v2962_v46 = vadd.f32 0.5, %v2961_v7 }
 0x7f4   :  { %5837 = vtanh.f32 %v3029_v61  ;;  %v3040_v28 = vmul.f32 0.5, %v3030_v40  ;;  %v5834_v1 = vpop.eup %5833  ;;  %v2964_v59 = vmul.f32 0.5, %v2954_v52  ;;  %v9267_v52 = vld [vmem:[#allocation26_spill] sm:$0xff] }
 0x7f5   :  { %v5836_v17 = vpop.eup %5835  ;;  %v3033_v34 = vmul.f32 0.5, %v5834_v1  ;;  %v2968_v1 = vmul.f32 %v2962_v46, %v2768_v35  ;;  %v9272_v46 = vld [vmem:[#allocation31_spill] sm:$0xff]  ;;  %v9275_v35 = vld [vmem:[#allocation49_spill] sm:$0xff] }
 0x7f6   :  { %v3037_v51 = vmul.f32 0.5, %v5836_v17  ;;  %5839 = vtanh.f32 %v3040_v28 }
 0x7f7   :  { %5841 = vtanh.f32 %v2953_v33  ;;  %v3034_v20 = vadd.f32 0.5, %v3033_v34 }
 0x7f8   :  { %v3038_v44 = vadd.f32 0.5, %v3037_v51 }
 0x7f9   :  { %v3012_v57 = vpop.f32.mrf.mxu2  ;;  %v3025_v12 = vpop.f32.mrf.mxu3 }
 0x7fa   :  { %v5838_v60 = vpop.eup %5837  ;;  %v3044_v55 = vmul.f32 %v3038_v44, %v2844_v18  ;;  %v9266_v18 = vld [vmem:[#allocation25_spill] sm:$0xff] }
 0x7fb   :  { %v3045_v61 = vmul.f32 %v5838_v60, %v3034_v20 }
 0x7fc   :  { %v5840_v40 = vpop.eup %5839 }
 0x7fd   :  { %v7906_v33 = vadd.f32 %v3045_v61, %v3044_v55  ;;  %v5842_v31 = vpop.eup %5841  ;;  %v3042_v28 = vmul.f32 0.5, %v5840_v40  ;;  %v9268_v55 = vld [vmem:[#allocation27_spill] sm:$0xff]  ;;  %v9269_v61 = vld [vmem:[#allocation28_spill] sm:$0xff]  ;;  %v9270_v40 = vld [vmem:[#allocation29_spill] sm:$0xff] }
 0x7fe   :  { %v2969_v43 = vmul.f32 %v5842_v31, %v2958_v0  ;;  %v9271_v0 = vld [vmem:[#allocation30_spill] sm:$0xff] }
 0x7ff   :  { %5843 = vtanh.f32 %v7906_v33  ;;  %v3043_v6 = vadd.f32 0.5, %v3042_v28  ;;  %v9273_v31 = vld [vmem:[#allocation46_spill] sm:$0xff]  ;;  %v9276_v28 = vld [vmem:[#allocation52_spill] sm:$0xff] }
 0x800   :  { %5845 = vtanh.f32 %v2964_v59  ;;  %v7913_v34 = vadd.f32 %v2969_v43, %v2968_v1  ;;  %v9274_v59 = vld [vmem:[#allocation48_spill] sm:$0xff]  ;;  %v9277_v1 = vld [vmem:[#allocation54_spill] sm:$0xff]  ;;  %v9278_v43 = vld [vmem:[#allocation55_spill] sm:$0xff] }
 0x802   :  { %5847 = vtanh.f32 %v7913_v34 }
 0x805   :  { %v5844_v17 = vpop.eup %5843 }
 0x806   :  { %v3048_v51 = vmul.f32 %v5844_v17, %v3043_v6  ;;  %v5846_v2 = vpop.eup %5845  ;;  %v9279_v6 = vld [vmem:[#allocation56_spill] sm:$0xff]  ;;  %v9280_v17 = vld [vmem:[#allocation57_spill] sm:$0xff] }
 0x807   :  { %v2966_v45 = vmul.f32 0.5, %v5846_v2  ;;  %v9283_v2 = vld [vmem:[#allocation61_spill] sm:$0xff] }
 0x808   :  { %v3049_v20 = vsel %vm646_vm0, %v3048_v51, %v7152_v9  ;;  %v5848_v7 = vpop.eup %5847  ;;  %v9281_v51 = vld [vmem:[#allocation58_spill] sm:$0xff] }
 0x809   :  { %v3051_v8 = vpack.c.bf16 %v3049_v20, %v3049_v20  ;;  %v2967_v44 = vadd.f32 0.5, %v2966_v45  ;;  %v9282_v20 = vld [vmem:[#allocation60_spill] sm:$0xff] }
 0x80a   :  { %v9284_v45 = vld [vmem:[#allocation64_spill] sm:$0xff] }
 0x80b   :  { %3060 = vmatmul.bf16.vlgmr.msrb.gmra.mxu0 %v3051_v8  ;;  %3073 = vmatmul.bf16.vlgmr.msrb.gmra.mxu1 %v3051_v8  ;;  %v2972_v57 = vmul.f32 %v5848_v7, %v2967_v44  ;;  %v9286_v7 = vld [vmem:[#allocation67_spill] sm:$0xff]  ;;  %v9287_v44 = vld [vmem:[#allocation68_spill] sm:$0xff] }
 0x80c   :  { %3086 = vmatmul.bf16.vlgmr.msrb.gmra.mxu2 %v3051_v8  ;;  %3099 = vmatmul.bf16.vlgmr.msrb.gmra.mxu3 %v3051_v8 }
 0x80d   :  { %3181 = vmatpush.bf16.msrb.mxu0 %v6362_v38  ;;  %3194 = vmatpush.bf16.msrb.mxu1 %v6364_v42  ;;  %v2973_v12 = vsel %vm646_vm0, %v2972_v57, %v7289_v3  ;;  %v9288_v57 = vld [vmem:[#allocation69_spill] sm:$0xff] }
 0x80e   :  { %3207 = vmatpush.bf16.msrb.mxu2 %v6366_v48  ;;  %3220 = vmatpush.bf16.msrb.mxu3 %v6369_v49  ;;  %v3104_v60 = vpack.c.bf16 %v2973_v12, %v2973_v12  ;;  %v9289_v12 = vld [vmem:[#allocation70_spill] sm:$0xff] }
 0x811   :  { %3182 = vmatpush.bf16.msrb.mxu0 %v6371_v50  ;;  %3195 = vmatpush.bf16.msrb.mxu1 %v6374_v53 }
 0x812   :  { %3208 = vmatpush.bf16.msrb.mxu2 %v6377_v54  ;;  %3221 = vmatpush.bf16.msrb.mxu3 %v6381_v58 }
 0x815   :  { %3183 = vmatpush.bf16.msrb.mxu0 %v6384_v62  ;;  %3196 = vmatpush.bf16.msrb.mxu1 %v6386_v63 }
 0x816   :  { %3209 = vmatpush.bf16.msrb.mxu2 %v6389_v4  ;;  %3222 = vmatpush.bf16.msrb.mxu3 %v6393_v5 }
 0x819   :  { %3184 = vmatpush.bf16.msrb.mxu0 %v6401_v10  ;;  %3197 = vmatpush.bf16.msrb.mxu1 %v6403_v14 }
 0x81a   :  { %3210 = vmatpush.bf16.msrb.mxu2 %v6405_v15  ;;  %3223 = vmatpush.bf16.msrb.mxu3 %v6408_v19 }
 0x81b   :  { %3113 = vmatmul.bf16.vlgmr.msra.gmra.mxu0 %v3104_v60  ;;  %3126 = vmatmul.bf16.vlgmr.msra.gmra.mxu1 %v3104_v60 }
 0x81c   :  { %3139 = vmatmul.bf16.vlgmr.msra.gmra.mxu2 %v3104_v60  ;;  %3152 = vmatmul.bf16.vlgmr.msra.gmra.mxu3 %v3104_v60  ;;  %v9290_v60 = vld [vmem:[#allocation72_spill] sm:$0xff] }
 0x81d   :  { %3185 = vmatpush.bf16.msrb.mxu0 %v6412_v23  ;;  %3198 = vmatpush.bf16.msrb.mxu1 %v6414_v24 }
 0x81e   :  { %3211 = vmatpush.bf16.msrb.mxu2 %v6417_v27  ;;  %3224 = vmatpush.bf16.msrb.mxu3 %v6425_v32 }
 0x821   :  { %3186 = vmatpush.bf16.msrb.mxu0 %v6427_v36  ;;  %3199 = vmatpush.bf16.msrb.mxu1 %v6429_v37 }
 0x822   :  { %3212 = vmatpush.bf16.msrb.mxu2 %v6432_v41  ;;  %3225 = vmatpush.bf16.msrb.mxu3 %v6440_v47 }
 0x825   :  { %3187 = vmatpush.bf16.msrb.mxu0 %v6442_v56  ;;  %3200 = vmatpush.bf16.msrb.mxu1 %v9266_v18 }
 0x826   :  { %3213 = vmatpush.bf16.msrb.mxu2 %v9267_v52  ;;  %3226 = vmatpush.bf16.msrb.mxu3 %v9268_v55 }
 0x829   :  { %3188 = vmatpush.bf16.msrb.mxu0 %v9269_v61  ;;  %3201 = vmatpush.bf16.msrb.mxu1 %v9270_v40  ;;  %v9338_v61 = vld [vmem:[#allocation113_spill] sm:$0xff] }
 0x82a   :  { %3214 = vmatpush.bf16.msrb.mxu2 %v9271_v0  ;;  %3227 = vmatpush.bf16.msrb.mxu3 %v9272_v46 }
 0x82c   :  { %3189 = vmatmul.bf16.vlgmr.msrb.gmra.mxu0 %v3051_v8  ;;  %3202 = vmatmul.bf16.vlgmr.msrb.gmra.mxu1 %v3051_v8 }
 0x82d   :  { %3258 = vmatpush.bf16.msra.mxu0 %v9273_v31  ;;  %3271 = vmatpush.bf16.msra.mxu1 %v9274_v59  ;;  %v9337_v31 = vld [vmem:[#allocation144_spill] sm:$0xff] }
 0x82e   :  { %3215 = vmatmul.bf16.vlgmr.msrb.gmra.mxu2 %v3051_v8  ;;  %3228 = vmatmul.bf16.vlgmr.msrb.gmra.mxu3 %v3051_v8  ;;  %v9285_v8 = vld [vmem:[#allocation66_spill] sm:$0xff] }
 0x82f   :  { %3284 = vmatpush.bf16.msra.mxu2 %v9275_v35  ;;  %3297 = vmatpush.bf16.msra.mxu3 %v9276_v28 }
 0x831   :  { %3259 = vmatpush.bf16.msra.mxu0 %v9277_v1  ;;  %3272 = vmatpush.bf16.msra.mxu1 %v9278_v43 }
 0x833   :  { %3285 = vmatpush.bf16.msra.mxu2 %v9279_v6  ;;  %3298 = vmatpush.bf16.msra.mxu3 %v9280_v17  ;;  %v9291_v17 = vld [vmem:[#allocation73_spill] sm:$0xff] }
 0x835   :  { %3260 = vmatpush.bf16.msra.mxu0 %v9281_v51  ;;  %3273 = vmatpush.bf16.msra.mxu1 %v9282_v20  ;;  %v9292_v51 = vld [vmem:[#allocation76_spill] sm:$0xff]  ;;  %v9293_v20 = vld [vmem:[#allocation78_spill] sm:$0xff] }
 0x837   :  { %3286 = vmatpush.bf16.msra.mxu2 %v9283_v2  ;;  %3299 = vmatpush.bf16.msra.mxu3 %v9284_v45  ;;  %v9294_v2 = vld [vmem:[#allocation79_spill] sm:$0xff]  ;;  %v9295_v45 = vld [vmem:[#allocation80_spill] sm:$0xff] }
 0x839   :  { %3261 = vmatpush.bf16.msra.mxu0 %v9285_v8  ;;  %3274 = vmatpush.bf16.msra.mxu1 %v9286_v7  ;;  %v9296_v8 = vld [vmem:[#allocation81_spill] sm:$0xff]  ;;  %v9297_v7 = vld [vmem:[#allocation82_spill] sm:$0xff] }
 0x83b   :  { %3287 = vmatpush.bf16.msra.mxu2 %v9287_v44  ;;  %3300 = vmatpush.bf16.msra.mxu3 %v9288_v57  ;;  %v9298_v44 = vld [vmem:[#allocation84_spill] sm:$0xff]  ;;  %v9299_v57 = vld [vmem:[#allocation85_spill] sm:$0xff] }
 0x83d   :  { %3262 = vmatpush.bf16.msra.mxu0 %v9289_v12  ;;  %3275 = vmatpush.bf16.msra.mxu1 %v9290_v60  ;;  %v9300_v12 = vld [vmem:[#allocation88_spill] sm:$0xff]  ;;  %v9301_v60 = vld [vmem:[#allocation90_spill] sm:$0xff] }
 0x83f   :  { %3288 = vmatpush.bf16.msra.mxu2 %v9291_v17  ;;  %3301 = vmatpush.bf16.msra.mxu3 %v9292_v51  ;;  %v9302_v17 = vld [vmem:[#allocation91_spill] sm:$0xff]  ;;  %v9303_v51 = vld [vmem:[#allocation94_spill] sm:$0xff] }
 0x841   :  { %3263 = vmatpush.bf16.msra.mxu0 %v9293_v20  ;;  %3276 = vmatpush.bf16.msra.mxu1 %v9294_v2  ;;  %v9304_v20 = vld [vmem:[#allocation95_spill] sm:$0xff]  ;;  %v9305_v2 = vld [vmem:[#allocation92_spill] sm:$0xff] }
 0x843   :  { %3289 = vmatpush.bf16.msra.mxu2 %v9295_v45  ;;  %3302 = vmatpush.bf16.msra.mxu3 %v9296_v8  ;;  %v9306_v45 = vld [vmem:[#allocation93_spill] sm:$0xff]  ;;  %v9307_v8 = vld [vmem:[#allocation96_spill] sm:$0xff] }
 0x845   :  { %3264 = vmatpush.bf16.msra.mxu0 %v9297_v7  ;;  %3277 = vmatpush.bf16.msra.mxu1 %v9298_v44  ;;  %v9308_v7 = vld [vmem:[#allocation98_spill] sm:$0xff]  ;;  %v9309_v44 = vld [vmem:[#allocation99_spill] sm:$0xff] }
 0x847   :  { %3290 = vmatpush.bf16.msra.mxu2 %v9299_v57  ;;  %3303 = vmatpush.bf16.msra.mxu3 %v9300_v12  ;;  %v9310_v57 = vld [vmem:[#allocation102_spill] sm:$0xff]  ;;  %v9311_v12 = vld [vmem:[#allocation104_spill] sm:$0xff] }
 0x849   :  { %3265 = vmatpush.bf16.msra.mxu0 %v9301_v60  ;;  %3278 = vmatpush.bf16.msra.mxu1 %v9302_v17  ;;  %v9312_v60 = vld [vmem:[#allocation105_spill] sm:$0xff]  ;;  %v9313_v17 = vld [vmem:[#allocation106_spill] sm:$0xff] }
 0x84b   :  { %3291 = vmatpush.bf16.msra.mxu2 %v9305_v2  ;;  %3304 = vmatpush.bf16.msra.mxu3 %v9306_v45  ;;  %v9316_v2 = vld [vmem:[#allocation109_spill] sm:$0xff]  ;;  %v9317_v45 = vld [vmem:[#allocation111_spill] sm:$0xff] }
 0x84d   :  { %3311 = vmatpush.bf16.msrb.mxu0 %v9303_v51  ;;  %3324 = vmatpush.bf16.msrb.mxu1 %v9304_v20  ;;  %v9314_v51 = vld [vmem:[#allocation107_spill] sm:$0xff]  ;;  %v9315_v20 = vld [vmem:[#allocation108_spill] sm:$0xff] }
 0x84f   :  { %3337 = vmatpush.bf16.msrb.mxu2 %v9307_v8  ;;  %3350 = vmatpush.bf16.msrb.mxu3 %v9308_v7  ;;  %v9318_v8 = vld [vmem:[#allocation114_spill] sm:$0xff]  ;;  %v9319_v7 = vld [vmem:[#allocation115_spill] sm:$0xff] }
 0x851   :  { %3312 = vmatpush.bf16.msrb.mxu0 %v9309_v44  ;;  %3325 = vmatpush.bf16.msrb.mxu1 %v9310_v57  ;;  %v9320_v44 = vld [vmem:[#allocation117_spill] sm:$0xff]  ;;  %v9321_v57 = vld [vmem:[#allocation118_spill] sm:$0xff] }
 0x853   :  { %3338 = vmatpush.bf16.msrb.mxu2 %v9311_v12  ;;  %3351 = vmatpush.bf16.msrb.mxu3 %v9312_v60  ;;  %v9322_v12 = vld [vmem:[#allocation119_spill] sm:$0xff]  ;;  %v9323_v60 = vld [vmem:[#allocation120_spill] sm:$0xff] }
 0x855   :  { %3313 = vmatpush.bf16.msrb.mxu0 %v9313_v17  ;;  %3326 = vmatpush.bf16.msrb.mxu1 %v9314_v51  ;;  %v9324_v17 = vld [vmem:[#allocation121_spill] sm:$0xff]  ;;  %v9325_v51 = vld [vmem:[#allocation123_spill] sm:$0xff] }
 0x857   :  { %3339 = vmatpush.bf16.msrb.mxu2 %v9315_v20  ;;  %3352 = vmatpush.bf16.msrb.mxu3 %v9316_v2  ;;  %v9326_v20 = vld [vmem:[#allocation126_spill] sm:$0xff]  ;;  %v9327_v2 = vld [vmem:[#allocation127_spill] sm:$0xff] }
 0x859   :  { %3314 = vmatpush.bf16.msrb.mxu0 %v9317_v45  ;;  %3327 = vmatpush.bf16.msrb.mxu1 %v9318_v8  ;;  %v9328_v45 = vld [vmem:[#allocation130_spill] sm:$0xff]  ;;  %v9329_v8 = vld [vmem:[#allocation131_spill] sm:$0xff] }
 0x85b   :  { %3340 = vmatpush.bf16.msrb.mxu2 %v9319_v7  ;;  %3353 = vmatpush.bf16.msrb.mxu3 %v9320_v44  ;;  %v9330_v7 = vld [vmem:[#allocation133_spill] sm:$0xff]  ;;  %v9331_v44 = vld [vmem:[#allocation134_spill] sm:$0xff] }
 0x85d   :  { %3315 = vmatpush.bf16.msrb.mxu0 %v9321_v57  ;;  %3328 = vmatpush.bf16.msrb.mxu1 %v9322_v12  ;;  %v9332_v57 = vld [vmem:[#allocation135_spill] sm:$0xff]  ;;  %v9333_v12 = vld [vmem:[#allocation137_spill] sm:$0xff] }
 0x85f   :  { %3341 = vmatpush.bf16.msrb.mxu2 %v9323_v60  ;;  %3354 = vmatpush.bf16.msrb.mxu3 %v9324_v17  ;;  %v9334_v60 = vld [vmem:[#allocation139_spill] sm:$0xff]  ;;  %v9335_v17 = vld [vmem:[#allocation140_spill] sm:$0xff] }
 0x861   :  { %3316 = vmatpush.bf16.msrb.mxu0 %v9325_v51  ;;  %3329 = vmatpush.bf16.msrb.mxu1 %v9326_v20  ;;  %v9336_v51 = vld [vmem:[#allocation141_spill] sm:$0xff] }
 0x863   :  { %3342 = vmatpush.bf16.msrb.mxu2 %v9327_v2  ;;  %3355 = vmatpush.bf16.msrb.mxu3 %v9328_v45 }
 0x865   :  { %3317 = vmatpush.bf16.msrb.mxu0 %v9329_v8  ;;  %3330 = vmatpush.bf16.msrb.mxu1 %v9330_v7 }
 0x867   :  { %3343 = vmatpush.bf16.msrb.mxu2 %v9331_v44  ;;  %3356 = vmatpush.bf16.msrb.mxu3 %v9332_v57 }
 0x869   :  { %3318 = vmatpush.bf16.msrb.mxu0 %v9333_v12  ;;  %3331 = vmatpush.bf16.msrb.mxu1 %v9334_v60 }
 0x86b   :  { %3344 = vmatpush.bf16.msrb.mxu2 %v9335_v17  ;;  %3357 = vmatpush.bf16.msrb.mxu3 %v9336_v51 }
 0x888   :  { %v3061_v20 = vpop.f32.mrf.mxu0  ;;  %v3074_v2 = vpop.f32.mrf.mxu1 }
 0x889   :  { %v3062_v60 = vadd.f32 %v3061_v20, %v9337_v31  ;;  %v3075_v17 = vadd.f32 %v3074_v2, %v8742_v39 }
 0x88f   :  { %v3087_v6 = vpop.f32.mrf.mxu2  ;;  %v3100_v45 = vpop.f32.mrf.mxu3 }
 0x890   :  { %v3063_v43 = vpop.f32.mrf.mxu0  ;;  %v3076_v8 = vpop.f32.mrf.mxu1 }
 0x891   :  { %v426_v43 = vadd.f32 %v9338_v61, %v8958_v11 }
 0x897   :  { %v3089_v1 = vpop.f32.mrf.mxu2  ;;  %v3102_v7 = vpop.f32.mrf.mxu3 }
 0x898   :  { %v3114_v28 = vpop.f32.mrf.mxu0  ;;  %v3127_v44 = vpop.f32.mrf.mxu1  ;;  %v9339_v1 = vld [vmem:[#allocation116_spill] sm:$0xff] }
 0x899   :  { %v3157_v46 = vadd.f32 %v3114_v28, %v3062_v60  ;;  %v3158_v51 = vadd.f32 %v3127_v44, %v3075_v17  ;;  %v465_v8 = vadd.f32 %v9339_v1, %v8672_v26  ;;  %v9341_v28 = vld [vmem:[#allocation124_spill] sm:$0xff] }
 0x89a   :  { %v543_v61 = vadd.f32 %v9341_v28, %v8676_v29 }
 0x89b   :  { %v3161_v7 = vmul.f32 0.5, %v3157_v46  ;;  %v3165_v55 = vmul.f32 0.5, %v3158_v51  ;;  %v3088_v46 = vadd.f32 %v3087_v6, %v6910_v21 }
 0x89d   :  { %5849 = vtanh.f32 %v3161_v7 }
 0x89e   :  { %5851 = vtanh.f32 %v3165_v55 }
 0x89f   :  { %v3140_v35 = vpop.f32.mrf.mxu2  ;;  %v3153_v57 = vpop.f32.mrf.mxu3 }
 0x8a0   :  { %v3116_v59 = vpop.f32.mrf.mxu0  ;;  %v3129_v12 = vpop.f32.mrf.mxu1  ;;  %v3159_v1 = vadd.f32 %v3140_v35, %v3088_v46  ;;  %v3050_v35 = vsel %vm646_vm0, %v7906_v33, %v7148_v16 }
 0x8a3   :  { %v5850_v60 = vpop.eup %5849 }
 0x8a7   :  { %v3142_v0 = vpop.f32.mrf.mxu2  ;;  %v3155_v40 = vpop.f32.mrf.mxu3 }
 0x8a8   :  { %v9340_v0 = vld [vmem:[#allocation122_spill] sm:$0xff] }
 0x8a9   :  { %v3190_v52 = vpop.f32.mrf.mxu0  ;;  %v3203_v18 = vpop.f32.mrf.mxu1  ;;  %v504_v40 = vadd.f32 %v9340_v0, %v8674_v30  ;;  %v3163_v0 = vmul.f32 0.5, %v5850_v60 }
 0x8aa   :  { %v3233_v59 = vadd.f32 %v3190_v52, %v426_v43  ;;  %v3234_v12 = vadd.f32 %v3203_v18, %v465_v8  ;;  %v5852_v43 = vpop.eup %5851 }
 0x8ab   :  { %v3167_v6 = vmul.f32 0.5, %v5852_v43  ;;  %v2974_v43 = vsel %vm646_vm0, %v7913_v34, %v7275_v25 }
 0x8ac   :  { %v3237_v20 = vmul.f32 0.5, %v3233_v59  ;;  %v3241_v31 = vmul.f32 0.5, %v3234_v12 }
 0x8ae   :  { %5853 = vtanh.f32 %v3237_v20  ;;  %v3101_v20 = vadd.f32 %v3100_v45, %v6913_v22 }
 0x8af   :  { %5855 = vtanh.f32 %v3241_v31 }
 0x8b1   :  { %v3216_v17 = vpop.f32.mrf.mxu2  ;;  %v3229_v2 = vpop.f32.mrf.mxu3 }
 0x8b2   :  { %v3235_v51 = vadd.f32 %v3216_v17, %v504_v40  ;;  %v3236_v44 = vadd.f32 %v3229_v2, %v543_v61  ;;  %v3192_v52 = vpop.f32.mrf.mxu0  ;;  %v3205_v18 = vpop.f32.mrf.mxu1  ;;  %v3160_v2 = vadd.f32 %v3153_v57, %v3101_v20 }
 0x8b3   :  { %v3164_v52 = vadd.f32 0.5, %v3163_v0  ;;  %v3168_v18 = vadd.f32 0.5, %v3167_v6 }
 0x8b4   :  { %5857 = vtanh.f32 %v3235_v51  ;;  %v3246_v55 = vmul.f32 0.5, %v3236_v44  ;;  %v5854_v8 = vpop.eup %5853  ;;  %v3170_v60 = vmul.f32 0.5, %v3160_v2  ;;  %v9368_v2 = vld [vmem:[#allocation76_spill] sm:$0xff] }
 0x8b5   :  { %v5856_v7 = vpop.eup %5855  ;;  %v3239_v59 = vmul.f32 0.5, %v5854_v8  ;;  %v3174_v8 = vmul.f32 %v3168_v18, %v2974_v43  ;;  %v9373_v18 = vld [vmem:[#allocation82_spill] sm:$0xff]  ;;  %v9376_v43 = vld [vmem:[#allocation88_spill] sm:$0xff] }
 0x8b6   :  { %v3243_v12 = vmul.f32 0.5, %v5856_v7  ;;  %5859 = vtanh.f32 %v3246_v55 }
 0x8b7   :  { %5861 = vtanh.f32 %v3159_v1  ;;  %v3240_v31 = vadd.f32 0.5, %v3239_v59 }
 0x8b8   :  { %v3244_v40 = vadd.f32 0.5, %v3243_v12 }
 0x8b9   :  { %v3218_v28 = vpop.f32.mrf.mxu2  ;;  %v3231_v61 = vpop.f32.mrf.mxu3 }
 0x8ba   :  { %v5858_v17 = vpop.eup %5857  ;;  %v3250_v46 = vmul.f32 %v3244_v40, %v3050_v35  ;;  %v9365_v61 = vld [vmem:[#allocation70_spill] sm:$0xff]  ;;  %v9367_v35 = vld [vmem:[#allocation73_spill] sm:$0xff] }
 0x8bb   :  { %v3251_v51 = vmul.f32 %v5858_v17, %v3240_v31  ;;  %v9366_v17 = vld [vmem:[#allocation72_spill] sm:$0xff] }
 0x8bc   :  { %v5860_v44 = vpop.eup %5859 }
 0x8bd   :  { %v8034_v1 = vadd.f32 %v3251_v51, %v3250_v46  ;;  %v5862_v45 = vpop.eup %5861  ;;  %v3248_v55 = vmul.f32 0.5, %v5860_v44  ;;  %v9369_v46 = vld [vmem:[#allocation78_spill] sm:$0xff]  ;;  %v9370_v51 = vld [vmem:[#allocation79_spill] sm:$0xff]  ;;  %v9371_v44 = vld [vmem:[#allocation80_spill] sm:$0xff] }
 0x8be   :  { %v3175_v33 = vmul.f32 %v5862_v45, %v3164_v52  ;;  %v9372_v52 = vld [vmem:[#allocation81_spill] sm:$0xff]  ;;  %v9374_v45 = vld [vmem:[#allocation84_spill] sm:$0xff] }
 0x8bf   :  { %5863 = vtanh.f32 %v8034_v1  ;;  %v3249_v57 = vadd.f32 0.5, %v3248_v55  ;;  %v9377_v55 = vld [vmem:[#allocation90_spill] sm:$0xff] }
 0x8c0   :  { %5865 = vtanh.f32 %v3170_v60  ;;  %v8041_v59 = vadd.f32 %v3175_v33, %v3174_v8  ;;  %v9375_v60 = vld [vmem:[#allocation85_spill] sm:$0xff]  ;;  %v9378_v8 = vld [vmem:[#allocation91_spill] sm:$0xff]  ;;  %v9379_v33 = vld [vmem:[#allocation94_spill] sm:$0xff] }
 0x8c2   :  { %5867 = vtanh.f32 %v8041_v59 }
 0x8c5   :  { %v5864_v7 = vpop.eup %5863 }
 0x8c6   :  { %v3254_v12 = vmul.f32 %v5864_v7, %v3249_v57  ;;  %v5866_v20 = vpop.eup %5865  ;;  %v9380_v57 = vld [vmem:[#allocation95_spill] sm:$0xff]  ;;  %v9381_v7 = vld [vmem:[#allocation92_spill] sm:$0xff] }
 0x8c7   :  { %v3172_v34 = vmul.f32 0.5, %v5866_v20  ;;  %v9384_v20 = vld [vmem:[#allocation98_spill] sm:$0xff] }
 0x8c8   :  { %v3255_v31 = vsel %vm646_vm0, %v3254_v12, %v7152_v9  ;;  %v5868_v6 = vpop.eup %5867  ;;  %v9382_v12 = vld [vmem:[#allocation93_spill] sm:$0xff] }
 0x8c9   :  { %v3257_v0 = vpack.c.bf16 %v3255_v31, %v3255_v31  ;;  %v3173_v40 = vadd.f32 0.5, %v3172_v34  ;;  %v9383_v31 = vld [vmem:[#allocation96_spill] sm:$0xff]  ;;  %v9386_v34 = vld [vmem:[#allocation102_spill] sm:$0xff] }
 0x8cb   :  { %3266 = vmatmul.bf16.vlgmr.msra.gmra.mxu0 %v3257_v0  ;;  %3279 = vmatmul.bf16.vlgmr.msra.gmra.mxu1 %v3257_v0  ;;  %v3178_v28 = vmul.f32 %v5868_v6, %v3173_v40  ;;  %v9387_v6 = vld [vmem:[#allocation104_spill] sm:$0xff]  ;;  %v9388_v40 = vld [vmem:[#allocation105_spill] sm:$0xff] }
 0x8cc   :  { %3292 = vmatmul.bf16.vlgmr.msra.gmra.mxu2 %v3257_v0  ;;  %3305 = vmatmul.bf16.vlgmr.msra.gmra.mxu3 %v3257_v0 }
 0x8cd   :  { %3387 = vmatpush.bf16.msra.mxu0 %v6362_v38  ;;  %3400 = vmatpush.bf16.msra.mxu1 %v6364_v42  ;;  %v3179_v38 = vsel %vm646_vm0, %v3178_v28, %v7289_v3  ;;  %v9389_v28 = vld [vmem:[#allocation106_spill] sm:$0xff] }
 0x8ce   :  { %3413 = vmatpush.bf16.msra.mxu2 %v6366_v48  ;;  %3426 = vmatpush.bf16.msra.mxu3 %v6369_v49  ;;  %v3310_v42 = vpack.c.bf16 %v3179_v38, %v3179_v38  ;;  %v9342_v48 = vld [vmem:[#allocation25_spill] sm:$0xff]  ;;  %v9343_v49 = vld [vmem:[#allocation26_spill] sm:$0xff]  ;;  %v9390_v38 = vld [vmem:[#allocation107_spill] sm:$0xff] }
 0x8d1   :  { %3388 = vmatpush.bf16.msra.mxu0 %v6371_v50  ;;  %3401 = vmatpush.bf16.msra.mxu1 %v6374_v53  ;;  %v9344_v50 = vld [vmem:[#allocation27_spill] sm:$0xff]  ;;  %v9345_v53 = vld [vmem:[#allocation28_spill] sm:$0xff] }
 0x8d2   :  { %3414 = vmatpush.bf16.msra.mxu2 %v6377_v54  ;;  %3427 = vmatpush.bf16.msra.mxu3 %v6381_v58  ;;  %v9346_v54 = vld [vmem:[#allocation29_spill] sm:$0xff]  ;;  %v9347_v58 = vld [vmem:[#allocation30_spill] sm:$0xff] }
 0x8d5   :  { %3389 = vmatpush.bf16.msra.mxu0 %v6384_v62  ;;  %3402 = vmatpush.bf16.msra.mxu1 %v6386_v63  ;;  %v9348_v62 = vld [vmem:[#allocation31_spill] sm:$0xff]  ;;  %v9349_v63 = vld [vmem:[#allocation46_spill] sm:$0xff] }
 0x8d6   :  { %3415 = vmatpush.bf16.msra.mxu2 %v6389_v4  ;;  %3428 = vmatpush.bf16.msra.mxu3 %v6393_v5  ;;  %v9350_v4 = vld [vmem:[#allocation48_spill] sm:$0xff]  ;;  %v9351_v5 = vld [vmem:[#allocation49_spill] sm:$0xff] }
 0x8d9   :  { %3390 = vmatpush.bf16.msra.mxu0 %v6401_v10  ;;  %3403 = vmatpush.bf16.msra.mxu1 %v6403_v14  ;;  %v9352_v10 = vld [vmem:[#allocation52_spill] sm:$0xff]  ;;  %v9353_v14 = vld [vmem:[#allocation54_spill] sm:$0xff] }
 0x8da   :  { %3416 = vmatpush.bf16.msra.mxu2 %v6405_v15  ;;  %3429 = vmatpush.bf16.msra.mxu3 %v6408_v19  ;;  %v9354_v15 = vld [vmem:[#allocation55_spill] sm:$0xff]  ;;  %v9355_v19 = vld [vmem:[#allocation56_spill] sm:$0xff] }
 0x8db   :  { %3319 = vmatmul.bf16.vlgmr.msrb.gmra.mxu0 %v3310_v42  ;;  %3332 = vmatmul.bf16.vlgmr.msrb.gmra.mxu1 %v3310_v42 }
 0x8dc   :  { %3345 = vmatmul.bf16.vlgmr.msrb.gmra.mxu2 %v3310_v42  ;;  %3358 = vmatmul.bf16.vlgmr.msrb.gmra.mxu3 %v3310_v42  ;;  %v9391_v42 = vld [vmem:[#allocation108_spill] sm:$0xff] }
 0x8dd   :  { %3391 = vmatpush.bf16.msra.mxu0 %v6412_v23  ;;  %3404 = vmatpush.bf16.msra.mxu1 %v6414_v24  ;;  %v9356_v23 = vld [vmem:[#allocation57_spill] sm:$0xff]  ;;  %v9357_v24 = vld [vmem:[#allocation58_spill] sm:$0xff] }
 0x8de   :  { %3417 = vmatpush.bf16.msra.mxu2 %v6417_v27  ;;  %3430 = vmatpush.bf16.msra.mxu3 %v6425_v32  ;;  %v9358_v27 = vld [vmem:[#allocation60_spill] sm:$0xff]  ;;  %v9359_v32 = vld [vmem:[#allocation61_spill] sm:$0xff] }
 0x8e1   :  { %3392 = vmatpush.bf16.msra.mxu0 %v6427_v36  ;;  %3405 = vmatpush.bf16.msra.mxu1 %v6429_v37  ;;  %v9360_v36 = vld [vmem:[#allocation64_spill] sm:$0xff]  ;;  %v9361_v37 = vld [vmem:[#allocation66_spill] sm:$0xff] }
 0x8e2   :  { %3418 = vmatpush.bf16.msra.mxu2 %v6432_v41  ;;  %3431 = vmatpush.bf16.msra.mxu3 %v6440_v47  ;;  %v9362_v41 = vld [vmem:[#allocation67_spill] sm:$0xff]  ;;  %v9363_v47 = vld [vmem:[#allocation68_spill] sm:$0xff] }
 0x8e5   :  { %3393 = vmatpush.bf16.msra.mxu0 %v6442_v56  ;;  %3406 = vmatpush.bf16.msra.mxu1 %v9342_v48  ;;  %v9364_v56 = vld [vmem:[#allocation69_spill] sm:$0xff] }
 0x8e6   :  { %3419 = vmatpush.bf16.msra.mxu2 %v9343_v49  ;;  %3432 = vmatpush.bf16.msra.mxu3 %v9344_v50  ;;  %v9392_v48 = vld [vmem:[#allocation109_spill] sm:$0xff]  ;;  %v9393_v49 = vld [vmem:[#allocation111_spill] sm:$0xff]  ;;  %v9394_v50 = vld [vmem:[#allocation114_spill] sm:$0xff] }
 0x8e9   :  { %3394 = vmatpush.bf16.msra.mxu0 %v9345_v53  ;;  %3407 = vmatpush.bf16.msra.mxu1 %v9346_v54  ;;  %v9395_v53 = vld [vmem:[#allocation115_spill] sm:$0xff]  ;;  %v9396_v54 = vld [vmem:[#allocation117_spill] sm:$0xff] }
 0x8ea   :  { %3420 = vmatpush.bf16.msra.mxu2 %v9347_v58  ;;  %3433 = vmatpush.bf16.msra.mxu3 %v9348_v62  ;;  %v9397_v58 = vld [vmem:[#allocation118_spill] sm:$0xff]  ;;  %v9398_v62 = vld [vmem:[#allocation119_spill] sm:$0xff] }
 0x8ec   :  { %3395 = vmatmul.bf16.vlgmr.msra.gmra.mxu0 %v3257_v0  ;;  %3408 = vmatmul.bf16.vlgmr.msra.gmra.mxu1 %v3257_v0 }
 0x8ed   :  { %3463 = vmatpush.bf16.msrb.mxu0 %v9349_v63  ;;  %3476 = vmatpush.bf16.msrb.mxu1 %v9350_v4  ;;  %v9399_v63 = vld [vmem:[#allocation120_spill] sm:$0xff]  ;;  %v9400_v4 = vld [vmem:[#allocation121_spill] sm:$0xff] }
 0x8ee   :  { %3421 = vmatmul.bf16.vlgmr.msra.gmra.mxu2 %v3257_v0  ;;  %3434 = vmatmul.bf16.vlgmr.msra.gmra.mxu3 %v3257_v0  ;;  %v9385_v0 = vld [vmem:[#allocation99_spill] sm:$0xff] }
 0x8ef   :  { %3489 = vmatpush.bf16.msrb.mxu2 %v9351_v5  ;;  %3502 = vmatpush.bf16.msrb.mxu3 %v9352_v10  ;;  %v9401_v5 = vld [vmem:[#allocation123_spill] sm:$0xff]  ;;  %v9402_v10 = vld [vmem:[#allocation126_spill] sm:$0xff] }
 0x8f1   :  { %3464 = vmatpush.bf16.msrb.mxu0 %v9353_v14  ;;  %3477 = vmatpush.bf16.msrb.mxu1 %v9354_v15  ;;  %v9403_v14 = vld [vmem:[#allocation127_spill] sm:$0xff]  ;;  %v9404_v15 = vld [vmem:[#allocation130_spill] sm:$0xff] }
 0x8f3   :  { %3490 = vmatpush.bf16.msrb.mxu2 %v9355_v19  ;;  %3503 = vmatpush.bf16.msrb.mxu3 %v9356_v23  ;;  %v9405_v19 = vld [vmem:[#allocation131_spill] sm:$0xff]  ;;  %v9406_v23 = vld [vmem:[#allocation133_spill] sm:$0xff] }
 0x8f5   :  { %3465 = vmatpush.bf16.msrb.mxu0 %v9357_v24  ;;  %3478 = vmatpush.bf16.msrb.mxu1 %v9358_v27  ;;  %v9407_v24 = vld [vmem:[#allocation134_spill] sm:$0xff]  ;;  %v9408_v27 = vld [vmem:[#allocation135_spill] sm:$0xff] }
 0x8f7   :  { %3491 = vmatpush.bf16.msrb.mxu2 %v9359_v32  ;;  %3504 = vmatpush.bf16.msrb.mxu3 %v9360_v36  ;;  %v9409_v32 = vld [vmem:[#allocation137_spill] sm:$0xff]  ;;  %v9410_v36 = vld [vmem:[#allocation139_spill] sm:$0xff] }
 0x8f9   :  { %3466 = vmatpush.bf16.msrb.mxu0 %v9361_v37  ;;  %3479 = vmatpush.bf16.msrb.mxu1 %v9362_v41  ;;  %v9411_v37 = vld [vmem:[#allocation140_spill] sm:$0xff]  ;;  %v9412_v41 = vld [vmem:[#allocation141_spill] sm:$0xff] }
 0x8fb   :  { %3492 = vmatpush.bf16.msrb.mxu2 %v9363_v47  ;;  %3505 = vmatpush.bf16.msrb.mxu3 %v9364_v56 }
 0x8fd   :  { %3467 = vmatpush.bf16.msrb.mxu0 %v9365_v61  ;;  %3480 = vmatpush.bf16.msrb.mxu1 %v9366_v17 }
 0x8ff   :  { %3493 = vmatpush.bf16.msrb.mxu2 %v9367_v35  ;;  %3506 = vmatpush.bf16.msrb.mxu3 %v9368_v2 }
 0x901   :  { %3468 = vmatpush.bf16.msrb.mxu0 %v9369_v46  ;;  %3481 = vmatpush.bf16.msrb.mxu1 %v9370_v51 }
 0x903   :  { %3494 = vmatpush.bf16.msrb.mxu2 %v9371_v44  ;;  %3507 = vmatpush.bf16.msrb.mxu3 %v9372_v52 }
 0x905   :  { %3469 = vmatpush.bf16.msrb.mxu0 %v9373_v18  ;;  %3482 = vmatpush.bf16.msrb.mxu1 %v9374_v45 }
 0x907   :  { %3495 = vmatpush.bf16.msrb.mxu2 %v9375_v60  ;;  %3508 = vmatpush.bf16.msrb.mxu3 %v9376_v43 }
 0x909   :  { %3470 = vmatpush.bf16.msrb.mxu0 %v9377_v55  ;;  %3483 = vmatpush.bf16.msrb.mxu1 %v9378_v8  ;;  %v9413_v55 = vld [vmem:[#allocation144_spill] sm:$0xff] }
 0x90b   :  { %3496 = vmatpush.bf16.msrb.mxu2 %v9381_v7  ;;  %3509 = vmatpush.bf16.msrb.mxu3 %v9382_v12 }
 0x90d   :  { %3516 = vmatpush.bf16.msra.mxu0 %v9379_v33  ;;  %3529 = vmatpush.bf16.msra.mxu1 %v9380_v57 }
 0x90f   :  { %3542 = vmatpush.bf16.msra.mxu2 %v9383_v31  ;;  %3555 = vmatpush.bf16.msra.mxu3 %v9384_v20  ;;  %v9414_v20 = vld [vmem:[#allocation125_spill] sm:$0xff] }
 0x911   :  { %3517 = vmatpush.bf16.msra.mxu0 %v9385_v0  ;;  %3530 = vmatpush.bf16.msra.mxu1 %v9386_v34  ;;  %v428_v0 = vadd.f32 %v9414_v20, %v8958_v11  ;;  %v9415_v34 = vld [vmem:[#allocation129_spill] sm:$0xff] }
 0x913   :  { %3543 = vmatpush.bf16.msra.mxu2 %v9387_v6  ;;  %3556 = vmatpush.bf16.msra.mxu3 %v9388_v40  ;;  %v467_v6 = vadd.f32 %v9415_v34, %v8672_v26 }
 0x915   :  { %3518 = vmatpush.bf16.msra.mxu0 %v9389_v28  ;;  %3531 = vmatpush.bf16.msra.mxu1 %v9390_v38 }
 0x917   :  { %3544 = vmatpush.bf16.msra.mxu2 %v9391_v42  ;;  %3557 = vmatpush.bf16.msra.mxu3 %v9392_v48 }
 0x919   :  { %3519 = vmatpush.bf16.msra.mxu0 %v9393_v49  ;;  %3532 = vmatpush.bf16.msra.mxu1 %v9394_v50 }
 0x91b   :  { %3545 = vmatpush.bf16.msra.mxu2 %v9395_v53  ;;  %3558 = vmatpush.bf16.msra.mxu3 %v9396_v54  ;;  %v9416_v54 = vld [vmem:[#allocation136_spill] sm:$0xff] }
 0x91d   :  { %3520 = vmatpush.bf16.msra.mxu0 %v9397_v58  ;;  %3533 = vmatpush.bf16.msra.mxu1 %v9398_v62  ;;  %v506_v58 = vadd.f32 %v9416_v54, %v8674_v30  ;;  %v9417_v62 = vld [vmem:[#allocation138_spill] sm:$0xff] }
 0x91e   :  { %v545_v11 = vadd.f32 %v9417_v62, %v8676_v29 }
 0x91f   :  { %3546 = vmatpush.bf16.msra.mxu2 %v9399_v63  ;;  %3559 = vmatpush.bf16.msra.mxu3 %v9400_v4 }
 0x921   :  { %3521 = vmatpush.bf16.msra.mxu0 %v9401_v5  ;;  %3534 = vmatpush.bf16.msra.mxu1 %v9402_v10 }
 0x923   :  { %3547 = vmatpush.bf16.msra.mxu2 %v9403_v14  ;;  %3560 = vmatpush.bf16.msra.mxu3 %v9404_v15 }
 0x925   :  { %3522 = vmatpush.bf16.msra.mxu0 %v9405_v19  ;;  %3535 = vmatpush.bf16.msra.mxu1 %v9406_v23 }
 0x927   :  { %3548 = vmatpush.bf16.msra.mxu2 %v9407_v24  ;;  %3561 = vmatpush.bf16.msra.mxu3 %v9408_v27 }
 0x929   :  { %3523 = vmatpush.bf16.msra.mxu0 %v9409_v32  ;;  %3536 = vmatpush.bf16.msra.mxu1 %v9410_v36 }
 0x92b   :  { %3549 = vmatpush.bf16.msra.mxu2 %v9411_v37  ;;  %3562 = vmatpush.bf16.msra.mxu3 %v9412_v41 }
 0x948   :  { %v3267_v47 = vpop.f32.mrf.mxu0  ;;  %v3280_v56 = vpop.f32.mrf.mxu1 }
 0x949   :  { %v3268_v8 = vadd.f32 %v3267_v47, %v9413_v55  ;;  %v3281_v33 = vadd.f32 %v3280_v56, %v8742_v39 }
 0x94f   :  { %v3293_v61 = vpop.f32.mrf.mxu2  ;;  %v3306_v17 = vpop.f32.mrf.mxu3 }
 0x950   :  { %v3269_v35 = vpop.f32.mrf.mxu0  ;;  %v3282_v2 = vpop.f32.mrf.mxu1  ;;  %v3294_v4 = vadd.f32 %v3293_v61, %v6910_v21  ;;  %v3307_v41 = vadd.f32 %v3306_v17, %v6913_v22 }
 0x957   :  { %v3295_v46 = vpop.f32.mrf.mxu2  ;;  %v3308_v51 = vpop.f32.mrf.mxu3 }
 0x958   :  { %v3320_v44 = vpop.f32.mrf.mxu0  ;;  %v3333_v52 = vpop.f32.mrf.mxu1  ;;  %v3256_v51 = vsel %vm646_vm0, %v8034_v1, %v7148_v16 }
 0x959   :  { %v3363_v57 = vadd.f32 %v3320_v44, %v3268_v8  ;;  %v3364_v7 = vadd.f32 %v3333_v52, %v3281_v33 }
 0x95b   :  { %v3367_v40 = vmul.f32 0.5, %v3363_v57  ;;  %v3371_v28 = vmul.f32 0.5, %v3364_v7  ;;  %v3180_v7 = vsel %vm646_vm0, %v8041_v59, %v7275_v25 }
 0x95d   :  { %5869 = vtanh.f32 %v3367_v40 }
 0x95e   :  { %5871 = vtanh.f32 %v3371_v28 }
 0x95f   :  { %v3346_v18 = vpop.f32.mrf.mxu2  ;;  %v3359_v45 = vpop.f32.mrf.mxu3 }
 0x960   :  { %v3322_v60 = vpop.f32.mrf.mxu0  ;;  %v3335_v43 = vpop.f32.mrf.mxu1  ;;  %v3365_v24 = vadd.f32 %v3346_v18, %v3294_v4  ;;  %v3366_v44 = vadd.f32 %v3359_v45, %v3307_v41 }
 0x962   :  { %v3376_v17 = vmul.f32 0.5, %v3366_v44 }
 0x963   :  { %v5870_v19 = vpop.eup %5869 }
 0x964   :  { %v5872_v23 = vpop.eup %5871  ;;  %v3369_v47 = vmul.f32 0.5, %v5870_v19 }
 0x965   :  { %v3373_v56 = vmul.f32 0.5, %v5872_v23 }
 0x966   :  { %v3370_v43 = vadd.f32 0.5, %v3369_v47 }
 0x967   :  { %v3348_v12 = vpop.f32.mrf.mxu2  ;;  %v3361_v31 = vpop.f32.mrf.mxu3  ;;  %v3374_v8 = vadd.f32 0.5, %v3373_v56 }
 0x969   :  { %v3396_v38 = vpop.f32.mrf.mxu0  ;;  %v3409_v42 = vpop.f32.mrf.mxu1  ;;  %v3380_v31 = vmul.f32 %v3374_v8, %v3180_v7 }
 0x96a   :  { %v3439_v48 = vadd.f32 %v3396_v38, %v428_v0  ;;  %v3440_v49 = vadd.f32 %v3409_v42, %v467_v6 }
 0x96c   :  { %v3443_v50 = vmul.f32 0.5, %v3439_v48  ;;  %v3447_v53 = vmul.f32 0.5, %v3440_v49 }
 0x96e   :  { %5873 = vtanh.f32 %v3443_v50 }
 0x96f   :  { %5875 = vtanh.f32 %v3447_v53 }
 0x971   :  { %v3422_v63 = vpop.f32.mrf.mxu2  ;;  %v3435_v26 = vpop.f32.mrf.mxu3 }
 0x972   :  { %v3441_v5 = vadd.f32 %v3422_v63, %v506_v58  ;;  %v3442_v10 = vadd.f32 %v3435_v26, %v545_v11  ;;  %v3398_v14 = vpop.f32.mrf.mxu0  ;;  %v3411_v15 = vpop.f32.mrf.mxu1 }
 0x974   :  { %5877 = vtanh.f32 %v3441_v5  ;;  %v3452_v27 = vmul.f32 0.5, %v3442_v10  ;;  %v5874_v32 = vpop.eup %5873 }
 0x975   :  { %v5876_v36 = vpop.eup %5875  ;;  %v3445_v30 = vmul.f32 0.5, %v5874_v32 }
 0x976   :  { %v3449_v37 = vmul.f32 0.5, %v5876_v36  ;;  %5879 = vtanh.f32 %v3452_v27 }
 0x977   :  { %5881 = vtanh.f32 %v3365_v24  ;;  %v3446_v29 = vadd.f32 0.5, %v3445_v30 }
 0x978   :  { %v3450_v61 = vadd.f32 0.5, %v3449_v37 }
 0x979   :  { %v3424_v35 = vpop.f32.mrf.mxu2  ;;  %v3437_v2 = vpop.f32.mrf.mxu3 }
 0x97a   :  { %v5878_v46 = vpop.eup %5877  ;;  %v3456_v52 = vmul.f32 %v3450_v61, %v3256_v51 }
 0x97b   :  { %v3457_v18 = vmul.f32 %v5878_v46, %v3446_v29 }
 0x97c   :  { %v5880_v60 = vpop.eup %5879 }
 0x97d   :  { %v3458_v33 = vadd.f32 %v3457_v18, %v3456_v52  ;;  %v5882_v57 = vpop.eup %5881  ;;  %v3454_v12 = vmul.f32 0.5, %v5880_v60 }
 0x97e   :  { %v3381_v20 = vmul.f32 %v5882_v57, %v3370_v43 }
 0x97f   :  { %5883 = vtanh.f32 %v3458_v33  ;;  %v3455_v16 = vadd.f32 0.5, %v3454_v12 }
 0x980   :  { %5885 = vtanh.f32 %v3376_v17  ;;  %v8166_v45 = vadd.f32 %v3381_v20, %v3380_v31  ;;  %v3591_v17 = vld [vmem:[%s8320_s7] sm:$0x3] }
 0x982   :  { %5887 = vtanh.f32 %v8166_v45 }
 0x985   :  { %v5884_v1 = vpop.eup %5883 }
 0x986   :  { %v3460_v0 = vmul.f32 %v5884_v1, %v3455_v16  ;;  %v5886_v6 = vpop.eup %5885 }
 0x987   :  { %v3378_v59 = vmul.f32 0.5, %v5886_v6 }
 0x988   :  { %v3461_v34 = vsel %vm646_vm0, %v3460_v0, %v7152_v9  ;;  %v5888_v28 = vpop.eup %5887 }
 0x989   :  { %v3462_v40 = vpack.c.bf16 %v3461_v34, %v3461_v34  ;;  %v3379_v38 = vadd.f32 0.5, %v3378_v59 }
 0x98b   :  { %3471 = vmatmul.bf16.vlgmr.msrb.gmra.mxu0 %v3462_v40  ;;  %3484 = vmatmul.bf16.vlgmr.msrb.gmra.mxu1 %v3462_v40  ;;  %v3384_v42 = vmul.f32 %v5888_v28, %v3379_v38 }
 0x98c   :  { %3497 = vmatmul.bf16.vlgmr.msrb.gmra.mxu2 %v3462_v40  ;;  %3510 = vmatmul.bf16.vlgmr.msrb.gmra.mxu3 %v3462_v40 }
 0x98d   :  { %v3385_v48 = vsel %vm646_vm0, %v3384_v42, %v7289_v3 }
 0x98e   :  { %v3515_v49 = vpack.c.bf16 %v3385_v48, %v3385_v48 }
 0x99b   :  { %3524 = vmatmul.bf16.vlgmr.msra.gmra.mxu0 %v3515_v49  ;;  %3537 = vmatmul.bf16.vlgmr.msra.gmra.mxu1 %v3515_v49 }
 0x99c   :  { %3550 = vmatmul.bf16.vlgmr.msra.gmra.mxu2 %v3515_v49  ;;  %3563 = vmatmul.bf16.vlgmr.msra.gmra.mxu3 %v3515_v49 }
 0xa08   :  { %v3472_v9 = vpop.f32.mrf.mxu0  ;;  %v3485_v50 = vpop.f32.mrf.mxu1 }
 0xa09   :  { %v3473_v11 = vadd.f32 %v3472_v9, %v9413_v55  ;;  %v3486_v63 = vadd.f32 %v3485_v50, %v8742_v39 }
 0xa0f   :  { %v3498_v53 = vpop.f32.mrf.mxu2  ;;  %v3511_v54 = vpop.f32.mrf.mxu3 }
 0xa10   :  { %v3474_v58 = vpop.f32.mrf.mxu0  ;;  %v3487_v62 = vpop.f32.mrf.mxu1  ;;  %v3499_v24 = vadd.f32 %v3498_v53, %v6910_v21  ;;  %v3512_v27 = vadd.f32 %v3511_v54, %v6913_v22  ;;  %v3386_v22 = vsel %vm646_vm0, %v8166_v45, %v7275_v25 }
 0xa17   :  { %v3500_v26 = vpop.f32.mrf.mxu2  ;;  %v3513_v4 = vpop.f32.mrf.mxu3 }
 0xa18   :  { %v3525_v5 = vpop.f32.mrf.mxu0  ;;  %v3538_v10 = vpop.f32.mrf.mxu1 }
 0xa19   :  { %v3568_v14 = vadd.f32 %v3525_v5, %v3473_v11  ;;  %v3569_v15 = vadd.f32 %v3538_v10, %v3486_v63 }
 0xa1b   :  { %v3572_v19 = vmul.f32 0.5, %v3568_v14  ;;  %v3576_v23 = vmul.f32 0.5, %v3569_v15 }
 0xa1d   :  { %5889 = vtanh.f32 %v3572_v19 }
 0xa1e   :  { %5891 = vtanh.f32 %v3576_v23 }
 0xa1f   :  { %v3551_v32 = vpop.f32.mrf.mxu2  ;;  %v3564_v36 = vpop.f32.mrf.mxu3 }
 0xa20   :  { %v3570_v30 = vadd.f32 %v3551_v32, %v3499_v24  ;;  %v3571_v55 = vadd.f32 %v3564_v36, %v3512_v27  ;;  %v3527_v37 = vpop.f32.mrf.mxu0  ;;  %v3540_v39 = vpop.f32.mrf.mxu1 }
 0xa22   :  { %5893 = vtanh.f32 %v3570_v30  ;;  %v3581_v29 = vmul.f32 0.5, %v3571_v55 }
 0xa23   :  { %v5890_v41 = vpop.eup %5889 }
 0xa24   :  { %v5892_v47 = vpop.eup %5891  ;;  %v3574_v56 = vmul.f32 0.5, %v5890_v41  ;;  %5895 = vtanh.f32 %v3581_v29 }
 0xa25   :  { %v3578_v61 = vmul.f32 0.5, %v5892_v47 }
 0xa26   :  { %v3575_v35 = vadd.f32 0.5, %v3574_v56 }
 0xa27   :  { %v3579_v2 = vadd.f32 0.5, %v3578_v61  ;;  %v3553_v46 = vpop.f32.mrf.mxu2  ;;  %v3566_v21 = vpop.f32.mrf.mxu3 }
 0xa28   :  { %v5894_v51 = vpop.eup %5893 }
 0xa29   :  { %v3585_v44 = vmul.f32 %v3579_v2, %v3386_v22  ;;  %v3586_v52 = vmul.f32 %v5894_v51, %v3575_v35 }
 0xa2a   :  { %v5896_v18 = vpop.eup %5895 }
 0xa2b   :  { %v3587_v60 = vadd.f32 %v3586_v52, %v3585_v44  ;;  %v3583_v43 = vmul.f32 0.5, %v5896_v18 }
 0xa2d   :  { %5897 = vtanh.f32 %v3587_v60  ;;  %v3584_v8 = vadd.f32 0.5, %v3583_v43 }
 0xa33   :  { %v5898_v33 = vpop.eup %5897 }
 0xa34   :  { %v3589_v57 = vmul.f32 %v5898_v33, %v3584_v8 }
 0xa36   :  { %v3590_v7 = vsel %vm646_vm0, %v3589_v57, %v7289_v3 }
 0xa37   :  { %3611 = vmatpush.msrb.mxu0 %v3590_v7 }
 0xa38   :  { %5032 = vmatmul.msk.f32.vlgmr.msrb.gmra.mxu0 %vm3592_vm1, %v3591_v17 }
 0xab5   :  { %v8198_v25 = vpop.f32.mrf.mxu0 }
 0xab6   :  { %6050 = dma.done.wait [#allocation5], 4096 }
 0xab7   :  { %6051 = vsyncadd [#allocation5], 4294963200 }
 0xab8   :  { %6052 = dma.done.wait [#allocation5 + $0x1], 4096 }
 0xab9   :  { %6053 = vsyncadd [#allocation5 + $0x1], 4294963200 }
 0xaba   :  { %6054 = dma.done.wait [#allocation5 + $0x2], 4096 }
 0xabb   :  { %6055 = vsyncadd [#allocation5 + $0x2], 4294963200  ;;  %v5584_v12 = vld [vmem:[#allocation2 + $0xf4] sm:$0xf]  ;;  %v5093_v31 = vld [vmem:[#allocation2 + $0xf8] sm:$0xf0] }
 0xabc   :  { %v5155_v20 = vld [vmem:[#allocation2 + $0x70] sm:$0xf]  ;;  %v5096_v16 = vor.u32 %v5584_v12, %v5093_v31  ;;  %v5569_v1 = vld [vmem:[#allocation2 + $0x74] sm:$0xf0]  ;;  %v5568_v45 = vld [vmem:[#allocation2 + $0x74] sm:$0xf] }
 0xabd   :  { %v5157_v0 = vld [vmem:[#allocation2 + $0x78] sm:$0xf0]  ;;  %v5156_v34 = vor.u32 %v5569_v1, %v5155_v20  ;;  %v5091_v3 = vld [vmem:[#allocation2 + $0xf0] sm:$0xf]  ;;  %v5585_v6 = vld [vmem:[#allocation2 + $0xf4] sm:$0xf0] }
 0xabe   :  { %v5160_v13 = vor.u32 %v5568_v45, %v5157_v0  ;;  %v5582_v40 = vld [vmem:[#allocation2 + $0xe4] sm:$0xf]  ;;  %3751 = vmatpush.bf16.msrb.mxu2 %v5096_v16  ;;  %v5092_v59 = vor.u32 %v5585_v6, %v5091_v3  ;;  %v5085_v28 = vld [vmem:[#allocation2 + $0xe8] sm:$0xf0]  ;;  %v5147_v38 = vld [vmem:[#allocation2 + $0x60] sm:$0xf] }
 0xabf   :  { %v5567_v42 = vld [vmem:[#allocation2 + $0x64] sm:$0xf0]  ;;  %3844 = vmatpush.bf16.msrb.mxu3 %v5156_v34  ;;  %v5088_v48 = vor.u32 %v5582_v40, %v5085_v28  ;;  %v5566_v9 = vld [vmem:[#allocation2 + $0x64] sm:$0xf]  ;;  %v5149_v50 = vld [vmem:[#allocation2 + $0x68] sm:$0xf0] }
 0xac0   :  { %3857 = vmatpush.bf16.msra.mxu0 %v5160_v13  ;;  %v5148_v49 = vor.u32 %v5567_v42, %v5147_v38  ;;  %v5083_v53 = vld [vmem:[#allocation2 + $0xe0] sm:$0xf]  ;;  %3738 = vmatpush.bf16.msrb.mxu1 %v5092_v59  ;;  %v5152_v54 = vor.u32 %v5566_v9, %v5149_v50  ;;  %v5583_v58 = vld [vmem:[#allocation2 + $0xe4] sm:$0xf0]  ;;  %v5580_v62 = vld [vmem:[#allocation2 + $0xd4] sm:$0xf] }
 0xac1   :  { %v5077_v11 = vld [vmem:[#allocation2 + $0xd8] sm:$0xf0]  ;;  %v5084_v63 = vor.u32 %v5583_v58, %v5083_v53  ;;  %v5139_v26 = vld [vmem:[#allocation2 + $0x50] sm:$0xf]  ;;  %v5565_v4 = vld [vmem:[#allocation2 + $0x54] sm:$0xf0] }
 0xac2   :  { %v5564_v5 = vld [vmem:[#allocation2 + $0x54] sm:$0xf]  ;;  %3752 = vmatpush.bf16.msrb.mxu2 %v5088_v48  ;;  %v5080_v10 = vor.u32 %v5580_v62, %v5077_v11  ;;  %v5141_v14 = vld [vmem:[#allocation2 + $0x58] sm:$0xf0]  ;;  %v5075_v15 = vld [vmem:[#allocation2 + $0xd0] sm:$0xf]  ;;  %v5140_v23 = vor.u32 %v5565_v4, %v5139_v26 }
 0xac3   :  { %v5581_v19 = vld [vmem:[#allocation2 + $0xd4] sm:$0xf0]  ;;  %3845 = vmatpush.bf16.msrb.mxu3 %v5148_v49  ;;  %v5144_v24 = vor.u32 %v5564_v5, %v5141_v14  ;;  %v5578_v27 = vld [vmem:[#allocation2 + $0xc4] sm:$0xf]  ;;  %v5069_v32 = vld [vmem:[#allocation2 + $0xc8] sm:$0xf0] }
 0xac4   :  { %3858 = vmatpush.bf16.msra.mxu0 %v5152_v54  ;;  %v5131_v36 = vld [vmem:[#allocation2 + $0x40] sm:$0xf]  ;;  %3739 = vmatpush.bf16.msrb.mxu1 %v5084_v63  ;;  %v5076_v30 = vor.u32 %v5581_v19, %v5075_v15  ;;  %v5563_v55 = vld [vmem:[#allocation2 + $0x44] sm:$0xf0]  ;;  %v5562_v37 = vld [vmem:[#allocation2 + $0x44] sm:$0xf]  ;;  %v5072_v47 = vor.u32 %v5578_v27, %v5069_v32 }
 0xac5   :  { %v5133_v39 = vld [vmem:[#allocation2 + $0x48] sm:$0xf0]  ;;  %v5067_v29 = vld [vmem:[#allocation2 + $0xc0] sm:$0xf]  ;;  %v5579_v41 = vld [vmem:[#allocation2 + $0xc4] sm:$0xf0]  ;;  %v5132_v56 = vor.u32 %v5563_v55, %v5131_v36 }
 0xac6   :  { %3753 = vmatpush.bf16.msrb.mxu2 %v5080_v10  ;;  %v5136_v61 = vor.u32 %v5562_v37, %v5133_v39  ;;  %v5576_v35 = vld [vmem:[#allocation2 + $0xb4] sm:$0xf]  ;;  %v5061_v2 = vld [vmem:[#allocation2 + $0xb8] sm:$0xf0]  ;;  %v5123_v46 = vld [vmem:[#allocation2 + $0x30] sm:$0xf]  ;;  %v5068_v21 = vor.u32 %v5579_v41, %v5067_v29  ;;  %v3641_v39 = vpack.c.bf16 %v8198_v25, %v8198_v25 }
 0xac7   :  { %3846 = vmatpush.bf16.msrb.mxu3 %v5140_v23  ;;  %v5561_v51 = vld [vmem:[#allocation2 + $0x34] sm:$0xf0]  ;;  %v5560_v22 = vld [vmem:[#allocation2 + $0x34] sm:$0xf]  ;;  %v5125_v44 = vld [vmem:[#allocation2 + $0x38] sm:$0xf0]  ;;  %v5064_v60 = vor.u32 %v5576_v35, %v5061_v2 }
 0xac8   :  { %3859 = vmatpush.bf16.msra.mxu0 %v5144_v24  ;;  %3740 = vmatpush.bf16.msrb.mxu1 %v5076_v30  ;;  %v5059_v52 = vld [vmem:[#allocation2 + $0xb0] sm:$0xf]  ;;  %v5577_v18 = vld [vmem:[#allocation2 + $0xb4] sm:$0xf0]  ;;  %v5124_v43 = vor.u32 %v5561_v51, %v5123_v46  ;;  %v5128_v8 = vor.u32 %v5560_v22, %v5125_v44  ;;  %v5574_v33 = vld [vmem:[#allocation2 + $0xa4] sm:$0xf] }
 0xac9   :  { %v5053_v57 = vld [vmem:[#allocation2 + $0xa8] sm:$0xf0]  ;;  %v5115_v17 = vld [vmem:[#allocation2 + $0x20] sm:$0xf]  ;;  %v5060_v7 = vor.u32 %v5577_v18, %v5059_v52  ;;  %v5559_v12 = vld [vmem:[#allocation2 + $0x24] sm:$0xf0] }
 0xaca   :  { %3754 = vmatpush.bf16.msrb.mxu2 %v5072_v47  ;;  %v5558_v31 = vld [vmem:[#allocation2 + $0x24] sm:$0xf]  ;;  %v5117_v20 = vld [vmem:[#allocation2 + $0x28] sm:$0xf0]  ;;  %v5051_v16 = vld [vmem:[#allocation2 + $0xa0] sm:$0xf]  ;;  %v5056_v45 = vor.u32 %v5574_v33, %v5053_v57  ;;  %v5116_v0 = vor.u32 %v5559_v12, %v5115_v17 }
 0xacb   :  { %3847 = vmatpush.bf16.msrb.mxu3 %v5132_v56  ;;  %v5575_v1 = vld [vmem:[#allocation2 + $0xa4] sm:$0xf0]  ;;  %v5120_v34 = vor.u32 %v5558_v31, %v5117_v20  ;;  %v5572_v13 = vld [vmem:[#allocation2 + $0x94] sm:$0xf]  ;;  %v5045_v3 = vld [vmem:[#allocation2 + $0x98] sm:$0xf0] }
 0xacc   :  { %3860 = vmatpush.bf16.msra.mxu0 %v5136_v61  ;;  %3741 = vmatpush.bf16.msrb.mxu1 %v5068_v21  ;;  %v5107_v6 = vld [vmem:[#allocation2 + $0x10] sm:$0xf]  ;;  %v5052_v40 = vor.u32 %v5575_v1, %v5051_v16  ;;  %v5557_v59 = vld [vmem:[#allocation2 + $0x14] sm:$0xf0]  ;;  %v5556_v28 = vld [vmem:[#allocation2 + $0x14] sm:$0xf]  ;;  %v5048_v49 = vor.u32 %v5572_v13, %v5045_v3 }
 0xacd   :  { %v5109_v38 = vld [vmem:[#allocation2 + $0x18] sm:$0xf0]  ;;  %v5043_v42 = vld [vmem:[#allocation2 + $0x90] sm:$0xf]  ;;  %v5573_v48 = vld [vmem:[#allocation2 + $0x94] sm:$0xf0]  ;;  %v5108_v50 = vor.u32 %v5557_v59, %v5107_v6 }
 0xace   :  { %3755 = vmatpush.bf16.msrb.mxu2 %v5064_v60  ;;  %v5570_v9 = vld [vmem:[#allocation2 + $0x84] sm:$0xf]  ;;  %v5112_v53 = vor.u32 %v5556_v28, %v5109_v38  ;;  %v5037_v54 = vld [vmem:[#allocation2 + $0x88] sm:$0xf0]  ;;  %v5099_v58 = vld [vmem:[#allocation2] sm:$0xf]  ;;  %v5044_v11 = vor.u32 %v5573_v48, %v5043_v42 }
 0xacf   :  { %3848 = vmatpush.bf16.msrb.mxu3 %v5124_v43  ;;  %v5555_v62 = vld [vmem:[#allocation2 + $0x4] sm:$0xf0]  ;;  %v5554_v63 = vld [vmem:[#allocation2 + $0x4] sm:$0xf]  ;;  %v5101_v26 = vld [vmem:[#allocation2 + $0x8] sm:$0xf0]  ;;  %v5040_v15 = vor.u32 %v5570_v9, %v5037_v54 }
 0xad0   :  { %3861 = vmatpush.bf16.msra.mxu0 %v5128_v8  ;;  %3742 = vmatpush.bf16.msrb.mxu1 %v5060_v7  ;;  %v5035_v4 = vld [vmem:[#allocation2 + $0x80] sm:$0xf]  ;;  %v5571_v5 = vld [vmem:[#allocation2 + $0x84] sm:$0xf0]  ;;  %v5283_v10 = vld [vmem:[#allocation3 + $0xf0] sm:$0xf]  ;;  %v5100_v24 = vor.u32 %v5555_v62, %v5099_v58  ;;  %v5104_v27 = vor.u32 %v5554_v63, %v5101_v26 }
 0xad1   :  { %v5617_v14 = vld [vmem:[#allocation3 + $0xf4] sm:$0xf0]  ;;  %v5219_v19 = vld [vmem:[#allocation3 + $0x70] sm:$0xf]  ;;  %v5036_v32 = vor.u32 %v5571_v5, %v5035_v4  ;;  %v5600_v30 = vld [vmem:[#allocation3 + $0x74] sm:$0xf] }
 0xad2   :  { %3756 = vmatpush.bf16.msrb.mxu2 %v5056_v45  ;;  %v5601_v23 = vld [vmem:[#allocation3 + $0x74] sm:$0xf0]  ;;  %v5284_v36 = vor.u32 %v5617_v14, %v5283_v10  ;;  %v5221_v55 = vld [vmem:[#allocation3 + $0x78] sm:$0xf0]  ;;  %v5616_v37 = vld [vmem:[#allocation3 + $0xf4] sm:$0xf] }
 0xad3   :  { %3849 = vmatpush.bf16.msrb.mxu3 %v5116_v0  ;;  %v5220_v29 = vor.u32 %v5601_v23, %v5219_v19  ;;  %v5285_v41 = vld [vmem:[#allocation3 + $0xf8] sm:$0xf0]  ;;  %v5275_v47 = vld [vmem:[#allocation3 + $0xe0] sm:$0xf]  ;;  %v5615_v56 = vld [vmem:[#allocation3 + $0xe4] sm:$0xf0]  ;;  %v5224_v46 = vor.u32 %v5600_v30, %v5221_v55 }
 0xad4   :  { %3862 = vmatpush.bf16.msra.mxu0 %v5120_v34  ;;  %3743 = vmatpush.bf16.msrb.mxu1 %v5052_v40  ;;  %v5211_v61 = vld [vmem:[#allocation3 + $0x60] sm:$0xf]  ;;  %v5599_v35 = vld [vmem:[#allocation3 + $0x64] sm:$0xf0]  ;;  %v5288_v21 = vor.u32 %v5616_v37, %v5285_v41  ;;  %v5276_v51 = vor.u32 %v5615_v56, %v5275_v47  ;;  %v5598_v22 = vld [vmem:[#allocation3 + $0x64] sm:$0xf] }
 0xad5   :  { %v3624_v2 = vld [vmem:[%s8321_s8] sm:$0x1]  ;;  %v5213_v25 = vld [vmem:[#allocation3 + $0x68] sm:$0xf0]  ;;  %v5614_v44 = vld [vmem:[#allocation3 + $0xe4] sm:$0xf]  ;;  %v5212_v52 = vor.u32 %v5599_v35, %v5211_v61 }
 0xad6   :  { %3757 = vmatpush.bf16.msrb.mxu2 %v5048_v49  ;;  %v5277_v18 = vld [vmem:[#allocation3 + $0xe8] sm:$0xf0]  ;;  %v5267_v60 = vld [vmem:[#allocation3 + $0xd0] sm:$0xf]  ;;  %v5613_v43 = vld [vmem:[#allocation3 + $0xd4] sm:$0xf0]  ;;  %v5216_v57 = vor.u32 %v5598_v22, %v5213_v25 }
 0xad7   :  { %3850 = vmatpush.bf16.msrb.mxu3 %v5108_v50  ;;  %v5203_v8 = vld [vmem:[#allocation3 + $0x50] sm:$0xf]  ;;  %v5597_v33 = vld [vmem:[#allocation3 + $0x54] sm:$0xf0]  ;;  %v5280_v17 = vor.u32 %v5614_v44, %v5277_v18  ;;  %v5268_v7 = vor.u32 %v5613_v43, %v5267_v60  ;;  %v5596_v12 = vld [vmem:[#allocation3 + $0x54] sm:$0xf] }
 0xad8   :  { %3863 = vmatpush.bf16.msra.mxu0 %v5112_v53  ;;  %3744 = vmatpush.bf16.msrb.mxu1 %v5044_v11  ;;  %v5205_v31 = vld [vmem:[#allocation3 + $0x58] sm:$0xf0]  ;;  %v5612_v20 = vld [vmem:[#allocation3 + $0xd4] sm:$0xf]  ;;  %v5204_v16 = vor.u32 %v5597_v33, %v5203_v8  ;;  %v5259_v45 = vld [vmem:[#allocation3 + $0xc0] sm:$0xf] }
 0xad9   :  { %v5269_v1 = vld [vmem:[#allocation3 + $0xd8] sm:$0xf0]  ;;  %v5611_v0 = vld [vmem:[#allocation3 + $0xc4] sm:$0xf0]  ;;  %v5195_v34 = vld [vmem:[#allocation3 + $0x40] sm:$0xf]  ;;  %v5208_v3 = vor.u32 %v5596_v12, %v5205_v31 }
 0xada   :  { %3758 = vmatpush.bf16.msrb.mxu2 %v5040_v15  ;;  %v5595_v13 = vld [vmem:[#allocation3 + $0x44] sm:$0xf0]  ;;  %v5272_v6 = vor.u32 %v5612_v20, %v5269_v1  ;;  %v5260_v40 = vor.u32 %v5611_v0, %v5259_v45  ;;  %v5594_v59 = vld [vmem:[#allocation3 + $0x44] sm:$0xf]  ;;  %v5197_v28 = vld [vmem:[#allocation3 + $0x48] sm:$0xf0] }
 0xadb   :  { %3851 = vmatpush.bf16.msrb.mxu3 %v5100_v24  ;;  %v5196_v38 = vor.u32 %v5595_v13, %v5195_v34  ;;  %v5610_v42 = vld [vmem:[#allocation3 + $0xc4] sm:$0xf]  ;;  %v5261_v48 = vld [vmem:[#allocation3 + $0xc8] sm:$0xf0]  ;;  %v5200_v49 = vor.u32 %v5594_v59, %v5197_v28  ;;  %v5187_v50 = vld [vmem:[#allocation3 + $0x30] sm:$0xf] }
 0xadc   :  { %3864 = vmatpush.bf16.msra.mxu0 %v5104_v27  ;;  %3745 = vmatpush.bf16.msrb.mxu1 %v5036_v32  ;;  %v5264_v9 = vor.u32 %v5610_v42, %v5261_v48  ;;  %v5593_v53 = vld [vmem:[#allocation3 + $0x34] sm:$0xf0]  ;;  %v5251_v54 = vld [vmem:[#allocation3 + $0xb0] sm:$0xf]  ;;  %v5592_v11 = vld [vmem:[#allocation3 + $0x34] sm:$0xf] }
 0xadd   :  { %3759 = vmatmul.bf16.vlgmr.msrb.gmra.mxu2 %v3641_v39  ;;  %v5188_v58 = vor.u32 %v5593_v53, %v5187_v50  ;;  %v5609_v62 = vld [vmem:[#allocation3 + $0xb4] sm:$0xf0]  ;;  %v5189_v63 = vld [vmem:[#allocation3 + $0x38] sm:$0xf0]  ;;  %v5608_v5 = vld [vmem:[#allocation3 + $0xb4] sm:$0xf] }
 0xade   :  { %4093 = vmatpush.bf16.msra.mxu2 %v5284_v36  ;;  %3852 = vmatmul.bf16.vlgmr.msrb.gmra.mxu3 %v3624_v2  ;;  %v5252_v26 = vor.u32 %v5609_v62, %v5251_v54  ;;  %v5192_v4 = vor.u32 %v5592_v11, %v5189_v63  ;;  %v5253_v10 = vld [vmem:[#allocation3 + $0xb8] sm:$0xf0]  ;;  %v5179_v15 = vld [vmem:[#allocation3 + $0x20] sm:$0xf]  ;;  %v5591_v19 = vld [vmem:[#allocation3 + $0x24] sm:$0xf0] }
 0xadf   :  { %3865 = vmatmul.bf16.vlgmr.msra.gmra.mxu0 %v3624_v2  ;;  %3746 = vmatmul.bf16.vlgmr.msrb.gmra.mxu1 %v3641_v39  ;;  %v5256_v14 = vor.u32 %v5608_v5, %v5253_v10  ;;  %v5243_v23 = vld [vmem:[#allocation3 + $0xa0] sm:$0xf]  ;;  %v5180_v24 = vor.u32 %v5591_v19, %v5179_v15  ;;  %v5607_v27 = vld [vmem:[#allocation3 + $0xa4] sm:$0xf0]  ;;  %v5590_v32 = vld [vmem:[#allocation3 + $0x24] sm:$0xf] }
 0xae0   :  { %4080 = vmatpush.bf16.msra.mxu1 %v5220_v29  ;;  %4106 = vmatpush.bf16.msra.mxu3 %v5224_v46  ;;  %v5181_v36 = vld [vmem:[#allocation3 + $0x28] sm:$0xf0]  ;;  %v5244_v30 = vor.u32 %v5607_v27, %v5243_v23  ;;  %v5606_v37 = vld [vmem:[#allocation3 + $0xa4] sm:$0xf]  ;;  %v5171_v41 = vld [vmem:[#allocation3 + $0x10] sm:$0xf] }
 0xae1   :  { %4119 = vmatpush.bf16.msrb.mxu0 %v5288_v21  ;;  %v5184_v55 = vor.u32 %v5590_v32, %v5181_v36  ;;  %v5245_v39 = vld [vmem:[#allocation3 + $0xa8] sm:$0xf0]  ;;  %v5589_v47 = vld [vmem:[#allocation3 + $0x14] sm:$0xf0]  ;;  %v5235_v56 = vld [vmem:[#allocation3 + $0x90] sm:$0xf] }
 0xae2   :  { %4094 = vmatpush.bf16.msra.mxu2 %v5276_v51  ;;  %v5248_v29 = vor.u32 %v5606_v37, %v5245_v39  ;;  %v5172_v61 = vor.u32 %v5589_v47, %v5171_v41  ;;  %v5605_v35 = vld [vmem:[#allocation3 + $0x94] sm:$0xf0]  ;;  %v5588_v2 = vld [vmem:[#allocation3 + $0x14] sm:$0xf]  ;;  %v5173_v21 = vld [vmem:[#allocation3 + $0x18] sm:$0xf0] }
 0xae3   :  { %v5236_v46 = vor.u32 %v5605_v35, %v5235_v56  ;;  %v5604_v51 = vld [vmem:[#allocation3 + $0x94] sm:$0xf]  ;;  %v5176_v22 = vor.u32 %v5588_v2, %v5173_v21  ;;  %v5237_v25 = vld [vmem:[#allocation3 + $0x98] sm:$0xf0]  ;;  %v5587_v18 = vld [vmem:[#allocation3 + $0x4] sm:$0xf0] }
 0xae4   :  { %4081 = vmatpush.bf16.msra.mxu1 %v5212_v52  ;;  %4107 = vmatpush.bf16.msra.mxu3 %v5216_v57  ;;  %v5240_v44 = vor.u32 %v5604_v51, %v5237_v25  ;;  %v5163_v52 = vld [vmem:[#allocation3] sm:$0xf]  ;;  %v5603_v8 = vld [vmem:[#allocation3 + $0x84] sm:$0xf0]  ;;  %v5586_v33 = vld [vmem:[#allocation3 + $0x4] sm:$0xf] }
 0xae5   :  { %4120 = vmatpush.bf16.msrb.mxu0 %v5280_v17  ;;  %v5227_v60 = vld [vmem:[#allocation3 + $0x80] sm:$0xf]  ;;  %v5164_v43 = vor.u32 %v5587_v18, %v5163_v52  ;;  %v5165_v57 = vld [vmem:[#allocation3 + $0x8] sm:$0xf0]  ;;  %v5602_v12 = vld [vmem:[#allocation3 + $0x84] sm:$0xf] }
 0xae6   :  { %4095 = vmatpush.bf16.msra.mxu2 %v5268_v7  ;;  %v5228_v17 = vor.u32 %v5603_v8, %v5227_v60  ;;  %v5168_v7 = vor.u32 %v5586_v33, %v5165_v57  ;;  %v5229_v31 = vld [vmem:[#allocation3 + $0x88] sm:$0xf0]  ;;  %v5633_v1 = vld [vmem:[#allocation4 + $0x74] sm:$0xf0]  ;;  %v5632_v45 = vld [vmem:[#allocation4 + $0x74] sm:$0xf] }
 0xae7   :  { %v5232_v20 = vor.u32 %v5602_v12, %v5229_v31  ;;  %v5349_v34 = vld [vmem:[#allocation4 + $0x78] sm:$0xf0]  ;;  %v5411_v13 = vld [vmem:[#allocation4 + $0xf0] sm:$0xf]  ;;  %v5648_v59 = vld [vmem:[#allocation4 + $0xf4] sm:$0xf] }
 0xae8   :  { %4082 = vmatpush.bf16.msra.mxu1 %v5204_v16  ;;  %4108 = vmatpush.bf16.msra.mxu3 %v5208_v3  ;;  %v5347_v16 = vld [vmem:[#allocation4 + $0x70] sm:$0xf]  ;;  %v5649_v3 = vld [vmem:[#allocation4 + $0xf4] sm:$0xf0]  ;;  %v5413_v28 = vld [vmem:[#allocation4 + $0xf8] sm:$0xf0] }
 0xae9   :  { %4121 = vmatpush.bf16.msrb.mxu0 %v5272_v6  ;;  %v5348_v0 = vor.u32 %v5633_v1, %v5347_v16  ;;  %v5352_v6 = vor.u32 %v5632_v45, %v5349_v34  ;;  %v5416_v42 = vor.u32 %v5648_v59, %v5413_v28  ;;  %v5631_v48 = vld [vmem:[#allocation4 + $0x64] sm:$0xf0]  ;;  %v5403_v54 = vld [vmem:[#allocation4 + $0xe0] sm:$0xf]  ;;  %v5646_v62 = vld [vmem:[#allocation4 + $0xe4] sm:$0xf] }
 0xaea   :  { %4096 = vmatpush.bf16.msra.mxu2 %v5260_v40  ;;  %v5412_v40 = vor.u32 %v5649_v3, %v5411_v13  ;;  %v5405_v63 = vld [vmem:[#allocation4 + $0xe8] sm:$0xf0]  ;;  %v5628_v10 = vld [vmem:[#allocation4 + $0x54] sm:$0xf]  ;;  %v5395_v15 = vld [vmem:[#allocation4 + $0xd0] sm:$0xf] }
 0xaeb   :  { %v5408_v5 = vor.u32 %v5646_v62, %v5405_v63  ;;  %v5645_v23 = vld [vmem:[#allocation4 + $0xd4] sm:$0xf0]  ;;  %v5397_v27 = vld [vmem:[#allocation4 + $0xd8] sm:$0xf0]  ;;  %v5626_v37 = vld [vmem:[#allocation4 + $0x44] sm:$0xf] }
 0xaec   :  { %4083 = vmatpush.bf16.msra.mxu1 %v5196_v38  ;;  %4109 = vmatpush.bf16.msra.mxu3 %v5200_v49  ;;  %v5339_v38 = vld [vmem:[#allocation4 + $0x60] sm:$0xf]  ;;  %v5630_v49 = vld [vmem:[#allocation4 + $0x64] sm:$0xf]  ;;  %v5396_v36 = vor.u32 %v5645_v23, %v5395_v15  ;;  %v5643_v47 = vld [vmem:[#allocation4 + $0xc4] sm:$0xf0] }
 0xaed   :  { %4122 = vmatpush.bf16.msrb.mxu0 %v5264_v9  ;;  %v5341_v9 = vld [vmem:[#allocation4 + $0x68] sm:$0xf0]  ;;  %v5340_v50 = vor.u32 %v5631_v48, %v5339_v38  ;;  %v5387_v41 = vld [vmem:[#allocation4 + $0xc0] sm:$0xf]  ;;  %v5642_v56 = vld [vmem:[#allocation4 + $0xc4] sm:$0xf] }
 0xaee   :  { %4097 = vmatpush.bf16.msra.mxu2 %v5252_v26  ;;  %v5344_v53 = vor.u32 %v5630_v49, %v5341_v9  ;;  %v5331_v26 = vld [vmem:[#allocation4 + $0x50] sm:$0xf]  ;;  %v5625_v51 = vld [vmem:[#allocation4 + $0x34] sm:$0xf0]  ;;  %v5624_v25 = vld [vmem:[#allocation4 + $0x34] sm:$0xf] }
 0xaef   :  { %v5315_v21 = vld [vmem:[#allocation4 + $0x30] sm:$0xf]  ;;  %v3870_v8 = vld [vmem:[%s8323_s10] sm:$0x3]  ;;  %v5641_v28 = vld [vmem:[#allocation4 + $0xb4] sm:$0xf0] }
 0xaf0   :  { %4084 = vmatpush.bf16.msra.mxu1 %v5188_v58  ;;  %4110 = vmatpush.bf16.msra.mxu3 %v5192_v4  ;;  %v5647_v58 = vld [vmem:[#allocation4 + $0xe4] sm:$0xf0]  ;;  %v5629_v4 = vld [vmem:[#allocation4 + $0x54] sm:$0xf0]  ;;  %v5316_v52 = vor.u32 %v5625_v51, %v5315_v21  ;;  %v3873_v33 = vperm.slane %v3870_v8, 1  ;;  %vm4468_vm2 = vcmask 1024  }
 0xaf1   :  { %4123 = vmatpush.bf16.msrb.mxu0 %v5256_v14  ;;  %v5404_v11 = vor.u32 %v5647_v58, %v5403_v54  ;;  %v5333_v14 = vld [vmem:[#allocation4 + $0x58] sm:$0xf0]  ;;  %v5332_v19 = vor.u32 %v5629_v4, %v5331_v26  ;;  %v5379_v59 = vld [vmem:[#allocation4 + $0xb0] sm:$0xf]  ;;  %v5640_v38 = vld [vmem:[#allocation4 + $0xb4] sm:$0xf] }
 0xaf2   :  { %4098 = vmatpush.bf16.msra.mxu2 %v5244_v30  ;;  %v5336_v32 = vor.u32 %v5628_v10, %v5333_v14  ;;  %v5323_v30 = vld [vmem:[#allocation4 + $0x40] sm:$0xf]  ;;  %v5381_v48 = vld [vmem:[#allocation4 + $0xb8] sm:$0xf0]  ;;  %v5309_v58 = vld [vmem:[#allocation4 + $0x28] sm:$0xf0] }
 0xaf3   :  { %v5384_v49 = vor.u32 %v5640_v38, %v5381_v48  ;;  %v5307_v9 = vld [vmem:[#allocation4 + $0x20] sm:$0xf]  ;;  %v5639_v63 = vld [vmem:[#allocation4 + $0xa4] sm:$0xf0]  ;;  %v5638_v26 = vld [vmem:[#allocation4 + $0xa4] sm:$0xf] }
 0xaf4   :  { %4085 = vmatpush.bf16.msra.mxu1 %v5180_v24  ;;  %4111 = vmatpush.bf16.msra.mxu3 %v5184_v55  ;;  %v5644_v24 = vld [vmem:[#allocation4 + $0xd4] sm:$0xf]  ;;  %v5627_v55 = vld [vmem:[#allocation4 + $0x44] sm:$0xf0]  ;;  %v5299_v14 = vld [vmem:[#allocation4 + $0x10] sm:$0xf] }
 0xaf5   :  { %4124 = vmatpush.bf16.msrb.mxu0 %v5248_v29  ;;  %v5400_v39 = vor.u32 %v5644_v24, %v5397_v27  ;;  %v5325_v29 = vld [vmem:[#allocation4 + $0x48] sm:$0xf0]  ;;  %v5324_v35 = vor.u32 %v5627_v55, %v5323_v30  ;;  %v5621_v15 = vld [vmem:[#allocation4 + $0x14] sm:$0xf0]  ;;  %v5301_v24 = vld [vmem:[#allocation4 + $0x18] sm:$0xf0] }
 0xaf6   :  { %4099 = vmatpush.bf16.msra.mxu2 %v5236_v46  ;;  %v5328_v2 = vor.u32 %v5626_v37, %v5325_v29  ;;  %v5388_v46 = vor.u32 %v5643_v47, %v5387_v41  ;;  %v5300_v23 = vor.u32 %v5621_v15, %v5299_v14  ;;  %v5636_v55 = vld [vmem:[#allocation4 + $0x94] sm:$0xf]  ;;  %v5365_v37 = vld [vmem:[#allocation4 + $0x98] sm:$0xf0]  ;;  %v5291_v29 = vld [vmem:[#allocation4] sm:$0xf] }
 0xaf7   :  { %v5619_v41 = vld [vmem:[#allocation4 + $0x4] sm:$0xf0]  ;;  %v5618_v47 = vld [vmem:[#allocation4 + $0x4] sm:$0xf] }
 0xaf8   :  { %4086 = vmatpush.bf16.msra.mxu1 %v5172_v61  ;;  %4112 = vmatpush.bf16.msra.mxu3 %v5176_v22  ;;  %v5389_v61 = vld [vmem:[#allocation4 + $0xc8] sm:$0xf0]  ;;  %v5634_v21 = vld [vmem:[#allocation4 + $0x84] sm:$0xf] }
 0xaf9   :  { %4125 = vmatpush.bf16.msrb.mxu0 %v5240_v44  ;;  %v5392_v22 = vor.u32 %v5642_v56, %v5389_v61  ;;  %v5317_v44 = vld [vmem:[#allocation4 + $0x38] sm:$0xf0]  ;;  %v5292_v56 = vor.u32 %v5619_v41, %v5291_v29  ;;  %v5293_v61 = vld [vmem:[#allocation4 + $0x8] sm:$0xf0]  ;;  %v4392_v15 = vld [vmem:[%s8328_s15 + $0x20] sm:$0xff] }
 0xafa   :  { %4100 = vmatpush.bf16.msra.mxu2 %v5228_v17  ;;  %v5320_v18 = vor.u32 %v5624_v25, %v5317_v44  ;;  %v3872_v17 = vperm.slane %v3870_v8, 0  ;;  %v4403_v44 = vld [vmem:[%s8328_s15 + $0x78] sm:$0xff]  ;;  %v4417_v8 = vld [vmem:[%s8328_s15 + $0xe8] sm:$0xff]  ;;  %v4168_v29 = vld [vmem:[%s8327_s14] sm:$0x3] }
 0xafb   :  { %v4409_v14 = vld [vmem:[%s8328_s15 + $0xa8] sm:$0xff] }
 0xafc   :  { %4087 = vmatpush.bf16.msra.mxu1 %v5164_v43  ;;  %4113 = vmatpush.bf16.msra.mxu3 %v5168_v7 }
 0xafd   :  { %4126 = vmatpush.bf16.msrb.mxu0 %v5232_v20 }
 0xafe   :  { %4347 = vmatpush.bf16.msrb.mxu2 %v5412_v40 }
 0xb00   :  { %4334 = vmatpush.bf16.msrb.mxu1 %v5348_v0  ;;  %4360 = vmatpush.bf16.msrb.mxu3 %v5352_v6 }
 0xb01   :  { %4373 = vmatpush.bf16.msra.mxu0 %v5416_v42  ;;  %v5380_v42 = vor.u32 %v5641_v28, %v5379_v59 }
 0xb02   :  { %4348 = vmatpush.bf16.msrb.mxu2 %v5404_v11  ;;  %v5371_v11 = vld [vmem:[#allocation4 + $0xa0] sm:$0xf] }
 0xb03   :  { %v5372_v4 = vor.u32 %v5639_v63, %v5371_v11 }
 0xb04   :  { %4335 = vmatpush.bf16.msrb.mxu1 %v5340_v50  ;;  %4361 = vmatpush.bf16.msrb.mxu3 %v5344_v53  ;;  %v5623_v50 = vld [vmem:[#allocation4 + $0x24] sm:$0xf0]  ;;  %v5622_v53 = vld [vmem:[#allocation4 + $0x24] sm:$0xf] }
 0xb05   :  { %4374 = vmatpush.bf16.msra.mxu0 %v5408_v5  ;;  %v5308_v54 = vor.u32 %v5623_v50, %v5307_v9  ;;  %v5312_v62 = vor.u32 %v5622_v53, %v5309_v58  ;;  %v5373_v5 = vld [vmem:[#allocation4 + $0xa8] sm:$0xf0] }
 0xb06   :  { %4349 = vmatpush.bf16.msrb.mxu2 %v5396_v36  ;;  %v5376_v10 = vor.u32 %v5638_v26, %v5373_v5  ;;  %v5637_v36 = vld [vmem:[#allocation4 + $0x94] sm:$0xf0]  ;;  %v4410_v5 = vld [vmem:[%s8328_s15 + $0xb0] sm:$0xff] }
 0xb08   :  { %4336 = vmatpush.bf16.msrb.mxu1 %v5332_v19  ;;  %4362 = vmatpush.bf16.msrb.mxu3 %v5336_v32  ;;  %v5620_v19 = vld [vmem:[#allocation4 + $0x14] sm:$0xf]  ;;  %v5363_v32 = vld [vmem:[#allocation4 + $0x90] sm:$0xf] }
 0xb09   :  { %4375 = vmatpush.bf16.msra.mxu0 %v5400_v39  ;;  %v5304_v27 = vor.u32 %v5620_v19, %v5301_v24  ;;  %v5364_v30 = vor.u32 %v5637_v36, %v5363_v32  ;;  %v5368_v39 = vor.u32 %v5636_v55, %v5365_v37  ;;  %v4408_v19 = vld [vmem:[%s8328_s15 + $0xa0] sm:$0xff]  ;;  %v4407_v24 = vld [vmem:[%s8328_s15 + $0x98] sm:$0xff]  ;;  %v4406_v32 = vld [vmem:[%s8328_s15 + $0x90] sm:$0xff] }
 0xb0a   :  { %4350 = vmatpush.bf16.msrb.mxu2 %v5388_v46  ;;  %v5635_v46 = vld [vmem:[#allocation4 + $0x84] sm:$0xf0]  ;;  %v4388_v55 = vld [vmem:[%s8328_s15] sm:$0xff] }
 0xb0b   :  { %v4389_v36 = vld [vmem:[%s8328_s15 + $0x8] sm:$0xff]  ;;  %v4404_v37 = vld [vmem:[%s8328_s15 + $0x80] sm:$0xff] }
 0xb0c   :  { %4337 = vmatpush.bf16.msrb.mxu1 %v5324_v35  ;;  %4363 = vmatpush.bf16.msrb.mxu3 %v5328_v2  ;;  %v5296_v35 = vor.u32 %v5618_v47, %v5293_v61  ;;  %v5355_v2 = vld [vmem:[#allocation4 + $0x80] sm:$0xf]  ;;  %v4171_v47 = vperm.slane %v4168_v29, 1 }
 0xb0d   :  { %4376 = vmatpush.bf16.msra.mxu0 %v5392_v22  ;;  %v5356_v51 = vor.u32 %v5635_v46, %v5355_v2  ;;  %v5357_v22 = vld [vmem:[#allocation4 + $0x88] sm:$0xf0] }
 0xb0e   :  { %4351 = vmatpush.bf16.msrb.mxu2 %v5380_v42  ;;  %v5360_v25 = vor.u32 %v5634_v21, %v5357_v22 }
 0xb10   :  { %4338 = vmatpush.bf16.msrb.mxu1 %v5316_v52  ;;  %4364 = vmatpush.bf16.msrb.mxu3 %v5320_v18  ;;  %v4419_v52 = vld [vmem:[%s8328_s15 + $0xf8] sm:$0xff]  ;;  %v4402_v18 = vld [vmem:[%s8328_s15 + $0x70] sm:$0xff] }
 0xb11   :  { %4377 = vmatpush.bf16.msra.mxu0 %v5384_v49 }
 0xb12   :  { %4352 = vmatpush.bf16.msrb.mxu2 %v5372_v4  ;;  %v4394_v4 = vld [vmem:[%s8328_s15 + $0x30] sm:$0xff] }
 0xb14   :  { %4339 = vmatpush.bf16.msrb.mxu1 %v5308_v54  ;;  %4365 = vmatpush.bf16.msrb.mxu3 %v5312_v62 }
 0xb15   :  { %4378 = vmatpush.bf16.msra.mxu0 %v5376_v10  ;;  %v4393_v10 = vld [vmem:[%s8328_s15 + $0x28] sm:$0xff] }
 0xb16   :  { %4353 = vmatpush.bf16.msrb.mxu2 %v5364_v30  ;;  %v4405_v30 = vld [vmem:[%s8328_s15 + $0x88] sm:$0xff] }
 0xb18   :  { %4340 = vmatpush.bf16.msrb.mxu1 %v5300_v23  ;;  %4366 = vmatpush.bf16.msrb.mxu3 %v5304_v27  ;;  %v4391_v23 = vld [vmem:[%s8328_s15 + $0x18] sm:$0xff]  ;;  %v4390_v27 = vld [vmem:[%s8328_s15 + $0x10] sm:$0xff] }
 0xb19   :  { %4379 = vmatpush.bf16.msra.mxu0 %v5368_v39 }
 0xb1a   :  { %4354 = vmatpush.bf16.msrb.mxu2 %v5356_v51 }
 0xb1c   :  { %4341 = vmatpush.bf16.msrb.mxu1 %v5292_v56  ;;  %4367 = vmatpush.bf16.msrb.mxu3 %v5296_v35  ;;  %v4170_v56 = vperm.slane %v4168_v29, 0 }
 0xb1d   :  { %4380 = vmatpush.bf16.msra.mxu0 %v5360_v25 }
 0xb5c   :  { %v3866_v60 = vpop.f32.mrf.mxu0  ;;  %v3747_v43 = vpop.f32.mrf.mxu1 }
 0xb60   :  { %v3760_v57 = vpop.f32.mrf.mxu2 }
 0xb61   :  { %v3867_v7 = vadd.f32 %v3866_v60, %v3760_v57  ;;  %v3853_v12 = vpop.f32.mrf.mxu3  ;;  %v4418_v60 = vld [vmem:[%s8328_s15 + $0xf0] sm:$0xff]  ;;  %v4416_v57 = vld [vmem:[%s8328_s15 + $0xe0] sm:$0xff] }
 0xb62   :  { %v3854_v31 = vadd.f32 %v3853_v12, %v3747_v43  ;;  %v4401_v43 = vld [vmem:[%s8328_s15 + $0x68] sm:$0xff]  ;;  %v4398_v12 = vld [vmem:[%s8328_s15 + $0x50] sm:$0xff] }
 0xb63   :  { %v3877_v20 = vadd.f32 %v3873_v33, %v3867_v7  ;;  %v4400_v33 = vld [vmem:[%s8328_s15 + $0x60] sm:$0xff]  ;;  %v4415_v7 = vld [vmem:[%s8328_s15 + $0xd8] sm:$0xff] }
 0xb64   :  { %v3868_v16 = vpop.f32.mrf.mxu0  ;;  %v3876_v1 = vadd.f32 %v3872_v17, %v3854_v31  ;;  %v3749_v45 = vpop.f32.mrf.mxu1  ;;  %v4399_v17 = vld [vmem:[%s8328_s15 + $0x58] sm:$0xff]  ;;  %v4414_v31 = vld [vmem:[%s8328_s15 + $0xd0] sm:$0xff] }
 0xb65   :  { %v3879_v0 = vmax.f32 %v3877_v20, 0.0  ;;  %v4397_v20 = vld [vmem:[%s8328_s15 + $0x48] sm:$0xff]  ;;  %v4396_v45 = vld [vmem:[%s8328_s15 + $0x40] sm:$0xff] }
 0xb66   :  { %v3878_v34 = vmax.f32 %v3876_v1, 0.0  ;;  %v4413_v16 = vld [vmem:[%s8328_s15 + $0xc8] sm:$0xff]  ;;  %v3914_v1 = vld [vmem:[%s8325_s12] sm:$0x3] }
 0xb67   :  { %v3881_v13 = vpack.c.bf16 %v3879_v0, %v3879_v0  ;;  %v4412_v0 = vld [vmem:[%s8328_s15 + $0xc0] sm:$0xff]  ;;  %v3917_v28 = vperm.slane %v3914_v1, 1 }
 0xb68   :  { %v3880_v3 = vpack.c.bf16 %v3878_v34, %v3878_v34  ;;  %v3762_v6 = vpop.f32.mrf.mxu2  ;;  %v4395_v34 = vld [vmem:[%s8328_s15 + $0x38] sm:$0xff] }
 0xb69   :  { %v3855_v40 = vpop.f32.mrf.mxu3  ;;  %4101 = vmatmul.bf16.vlgmr.msra.gmra.mxu2 %v3881_v13  ;;  %4127 = vmatmul.bf16.vlgmr.msrb.gmra.mxu0 %v3881_v13  ;;  %v4411_v13 = vld [vmem:[%s8328_s15 + $0xb8] sm:$0xff] }
 0xb6a   :  { %4088 = vmatmul.bf16.vlgmr.msra.gmra.mxu1 %v3880_v3  ;;  %4114 = vmatmul.bf16.vlgmr.msra.gmra.mxu3 %v3880_v3  ;;  %v3916_v3 = vperm.slane %v3914_v1, 0 }
 0xb6b   :  { %4424 = vmatpush.msra.mxu1 %v4403_v44  ;;  %4444 = vmatpush.msra.mxu2 %v4419_v52 }
 0xb6d   :  { %4425 = vmatpush.msra.mxu1 %v4402_v18  ;;  %4445 = vmatpush.msra.mxu2 %v4418_v60 }
 0xb6f   :  { %4426 = vmatpush.msra.mxu1 %v4401_v43  ;;  %4446 = vmatpush.msra.mxu2 %v4417_v8  ;;  %v5899_v43 = vld [vmem:[#allocation6] ss:$0 sm:$0xff] }
 0xb71   :  { %4427 = vmatpush.msra.mxu1 %v4400_v33  ;;  %4447 = vmatpush.msra.mxu2 %v4416_v57 }
 0xb73   :  { %4428 = vmatpush.msra.mxu1 %v4399_v17  ;;  %4448 = vmatpush.msra.mxu2 %v4415_v7 }
 0xb75   :  { %4429 = vmatpush.msra.mxu1 %v4398_v12  ;;  %4449 = vmatpush.msra.mxu2 %v4414_v31 }
 0xb77   :  { %4430 = vmatpush.msra.mxu1 %v4397_v20  ;;  %4450 = vmatpush.msra.mxu2 %v4413_v16 }
 0xb79   :  { %4431 = vmatpush.msra.mxu1 %v4396_v45  ;;  %4451 = vmatpush.msra.mxu2 %v4412_v0 }
 0xb7b   :  { %4432 = vmatpush.msra.mxu1 %v4395_v34  ;;  %4452 = vmatpush.msra.mxu2 %v4411_v13 }
 0xb7d   :  { %4433 = vmatpush.msra.mxu1 %v4394_v4  ;;  %4453 = vmatpush.msra.mxu2 %v4410_v5 }
 0xb7f   :  { %4434 = vmatpush.msra.mxu1 %v4393_v10  ;;  %4454 = vmatpush.msra.mxu2 %v4409_v14 }
 0xb81   :  { %4435 = vmatpush.msra.mxu1 %v4392_v15  ;;  %4455 = vmatpush.msra.mxu2 %v4408_v19 }
 0xb83   :  { %4436 = vmatpush.msra.mxu1 %v4391_v23  ;;  %4456 = vmatpush.msra.mxu2 %v4407_v24 }
 0xb85   :  { %4437 = vmatpush.msra.mxu1 %v4390_v27  ;;  %4457 = vmatpush.msra.mxu2 %v4406_v32 }
 0xb87   :  { %4438 = vmatpush.msra.mxu1 %v4389_v36  ;;  %4458 = vmatpush.msra.mxu2 %v4405_v30 }
 0xb89   :  { %4439 = vmatpush.msra.mxu1 %v4388_v55  ;;  %4459 = vmatpush.msra.mxu2 %v4404_v37 }
 0xbe6   :  { %v4128_v6 = vpop.f32.mrf.mxu0 }
 0xbe7   :  { %v4089_v40 = vpop.f32.mrf.mxu1 }
 0xbe8   :  { %v4090_v59 = vadd.f32 %v4089_v40, %v3916_v3 }
 0xbec   :  { %v4102_v38 = vpop.f32.mrf.mxu2 }
 0xbed   :  { %v4103_v42 = vadd.f32 %v4102_v38, %v4090_v59  ;;  %v4115_v48 = vpop.f32.mrf.mxu3 }
 0xbee   :  { %v4116_v49 = vadd.f32 %v4115_v48, %v3917_v28  ;;  %v4130_v9 = vpop.f32.mrf.mxu0 }
 0xbef   :  { %v4132_v50 = vmax.f32 %v4103_v42, 0.0  ;;  %v4091_v53 = vpop.f32.mrf.mxu1 }
 0xbf0   :  { %v4129_v54 = vadd.f32 %v4128_v6, %v4116_v49 }
 0xbf1   :  { %v4134_v58 = vpack.c.bf16 %v4132_v50, %v4132_v50 }
 0xbf2   :  { %v4133_v62 = vmax.f32 %v4129_v54, 0.0 }
 0xbf3   :  { %4342 = vmatmul.bf16.vlgmr.msrb.gmra.mxu1 %v4134_v58  ;;  %4368 = vmatmul.bf16.vlgmr.msrb.gmra.mxu3 %v4134_v58 }
 0xbf4   :  { %v4135_v11 = vpack.c.bf16 %v4133_v62, %v4133_v62  ;;  %v4104_v63 = vpop.f32.mrf.mxu2 }
 0xbf5   :  { %v4117_v26 = vpop.f32.mrf.mxu3 }
 0xbf6   :  { %4355 = vmatmul.bf16.vlgmr.msrb.gmra.mxu2 %v4135_v11  ;;  %4381 = vmatmul.bf16.vlgmr.msra.gmra.mxu0 %v4135_v11 }
 0xc70   :  { %v4343_v39 = vpop.f32.mrf.mxu1 }
 0xc71   :  { %v4344_v2 = vadd.f32 %v4343_v39, %v4170_v56 }
 0xc73   :  { %v4382_v41 = vpop.f32.mrf.mxu0 }
 0xc76   :  { %v4369_v61 = vpop.f32.mrf.mxu3 }
 0xc77   :  { %v4370_v35 = vadd.f32 %v4369_v61, %v4171_v47 }
 0xc78   :  { %v4345_v46 = vpop.f32.mrf.mxu1 }
 0xc79   :  { %v4383_v21 = vadd.f32 %v4382_v41, %v4370_v35  ;;  %v4356_v51 = vpop.f32.mrf.mxu2 }
 0xc7a   :  { %v4357_v22 = vadd.f32 %v4356_v51, %v4344_v2 }
 0xc7b   :  { %v4387_v25 = vmax.f32 %v4383_v21, 0.0  ;;  %v4384_v44 = vpop.f32.mrf.mxu0 }
 0xc7c   :  { %v4386_v52 = vmax.f32 %v4357_v22, 0.0 }
 0xc7d   :  { %4460 = vmatmul.f32.vlgmr.msra.gmra.mxu2 %v4387_v25 }
 0xc7e   :  { %4440 = vmatmul.f32.vlgmr.msra.gmra.mxu1 %v4386_v52  ;;  %v4371_v18 = vpop.f32.mrf.mxu3 }
 0xc81   :  { %v4358_v60 = vpop.f32.mrf.mxu2 }
 0xcfb   :  { %v4441_v8 = vpop.f32.mrf.mxu1 }
 0xcfc   :  { %v4442_v33 = vadd.f32 %v5899_v43, %v4441_v8 }
 0xd00   :  { %v4461_v57 = vpop.f32.mrf.mxu2 }
 0xd01   :  { %v4462_v17 = vadd.f32 %v4461_v57, %v4442_v33 }
 0xd03   :  { %v4464_v7 = vmul.f32 0.5, %v4462_v17 }
 0xd05   :  { %5900 = vtanh.f32 %v4464_v7 }
 0xd0b   :  { %v5901_v12 = vpop.eup %5900 }
 0xd0c   :  { %v4466_v31 = vmul.f32 0.5, %v5901_v12 }
 0xd0e   :  { %v4467_v20 = vadd.f32 0.5, %v4466_v31 }
 0xd10   :  { %4469 = vst.msk [vmem:[%s8330_s17] sm:$0x3] %vm4468_vm2, %v4467_v20 }
 0xd11   :  { %4474 = vsyncpa [#allocation8], 1 }
 0xd12   :  { %4475 = vsyncpa [#allocation10], 1 }
 0xd13   :  { %4476 = vsyncmov [#allocation5] }
 0xd16   :  { %s4477_s5 = vpop.sfrf %4476 }
 0xd17   :  { %p5417_p0 = scmp.ne.s32.totalorder %s4477_s5, 0 }
 0xd19   :  { %4481 = shalt.err (%p5417_p0)  }
 0xd1a   :  { %4483 = vsyncmov [#allocation5 + $0x1] }
 0xd1d   :  { %s4484_s27 = vpop.sfrf %4483 }
 0xd1e   :  { %p5418_p1 = scmp.ne.s32.totalorder %s4484_s27, 0 }
 0xd20   :  { %4488 = shalt.err (%p5418_p1)  }
 0xd21   :  { %4490 = vsyncmov [#allocation5 + $0x2] }
 0xd24   :  { %s4491_s0 = vpop.sfrf %4490 }
 0xd25   :  { %p5419_p2 = scmp.ne.s32.totalorder %s4491_s0, 0 }
 0xd27   :  { %4495 = shalt.err (%p5419_p2)  }

</bundles_post_ra>
